<compile_context>
chip_gen: v5e
topology: v5e:2x2
jax: 0.10.0
libtpu: 0.0.40
codegen_flags: <defaults>
</compile_context>

<pallas_src>
import functools

import jax
import jax.numpy as jnp
import numpy as np
from jax.experimental import pallas as pl
from jax.experimental.pallas import tpu as pltpu


def _cparams(semantics):
    return pltpu.CompilerParams(
        dimension_semantics=semantics, vmem_limit_bytes=64 * 1024 * 1024)


# ----------------------------------------------------------------------------
# Kernels
# ----------------------------------------------------------------------------
def _matmul_kernel(x_ref, w_ref, b_ref, *rest, relu_in=False, n_extra=0):
    """K-tiled matmul: acc += (relu?)(x_k) @ w_k; finalize adds bias (+ add).

    rest = ([add_ref], out_ref, acc_scratch_ref)
    """
    out_ref = rest[-2]
    acc_ref = rest[-1]
    k = pl.program_id(1)

    @pl.when(k == 0)
    def _():
        acc_ref[...] = jnp.zeros_like(acc_ref)

    x = x_ref[...]
    if relu_in:
        x = jnp.maximum(x, 0.0)
    acc_ref[...] += jnp.dot(x.astype(jnp.bfloat16), w_ref[...],
                            preferred_element_type=jnp.float32)

    @pl.when(k == pl.num_programs(1) - 1)
    def _():
        r = acc_ref[...] + b_ref[...]
        if n_extra:
            r = r + rest[0][...].astype(jnp.float32)
        out_ref[...] = r.astype(out_ref.dtype)


def _lateral_upadd_kernel(x_ref, w_ref, b_ref, c_ref, out_ref, *, R, W):
    """out = conv1x1(x) + b + nearest2x(coarse), upsample done on VPU/XLU.

    x_ref : (1, R, W, Cin)      fine lateral input block
    c_ref : (1, R//2, W//2, F)  coarse FPN block (f32)
    out   : (R*W, F)            lane-dense flattened output block
    """
    F = out_ref.shape[-1]
    Cin = x_ref.shape[-1]
    Rh, Wh = R // 2, W // 2
    x = x_ref[0].reshape(R * W, Cin).astype(jnp.bfloat16)
    acc = jnp.dot(x, w_ref[...], preferred_element_type=jnp.float32)
    c = c_ref[0]                                           # (Rh, Wh, F) f32
    up = jnp.broadcast_to(c[:, None, :, None, :], (Rh, 2, Wh, 2, F))
    up = up.reshape(R * W, F)                              # nearest-2x upsample
    out_ref[...] = (acc + up + b_ref[...]).astype(out_ref.dtype)


def _conv3x3_rows_kernel(p_ref, w_ref, b_ref, out_ref, *, W, R):
    """Stride-1 3x3 conv on a tile of R output rows (halo held in VMEM).

    p_ref : (1, 1, R+2, W+2, Cin) bf16 padded halo tile
    w_ref : (9, Cin, Cout) bf16   per-tap weight slabs (dy*3+dx)
    out   : (1, 1, R*W, Cout)
    """
    Cin = p_ref.shape[-1]
    acc = None
    for dy in range(3):
        for dx in range(3):
            tap = p_ref[0, 0, dy:dy + R, dx:dx + W, :].reshape(R * W, Cin)
            contrib = jnp.dot(tap, w_ref[dy * 3 + dx],
                              preferred_element_type=jnp.float32)
            acc = contrib if acc is None else acc + contrib
    out_ref[0, 0] = (acc + b_ref[...]).astype(out_ref.dtype)


# ----------------------------------------------------------------------------
# Tiled matmul wrapper (1x1 convs, stride-2 3x3 convs, fallback lateral add)
# ----------------------------------------------------------------------------
def _matmul_tiled(x, w, b, add=None, relu_in=False, out_dtype=None,
                  tm_target=512, tk_max=2048):
    M, K = x.shape
    F = w.shape[1]
    out_dtype = out_dtype or x.dtype
    wb = w.astype(jnp.bfloat16)

    tm = min(tm_target, M)
    if tm != M:
        tm = max(8, (tm // 8) * 8)
    if M // tm < 2 and M >= 16:           # give v7x's 2nd TensorCore some work
        tm = max(8, ((M // 2) // 8) * 8)
    Mp = pl.cdiv(M, tm) * tm

    tk = K if K <= tk_max else tk_max     # K-tiling for ResNet-scale channels
    Kp = pl.cdiv(K, tk) * tk
    nk = Kp // tk

    if Mp != M:
        x = jnp.pad(x, ((0, Mp - M), (0, 0)))
        if add is not None:
            add = jnp.pad(add, ((0, Mp - M), (0, 0)))
    if Kp != K:
        x = jnp.pad(x, ((0, 0), (0, Kp - K)))
        wb = jnp.pad(wb, ((0, Kp - K), (0, 0)))

    in_specs = [
        pl.BlockSpec((tm, tk), lambda i, k: (i, k)),
        pl.BlockSpec((tk, F), lambda i, k: (k, 0)),
        pl.BlockSpec((1, F), lambda i, k: (0, 0)),
    ]
    args = [x, wb, b.reshape(1, F).astype(jnp.float32)]
    n_extra = 0
    if add is not None:
        in_specs.append(pl.BlockSpec((tm, F), lambda i, k: (i, 0)))
        args.append(add)
        n_extra = 1

    out = pl.pallas_call(
        functools.partial(_matmul_kernel, relu_in=relu_in, n_extra=n_extra),
        grid=(Mp // tm, nk),
        in_specs=in_specs,
        out_specs=pl.BlockSpec((tm, F), lambda i, k: (i, 0)),
        out_shape=jax.ShapeDtypeStruct((Mp, F), out_dtype),
        scratch_shapes=[pltpu.VMEM((tm, F), jnp.float32)],
        compiler_params=_cparams(("parallel", "arbitrary")),
    )(*args)
    return out[:M] if Mp != M else out


# ----------------------------------------------------------------------------
# Conv wrappers
# ----------------------------------------------------------------------------
def conv1x1(x, w, b):
    N, H, W, Cin = x.shape
    F = w.shape[1]
    out = _matmul_tiled(x.reshape(N * H * W, Cin), w, b, out_dtype=jnp.float32)
    return out.reshape(N, H, W, F)


def _pick_rows_upadd(H, W, N, cap_rows=1024):
    """Fine-row tile R (even, R|H, R*W%8==0, R*W<=cap), prefer >=2 grid steps."""
    if H % 2 or W % 2:
        return None
    best_any, best_par = None, None
    for r in range(2, H + 1, 2):
        if H % r or r * W > cap_rows or (r * W) % 8:
            continue
        best_any = r
        if N * (H // r) >= 2:
            best_par = r
    return best_par if best_par is not None else best_any


def conv1x1_add_upsampled(x, w, b, coarse):
    """conv1x1(x) + nearest_upsample_2x(coarse), fused into one kernel."""
    N, H, W, Cin = x.shape
    F = w.shape[1]
    Hc, Wc = coarse.shape[1], coarse.shape[2]
    assert Hc * 2 == H and Wc * 2 == W
    R = _pick_rows_upadd(H, W, N)
    if R is None:
        # Fallback for awkward shapes: materialise the upsample (XLA), fuse add.
        up = jnp.repeat(jnp.repeat(coarse, 2, axis=1), 2, axis=2)
        out = _matmul_tiled(x.reshape(N * H * W, Cin), w, b,
                            add=up.reshape(N * H * W, F), out_dtype=jnp.float32)
        return out.reshape(N, H, W, F)
    T = H // R
    Rh = R // 2
    M = N * H * W
    out = pl.pallas_call(
        functools.partial(_lateral_upadd_kernel, R=R, W=W),
        grid=(N, T),
        in_specs=[
            pl.BlockSpec((1, R, W, Cin), lambda n, t: (n, t, 0, 0)),
            pl.BlockSpec((Cin, F), lambda n, t: (0, 0)),
            pl.BlockSpec((1, F), lambda n, t: (0, 0)),
            pl.BlockSpec((1, Rh, Wc, F), lambda n, t: (n, t, 0, 0)),
        ],
        out_specs=pl.BlockSpec((R * W, F), lambda n, t: (n * T + t, 0)),
        out_shape=jax.ShapeDtypeStruct((M, F), jnp.float32),
        compiler_params=_cparams(("parallel", "parallel")),
    )(x, w.astype(jnp.bfloat16), b.reshape(1, F), coarse)
    return out.reshape(N, H, W, F)


def _pick_rows_s1(H, W, N, target=512):
    cap = max(1, target // max(W, 1))
    if N == 1 and H >= 2:
        cap = min(cap, max(1, H // 2))     # keep >= 2 parallel steps (v7x)
    best = 1
    for r in range(1, min(H, cap) + 1):
        if H % r == 0:
            best = r
    return best


def conv3x3_s1(x, w, b, *, target_m=512):
    """3x3 conv, stride 1, padding 1, NHWC (taps sliced in VMEM, bf16 MXU)."""
    N, H, W, Cin = x.shape
    Cout = w.shape[-1]
    R = _pick_rows_s1(H, W, N, target_m)   # R | H, so no ragged tail / slice
    T = H // R
    xb = x.astype(jnp.bfloat16)
    xp = jnp.pad(xb, ((0, 0), (1, 1), (1, 1), (0, 0)))     # (N, H+2, W+2, Cin)
    # pre-tile rows with a 2-row halo only (no dx-concat, no 3x HBM blow-up)
    rows = np.arange(T)[:, None] * R + np.arange(R + 2)[None, :]
    p = xp[:, rows]                                        # (N, T, R+2, W+2, Cin)
    wb = w.reshape(9, Cin, Cout).astype(jnp.bfloat16)
    out = pl.pallas_call(
        functools.partial(_conv3x3_rows_kernel, W=W, R=R),
        grid=(N, T),
        in_specs=[
            pl.BlockSpec((1, 1, R + 2, W + 2, Cin), lambda n, t: (n, t, 0, 0, 0)),
            pl.BlockSpec((9, Cin, Cout), lambda n, t: (0, 0, 0)),
            pl.BlockSpec((1, Cout), lambda n, t: (0, 0)),
        ],
        out_specs=pl.BlockSpec((1, 1, R * W, Cout), lambda n, t: (n, t, 0, 0)),
        out_shape=jax.ShapeDtypeStruct((N, T, R * W, Cout), jnp.float32),
        compiler_params=_cparams(("parallel", "parallel")),
    )(p, wb, b.reshape(1, Cout))
    return out.reshape(N, H, W, Cout)


def conv3x3_s2(x, w, b, *, relu_in=False):
    """3x3 conv, stride 2, padding 1 (true stride-2 via tap-only im2col, bf16)."""
    N, H, W, Cin = x.shape
    Cout = w.shape[-1]
    Ho = (H - 1) // 2 + 1
    Wo = (W - 1) // 2 + 1
    xb = x.astype(jnp.bfloat16)                 # slab built (and DMA'd) in bf16
    xp = jnp.pad(xb, ((0, 0), (1, 1), (1, 1), (0, 0)))
    cols = [xp[:, dy:dy + 2 * Ho:2, dx:dx + 2 * Wo:2, :]
            for dy in range(3) for dx in range(3)]
    a = jnp.concatenate(cols, axis=-1).reshape(N * Ho * Wo, 9 * Cin)
    out = _matmul_tiled(a, w.reshape(9 * Cin, Cout), b, relu_in=relu_in,
                        out_dtype=jnp.float32)
    return out.reshape(N, Ho, Wo, Cout)


# ----------------------------------------------------------------------------
# PyramidFeatures forward
# ----------------------------------------------------------------------------
def pyramid_features(params, C3, C4, C5):
    p = params
    # P5
    P5_x = conv1x1(C5, p["P5_1_w"], p["P5_1_b"])
    P5_out = conv3x3_s1(P5_x, p["P5_2_w"], p["P5_2_b"])
    # P4 (lateral conv + fused nearest-2x upsample-add of P5_x)
    P4_x = conv1x1_add_upsampled(C4, p["P4_1_w"], p["P4_1_b"], P5_x)
    P4_out = conv3x3_s1(P4_x, p["P4_2_w"], p["P4_2_b"])
    # P3
    P3_x = conv1x1_add_upsampled(C3, p["P3_1_w"], p["P3_1_b"], P4_x)
    P3_out = conv3x3_s1(P3_x, p["P3_2_w"], p["P3_2_b"])
    # P6 / P7 (true stride-2; ReLU before P7_2 fused into the kernel)
    P6_out = conv3x3_s2(C5, p["P6_w"], p["P6_b"])
    P7_out = conv3x3_s2(P6_out, p["P7_2_w"], p["P7_2_b"], relu_in=True)
    return [P3_out, P4_out, P5_out, P6_out, P7_out]


# ----------------------------------------------------------------------------
# Pure-JAX reference (for correctness check)
# ----------------------------------------------------------------------------
def _ref_conv(x, w, b, stride=1):
    w4 = w[None, None] if w.ndim == 2 else w
    pad = (0, 0) if w4.shape[0] == 1 else (1, 1)
    out = jax.lax.conv_general_dilated(
        x, w4, window_strides=(stride, stride), padding=(pad, pad),
        dimension_numbers=("NHWC", "HWIO", "NHWC"),
        precision=jax.lax.Precision.HIGHEST)
    return out + b


def pyramid_features_ref(params, C3, C4, C5):
    p = params
    P5_x = _ref_conv(C5, p["P5_1_w"], p["P5_1_b"])
    P5_up = jnp.repeat(jnp.repeat(P5_x, 2, axis=1), 2, axis=2)
    P5_out = _ref_conv(P5_x, p["P5_2_w"], p["P5_2_b"])
    P4_x = _ref_conv(C4, p["P4_1_w"], p["P4_1_b"]) + P5_up
    P4_up = jnp.repeat(jnp.repeat(P4_x, 2, axis=1), 2, axis=2)
    P4_out = _ref_conv(P4_x, p["P4_2_w"], p["P4_2_b"])
    P3_x = _ref_conv(C3, p["P3_1_w"], p["P3_1_b"]) + P4_up
    P3_out = _ref_conv(P3_x, p["P3_2_w"], p["P3_2_b"])
    P6_out = _ref_conv(C5, p["P6_w"], p["P6_b"], stride=2)
    P7_out = _ref_conv(jnp.maximum(P6_out, 0.0), p["P7_2_w"], p["P7_2_b"], stride=2)
    return [P3_out, P4_out, P5_out, P6_out, P7_out]


# ----------------------------------------------------------------------------
# Deterministic parameter initialization (shapes follow the PyTorch module)
# ----------------------------------------------------------------------------
def _init_conv(key, cin, cout, k):
    wk, bk = jax.random.split(key)
    bound = 1.0 / np.sqrt(cin * k * k)
    w_shape = (cin, cout) if k == 1 else (k, k, cin, cout)
    w = jax.random.uniform(wk, w_shape, jnp.float32, -bound, bound)
    b = jax.random.uniform(bk, (cout,), jnp.float32, -bound, bound)
    return w, b


def make_params(C3_size, C4_size, C5_size, feature_size):
    keys = jax.random.split(jax.random.PRNGKey(0), 8)
    params = {}
    params["P5_1_w"], params["P5_1_b"] = _init_conv(keys[0], C5_size, feature_size, 1)
    params["P5_2_w"], params["P5_2_b"] = _init_conv(keys[1], feature_size, feature_size, 3)
    params["P4_1_w"], params["P4_1_b"] = _init_conv(keys[2], C4_size, feature_size, 1)
    params["P4_2_w"], params["P4_2_b"] = _init_conv(keys[3], feature_size, feature_size, 3)
    params["P3_1_w"], params["P3_1_b"] = _init_conv(keys[4], C3_size, feature_size, 1)
    params["P3_2_w"], params["P3_2_b"] = _init_conv(keys[5], feature_size, feature_size, 3)
    params["P6_w"], params["P6_b"] = _init_conv(keys[6], C5_size, feature_size, 3)
    params["P7_2_w"], params["P7_2_b"] = _init_conv(keys[7], feature_size, feature_size, 3)
    return params


if __name__ == "__main__":
    N = 2
    C3_size, C4_size, C5_size = 32, 64, 64
    feature_size = 128

    key = jax.random.PRNGKey(0)
    k3, k4, k5 = jax.random.split(key, 3)
    # NHWC activations (PyTorch NCHW equivalents: (2,32,16,16), (2,64,8,8), (2,64,4,4))
    C3 = jax.random.normal(k3, (N, 16, 16, C3_size), jnp.float32)
    C4 = jax.random.normal(k4, (N, 8, 8, C4_size), jnp.float32)
    C5 = jax.random.normal(k5, (N, 4, 4, C5_size), jnp.float32)

    params = make_params(C3_size, C4_size, C5_size, feature_size)

    outs = jax.block_until_ready(jax.jit(pyramid_features)(params, C3, C4, C5))

    expected = [
        (N, 16, 16, feature_size),  # P3
        (N, 8, 8, feature_size),    # P4
        (N, 4, 4, feature_size),    # P5
        (N, 2, 2, feature_size),    # P6
        (N, 1, 1, feature_size),    # P7
    ]
    refs = pyramid_features_ref(params, C3, C4, C5)
    # bf16 MXU operands with f32 accumulation -> slightly looser tolerance.
    for o, r, s in zip(outs, refs, expected):
        assert o.shape == s, (o.shape, s)
        assert bool(jnp.all(jnp.isfinite(o)))
        err = float(jnp.max(jnp.abs(o - r)))
        assert err < 3e-2, f"max abs error {err} vs reference"
    print("KERNEL_OK")
</pallas_src>

<mosaic_0001>
module attributes {stable_mosaic.version = 11 : i64} {
  func.func @_matmul_kernel(%arg0: i32, %arg1: i32, %arg2: memref<16x64xf32, #tpu.memory_space<vmem>>, %arg3: memref<64x128xbf16, #tpu.memory_space<vmem>>, %arg4: memref<1x128xf32, #tpu.memory_space<vmem>>, %arg5: memref<16x128xf32, #tpu.memory_space<vmem>>, %arg6: memref<16x128xf32, #tpu.memory_space<vmem>>) attributes {dimension_semantics = [#tpu.dimension_semantics<parallel>, #tpu.dimension_semantics<arbitrary>], iteration_bounds = array<i64: 2, 1>, scalar_prefetch = 0 : i64, scratch_operands = 1 : i64, tpu.core_type = #tpu.core_type<tc>, window_params = [{transform_indices = @transform_0, window_bounds = array<i64: 16, 64>}, {transform_indices = @transform_1, window_bounds = array<i64: 64, 128>}, {pipeline_mode = #tpu.pipeline_mode<synchronous>, transform_indices = @transform_2, window_bounds = array<i64: 1, 128>}, {transform_indices = @transform_3, window_bounds = array<i64: 16, 128>}]} {
    %c0_i32 = arith.constant 0 : i32
    %0 = arith.cmpi eq, %arg1, %c0_i32 : i32
    %1 = arith.extui %0 : i1 to i32
    %c0_i32_0 = arith.constant 0 : i32
    %2 = arith.cmpi ne, %1, %c0_i32_0 : i32
    scf.if %2 {
      %cst_10 = arith.constant 0.000000e+00 : f32
      %13 = vector.broadcast %cst_10 : f32 to vector<16x128xf32>
      %c0_11 = arith.constant 0 : index
      %c0_12 = arith.constant 0 : index
      %14 = vector.load %arg6[%c0_11, %c0_12] : memref<16x128xf32, #tpu.memory_space<vmem>>, vector<16x128xf32>
      tpu.vector_store %arg6[%c0_11, %c0_12], %13 {strides = array<i32>} : memref<16x128xf32, #tpu.memory_space<vmem>>, vector<16x128xf32>,
    } else {
    }
    %c0 = arith.constant 0 : index
    %c0_1 = arith.constant 0 : index
    %3 = vector.load %arg2[%c0, %c0_1] : memref<16x64xf32, #tpu.memory_space<vmem>>, vector<16x64xf32>
    %c0_2 = arith.constant 0 : index
    %c0_3 = arith.constant 0 : index
    %4 = vector.load %arg6[%c0_2, %c0_3] : memref<16x128xf32, #tpu.memory_space<vmem>>, vector<16x128xf32>
    %5 = arith.truncf %3 : vector<16x64xf32> to vector<16x64xbf16>
    %c0_4 = arith.constant 0 : index
    %c0_5 = arith.constant 0 : index
    %6 = vector.load %arg3[%c0_4, %c0_5] : memref<64x128xbf16, #tpu.memory_space<vmem>>, vector<64x128xbf16>
    %cst = arith.constant dense<0.000000e+00> : vector<16x128xf32>
    %7 = tpu.matmul %5, %6, %cst {dimension_numbers = #tpu.dot_dimension_numbers<[1], [0], [0], [1], [0, 0, 1, 1], [], []>} : vector<16x64xbf16>, vector<64x128xbf16>, vector<16x128xf32> -> vector<16x128xf32>
    %8 = arith.addf %4, %7 : vector<16x128xf32>
    %c0_6 = arith.constant 0 : index
    %c0_7 = arith.constant 0 : index
    %9 = vector.load %arg6[%c0_6, %c0_7] : memref<16x128xf32, #tpu.memory_space<vmem>>, vector<16x128xf32>
    tpu.vector_store %arg6[%c0_6, %c0_7], %8 {strides = array<i32>} : memref<16x128xf32, #tpu.memory_space<vmem>>, vector<16x128xf32>,
    %c0_i32_8 = arith.constant 0 : i32
    %10 = arith.cmpi eq, %arg1, %c0_i32_8 : i32
    %11 = arith.extui %10 : i1 to i32
    %c0_i32_9 = arith.constant 0 : i32
    %12 = arith.cmpi ne, %11, %c0_i32_9 : i32
    scf.if %12 {
      %c0_10 = arith.constant 0 : index
      %c0_11 = arith.constant 0 : index
      %13 = vector.load %arg6[%c0_10, %c0_11] : memref<16x128xf32, #tpu.memory_space<vmem>>, vector<16x128xf32>
      %c0_12 = arith.constant 0 : index
      %c0_13 = arith.constant 0 : index
      %14 = vector.load %arg4[%c0_12, %c0_13] : memref<1x128xf32, #tpu.memory_space<vmem>>, vector<1x128xf32>
      %15 = vector.broadcast %14 : vector<1x128xf32> to vector<16x128xf32>
      %16 = arith.addf %13, %15 : vector<16x128xf32>
      %c0_14 = arith.constant 0 : index
      %c0_15 = arith.constant 0 : index
      %17 = vector.load %arg5[%c0_14, %c0_15] : memref<16x128xf32, #tpu.memory_space<vmem>>, vector<16x128xf32>
      tpu.vector_store %arg5[%c0_14, %c0_15], %16 {strides = array<i32>} : memref<16x128xf32, #tpu.memory_space<vmem>>, vector<16x128xf32>,
    } else {
    }
    return
  }
  func.func @transform_0(%arg0: i32, %arg1: i32) -> (i32, i32) {
    %c0_i32 = arith.constant 0 : i32
    return %arg0, %arg1 : i32, i32
  }
  func.func @transform_1(%arg0: i32, %arg1: i32) -> (i32, i32) {
    %c0_i32 = arith.constant 0 : i32
    %c0_i32_0 = arith.constant 0 : i32
    return %arg1, %c0_i32 : i32, i32
  }
  func.func @transform_2(%arg0: i32, %arg1: i32) -> (i32, i32) {
    %c0_i32 = arith.constant 0 : i32
    %c0_i32_0 = arith.constant 0 : i32
    %c0_i32_1 = arith.constant 0 : i32
    return %c0_i32, %c0_i32_0 : i32, i32
  }
  func.func @transform_3(%arg0: i32, %arg1: i32) -> (i32, i32) {
    %c0_i32 = arith.constant 0 : i32
    %c0_i32_0 = arith.constant 0 : i32
    return %arg0, %c0_i32 : i32, i32
  }
}

module attributes {stable_mosaic.version = 11 : i64} {
  func.func @_lateral_upadd_kernel(%arg0: i32, %arg1: i32, %arg2: memref<1x8x8x64xf32, #tpu.memory_space<vmem>>, %arg3: memref<64x128xbf16, #tpu.memory_space<vmem>>, %arg4: memref<1x128xf32, #tpu.memory_space<vmem>>, %arg5: memref<1x4x4x128xf32, #tpu.memory_space<vmem>>, %arg6: memref<64x128xf32, #tpu.memory_space<vmem>>) attributes {dimension_semantics = [#tpu.dimension_semantics<parallel>, #tpu.dimension_semantics<parallel>], iteration_bounds = array<i64: 2, 1>, scalar_prefetch = 0 : i64, scratch_operands = 0 : i64, tpu.core_type = #tpu.core_type<tc>, window_params = [{transform_indices = @transform_0, window_bounds = array<i64: 1, 8, 8, 64>}, {pipeline_mode = #tpu.pipeline_mode<synchronous>, transform_indices = @transform_1, window_bounds = array<i64: 64, 128>}, {pipeline_mode = #tpu.pipeline_mode<synchronous>, transform_indices = @transform_2, window_bounds = array<i64: 1, 128>}, {transform_indices = @transform_3, window_bounds = array<i64: 1, 4, 4, 128>}, {transform_indices = @transform_4, window_bounds = array<i64: 64, 128>}]} {
    %c0 = arith.constant 0 : index
    %c0_0 = arith.constant 0 : index
    %c0_1 = arith.constant 0 : index
    %c0_2 = arith.constant 0 : index
    %0 = vector.load %arg2[%c0, %c0_0, %c0_1, %c0_2] : memref<1x8x8x64xf32, #tpu.memory_space<vmem>>, vector<1x8x8x64xf32>
    %1 = vector.shape_cast %0 : vector<1x8x8x64xf32> to vector<8x8x64xf32>
    %2 = vector.shape_cast %1 : vector<8x8x64xf32> to vector<64x64xf32>
    %3 = arith.truncf %2 : vector<64x64xf32> to vector<64x64xbf16>
    %c0_3 = arith.constant 0 : index
    %c0_4 = arith.constant 0 : index
    %4 = vector.load %arg3[%c0_3, %c0_4] : memref<64x128xbf16, #tpu.memory_space<vmem>>, vector<64x128xbf16>
    %cst = arith.constant dense<0.000000e+00> : vector<64x128xf32>
    %5 = tpu.matmul %3, %4, %cst {dimension_numbers = #tpu.dot_dimension_numbers<[1], [0], [0], [1], [0, 0, 1, 1], [], []>} : vector<64x64xbf16>, vector<64x128xbf16>, vector<64x128xf32> -> vector<64x128xf32>
    %c0_5 = arith.constant 0 : index
    %c0_6 = arith.constant 0 : index
    %c0_7 = arith.constant 0 : index
    %c0_8 = arith.constant 0 : index
    %6 = vector.load %arg5[%c0_5, %c0_6, %c0_7, %c0_8] : memref<1x4x4x128xf32, #tpu.memory_space<vmem>>, vector<1x4x4x128xf32>
    %7 = vector.shape_cast %6 : vector<1x4x4x128xf32> to vector<4x4x128xf32>
    %8 = vector.shape_cast %7 : vector<4x4x128xf32> to vector<4x1x4x1x128xf32>
    %9 = vector.shape_cast %8 : vector<4x1x4x1x128xf32> to vector<4x1x4x1x128xf32>
    %10 = vector.broadcast %9 : vector<4x1x4x1x128xf32> to vector<4x2x4x2x128xf32>
    %11 = vector.shape_cast %10 : vector<4x2x4x2x128xf32> to vector<64x128xf32>
    %12 = arith.addf %5, %11 : vector<64x128xf32>
    %c0_9 = arith.constant 0 : index
    %c0_10 = arith.constant 0 : index
    %13 = vector.load %arg4[%c0_9, %c0_10] : memref<1x128xf32, #tpu.memory_space<vmem>>, vector<1x128xf32>
    %14 = vector.broadcast %13 : vector<1x128xf32> to vector<64x128xf32>
    %15 = arith.addf %12, %14 : vector<64x128xf32>
    %c0_11 = arith.constant 0 : index
    %c0_12 = arith.constant 0 : index
    %16 = vector.load %arg6[%c0_11, %c0_12] : memref<64x128xf32, #tpu.memory_space<vmem>>, vector<64x128xf32>
    tpu.vector_store %arg6[%c0_11, %c0_12], %15 {strides = array<i32>} : memref<64x128xf32, #tpu.memory_space<vmem>>, vector<64x128xf32>,
    return
  }
  func.func @transform_0(%arg0: i32, %arg1: i32) -> (i32, i32, i32, i32) {
    %c0_i32 = arith.constant 0 : i32
    %c0_i32_0 = arith.constant 0 : i32
    %c0_i32_1 = arith.constant 0 : i32
    return %arg0, %arg1, %c0_i32, %c0_i32_0 : i32, i32, i32, i32
  }
  func.func @transform_1(%arg0: i32, %arg1: i32) -> (i32, i32) {
    %c0_i32 = arith.constant 0 : i32
    %c0_i32_0 = arith.constant 0 : i32
    %c0_i32_1 = arith.constant 0 : i32
    return %c0_i32, %c0_i32_0 : i32, i32
  }
  func.func @transform_2(%arg0: i32, %arg1: i32) -> (i32, i32) {
    %c0_i32 = arith.constant 0 : i32
    %c0_i32_0 = arith.constant 0 : i32
    %c0_i32_1 = arith.constant 0 : i32
    return %c0_i32, %c0_i32_0 : i32, i32
  }
  func.func @transform_3(%arg0: i32, %arg1: i32) -> (i32, i32, i32, i32) {
    %c0_i32 = arith.constant 0 : i32
    %c0_i32_0 = arith.constant 0 : i32
    %c0_i32_1 = arith.constant 0 : i32
    return %arg0, %arg1, %c0_i32, %c0_i32_0 : i32, i32, i32, i32
  }
  func.func @transform_4(%arg0: i32, %arg1: i32) -> (i32, i32) {
    %c1_i32 = arith.constant 1 : i32
    %0 = arith.muli %arg0, %c1_i32 : i32
    %1 = arith.addi %0, %arg1 : i32
    %c0_i32 = arith.constant 0 : i32
    %c0_i32_0 = arith.constant 0 : i32
    return %1, %c0_i32 : i32, i32
  }
}

module attributes {stable_mosaic.version = 11 : i64} {
  func.func @_lateral_upadd_kernel(%arg0: i32, %arg1: i32, %arg2: memref<1x16x16x32xf32, #tpu.memory_space<vmem>>, %arg3: memref<32x128xbf16, #tpu.memory_space<vmem>>, %arg4: memref<1x128xf32, #tpu.memory_space<vmem>>, %arg5: memref<1x8x8x128xf32, #tpu.memory_space<vmem>>, %arg6: memref<256x128xf32, #tpu.memory_space<vmem>>) attributes {dimension_semantics = [#tpu.dimension_semantics<parallel>, #tpu.dimension_semantics<parallel>], iteration_bounds = array<i64: 2, 1>, scalar_prefetch = 0 : i64, scratch_operands = 0 : i64, tpu.core_type = #tpu.core_type<tc>, window_params = [{transform_indices = @transform_0, window_bounds = array<i64: 1, 16, 16, 32>}, {pipeline_mode = #tpu.pipeline_mode<synchronous>, transform_indices = @transform_1, window_bounds = array<i64: 32, 128>}, {pipeline_mode = #tpu.pipeline_mode<synchronous>, transform_indices = @transform_2, window_bounds = array<i64: 1, 128>}, {transform_indices = @transform_3, window_bounds = array<i64: 1, 8, 8, 128>}, {transform_indices = @transform_4, window_bounds = array<i64: 256, 128>}]} {
    %c0 = arith.constant 0 : index
    %c0_0 = arith.constant 0 : index
    %c0_1 = arith.constant 0 : index
    %c0_2 = arith.constant 0 : index
    %0 = vector.load %arg2[%c0, %c0_0, %c0_1, %c0_2] : memref<1x16x16x32xf32, #tpu.memory_space<vmem>>, vector<1x16x16x32xf32>
    %1 = vector.shape_cast %0 : vector<1x16x16x32xf32> to vector<16x16x32xf32>
    %2 = vector.shape_cast %1 : vector<16x16x32xf32> to vector<256x32xf32>
    %3 = arith.truncf %2 : vector<256x32xf32> to vector<256x32xbf16>
    %c0_3 = arith.constant 0 : index
    %c0_4 = arith.constant 0 : index
    %4 = vector.load %arg3[%c0_3, %c0_4] : memref<32x128xbf16, #tpu.memory_space<vmem>>, vector<32x128xbf16>
    %cst = arith.constant dense<0.000000e+00> : vector<256x128xf32>
    %5 = tpu.matmul %3, %4, %cst {dimension_numbers = #tpu.dot_dimension_numbers<[1], [0], [0], [1], [0, 0, 1, 1], [], []>} : vector<256x32xbf16>, vector<32x128xbf16>, vector<256x128xf32> -> vector<256x128xf32>
    %c0_5 = arith.constant 0 : index
    %c0_6 = arith.constant 0 : index
    %c0_7 = arith.constant 0 : index
    %c0_8 = arith.constant 0 : index
    %6 = vector.load %arg5[%c0_5, %c0_6, %c0_7, %c0_8] : memref<1x8x8x128xf32, #tpu.memory_space<vmem>>, vector<1x8x8x128xf32>
    %7 = vector.shape_cast %6 : vector<1x8x8x128xf32> to vector<8x8x128xf32>
    %8 = vector.shape_cast %7 : vector<8x8x128xf32> to vector<8x1x8x1x128xf32>
    %9 = vector.shape_cast %8 : vector<8x1x8x1x128xf32> to vector<8x1x8x1x128xf32>
    %10 = vector.broadcast %9 : vector<8x1x8x1x128xf32> to vector<8x2x8x2x128xf32>
    %11 = vector.shape_cast %10 : vector<8x2x8x2x128xf32> to vector<256x128xf32>
    %12 = arith.addf %5, %11 : vector<256x128xf32>
    %c0_9 = arith.constant 0 : index
    %c0_10 = arith.constant 0 : index
    %13 = vector.load %arg4[%c0_9, %c0_10] : memref<1x128xf32, #tpu.memory_space<vmem>>, vector<1x128xf32>
    %14 = vector.broadcast %13 : vector<1x128xf32> to vector<256x128xf32>
    %15 = arith.addf %12, %14 : vector<256x128xf32>
    %c0_11 = arith.constant 0 : index
    %c0_12 = arith.constant 0 : index
    %16 = vector.load %arg6[%c0_11, %c0_12] : memref<256x128xf32, #tpu.memory_space<vmem>>, vector<256x128xf32>
    tpu.vector_store %arg6[%c0_11, %c0_12], %15 {strides = array<i32>} : memref<256x128xf32, #tpu.memory_space<vmem>>, vector<256x128xf32>,
    return
  }
  func.func @transform_0(%arg0: i32, %arg1: i32) -> (i32, i32, i32, i32) {
    %c0_i32 = arith.constant 0 : i32
    %c0_i32_0 = arith.constant 0 : i32
    %c0_i32_1 = arith.constant 0 : i32
    return %arg0, %arg1, %c0_i32, %c0_i32_0 : i32, i32, i32, i32
  }
  func.func @transform_1(%arg0: i32, %arg1: i32) -> (i32, i32) {
    %c0_i32 = arith.constant 0 : i32
    %c0_i32_0 = arith.constant 0 : i32
    %c0_i32_1 = arith.constant 0 : i32
    return %c0_i32, %c0_i32_0 : i32, i32
  }
  func.func @transform_2(%arg0: i32, %arg1: i32) -> (i32, i32) {
    %c0_i32 = arith.constant 0 : i32
    %c0_i32_0 = arith.constant 0 : i32
    %c0_i32_1 = arith.constant 0 : i32
    return %c0_i32, %c0_i32_0 : i32, i32
  }
  func.func @transform_3(%arg0: i32, %arg1: i32) -> (i32, i32, i32, i32) {
    %c0_i32 = arith.constant 0 : i32
    %c0_i32_0 = arith.constant 0 : i32
    %c0_i32_1 = arith.constant 0 : i32
    return %arg0, %arg1, %c0_i32, %c0_i32_0 : i32, i32, i32, i32
  }
  func.func @transform_4(%arg0: i32, %arg1: i32) -> (i32, i32) {
    %c1_i32 = arith.constant 1 : i32
    %0 = arith.muli %arg0, %c1_i32 : i32
    %1 = arith.addi %0, %arg1 : i32
    %c0_i32 = arith.constant 0 : i32
    %c0_i32_0 = arith.constant 0 : i32
    return %1, %c0_i32 : i32, i32
  }
}

module attributes {stable_mosaic.version = 11 : i64} {
  func.func @_conv3x3_rows_kernel(%arg0: i32, %arg1: i32, %arg2: memref<1x1x18x18x128xbf16, #tpu.memory_space<vmem>>, %arg3: memref<9x128x128xbf16, #tpu.memory_space<vmem>>, %arg4: memref<1x128xf32, #tpu.memory_space<vmem>>, %arg5: memref<1x1x256x128xf32, #tpu.memory_space<vmem>>) attributes {dimension_semantics = [#tpu.dimension_semantics<parallel>, #tpu.dimension_semantics<parallel>], iteration_bounds = array<i64: 2, 1>, scalar_prefetch = 0 : i64, scratch_operands = 0 : i64, tpu.core_type = #tpu.core_type<tc>, window_params = [{transform_indices = @transform_0, window_bounds = array<i64: 1, 1, 18, 18, 128>}, {pipeline_mode = #tpu.pipeline_mode<synchronous>, transform_indices = @transform_1, window_bounds = array<i64: 9, 128, 128>}, {pipeline_mode = #tpu.pipeline_mode<synchronous>, transform_indices = @transform_2, window_bounds = array<i64: 1, 128>}, {transform_indices = @transform_3, window_bounds = array<i64: 1, 1, 256, 128>}]} {
    %c0 = arith.constant 0 : index
    %c0_0 = arith.constant 0 : index
    %c0_1 = arith.constant 0 : index
    %c0_2 = arith.constant 0 : index
    %c0_3 = arith.constant 0 : index
    %0 = vector.load %arg2[%c0, %c0_0, %c0_1, %c0_2, %c0_3] : memref<1x1x18x18x128xbf16, #tpu.memory_space<vmem>>, vector<1x1x16x16x128xbf16>
    %1 = vector.shape_cast %0 : vector<1x1x16x16x128xbf16> to vector<16x16x128xbf16>
    %2 = vector.shape_cast %1 : vector<16x16x128xbf16> to vector<256x128xbf16>
    %c0_4 = arith.constant 0 : index
    %c0_5 = arith.constant 0 : index
    %c0_6 = arith.constant 0 : index
    %3 = vector.load %arg3[%c0_4, %c0_5, %c0_6] : memref<9x128x128xbf16, #tpu.memory_space<vmem>>, vector<1x128x128xbf16>
    %4 = vector.shape_cast %3 : vector<1x128x128xbf16> to vector<128x128xbf16>
    %cst = arith.constant dense<0.000000e+00> : vector<256x128xf32>
    %5 = tpu.matmul %2, %4, %cst {dimension_numbers = #tpu.dot_dimension_numbers<[1], [0], [0], [1], [0, 0, 1, 1], [], []>} : vector<256x128xbf16>, vector<128x128xbf16>, vector<256x128xf32> -> vector<256x128xf32>
    %c0_7 = arith.constant 0 : index
    %c0_8 = arith.constant 0 : index
    %c0_9 = arith.constant 0 : index
    %c1 = arith.constant 1 : index
    %c0_10 = arith.constant 0 : index
    %6 = vector.load %arg2[%c0_7, %c0_8, %c0_9, %c1, %c0_10] : memref<1x1x18x18x128xbf16, #tpu.memory_space<vmem>>, vector<1x1x16x16x128xbf16>
    %7 = vector.shape_cast %6 : vector<1x1x16x16x128xbf16> to vector<16x16x128xbf16>
    %8 = vector.shape_cast %7 : vector<16x16x128xbf16> to vector<256x128xbf16>
    %c1_11 = arith.constant 1 : index
    %c0_12 = arith.constant 0 : index
    %c0_13 = arith.constant 0 : index
    %9 = vector.load %arg3[%c1_11, %c0_12, %c0_13] : memref<9x128x128xbf16, #tpu.memory_space<vmem>>, vector<1x128x128xbf16>
    %10 = vector.shape_cast %9 : vector<1x128x128xbf16> to vector<128x128xbf16>
    %cst_14 = arith.constant dense<0.000000e+00> : vector<256x128xf32>
    %11 = tpu.matmul %8, %10, %cst_14 {dimension_numbers = #tpu.dot_dimension_numbers<[1], [0], [0], [1], [0, 0, 1, 1], [], []>} : vector<256x128xbf16>, vector<128x128xbf16>, vector<256x128xf32> -> vector<256x128xf32>
    %12 = arith.addf %5, %11 : vector<256x128xf32>
    %c0_15 = arith.constant 0 : index
    %c0_16 = arith.constant 0 : index
    %c0_17 = arith.constant 0 : index
    %c2 = arith.constant 2 : index
    %c0_18 = arith.constant 0 : index
    %13 = vector.load %arg2[%c0_15, %c0_16, %c0_17, %c2, %c0_18] : memref<1x1x18x18x128xbf16, #tpu.memory_space<vmem>>, vector<1x1x16x16x128xbf16>
    %14 = vector.shape_cast %13 : vector<1x1x16x16x128xbf16> to vector<16x16x128xbf16>
    %15 = vector.shape_cast %14 : vector<16x16x128xbf16> to vector<256x128xbf16>
    %c2_19 = arith.constant 2 : index
    %c0_20 = arith.constant 0 : index
    %c0_21 = arith.constant 0 : index
    %16 = vector.load %arg3[%c2_19, %c0_20, %c0_21] : memref<9x128x128xbf16, #tpu.memory_space<vmem>>, vector<1x128x128xbf16>
    %17 = vector.shape_cast %16 : vector<1x128x128xbf16> to vector<128x128xbf16>
    %cst_22 = arith.constant dense<0.000000e+00> : vector<256x128xf32>
    %18 = tpu.matmul %15, %17, %cst_22 {dimension_numbers = #tpu.dot_dimension_numbers<[1], [0], [0], [1], [0, 0, 1, 1], [], []>} : vector<256x128xbf16>, vector<128x128xbf16>, vector<256x128xf32> -> vector<256x128xf32>
    %19 = arith.addf %12, %18 : vector<256x128xf32>
    %c0_23 = arith.constant 0 : index
    %c0_24 = arith.constant 0 : index
    %c1_25 = arith.constant 1 : index
    %c0_26 = arith.constant 0 : index
    %c0_27 = arith.constant 0 : index
    %20 = vector.load %arg2[%c0_23, %c0_24, %c1_25, %c0_26, %c0_27] : memref<1x1x18x18x128xbf16, #tpu.memory_space<vmem>>, vector<1x1x16x16x128xbf16>
    %21 = vector.shape_cast %20 : vector<1x1x16x16x128xbf16> to vector<16x16x128xbf16>
    %22 = vector.shape_cast %21 : vector<16x16x128xbf16> to vector<256x128xbf16>
    %c3 = arith.constant 3 : index
    %c0_28 = arith.constant 0 : index
    %c0_29 = arith.constant 0 : index
    %23 = vector.load %arg3[%c3, %c0_28, %c0_29] : memref<9x128x128xbf16, #tpu.memory_space<vmem>>, vector<1x128x128xbf16>
    %24 = vector.shape_cast %23 : vector<1x128x128xbf16> to vector<128x128xbf16>
    %cst_30 = arith.constant dense<0.000000e+00> : vector<256x128xf32>
    %25 = tpu.matmul %22, %24, %cst_30 {dimension_numbers = #tpu.dot_dimension_numbers<[1], [0], [0], [1], [0, 0, 1, 1], [], []>} : vector<256x128xbf16>, vector<128x128xbf16>, vector<256x128xf32> -> vector<256x128xf32>
    %26 = arith.addf %19, %25 : vector<256x128xf32>
    %c0_31 = arith.constant 0 : index
    %c0_32 = arith.constant 0 : index
    %c1_33 = arith.constant 1 : index
    %c1_34 = arith.constant 1 : index
    %c0_35 = arith.constant 0 : index
    %27 = vector.load %arg2[%c0_31, %c0_32, %c1_33, %c1_34, %c0_35] : memref<1x1x18x18x128xbf16, #tpu.memory_space<vmem>>, vector<1x1x16x16x128xbf16>
    %28 = vector.shape_cast %27 : vector<1x1x16x16x128xbf16> to vector<16x16x128xbf16>
    %29 = vector.shape_cast %28 : vector<16x16x128xbf16> to vector<256x128xbf16>
    %c4 = arith.constant 4 : index
    %c0_36 = arith.constant 0 : index
    %c0_37 = arith.constant 0 : index
    %30 = vector.load %arg3[%c4, %c0_36, %c0_37] : memref<9x128x128xbf16, #tpu.memory_space<vmem>>, vector<1x128x128xbf16>
    %31 = vector.shape_cast %30 : vector<1x128x128xbf16> to vector<128x128xbf16>
    %cst_38 = arith.constant dense<0.000000e+00> : vector<256x128xf32>
    %32 = tpu.matmul %29, %31, %cst_38 {dimension_numbers = #tpu.dot_dimension_numbers<[1], [0], [0], [1], [0, 0, 1, 1], [], []>} : vector<256x128xbf16>, vector<128x128xbf16>, vector<256x128xf32> -> vector<256x128xf32>
    %33 = arith.addf %26, %32 : vector<256x128xf32>
    %c0_39 = arith.constant 0 : index
    %c0_40 = arith.constant 0 : index
    %c1_41 = arith.constant 1 : index
    %c2_42 = arith.constant 2 : index
    %c0_43 = arith.constant 0 : index
    %34 = vector.load %arg2[%c0_39, %c0_40, %c1_41, %c2_42, %c0_43] : memref<1x1x18x18x128xbf16, #tpu.memory_space<vmem>>, vector<1x1x16x16x128xbf16>
    %35 = vector.shape_cast %34 : vector<1x1x16x16x128xbf16> to vector<16x16x128xbf16>
    %36 = vector.shape_cast %35 : vector<16x16x128xbf16> to vector<256x128xbf16>
    %c5 = arith.constant 5 : index
    %c0_44 = arith.constant 0 : index
    %c0_45 = arith.constant 0 : index
    %37 = vector.load %arg3[%c5, %c0_44, %c0_45] : memref<9x128x128xbf16, #tpu.memory_space<vmem>>, vector<1x128x128xbf16>
    %38 = vector.shape_cast %37 : vector<1x128x128xbf16> to vector<128x128xbf16>
    %cst_46 = arith.constant dense<0.000000e+00> : vector<256x128xf32>
    %39 = tpu.matmul %36, %38, %cst_46 {dimension_numbers = #tpu.dot_dimension_numbers<[1], [0], [0], [1], [0, 0, 1, 1], [], []>} : vector<256x128xbf16>, vector<128x128xbf16>, vector<256x128xf32> -> vector<256x128xf32>
    %40 = arith.addf %33, %39 : vector<256x128xf32>
    %c0_47 = arith.constant 0 : index
    %c0_48 = arith.constant 0 : index
    %c2_49 = arith.constant 2 : index
    %c0_50 = arith.constant 0 : index
    %c0_51 = arith.constant 0 : index
    %41 = vector.load %arg2[%c0_47, %c0_48, %c2_49, %c0_50, %c0_51] : memref<1x1x18x18x128xbf16, #tpu.memory_space<vmem>>, vector<1x1x16x16x128xbf16>
    %42 = vector.shape_cast %41 : vector<1x1x16x16x128xbf16> to vector<16x16x128xbf16>
    %43 = vector.shape_cast %42 : vector<16x16x128xbf16> to vector<256x128xbf16>
    %c6 = arith.constant 6 : index
    %c0_52 = arith.constant 0 : index
    %c0_53 = arith.constant 0 : index
    %44 = vector.load %arg3[%c6, %c0_52, %c0_53] : memref<9x128x128xbf16, #tpu.memory_space<vmem>>, vector<1x128x128xbf16>
    %45 = vector.shape_cast %44 : vector<1x128x128xbf16> to vector<128x128xbf16>
    %cst_54 = arith.constant dense<0.000000e+00> : vector<256x128xf32>
    %46 = tpu.matmul %43, %45, %cst_54 {dimension_numbers = #tpu.dot_dimension_numbers<[1], [0], [0], [1], [0, 0, 1, 1], [], []>} : vector<256x128xbf16>, vector<128x128xbf16>, vector<256x128xf32> -> vector<256x128xf32>
    %47 = arith.addf %40, %46 : vector<256x128xf32>
    %c0_55 = arith.constant 0 : index
    %c0_56 = arith.constant 0 : index
    %c2_57 = arith.constant 2 : index
    %c1_58 = arith.constant 1 : index
    %c0_59 = arith.constant 0 : index
    %48 = vector.load %arg2[%c0_55, %c0_56, %c2_57, %c1_58, %c0_59] : memref<1x1x18x18x128xbf16, #tpu.memory_space<vmem>>, vector<1x1x16x16x128xbf16>
    %49 = vector.shape_cast %48 : vector<1x1x16x16x128xbf16> to vector<16x16x128xbf16>
    %50 = vector.shape_cast %49 : vector<16x16x128xbf16> to vector<256x128xbf16>
    %c7 = arith.constant 7 : index
    %c0_60 = arith.constant 0 : index
    %c0_61 = arith.constant 0 : index
    %51 = vector.load %arg3[%c7, %c0_60, %c0_61] : memref<9x128x128xbf16, #tpu.memory_space<vmem>>, vector<1x128x128xbf16>
    %52 = vector.shape_cast %51 : vector<1x128x128xbf16> to vector<128x128xbf16>
    %cst_62 = arith.constant dense<0.000000e+00> : vector<256x128xf32>
    %53 = tpu.matmul %50, %52, %cst_62 {dimension_numbers = #tpu.dot_dimension_numbers<[1], [0], [0], [1], [0, 0, 1, 1], [], []>} : vector<256x128xbf16>, vector<128x128xbf16>, vector<256x128xf32> -> vector<256x128xf32>
    %54 = arith.addf %47, %53 : vector<256x128xf32>
    %c0_63 = arith.constant 0 : index
    %c0_64 = arith.constant 0 : index
    %c2_65 = arith.constant 2 : index
    %c2_66 = arith.constant 2 : index
    %c0_67 = arith.constant 0 : index
    %55 = vector.load %arg2[%c0_63, %c0_64, %c2_65, %c2_66, %c0_67] : memref<1x1x18x18x128xbf16, #tpu.memory_space<vmem>>, vector<1x1x16x16x128xbf16>
    %56 = vector.shape_cast %55 : vector<1x1x16x16x128xbf16> to vector<16x16x128xbf16>
    %57 = vector.shape_cast %56 : vector<16x16x128xbf16> to vector<256x128xbf16>
    %c8 = arith.constant 8 : index
    %c0_68 = arith.constant 0 : index
    %c0_69 = arith.constant 0 : index
    %58 = vector.load %arg3[%c8, %c0_68, %c0_69] : memref<9x128x128xbf16, #tpu.memory_space<vmem>>, vector<1x128x128xbf16>
    %59 = vector.shape_cast %58 : vector<1x128x128xbf16> to vector<128x128xbf16>
    %cst_70 = arith.constant dense<0.000000e+00> : vector<256x128xf32>
    %60 = tpu.matmul %57, %59, %cst_70 {dimension_numbers = #tpu.dot_dimension_numbers<[1], [0], [0], [1], [0, 0, 1, 1], [], []>} : vector<256x128xbf16>, vector<128x128xbf16>, vector<256x128xf32> -> vector<256x128xf32>
    %61 = arith.addf %54, %60 : vector<256x128xf32>
    %c0_71 = arith.constant 0 : index
    %c0_72 = arith.constant 0 : index
    %62 = vector.load %arg4[%c0_71, %c0_72] : memref<1x128xf32, #tpu.memory_space<vmem>>, vector<1x128xf32>
    %63 = vector.broadcast %62 : vector<1x128xf32> to vector<256x128xf32>
    %64 = arith.addf %61, %63 : vector<256x128xf32>
    %c0_73 = arith.constant 0 : index
    %c0_74 = arith.constant 0 : index
    %c0_75 = arith.constant 0 : index
    %c0_76 = arith.constant 0 : index
    %65 = vector.load %arg5[%c0_73, %c0_74, %c0_75, %c0_76] : memref<1x1x256x128xf32, #tpu.memory_space<vmem>>, vector<1x1x256x128xf32>
    %66 = vector.shape_cast %65 : vector<1x1x256x128xf32> to vector<256x128xf32>
    %67 = vector.shape_cast %64 : vector<256x128xf32> to vector<1x1x256x128xf32>
    tpu.vector_store %arg5[%c0_73, %c0_74, %c0_75, %c0_76], %67 {strides = array<i32>} : memref<1x1x256x128xf32, #tpu.memory_space<vmem>>, vector<1x1x256x128xf32>,
    return
  }
  func.func @transform_0(%arg0: i32, %arg1: i32) -> (i32, i32, i32, i32, i32) {
    %c0_i32 = arith.constant 0 : i32
    %c0_i32_0 = arith.constant 0 : i32
    %c0_i32_1 = arith.constant 0 : i32
    %c0_i32_2 = arith.constant 0 : i32
    return %arg0, %arg1, %c0_i32, %c0_i32_0, %c0_i32_1 : i32, i32, i32, i32, i32
  }
  func.func @transform_1(%arg0: i32, %arg1: i32) -> (i32, i32, i32) {
    %c0_i32 = arith.constant 0 : i32
    %c0_i32_0 = arith.constant 0 : i32
    %c0_i32_1 = arith.constant 0 : i32
    %c0_i32_2 = arith.constant 0 : i32
    return %c0_i32, %c0_i32_0, %c0_i32_1 : i32, i32, i32
  }
  func.func @transform_2(%arg0: i32, %arg1: i32) -> (i32, i32) {
    %c0_i32 = arith.constant 0 : i32
    %c0_i32_0 = arith.constant 0 : i32
    %c0_i32_1 = arith.constant 0 : i32
    return %c0_i32, %c0_i32_0 : i32, i32
  }
  func.func @transform_3(%arg0: i32, %arg1: i32) -> (i32, i32, i32, i32) {
    %c0_i32 = arith.constant 0 : i32
    %c0_i32_0 = arith.constant 0 : i32
    %c0_i32_1 = arith.constant 0 : i32
    return %arg0, %arg1, %c0_i32, %c0_i32_0 : i32, i32, i32, i32
  }
}

module attributes {stable_mosaic.version = 11 : i64} {
  func.func @_conv3x3_rows_kernel(%arg0: i32, %arg1: i32, %arg2: memref<1x1x10x10x128xbf16, #tpu.memory_space<vmem>>, %arg3: memref<9x128x128xbf16, #tpu.memory_space<vmem>>, %arg4: memref<1x128xf32, #tpu.memory_space<vmem>>, %arg5: memref<1x1x64x128xf32, #tpu.memory_space<vmem>>) attributes {dimension_semantics = [#tpu.dimension_semantics<parallel>, #tpu.dimension_semantics<parallel>], iteration_bounds = array<i64: 2, 1>, scalar_prefetch = 0 : i64, scratch_operands = 0 : i64, tpu.core_type = #tpu.core_type<tc>, window_params = [{transform_indices = @transform_0, window_bounds = array<i64: 1, 1, 10, 10, 128>}, {pipeline_mode = #tpu.pipeline_mode<synchronous>, transform_indices = @transform_1, window_bounds = array<i64: 9, 128, 128>}, {pipeline_mode = #tpu.pipeline_mode<synchronous>, transform_indices = @transform_2, window_bounds = array<i64: 1, 128>}, {transform_indices = @transform_3, window_bounds = array<i64: 1, 1, 64, 128>}]} {
    %c0 = arith.constant 0 : index
    %c0_0 = arith.constant 0 : index
    %c0_1 = arith.constant 0 : index
    %c0_2 = arith.constant 0 : index
    %c0_3 = arith.constant 0 : index
    %0 = vector.load %arg2[%c0, %c0_0, %c0_1, %c0_2, %c0_3] : memref<1x1x10x10x128xbf16, #tpu.memory_space<vmem>>, vector<1x1x8x8x128xbf16>
    %1 = vector.shape_cast %0 : vector<1x1x8x8x128xbf16> to vector<8x8x128xbf16>
    %2 = vector.shape_cast %1 : vector<8x8x128xbf16> to vector<64x128xbf16>
    %c0_4 = arith.constant 0 : index
    %c0_5 = arith.constant 0 : index
    %c0_6 = arith.constant 0 : index
    %3 = vector.load %arg3[%c0_4, %c0_5, %c0_6] : memref<9x128x128xbf16, #tpu.memory_space<vmem>>, vector<1x128x128xbf16>
    %4 = vector.shape_cast %3 : vector<1x128x128xbf16> to vector<128x128xbf16>
    %cst = arith.constant dense<0.000000e+00> : vector<64x128xf32>
    %5 = tpu.matmul %2, %4, %cst {dimension_numbers = #tpu.dot_dimension_numbers<[1], [0], [0], [1], [0, 0, 1, 1], [], []>} : vector<64x128xbf16>, vector<128x128xbf16>, vector<64x128xf32> -> vector<64x128xf32>
    %c0_7 = arith.constant 0 : index
    %c0_8 = arith.constant 0 : index
    %c0_9 = arith.constant 0 : index
    %c1 = arith.constant 1 : index
    %c0_10 = arith.constant 0 : index
    %6 = vector.load %arg2[%c0_7, %c0_8, %c0_9, %c1, %c0_10] : memref<1x1x10x10x128xbf16, #tpu.memory_space<vmem>>, vector<1x1x8x8x128xbf16>
    %7 = vector.shape_cast %6 : vector<1x1x8x8x128xbf16> to vector<8x8x128xbf16>
    %8 = vector.shape_cast %7 : vector<8x8x128xbf16> to vector<64x128xbf16>
    %c1_11 = arith.constant 1 : index
    %c0_12 = arith.constant 0 : index
    %c0_13 = arith.constant 0 : index
    %9 = vector.load %arg3[%c1_11, %c0_12, %c0_13] : memref<9x128x128xbf16, #tpu.memory_space<vmem>>, vector<1x128x128xbf16>
    %10 = vector.shape_cast %9 : vector<1x128x128xbf16> to vector<128x128xbf16>
    %cst_14 = arith.constant dense<0.000000e+00> : vector<64x128xf32>
    %11 = tpu.matmul %8, %10, %cst_14 {dimension_numbers = #tpu.dot_dimension_numbers<[1], [0], [0], [1], [0, 0, 1, 1], [], []>} : vector<64x128xbf16>, vector<128x128xbf16>, vector<64x128xf32> -> vector<64x128xf32>
    %12 = arith.addf %5, %11 : vector<64x128xf32>
    %c0_15 = arith.constant 0 : index
    %c0_16 = arith.constant 0 : index
    %c0_17 = arith.constant 0 : index
    %c2 = arith.constant 2 : index
    %c0_18 = arith.constant 0 : index
    %13 = vector.load %arg2[%c0_15, %c0_16, %c0_17, %c2, %c0_18] : memref<1x1x10x10x128xbf16, #tpu.memory_space<vmem>>, vector<1x1x8x8x128xbf16>
    %14 = vector.shape_cast %13 : vector<1x1x8x8x128xbf16> to vector<8x8x128xbf16>
    %15 = vector.shape_cast %14 : vector<8x8x128xbf16> to vector<64x128xbf16>
    %c2_19 = arith.constant 2 : index
    %c0_20 = arith.constant 0 : index
    %c0_21 = arith.constant 0 : index
    %16 = vector.load %arg3[%c2_19, %c0_20, %c0_21] : memref<9x128x128xbf16, #tpu.memory_space<vmem>>, vector<1x128x128xbf16>
    %17 = vector.shape_cast %16 : vector<1x128x128xbf16> to vector<128x128xbf16>
    %cst_22 = arith.constant dense<0.000000e+00> : vector<64x128xf32>
    %18 = tpu.matmul %15, %17, %cst_22 {dimension_numbers = #tpu.dot_dimension_numbers<[1], [0], [0], [1], [0, 0, 1, 1], [], []>} : vector<64x128xbf16>, vector<128x128xbf16>, vector<64x128xf32> -> vector<64x128xf32>
    %19 = arith.addf %12, %18 : vector<64x128xf32>
    %c0_23 = arith.constant 0 : index
    %c0_24 = arith.constant 0 : index
    %c1_25 = arith.constant 1 : index
    %c0_26 = arith.constant 0 : index
    %c0_27 = arith.constant 0 : index
    %20 = vector.load %arg2[%c0_23, %c0_24, %c1_25, %c0_26, %c0_27] : memref<1x1x10x10x128xbf16, #tpu.memory_space<vmem>>, vector<1x1x8x8x128xbf16>
    %21 = vector.shape_cast %20 : vector<1x1x8x8x128xbf16> to vector<8x8x128xbf16>
    %22 = vector.shape_cast %21 : vector<8x8x128xbf16> to vector<64x128xbf16>
    %c3 = arith.constant 3 : index
    %c0_28 = arith.constant 0 : index
    %c0_29 = arith.constant 0 : index
    %23 = vector.load %arg3[%c3, %c0_28, %c0_29] : memref<9x128x128xbf16, #tpu.memory_space<vmem>>, vector<1x128x128xbf16>
    %24 = vector.shape_cast %23 : vector<1x128x128xbf16> to vector<128x128xbf16>
    %cst_30 = arith.constant dense<0.000000e+00> : vector<64x128xf32>
    %25 = tpu.matmul %22, %24, %cst_30 {dimension_numbers = #tpu.dot_dimension_numbers<[1], [0], [0], [1], [0, 0, 1, 1], [], []>} : vector<64x128xbf16>, vector<128x128xbf16>, vector<64x128xf32> -> vector<64x128xf32>
    %26 = arith.addf %19, %25 : vector<64x128xf32>
    %c0_31 = arith.constant 0 : index
    %c0_32 = arith.constant 0 : index
    %c1_33 = arith.constant 1 : index
    %c1_34 = arith.constant 1 : index
    %c0_35 = arith.constant 0 : index
    %27 = vector.load %arg2[%c0_31, %c0_32, %c1_33, %c1_34, %c0_35] : memref<1x1x10x10x128xbf16, #tpu.memory_space<vmem>>, vector<1x1x8x8x128xbf16>
    %28 = vector.shape_cast %27 : vector<1x1x8x8x128xbf16> to vector<8x8x128xbf16>
    %29 = vector.shape_cast %28 : vector<8x8x128xbf16> to vector<64x128xbf16>
    %c4 = arith.constant 4 : index
    %c0_36 = arith.constant 0 : index
    %c0_37 = arith.constant 0 : index
    %30 = vector.load %arg3[%c4, %c0_36, %c0_37] : memref<9x128x128xbf16, #tpu.memory_space<vmem>>, vector<1x128x128xbf16>
    %31 = vector.shape_cast %30 : vector<1x128x128xbf16> to vector<128x128xbf16>
    %cst_38 = arith.constant dense<0.000000e+00> : vector<64x128xf32>
    %32 = tpu.matmul %29, %31, %cst_38 {dimension_numbers = #tpu.dot_dimension_numbers<[1], [0], [0], [1], [0, 0, 1, 1], [], []>} : vector<64x128xbf16>, vector<128x128xbf16>, vector<64x128xf32> -> vector<64x128xf32>
    %33 = arith.addf %26, %32 : vector<64x128xf32>
    %c0_39 = arith.constant 0 : index
    %c0_40 = arith.constant 0 : index
    %c1_41 = arith.constant 1 : index
    %c2_42 = arith.constant 2 : index
    %c0_43 = arith.constant 0 : index
    %34 = vector.load %arg2[%c0_39, %c0_40, %c1_41, %c2_42, %c0_43] : memref<1x1x10x10x128xbf16, #tpu.memory_space<vmem>>, vector<1x1x8x8x128xbf16>
    %35 = vector.shape_cast %34 : vector<1x1x8x8x128xbf16> to vector<8x8x128xbf16>
    %36 = vector.shape_cast %35 : vector<8x8x128xbf16> to vector<64x128xbf16>
    %c5 = arith.constant 5 : index
    %c0_44 = arith.constant 0 : index
    %c0_45 = arith.constant 0 : index
    %37 = vector.load %arg3[%c5, %c0_44, %c0_45] : memref<9x128x128xbf16, #tpu.memory_space<vmem>>, vector<1x128x128xbf16>
    %38 = vector.shape_cast %37 : vector<1x128x128xbf16> to vector<128x128xbf16>
    %cst_46 = arith.constant dense<0.000000e+00> : vector<64x128xf32>
    %39 = tpu.matmul %36, %38, %cst_46 {dimension_numbers = #tpu.dot_dimension_numbers<[1], [0], [0], [1], [0, 0, 1, 1], [], []>} : vector<64x128xbf16>, vector<128x128xbf16>, vector<64x128xf32> -> vector<64x128xf32>
    %40 = arith.addf %33, %39 : vector<64x128xf32>
    %c0_47 = arith.constant 0 : index
    %c0_48 = arith.constant 0 : index
    %c2_49 = arith.constant 2 : index
    %c0_50 = arith.constant 0 : index
    %c0_51 = arith.constant 0 : index
    %41 = vector.load %arg2[%c0_47, %c0_48, %c2_49, %c0_50, %c0_51] : memref<1x1x10x10x128xbf16, #tpu.memory_space<vmem>>, vector<1x1x8x8x128xbf16>
    %42 = vector.shape_cast %41 : vector<1x1x8x8x128xbf16> to vector<8x8x128xbf16>
    %43 = vector.shape_cast %42 : vector<8x8x128xbf16> to vector<64x128xbf16>
    %c6 = arith.constant 6 : index
    %c0_52 = arith.constant 0 : index
    %c0_53 = arith.constant 0 : index
    %44 = vector.load %arg3[%c6, %c0_52, %c0_53] : memref<9x128x128xbf16, #tpu.memory_space<vmem>>, vector<1x128x128xbf16>
    %45 = vector.shape_cast %44 : vector<1x128x128xbf16> to vector<128x128xbf16>
    %cst_54 = arith.constant dense<0.000000e+00> : vector<64x128xf32>
    %46 = tpu.matmul %43, %45, %cst_54 {dimension_numbers = #tpu.dot_dimension_numbers<[1], [0], [0], [1], [0, 0, 1, 1], [], []>} : vector<64x128xbf16>, vector<128x128xbf16>, vector<64x128xf32> -> vector<64x128xf32>
    %47 = arith.addf %40, %46 : vector<64x128xf32>
    %c0_55 = arith.constant 0 : index
    %c0_56 = arith.constant 0 : index
    %c2_57 = arith.constant 2 : index
    %c1_58 = arith.constant 1 : index
    %c0_59 = arith.constant 0 : index
    %48 = vector.load %arg2[%c0_55, %c0_56, %c2_57, %c1_58, %c0_59] : memref<1x1x10x10x128xbf16, #tpu.memory_space<vmem>>, vector<1x1x8x8x128xbf16>
    %49 = vector.shape_cast %48 : vector<1x1x8x8x128xbf16> to vector<8x8x128xbf16>
    %50 = vector.shape_cast %49 : vector<8x8x128xbf16> to vector<64x128xbf16>
    %c7 = arith.constant 7 : index
    %c0_60 = arith.constant 0 : index
    %c0_61 = arith.constant 0 : index
    %51 = vector.load %arg3[%c7, %c0_60, %c0_61] : memref<9x128x128xbf16, #tpu.memory_space<vmem>>, vector<1x128x128xbf16>
    %52 = vector.shape_cast %51 : vector<1x128x128xbf16> to vector<128x128xbf16>
    %cst_62 = arith.constant dense<0.000000e+00> : vector<64x128xf32>
    %53 = tpu.matmul %50, %52, %cst_62 {dimension_numbers = #tpu.dot_dimension_numbers<[1], [0], [0], [1], [0, 0, 1, 1], [], []>} : vector<64x128xbf16>, vector<128x128xbf16>, vector<64x128xf32> -> vector<64x128xf32>
    %54 = arith.addf %47, %53 : vector<64x128xf32>
    %c0_63 = arith.constant 0 : index
    %c0_64 = arith.constant 0 : index
    %c2_65 = arith.constant 2 : index
    %c2_66 = arith.constant 2 : index
    %c0_67 = arith.constant 0 : index
    %55 = vector.load %arg2[%c0_63, %c0_64, %c2_65, %c2_66, %c0_67] : memref<1x1x10x10x128xbf16, #tpu.memory_space<vmem>>, vector<1x1x8x8x128xbf16>
    %56 = vector.shape_cast %55 : vector<1x1x8x8x128xbf16> to vector<8x8x128xbf16>
    %57 = vector.shape_cast %56 : vector<8x8x128xbf16> to vector<64x128xbf16>
    %c8 = arith.constant 8 : index
    %c0_68 = arith.constant 0 : index
    %c0_69 = arith.constant 0 : index
    %58 = vector.load %arg3[%c8, %c0_68, %c0_69] : memref<9x128x128xbf16, #tpu.memory_space<vmem>>, vector<1x128x128xbf16>
    %59 = vector.shape_cast %58 : vector<1x128x128xbf16> to vector<128x128xbf16>
    %cst_70 = arith.constant dense<0.000000e+00> : vector<64x128xf32>
    %60 = tpu.matmul %57, %59, %cst_70 {dimension_numbers = #tpu.dot_dimension_numbers<[1], [0], [0], [1], [0, 0, 1, 1], [], []>} : vector<64x128xbf16>, vector<128x128xbf16>, vector<64x128xf32> -> vector<64x128xf32>
    %61 = arith.addf %54, %60 : vector<64x128xf32>
    %c0_71 = arith.constant 0 : index
    %c0_72 = arith.constant 0 : index
    %62 = vector.load %arg4[%c0_71, %c0_72] : memref<1x128xf32, #tpu.memory_space<vmem>>, vector<1x128xf32>
    %63 = vector.broadcast %62 : vector<1x128xf32> to vector<64x128xf32>
    %64 = arith.addf %61, %63 : vector<64x128xf32>
    %c0_73 = arith.constant 0 : index
    %c0_74 = arith.constant 0 : index
    %c0_75 = arith.constant 0 : index
    %c0_76 = arith.constant 0 : index
    %65 = vector.load %arg5[%c0_73, %c0_74, %c0_75, %c0_76] : memref<1x1x64x128xf32, #tpu.memory_space<vmem>>, vector<1x1x64x128xf32>
    %66 = vector.shape_cast %65 : vector<1x1x64x128xf32> to vector<64x128xf32>
    %67 = vector.shape_cast %64 : vector<64x128xf32> to vector<1x1x64x128xf32>
    tpu.vector_store %arg5[%c0_73, %c0_74, %c0_75, %c0_76], %67 {strides = array<i32>} : memref<1x1x64x128xf32, #tpu.memory_space<vmem>>, vector<1x1x64x128xf32>,
    return
  }
  func.func @transform_0(%arg0: i32, %arg1: i32) -> (i32, i32, i32, i32, i32) {
    %c0_i32 = arith.constant 0 : i32
    %c0_i32_0 = arith.constant 0 : i32
    %c0_i32_1 = arith.constant 0 : i32
    %c0_i32_2 = arith.constant 0 : i32
    return %arg0, %arg1, %c0_i32, %c0_i32_0, %c0_i32_1 : i32, i32, i32, i32, i32
  }
  func.func @transform_1(%arg0: i32, %arg1: i32) -> (i32, i32, i32) {
    %c0_i32 = arith.constant 0 : i32
    %c0_i32_0 = arith.constant 0 : i32
    %c0_i32_1 = arith.constant 0 : i32
    %c0_i32_2 = arith.constant 0 : i32
    return %c0_i32, %c0_i32_0, %c0_i32_1 : i32, i32, i32
  }
  func.func @transform_2(%arg0: i32, %arg1: i32) -> (i32, i32) {
    %c0_i32 = arith.constant 0 : i32
    %c0_i32_0 = arith.constant 0 : i32
    %c0_i32_1 = arith.constant 0 : i32
    return %c0_i32, %c0_i32_0 : i32, i32
  }
  func.func @transform_3(%arg0: i32, %arg1: i32) -> (i32, i32, i32, i32) {
    %c0_i32 = arith.constant 0 : i32
    %c0_i32_0 = arith.constant 0 : i32
    %c0_i32_1 = arith.constant 0 : i32
    return %arg0, %arg1, %c0_i32, %c0_i32_0 : i32, i32, i32, i32
  }
}

module attributes {stable_mosaic.version = 11 : i64} {
  func.func @_conv3x3_rows_kernel(%arg0: i32, %arg1: i32, %arg2: memref<1x1x6x6x128xbf16, #tpu.memory_space<vmem>>, %arg3: memref<9x128x128xbf16, #tpu.memory_space<vmem>>, %arg4: memref<1x128xf32, #tpu.memory_space<vmem>>, %arg5: memref<1x1x16x128xf32, #tpu.memory_space<vmem>>) attributes {dimension_semantics = [#tpu.dimension_semantics<parallel>, #tpu.dimension_semantics<parallel>], iteration_bounds = array<i64: 2, 1>, scalar_prefetch = 0 : i64, scratch_operands = 0 : i64, tpu.core_type = #tpu.core_type<tc>, window_params = [{transform_indices = @transform_0, window_bounds = array<i64: 1, 1, 6, 6, 128>}, {pipeline_mode = #tpu.pipeline_mode<synchronous>, transform_indices = @transform_1, window_bounds = array<i64: 9, 128, 128>}, {pipeline_mode = #tpu.pipeline_mode<synchronous>, transform_indices = @transform_2, window_bounds = array<i64: 1, 128>}, {transform_indices = @transform_3, window_bounds = array<i64: 1, 1, 16, 128>}]} {
    %c0 = arith.constant 0 : index
    %c0_0 = arith.constant 0 : index
    %c0_1 = arith.constant 0 : index
    %c0_2 = arith.constant 0 : index
    %c0_3 = arith.constant 0 : index
    %0 = vector.load %arg2[%c0, %c0_0, %c0_1, %c0_2, %c0_3] : memref<1x1x6x6x128xbf16, #tpu.memory_space<vmem>>, vector<1x1x4x4x128xbf16>
    %1 = vector.shape_cast %0 : vector<1x1x4x4x128xbf16> to vector<4x4x128xbf16>
    %2 = vector.shape_cast %1 : vector<4x4x128xbf16> to vector<16x128xbf16>
    %c0_4 = arith.constant 0 : index
    %c0_5 = arith.constant 0 : index
    %c0_6 = arith.constant 0 : index
    %3 = vector.load %arg3[%c0_4, %c0_5, %c0_6] : memref<9x128x128xbf16, #tpu.memory_space<vmem>>, vector<1x128x128xbf16>
    %4 = vector.shape_cast %3 : vector<1x128x128xbf16> to vector<128x128xbf16>
    %cst = arith.constant dense<0.000000e+00> : vector<16x128xf32>
    %5 = tpu.matmul %2, %4, %cst {dimension_numbers = #tpu.dot_dimension_numbers<[1], [0], [0], [1], [0, 0, 1, 1], [], []>} : vector<16x128xbf16>, vector<128x128xbf16>, vector<16x128xf32> -> vector<16x128xf32>
    %c0_7 = arith.constant 0 : index
    %c0_8 = arith.constant 0 : index
    %c0_9 = arith.constant 0 : index
    %c1 = arith.constant 1 : index
    %c0_10 = arith.constant 0 : index
    %6 = vector.load %arg2[%c0_7, %c0_8, %c0_9, %c1, %c0_10] : memref<1x1x6x6x128xbf16, #tpu.memory_space<vmem>>, vector<1x1x4x4x128xbf16>
    %7 = vector.shape_cast %6 : vector<1x1x4x4x128xbf16> to vector<4x4x128xbf16>
    %8 = vector.shape_cast %7 : vector<4x4x128xbf16> to vector<16x128xbf16>
    %c1_11 = arith.constant 1 : index
    %c0_12 = arith.constant 0 : index
    %c0_13 = arith.constant 0 : index
    %9 = vector.load %arg3[%c1_11, %c0_12, %c0_13] : memref<9x128x128xbf16, #tpu.memory_space<vmem>>, vector<1x128x128xbf16>
    %10 = vector.shape_cast %9 : vector<1x128x128xbf16> to vector<128x128xbf16>
    %cst_14 = arith.constant dense<0.000000e+00> : vector<16x128xf32>
    %11 = tpu.matmul %8, %10, %cst_14 {dimension_numbers = #tpu.dot_dimension_numbers<[1], [0], [0], [1], [0, 0, 1, 1], [], []>} : vector<16x128xbf16>, vector<128x128xbf16>, vector<16x128xf32> -> vector<16x128xf32>
    %12 = arith.addf %5, %11 : vector<16x128xf32>
    %c0_15 = arith.constant 0 : index
    %c0_16 = arith.constant 0 : index
    %c0_17 = arith.constant 0 : index
    %c2 = arith.constant 2 : index
    %c0_18 = arith.constant 0 : index
    %13 = vector.load %arg2[%c0_15, %c0_16, %c0_17, %c2, %c0_18] : memref<1x1x6x6x128xbf16, #tpu.memory_space<vmem>>, vector<1x1x4x4x128xbf16>
    %14 = vector.shape_cast %13 : vector<1x1x4x4x128xbf16> to vector<4x4x128xbf16>
    %15 = vector.shape_cast %14 : vector<4x4x128xbf16> to vector<16x128xbf16>
    %c2_19 = arith.constant 2 : index
    %c0_20 = arith.constant 0 : index
    %c0_21 = arith.constant 0 : index
    %16 = vector.load %arg3[%c2_19, %c0_20, %c0_21] : memref<9x128x128xbf16, #tpu.memory_space<vmem>>, vector<1x128x128xbf16>
    %17 = vector.shape_cast %16 : vector<1x128x128xbf16> to vector<128x128xbf16>
    %cst_22 = arith.constant dense<0.000000e+00> : vector<16x128xf32>
    %18 = tpu.matmul %15, %17, %cst_22 {dimension_numbers = #tpu.dot_dimension_numbers<[1], [0], [0], [1], [0, 0, 1, 1], [], []>} : vector<16x128xbf16>, vector<128x128xbf16>, vector<16x128xf32> -> vector<16x128xf32>
    %19 = arith.addf %12, %18 : vector<16x128xf32>
    %c0_23 = arith.constant 0 : index
    %c0_24 = arith.constant 0 : index
    %c1_25 = arith.constant 1 : index
    %c0_26 = arith.constant 0 : index
    %c0_27 = arith.constant 0 : index
    %20 = vector.load %arg2[%c0_23, %c0_24, %c1_25, %c0_26, %c0_27] : memref<1x1x6x6x128xbf16, #tpu.memory_space<vmem>>, vector<1x1x4x4x128xbf16>
    %21 = vector.shape_cast %20 : vector<1x1x4x4x128xbf16> to vector<4x4x128xbf16>
    %22 = vector.shape_cast %21 : vector<4x4x128xbf16> to vector<16x128xbf16>
    %c3 = arith.constant 3 : index
    %c0_28 = arith.constant 0 : index
    %c0_29 = arith.constant 0 : index
    %23 = vector.load %arg3[%c3, %c0_28, %c0_29] : memref<9x128x128xbf16, #tpu.memory_space<vmem>>, vector<1x128x128xbf16>
    %24 = vector.shape_cast %23 : vector<1x128x128xbf16> to vector<128x128xbf16>
    %cst_30 = arith.constant dense<0.000000e+00> : vector<16x128xf32>
    %25 = tpu.matmul %22, %24, %cst_30 {dimension_numbers = #tpu.dot_dimension_numbers<[1], [0], [0], [1], [0, 0, 1, 1], [], []>} : vector<16x128xbf16>, vector<128x128xbf16>, vector<16x128xf32> -> vector<16x128xf32>
    %26 = arith.addf %19, %25 : vector<16x128xf32>
    %c0_31 = arith.constant 0 : index
    %c0_32 = arith.constant 0 : index
    %c1_33 = arith.constant 1 : index
    %c1_34 = arith.constant 1 : index
    %c0_35 = arith.constant 0 : index
    %27 = vector.load %arg2[%c0_31, %c0_32, %c1_33, %c1_34, %c0_35] : memref<1x1x6x6x128xbf16, #tpu.memory_space<vmem>>, vector<1x1x4x4x128xbf16>
    %28 = vector.shape_cast %27 : vector<1x1x4x4x128xbf16> to vector<4x4x128xbf16>
    %29 = vector.shape_cast %28 : vector<4x4x128xbf16> to vector<16x128xbf16>
    %c4 = arith.constant 4 : index
    %c0_36 = arith.constant 0 : index
    %c0_37 = arith.constant 0 : index
    %30 = vector.load %arg3[%c4, %c0_36, %c0_37] : memref<9x128x128xbf16, #tpu.memory_space<vmem>>, vector<1x128x128xbf16>
    %31 = vector.shape_cast %30 : vector<1x128x128xbf16> to vector<128x128xbf16>
    %cst_38 = arith.constant dense<0.000000e+00> : vector<16x128xf32>
    %32 = tpu.matmul %29, %31, %cst_38 {dimension_numbers = #tpu.dot_dimension_numbers<[1], [0], [0], [1], [0, 0, 1, 1], [], []>} : vector<16x128xbf16>, vector<128x128xbf16>, vector<16x128xf32> -> vector<16x128xf32>
    %33 = arith.addf %26, %32 : vector<16x128xf32>
    %c0_39 = arith.constant 0 : index
    %c0_40 = arith.constant 0 : index
    %c1_41 = arith.constant 1 : index
    %c2_42 = arith.constant 2 : index
    %c0_43 = arith.constant 0 : index
    %34 = vector.load %arg2[%c0_39, %c0_40, %c1_41, %c2_42, %c0_43] : memref<1x1x6x6x128xbf16, #tpu.memory_space<vmem>>, vector<1x1x4x4x128xbf16>
    %35 = vector.shape_cast %34 : vector<1x1x4x4x128xbf16> to vector<4x4x128xbf16>
    %36 = vector.shape_cast %35 : vector<4x4x128xbf16> to vector<16x128xbf16>
    %c5 = arith.constant 5 : index
    %c0_44 = arith.constant 0 : index
    %c0_45 = arith.constant 0 : index
    %37 = vector.load %arg3[%c5, %c0_44, %c0_45] : memref<9x128x128xbf16, #tpu.memory_space<vmem>>, vector<1x128x128xbf16>
    %38 = vector.shape_cast %37 : vector<1x128x128xbf16> to vector<128x128xbf16>
    %cst_46 = arith.constant dense<0.000000e+00> : vector<16x128xf32>
    %39 = tpu.matmul %36, %38, %cst_46 {dimension_numbers = #tpu.dot_dimension_numbers<[1], [0], [0], [1], [0, 0, 1, 1], [], []>} : vector<16x128xbf16>, vector<128x128xbf16>, vector<16x128xf32> -> vector<16x128xf32>
    %40 = arith.addf %33, %39 : vector<16x128xf32>
    %c0_47 = arith.constant 0 : index
    %c0_48 = arith.constant 0 : index
    %c2_49 = arith.constant 2 : index
    %c0_50 = arith.constant 0 : index
    %c0_51 = arith.constant 0 : index
    %41 = vector.load %arg2[%c0_47, %c0_48, %c2_49, %c0_50, %c0_51] : memref<1x1x6x6x128xbf16, #tpu.memory_space<vmem>>, vector<1x1x4x4x128xbf16>
    %42 = vector.shape_cast %41 : vector<1x1x4x4x128xbf16> to vector<4x4x128xbf16>
    %43 = vector.shape_cast %42 : vector<4x4x128xbf16> to vector<16x128xbf16>
    %c6 = arith.constant 6 : index
    %c0_52 = arith.constant 0 : index
    %c0_53 = arith.constant 0 : index
    %44 = vector.load %arg3[%c6, %c0_52, %c0_53] : memref<9x128x128xbf16, #tpu.memory_space<vmem>>, vector<1x128x128xbf16>
    %45 = vector.shape_cast %44 : vector<1x128x128xbf16> to vector<128x128xbf16>
    %cst_54 = arith.constant dense<0.000000e+00> : vector<16x128xf32>
    %46 = tpu.matmul %43, %45, %cst_54 {dimension_numbers = #tpu.dot_dimension_numbers<[1], [0], [0], [1], [0, 0, 1, 1], [], []>} : vector<16x128xbf16>, vector<128x128xbf16>, vector<16x128xf32> -> vector<16x128xf32>
    %47 = arith.addf %40, %46 : vector<16x128xf32>
    %c0_55 = arith.constant 0 : index
    %c0_56 = arith.constant 0 : index
    %c2_57 = arith.constant 2 : index
    %c1_58 = arith.constant 1 : index
    %c0_59 = arith.constant 0 : index
    %48 = vector.load %arg2[%c0_55, %c0_56, %c2_57, %c1_58, %c0_59] : memref<1x1x6x6x128xbf16, #tpu.memory_space<vmem>>, vector<1x1x4x4x128xbf16>
    %49 = vector.shape_cast %48 : vector<1x1x4x4x128xbf16> to vector<4x4x128xbf16>
    %50 = vector.shape_cast %49 : vector<4x4x128xbf16> to vector<16x128xbf16>
    %c7 = arith.constant 7 : index
    %c0_60 = arith.constant 0 : index
    %c0_61 = arith.constant 0 : index
    %51 = vector.load %arg3[%c7, %c0_60, %c0_61] : memref<9x128x128xbf16, #tpu.memory_space<vmem>>, vector<1x128x128xbf16>
    %52 = vector.shape_cast %51 : vector<1x128x128xbf16> to vector<128x128xbf16>
    %cst_62 = arith.constant dense<0.000000e+00> : vector<16x128xf32>
    %53 = tpu.matmul %50, %52, %cst_62 {dimension_numbers = #tpu.dot_dimension_numbers<[1], [0], [0], [1], [0, 0, 1, 1], [], []>} : vector<16x128xbf16>, vector<128x128xbf16>, vector<16x128xf32> -> vector<16x128xf32>
    %54 = arith.addf %47, %53 : vector<16x128xf32>
    %c0_63 = arith.constant 0 : index
    %c0_64 = arith.constant 0 : index
    %c2_65 = arith.constant 2 : index
    %c2_66 = arith.constant 2 : index
    %c0_67 = arith.constant 0 : index
    %55 = vector.load %arg2[%c0_63, %c0_64, %c2_65, %c2_66, %c0_67] : memref<1x1x6x6x128xbf16, #tpu.memory_space<vmem>>, vector<1x1x4x4x128xbf16>
    %56 = vector.shape_cast %55 : vector<1x1x4x4x128xbf16> to vector<4x4x128xbf16>
    %57 = vector.shape_cast %56 : vector<4x4x128xbf16> to vector<16x128xbf16>
    %c8 = arith.constant 8 : index
    %c0_68 = arith.constant 0 : index
    %c0_69 = arith.constant 0 : index
    %58 = vector.load %arg3[%c8, %c0_68, %c0_69] : memref<9x128x128xbf16, #tpu.memory_space<vmem>>, vector<1x128x128xbf16>
    %59 = vector.shape_cast %58 : vector<1x128x128xbf16> to vector<128x128xbf16>
    %cst_70 = arith.constant dense<0.000000e+00> : vector<16x128xf32>
    %60 = tpu.matmul %57, %59, %cst_70 {dimension_numbers = #tpu.dot_dimension_numbers<[1], [0], [0], [1], [0, 0, 1, 1], [], []>} : vector<16x128xbf16>, vector<128x128xbf16>, vector<16x128xf32> -> vector<16x128xf32>
    %61 = arith.addf %54, %60 : vector<16x128xf32>
    %c0_71 = arith.constant 0 : index
    %c0_72 = arith.constant 0 : index
    %62 = vector.load %arg4[%c0_71, %c0_72] : memref<1x128xf32, #tpu.memory_space<vmem>>, vector<1x128xf32>
    %63 = vector.broadcast %62 : vector<1x128xf32> to vector<16x128xf32>
    %64 = arith.addf %61, %63 : vector<16x128xf32>
    %c0_73 = arith.constant 0 : index
    %c0_74 = arith.constant 0 : index
    %c0_75 = arith.constant 0 : index
    %c0_76 = arith.constant 0 : index
    %65 = vector.load %arg5[%c0_73, %c0_74, %c0_75, %c0_76] : memref<1x1x16x128xf32, #tpu.memory_space<vmem>>, vector<1x1x16x128xf32>
    %66 = vector.shape_cast %65 : vector<1x1x16x128xf32> to vector<16x128xf32>
    %67 = vector.shape_cast %64 : vector<16x128xf32> to vector<1x1x16x128xf32>
    tpu.vector_store %arg5[%c0_73, %c0_74, %c0_75, %c0_76], %67 {strides = array<i32>} : memref<1x1x16x128xf32, #tpu.memory_space<vmem>>, vector<1x1x16x128xf32>,
    return
  }
  func.func @transform_0(%arg0: i32, %arg1: i32) -> (i32, i32, i32, i32, i32) {
    %c0_i32 = arith.constant 0 : i32
    %c0_i32_0 = arith.constant 0 : i32
    %c0_i32_1 = arith.constant 0 : i32
    %c0_i32_2 = arith.constant 0 : i32
    return %arg0, %arg1, %c0_i32, %c0_i32_0, %c0_i32_1 : i32, i32, i32, i32, i32
  }
  func.func @transform_1(%arg0: i32, %arg1: i32) -> (i32, i32, i32) {
    %c0_i32 = arith.constant 0 : i32
    %c0_i32_0 = arith.constant 0 : i32
    %c0_i32_1 = arith.constant 0 : i32
    %c0_i32_2 = arith.constant 0 : i32
    return %c0_i32, %c0_i32_0, %c0_i32_1 : i32, i32, i32
  }
  func.func @transform_2(%arg0: i32, %arg1: i32) -> (i32, i32) {
    %c0_i32 = arith.constant 0 : i32
    %c0_i32_0 = arith.constant 0 : i32
    %c0_i32_1 = arith.constant 0 : i32
    return %c0_i32, %c0_i32_0 : i32, i32
  }
  func.func @transform_3(%arg0: i32, %arg1: i32) -> (i32, i32, i32, i32) {
    %c0_i32 = arith.constant 0 : i32
    %c0_i32_0 = arith.constant 0 : i32
    %c0_i32_1 = arith.constant 0 : i32
    return %arg0, %arg1, %c0_i32, %c0_i32_0 : i32, i32, i32, i32
  }
}

module attributes {stable_mosaic.version = 11 : i64} {
  func.func @_matmul_kernel(%arg0: i32, %arg1: i32, %arg2: memref<8x576xbf16, #tpu.memory_space<vmem>>, %arg3: memref<576x128xbf16, #tpu.memory_space<vmem>>, %arg4: memref<1x128xf32, #tpu.memory_space<vmem>>, %arg5: memref<8x128xf32, #tpu.memory_space<vmem>>, %arg6: memref<8x128xf32, #tpu.memory_space<vmem>>) attributes {dimension_semantics = [#tpu.dimension_semantics<parallel>, #tpu.dimension_semantics<arbitrary>], iteration_bounds = array<i64: 1, 1>, scalar_prefetch = 0 : i64, scratch_operands = 1 : i64, tpu.core_type = #tpu.core_type<tc>, window_params = [{transform_indices = @transform_0, window_bounds = array<i64: 8, 576>}, {transform_indices = @transform_1, window_bounds = array<i64: 576, 128>}, {pipeline_mode = #tpu.pipeline_mode<synchronous>, transform_indices = @transform_2, window_bounds = array<i64: 1, 128>}, {transform_indices = @transform_3, window_bounds = array<i64: 8, 128>}]} {
    %c0_i32 = arith.constant 0 : i32
    %0 = arith.cmpi eq, %arg1, %c0_i32 : i32
    %1 = arith.extui %0 : i1 to i32
    %c0_i32_0 = arith.constant 0 : i32
    %2 = arith.cmpi ne, %1, %c0_i32_0 : i32
    scf.if %2 {
      %cst_10 = arith.constant 0.000000e+00 : f32
      %12 = vector.broadcast %cst_10 : f32 to vector<8x128xf32>
      %c0_11 = arith.constant 0 : index
      %c0_12 = arith.constant 0 : index
      %13 = vector.load %arg6[%c0_11, %c0_12] : memref<8x128xf32, #tpu.memory_space<vmem>>, vector<8x128xf32>
      tpu.vector_store %arg6[%c0_11, %c0_12], %12 {strides = array<i32>} : memref<8x128xf32, #tpu.memory_space<vmem>>, vector<8x128xf32>,
    } else {
    }
    %c0 = arith.constant 0 : index
    %c0_1 = arith.constant 0 : index
    %3 = vector.load %arg2[%c0, %c0_1] : memref<8x576xbf16, #tpu.memory_space<vmem>>, vector<8x576xbf16>
    %c0_2 = arith.constant 0 : index
    %c0_3 = arith.constant 0 : index
    %4 = vector.load %arg6[%c0_2, %c0_3] : memref<8x128xf32, #tpu.memory_space<vmem>>, vector<8x128xf32>
    %c0_4 = arith.constant 0 : index
    %c0_5 = arith.constant 0 : index
    %5 = vector.load %arg3[%c0_4, %c0_5] : memref<576x128xbf16, #tpu.memory_space<vmem>>, vector<576x128xbf16>
    %cst = arith.constant dense<0.000000e+00> : vector<8x128xf32>
    %6 = tpu.matmul %3, %5, %cst {dimension_numbers = #tpu.dot_dimension_numbers<[1], [0], [0], [1], [0, 0, 1, 1], [], []>} : vector<8x576xbf16>, vector<576x128xbf16>, vector<8x128xf32> -> vector<8x128xf32>
    %7 = arith.addf %4, %6 : vector<8x128xf32>
    %c0_6 = arith.constant 0 : index
    %c0_7 = arith.constant 0 : index
    %8 = vector.load %arg6[%c0_6, %c0_7] : memref<8x128xf32, #tpu.memory_space<vmem>>, vector<8x128xf32>
    tpu.vector_store %arg6[%c0_6, %c0_7], %7 {strides = array<i32>} : memref<8x128xf32, #tpu.memory_space<vmem>>, vector<8x128xf32>,
    %c0_i32_8 = arith.constant 0 : i32
    %9 = arith.cmpi eq, %arg1, %c0_i32_8 : i32
    %10 = arith.extui %9 : i1 to i32
    %c0_i32_9 = arith.constant 0 : i32
    %11 = arith.cmpi ne, %10, %c0_i32_9 : i32
    scf.if %11 {
      %c0_10 = arith.constant 0 : index
      %c0_11 = arith.constant 0 : index
      %12 = vector.load %arg6[%c0_10, %c0_11] : memref<8x128xf32, #tpu.memory_space<vmem>>, vector<8x128xf32>
      %c0_12 = arith.constant 0 : index
      %c0_13 = arith.constant 0 : index
      %13 = vector.load %arg4[%c0_12, %c0_13] : memref<1x128xf32, #tpu.memory_space<vmem>>, vector<1x128xf32>
      %14 = vector.broadcast %13 : vector<1x128xf32> to vector<8x128xf32>
      %15 = arith.addf %12, %14 : vector<8x128xf32>
      %c0_14 = arith.constant 0 : index
      %c0_15 = arith.constant 0 : index
      %16 = vector.load %arg5[%c0_14, %c0_15] : memref<8x128xf32, #tpu.memory_space<vmem>>, vector<8x128xf32>
      tpu.vector_store %arg5[%c0_14, %c0_15], %15 {strides = array<i32>} : memref<8x128xf32, #tpu.memory_space<vmem>>, vector<8x128xf32>,
    } else {
    }
    return
  }
  func.func @transform_0(%arg0: i32, %arg1: i32) -> (i32, i32) {
    %c0_i32 = arith.constant 0 : i32
    return %arg0, %arg1 : i32, i32
  }
  func.func @transform_1(%arg0: i32, %arg1: i32) -> (i32, i32) {
    %c0_i32 = arith.constant 0 : i32
    %c0_i32_0 = arith.constant 0 : i32
    return %arg1, %c0_i32 : i32, i32
  }
  func.func @transform_2(%arg0: i32, %arg1: i32) -> (i32, i32) {
    %c0_i32 = arith.constant 0 : i32
    %c0_i32_0 = arith.constant 0 : i32
    %c0_i32_1 = arith.constant 0 : i32
    return %c0_i32, %c0_i32_0 : i32, i32
  }
  func.func @transform_3(%arg0: i32, %arg1: i32) -> (i32, i32) {
    %c0_i32 = arith.constant 0 : i32
    %c0_i32_0 = arith.constant 0 : i32
    return %arg0, %c0_i32 : i32, i32
  }
}

module attributes {stable_mosaic.version = 11 : i64} {
  func.func @_matmul_kernel(%arg0: i32, %arg1: i32, %arg2: memref<2x1152xbf16, #tpu.memory_space<vmem>>, %arg3: memref<1152x128xbf16, #tpu.memory_space<vmem>>, %arg4: memref<1x128xf32, #tpu.memory_space<vmem>>, %arg5: memref<2x128xf32, #tpu.memory_space<vmem>>, %arg6: memref<2x128xf32, #tpu.memory_space<vmem>>) attributes {dimension_semantics = [#tpu.dimension_semantics<parallel>, #tpu.dimension_semantics<arbitrary>], iteration_bounds = array<i64: 1, 1>, scalar_prefetch = 0 : i64, scratch_operands = 1 : i64, tpu.core_type = #tpu.core_type<tc>, window_params = [{transform_indices = @transform_0, window_bounds = array<i64: 2, 1152>}, {transform_indices = @transform_1, window_bounds = array<i64: 1152, 128>}, {pipeline_mode = #tpu.pipeline_mode<synchronous>, transform_indices = @transform_2, window_bounds = array<i64: 1, 128>}, {transform_indices = @transform_3, window_bounds = array<i64: 2, 128>}]} {
    %c0_i32 = arith.constant 0 : i32
    %0 = arith.cmpi eq, %arg1, %c0_i32 : i32
    %1 = arith.extui %0 : i1 to i32
    %c0_i32_0 = arith.constant 0 : i32
    %2 = arith.cmpi ne, %1, %c0_i32_0 : i32
    scf.if %2 {
      %cst_11 = arith.constant 0.000000e+00 : f32
      %14 = vector.broadcast %cst_11 : f32 to vector<2x128xf32>
      %c0_12 = arith.constant 0 : index
      %c0_13 = arith.constant 0 : index
      %15 = vector.load %arg6[%c0_12, %c0_13] : memref<2x128xf32, #tpu.memory_space<vmem>>, vector<2x128xf32>
      tpu.vector_store %arg6[%c0_12, %c0_13], %14 {strides = array<i32>} : memref<2x128xf32, #tpu.memory_space<vmem>>, vector<2x128xf32>,
    } else {
    }
    %c0 = arith.constant 0 : index
    %c0_1 = arith.constant 0 : index
    %3 = vector.load %arg2[%c0, %c0_1] : memref<2x1152xbf16, #tpu.memory_space<vmem>>, vector<2x1152xbf16>
    %cst = arith.constant 0.000000e+00 : bf16
    %4 = vector.broadcast %cst : bf16 to vector<2x1152xbf16>
    %5 = arith.maximumf %3, %4 : vector<2x1152xbf16>
    %c0_2 = arith.constant 0 : index
    %c0_3 = arith.constant 0 : index
    %6 = vector.load %arg6[%c0_2, %c0_3] : memref<2x128xf32, #tpu.memory_space<vmem>>, vector<2x128xf32>
    %c0_4 = arith.constant 0 : index
    %c0_5 = arith.constant 0 : index
    %7 = vector.load %arg3[%c0_4, %c0_5] : memref<1152x128xbf16, #tpu.memory_space<vmem>>, vector<1152x128xbf16>
    %cst_6 = arith.constant dense<0.000000e+00> : vector<2x128xf32>
    %8 = tpu.matmul %5, %7, %cst_6 {dimension_numbers = #tpu.dot_dimension_numbers<[1], [0], [0], [1], [0, 0, 1, 1], [], []>} : vector<2x1152xbf16>, vector<1152x128xbf16>, vector<2x128xf32> -> vector<2x128xf32>
    %9 = arith.addf %6, %8 : vector<2x128xf32>
    %c0_7 = arith.constant 0 : index
    %c0_8 = arith.constant 0 : index
    %10 = vector.load %arg6[%c0_7, %c0_8] : memref<2x128xf32, #tpu.memory_space<vmem>>, vector<2x128xf32>
    tpu.vector_store %arg6[%c0_7, %c0_8], %9 {strides = array<i32>} : memref<2x128xf32, #tpu.memory_space<vmem>>, vector<2x128xf32>,
    %c0_i32_9 = arith.constant 0 : i32
    %11 = arith.cmpi eq, %arg1, %c0_i32_9 : i32
    %12 = arith.extui %11 : i1 to i32
    %c0_i32_10 = arith.constant 0 : i32
    %13 = arith.cmpi ne, %12, %c0_i32_10 : i32
    scf.if %13 {
      %c0_11 = arith.constant 0 : index
      %c0_12 = arith.constant 0 : index
      %14 = vector.load %arg6[%c0_11, %c0_12] : memref<2x128xf32, #tpu.memory_space<vmem>>, vector<2x128xf32>
      %c0_13 = arith.constant 0 : index
      %c0_14 = arith.constant 0 : index
      %15 = vector.load %arg4[%c0_13, %c0_14] : memref<1x128xf32, #tpu.memory_space<vmem>>, vector<1x128xf32>
      %16 = vector.broadcast %15 : vector<1x128xf32> to vector<2x128xf32>
      %17 = arith.addf %14, %16 : vector<2x128xf32>
      %c0_15 = arith.constant 0 : index
      %c0_16 = arith.constant 0 : index
      %18 = vector.load %arg5[%c0_15, %c0_16] : memref<2x128xf32, #tpu.memory_space<vmem>>, vector<2x128xf32>
      tpu.vector_store %arg5[%c0_15, %c0_16], %17 {strides = array<i32>} : memref<2x128xf32, #tpu.memory_space<vmem>>, vector<2x128xf32>,
    } else {
    }
    return
  }
  func.func @transform_0(%arg0: i32, %arg1: i32) -> (i32, i32) {
    %c0_i32 = arith.constant 0 : i32
    return %arg0, %arg1 : i32, i32
  }
  func.func @transform_1(%arg0: i32, %arg1: i32) -> (i32, i32) {
    %c0_i32 = arith.constant 0 : i32
    %c0_i32_0 = arith.constant 0 : i32
    return %arg1, %c0_i32 : i32, i32
  }
  func.func @transform_2(%arg0: i32, %arg1: i32) -> (i32, i32) {
    %c0_i32 = arith.constant 0 : i32
    %c0_i32_0 = arith.constant 0 : i32
    %c0_i32_1 = arith.constant 0 : i32
    return %c0_i32, %c0_i32_0 : i32, i32
  }
  func.func @transform_3(%arg0: i32, %arg1: i32) -> (i32, i32) {
    %c0_i32 = arith.constant 0 : i32
    %c0_i32_0 = arith.constant 0 : i32
    return %arg0, %c0_i32 : i32, i32
  }
}

</mosaic_0001>

<bundles_post_ra>
// kernel: pyramid_features.8
= control target key start
LH: loop header
LB: loop body
LE: loop exit
PB: predicated region body
PF: predicated region fallthrough
CT: control target
= control target key end

     0   :  { %s483_s12 = smov 0   ;;  %s485_s13 = smov 0   ;;  %s531_s0 = inlined_call_operand.vmem [shape: f32[32,64], index: 0, kind: input, shape index: {}]   ;;  %s532_s1 = inlined_call_operand.vmem [shape: bf16[64,128], index: 1, kind: input, shape index: {}]   ;;  %s533_s2 = inlined_call_operand.vmem [shape: f32[1,128], index: 2, kind: input, shape index: {}]   ;;  %s534_s3 = inlined_call_operand.vmem [shape: f32[32,128], index: 3, kind: output, shape index: {}]  }
   0x1   :  { %s487_s14 = smov 0  }
   0x2 LB: > { %s25_s15 = sadd.s32 1, %s457_s13  ;;  %p386_p0 = scmp.ge.s32.totalorder %s461_s14, 1  ;;  %s461_s14 = sphi %s487_s14, %s13_s14   ;;  %s457_s13 = sphi %s485_s13, %s536_s13   ;;  %s453_s12 = sphi %s483_s12, %s535_s12  }
   0x3   : > { %p27_p1 = scmp.ge.s32.totalorder %s25_s15, 2  ;;  %p166_p2 = scmp.lt.s32.totalorder %s461_s14, 3 }
   0x5   : > { %s538_s15 = smov (%p27_p1, %s25_s15), 0  ;;  %p167_p3 = pnand %p386_p0, %p166_p2 }
   0x6   : > { %s387_s18 = sshll.u32 (!%p167_p3), %s453_s12, 1 }
   0x7   : > { %170 = sbr.rel (%p167_p3) target bundleno = 165 (0xa5), region = 32  ;;  %p199_p4 = scmp.lt.s32.totalorder (!%p167_p3), %s387_s18, 3 }
   0xc   : > { %v413_v0 = vld [vmem:[%s532_s1 + $0x18] sm:$0xff]  ;;  %v412_v1 = vld [vmem:[%s532_s1 + $0x10] sm:$0xff]  ;;  %s540_s18 = smov (!%p199_p4, %s387_s18), 3  ;;  %v411_v2 = vld [vmem:[%s532_s1 + $0x8] sm:$0xff]  ;;  %vm263_vm0 = vcmask 523264  }
   0xd   : > { %271 = vmatpush.bf16.msra.mxu0 %v413_v0  ;;  %s388_s21 = sshll.u32 %s540_s18, 3  ;;  %v410_v3 = vld [vmem:[%s532_s1] sm:$0xff] }
   0xe   : > { %s205_s26 = scalar_lea.vmem %s531_s0, %s388_s21  ;;  %v438_v7 = vld [vmem:[%s533_s2] ss:$0 sm:$0xff]  ;;  %s217_s6 = scalar_lea.vmem %s534_s3, %s388_s21 }
   0xf   : > { %v226_v4 = vld [vmem:[%s205_s26] sm:$0xff]  ;;  %v227_v5 = vld [vmem:[%s205_s26 + $0x8] sm:$0xff] }
  0x10   : > { %v230_v6 = vpack.c.bf16 %v227_v5, %v226_v4 }
  0x11   : > { %272 = vmatpush.bf16.msra.mxu0 %v412_v1 }
  0x15   : > { %273 = vmatpush.bf16.msra.mxu0 %v411_v2 }
  0x19   : > { %274 = vmatpush.bf16.msra.mxu0 %v410_v3 }
  0x1c   : > { %407 = vmatmul.msk.bf16.vlgmr.msra.gmra.mxu0 %vm263_vm0, %v230_v6 }
  0x99   : > { %v276_v8 = vpop.f32.mrf.mxu0 }
  0x9a   : > { %v294_v9 = vadd.f32 %v438_v7, %v276_v8 }
  0x9c   : > { %296 = vst [vmem:[%s217_s6] sm:$0xff] %v294_v9 }
  0xa1   : > { %v278_v10 = vpop.f32.mrf.mxu0 }
  0xa2   : > { %v295_v11 = vadd.f32 %v438_v7, %v278_v10 }
  0xa4   : > { %297 = vst [vmem:[%s217_s6 + $0x8] sm:$0xff] %v295_v11 }
  0xa5 PF: > { %s13_s14 = sadd.s32 1, %s461_s14   ;;  %s535_s12 = smov %s457_s13 }
  0xa6   : > { %p10_p5 = scmp.ge.s32.totalorder %s13_s14, 4   ;;  %s536_s13 = smov %s538_s15 }
  0xa8   :  { %12 = sbr.rel (!%p10_p5) target bundleno = 2 (0x2), region = 73 }

// kernel: pyramid_features.10
= control target key start
LH: loop header
LB: loop body
LE: loop exit
PB: predicated region body
PF: predicated region fallthrough
CT: control target
= control target key end

     0   :  { %s683_s15 = smov 0   ;;  %s685_s16 = smov 0   ;;  %s752_s0 = inlined_call_operand.vmem [shape: f32[2,8,8,64], index: 0, kind: input, shape index: {}]   ;;  %s753_s1 = inlined_call_operand.vmem [shape: bf16[64,128], index: 1, kind: input, shape index: {}]   ;;  %s754_s2 = inlined_call_operand.vmem [shape: f32[1,128], index: 2, kind: input, shape index: {}]   ;;  %s755_s3 = inlined_call_operand.vmem [shape: f32[2,4,4,128], index: 3, kind: input, shape index: {}]   ;;  %s756_s4 = inlined_call_operand.vmem [shape: f32[128,128], index: 4, kind: output, shape index: {}]  }
   0x1   :  { %s687_s17 = smov 0  }
   0x2 LB: > { %s26_s18 = sadd.s32 1, %s652_s16  ;;  %p562_p0 = scmp.ge.s32.totalorder %s656_s17, 1  ;;  %s656_s17 = sphi %s687_s17, %s14_s17   ;;  %s652_s16 = sphi %s685_s16, %s758_s16   ;;  %s648_s15 = sphi %s683_s15, %s757_s15  }
   0x3   : > { %p28_p1 = scmp.ge.s32.totalorder %s26_s18, 2  ;;  %p200_p2 = scmp.lt.s32.totalorder %s656_s17, 3 }
   0x5   : > { %s760_s18 = smov (%p28_p1, %s26_s18), 0  ;;  %p201_p3 = pnand %p562_p0, %p200_p2 }
   0x6   : > { %p241_p4 = scmp.lt.s32.totalorder (!%p201_p3), %s648_s15, 1  ;;  %s567_s10 = sshll.u32 (!%p201_p3), %s648_s15, 3 }
   0x7   : > { %204 = sbr.rel (%p201_p3) target bundleno = 175 (0xaf), region = 36  ;;  %p262_p5 = scmp.lt.s32.totalorder (!%p201_p3), %s567_s10, 15 }
   0xc   : > { %v596_v0 = vld [vmem:[%s753_s1 + $0x18] sm:$0xff]  ;;  %v595_v1 = vld [vmem:[%s753_s1 + $0x10] sm:$0xff]  ;;  %s242_s23 = scalar_select %p241_p4, %s648_s15, 1  ;;  %v594_v2 = vld [vmem:[%s753_s1 + $0x8] sm:$0xff]  ;;  %vm404_vm0 = vcmask 523264  }
   0xd   : > { %421 = vmatpush.bf16.msra.mxu0 %v596_v0  ;;  %597 = vmatpush.bf16.msra.mxu1 %v596_v0  ;;  %v593_v7 = vld [vmem:[%s753_s1] sm:$0xff]  ;;  %s762_s10 = smov (!%p262_p5, %s567_s10), 15 }
   0xe   : > { %598 = vmatpush.bf16.msra.mxu2 %v596_v0  ;;  %599 = vmatpush.bf16.msra.mxu3 %v596_v0  ;;  %s591_s24 = sshll.u32 %s242_s23, 6  ;;  %s592_s25 = sshll.u32 %s242_s23, 4  ;;  %v633_v54 = vld [vmem:[%s754_s2] ss:$0 sm:$0xff] }
   0xf   : > { %s714_s28 = scalar_lea.vmem %s755_s3, %s592_s25  ;;  %s248_s7 = scalar_lea.vmem %s752_s0, %s591_s24 }
  0x10   : > { %v289_v3 = vld [vmem:[%s714_s28] sm:$0xf]  ;;  %v270_v9 = vld [vmem:[%s248_s7 + $0x8] sm:$0xff]  ;;  %v271_v14 = vld [vmem:[%s248_s7 + $0x10] sm:$0xff]  ;;  %s568_s11 = sshll.u32 %s762_s10, 3 }
  0x11   : > { %422 = vmatpush.bf16.msra.mxu0 %v595_v1  ;;  %600 = vmatpush.bf16.msra.mxu1 %v595_v1  ;;  %v297_v4 = vrot.slane %v289_v3, 1  ;;  %v298_v5 = vrot.slane %v289_v3, 2  ;;  %v299_v6 = vrot.slane %v289_v3, 3  ;;  %v269_v8 = vld [vmem:[%s248_s7] sm:$0xff]  ;;  %v309_v10 = vperm.slane %v289_v3, 0  ;;  %v272_v15 = vld [vmem:[%s248_s7 + $0x18] sm:$0xff]  ;;  %s265_s20 = scalar_lea.vmem %s756_s4, %s568_s11 }
  0x12   : > { %601 = vmatpush.bf16.msra.mxu2 %v595_v1  ;;  %602 = vmatpush.bf16.msra.mxu3 %v595_v1  ;;  %v273_v16 = vld [vmem:[%s248_s7 + $0x20] sm:$0xff]  ;;  %v274_v17 = vld [vmem:[%s248_s7 + $0x28] sm:$0xff]  ;;  %v275_v18 = vld [vmem:[%s248_s7 + $0x30] sm:$0xff]  ;;  %v277_v21 = vpack.c.bf16 %v270_v9, %v269_v8  ;;  %v278_v22 = vpack.c.bf16 %v272_v15, %v271_v14 }
  0x13   : > { %v310_v11 = vperm.slane %v297_v4, 0  ;;  %v311_v12 = vperm.slane %v298_v5, 0  ;;  %v312_v13 = vperm.slane %v299_v6, 0  ;;  %349 = vst [vmem:[#allocation1] ss:$4 sm:$0xff] %v309_v10  ;;  %v276_v19 = vld [vmem:[%s248_s7 + $0x38] sm:$0xff]  ;;  %v279_v23 = vpack.c.bf16 %v274_v17, %v273_v16 }
  0x14   : > { %v290_v20 = vld [vmem:[%s714_s28 + $0x4] sm:$0xf]  ;;  %v280_v24 = vpack.c.bf16 %v276_v19, %v275_v18  ;;  %357 = vst [vmem:[#allocation1 + $0x20] ss:$4 sm:$0xff] %v309_v10  ;;  %v291_v34 = vld [vmem:[%s714_s28 + $0x8] sm:$0xf] }
  0x15   : > { %423 = vmatpush.bf16.msra.mxu0 %v594_v2  ;;  %603 = vmatpush.bf16.msra.mxu1 %v594_v2  ;;  %351 = vst [vmem:[#allocation1 + $0x1] ss:$4 sm:$0xff] %v310_v11  ;;  %v300_v25 = vrot.slane %v290_v20, 1  ;;  %v301_v26 = vrot.slane %v290_v20, 2  ;;  %v302_v27 = vrot.slane %v290_v20, 3  ;;  %v313_v28 = vperm.slane %v290_v20, 0 }
  0x16   : > { %604 = vmatpush.bf16.msra.mxu2 %v594_v2  ;;  %605 = vmatpush.bf16.msra.mxu3 %v594_v2  ;;  %353 = vst [vmem:[#allocation1 + $0x2] ss:$4 sm:$0xff] %v311_v12  ;;  %v303_v35 = vrot.slane %v291_v34, 1  ;;  %v304_v36 = vrot.slane %v291_v34, 2  ;;  %v305_v37 = vrot.slane %v291_v34, 3  ;;  %v317_v38 = vperm.slane %v291_v34, 0 }
  0x17   : > { %355 = vst [vmem:[#allocation1 + $0x3] ss:$4 sm:$0xff] %v312_v13  ;;  %v314_v29 = vperm.slane %v300_v25, 0  ;;  %v315_v30 = vperm.slane %v301_v26, 0  ;;  %v316_v31 = vperm.slane %v302_v27, 0 }
  0x18   : > { %359 = vst [vmem:[#allocation1 + $0x21] ss:$4 sm:$0xff] %v310_v11  ;;  %v318_v39 = vperm.slane %v303_v35, 0  ;;  %v319_v40 = vperm.slane %v304_v36, 0  ;;  %v320_v42 = vperm.slane %v305_v37, 0 }
  0x19   : > { %424 = vmatpush.bf16.msra.mxu0 %v593_v7  ;;  %606 = vmatpush.bf16.msra.mxu1 %v593_v7  ;;  %361 = vst [vmem:[#allocation1 + $0x22] ss:$4 sm:$0xff] %v311_v12  ;;  %v292_v43 = vld [vmem:[%s714_s28 + $0xc] sm:$0xf] }
  0x1a   : > { %607 = vmatpush.bf16.msra.mxu2 %v593_v7  ;;  %608 = vmatpush.bf16.msra.mxu3 %v593_v7  ;;  %363 = vst [vmem:[#allocation1 + $0x23] ss:$4 sm:$0xff] %v312_v13  ;;  %v306_v44 = vrot.slane %v292_v43, 1  ;;  %v307_v45 = vrot.slane %v292_v43, 2  ;;  %v308_v46 = vrot.slane %v292_v43, 3  ;;  %v321_v47 = vperm.slane %v292_v43, 0 }
  0x1c   : > { %585 = vmatmul.msk.bf16.vlgmr.msra.gmra.mxu0 %vm404_vm0, %v277_v21  ;;  %586 = vmatmul.msk.bf16.vlgmr.msra.gmra.mxu1 %vm404_vm0, %v278_v22  ;;  %v322_v48 = vperm.slane %v306_v44, 0  ;;  %v323_v50 = vperm.slane %v307_v45, 0  ;;  %v324_v51 = vperm.slane %v308_v46, 0 }
  0x1d   : > { %587 = vmatmul.msk.bf16.vlgmr.msra.gmra.mxu2 %vm404_vm0, %v279_v23  ;;  %588 = vmatmul.msk.bf16.vlgmr.msra.gmra.mxu3 %vm404_vm0, %v280_v24 }
  0x1e   : > { %v364_v32 = vld.sshfl [vmem:[#allocation1] sm:$0xff pattern:$0x73625140] }
  0x1f   : > { %366 = vst [vmem:[#allocation1] ss:$4 sm:$0xff] %v313_v28 }
  0x20   : > { %367 = vst [vmem:[#allocation1 + $0x1] ss:$4 sm:$0xff] %v314_v29 }
  0x21   : > { %368 = vst [vmem:[#allocation1 + $0x2] ss:$4 sm:$0xff] %v315_v30  ;;  %v731_v33 = vld.sshfl [vmem:[#allocation1 + $0x20] sm:$0xff pattern:$0x73625140] }
  0x22   : > { %369 = vst [vmem:[#allocation1 + $0x3] ss:$4 sm:$0xff] %v316_v31 }
  0x23   : > { %370 = vst [vmem:[#allocation1 + $0x20] ss:$4 sm:$0xff] %v313_v28 }
  0x24   : > { %371 = vst [vmem:[#allocation1 + $0x21] ss:$4 sm:$0xff] %v314_v29 }
  0x25   : > { %372 = vst [vmem:[#allocation1 + $0x22] ss:$4 sm:$0xff] %v315_v30 }
  0x26   : > { %373 = vst [vmem:[#allocation1 + $0x23] ss:$4 sm:$0xff] %v316_v31 }
  0x29   : > { %v374_v41 = vld.sshfl [vmem:[#allocation1] sm:$0xff pattern:$0x73625140] }
  0x2a   : > { %376 = vst [vmem:[#allocation1] ss:$4 sm:$0xff] %v317_v38 }
  0x2b   : > { %377 = vst [vmem:[#allocation1 + $0x1] ss:$4 sm:$0xff] %v318_v39 }
  0x2c   : > { %378 = vst [vmem:[#allocation1 + $0x2] ss:$4 sm:$0xff] %v319_v40 }
  0x2d   : > { %379 = vst [vmem:[#allocation1 + $0x3] ss:$4 sm:$0xff] %v320_v42  ;;  %v375_v49 = vld.sshfl [vmem:[#allocation1 + $0x20] sm:$0xff pattern:$0x73625140] }
  0x2e   : > { %380 = vst [vmem:[#allocation1 + $0x20] ss:$4 sm:$0xff] %v317_v38 }
  0x2f   : > { %381 = vst [vmem:[#allocation1 + $0x21] ss:$4 sm:$0xff] %v318_v39 }
  0x30   : > { %382 = vst [vmem:[#allocation1 + $0x22] ss:$4 sm:$0xff] %v319_v40 }
  0x31   : > { %383 = vst [vmem:[#allocation1 + $0x23] ss:$4 sm:$0xff] %v320_v42 }
  0x34   : > { %v384_v52 = vld.sshfl [vmem:[#allocation1] sm:$0xff pattern:$0x73625140] }
  0x35   : > { %386 = vst [vmem:[#allocation1] ss:$4 sm:$0xff] %v321_v47 }
  0x36   : > { %387 = vst [vmem:[#allocation1 + $0x1] ss:$4 sm:$0xff] %v322_v48 }
  0x37   : > { %388 = vst [vmem:[#allocation1 + $0x2] ss:$4 sm:$0xff] %v323_v50 }
  0x38   : > { %389 = vst [vmem:[#allocation1 + $0x3] ss:$4 sm:$0xff] %v324_v51  ;;  %v385_v53 = vld.sshfl [vmem:[#allocation1 + $0x20] sm:$0xff pattern:$0x73625140] }
  0x39   : > { %390 = vst [vmem:[#allocation1 + $0x20] ss:$4 sm:$0xff] %v321_v47 }
  0x3a   : > { %391 = vst [vmem:[#allocation1 + $0x21] ss:$4 sm:$0xff] %v322_v48 }
  0x3b   : > { %392 = vst [vmem:[#allocation1 + $0x22] ss:$4 sm:$0xff] %v323_v50 }
  0x3c   : > { %393 = vst [vmem:[#allocation1 + $0x23] ss:$4 sm:$0xff] %v324_v51 }
  0x3f   : > { %v394_v61 = vld.sshfl [vmem:[#allocation1] sm:$0xff pattern:$0x73625140] }
  0x43   : > { %v395_v10 = vld.sshfl [vmem:[#allocation1 + $0x20] sm:$0xff pattern:$0x73625140] }
  0x99   : > { %v426_v55 = vpop.f32.mrf.mxu0  ;;  %v431_v56 = vpop.f32.mrf.mxu1 }
  0x9a   : > { %v427_v57 = vadd.f32 %v426_v55, %v364_v32  ;;  %v432_v58 = vadd.f32 %v431_v56, %v374_v41 }
  0x9c   : > { %v450_v59 = vadd.f32 %v633_v54, %v427_v57  ;;  %v452_v60 = vadd.f32 %v633_v54, %v432_v58 }
  0x9e   : > { %458 = vst [vmem:[%s265_s20] sm:$0xff] %v450_v59 }
  0x9f   : > { %460 = vst [vmem:[%s265_s20 + $0x10] sm:$0xff] %v452_v60 }
  0xa0   : > { %v436_v62 = vpop.f32.mrf.mxu2  ;;  %v441_v63 = vpop.f32.mrf.mxu3 }
  0xa1   : > { %v437_v0 = vadd.f32 %v436_v62, %v384_v52  ;;  %v442_v1 = vadd.f32 %v441_v63, %v394_v61  ;;  %v428_v2 = vpop.f32.mrf.mxu0  ;;  %v433_v3 = vpop.f32.mrf.mxu1 }
  0xa2   : > { %v429_v4 = vadd.f32 %v428_v2, %v731_v33  ;;  %v434_v5 = vadd.f32 %v433_v3, %v375_v49 }
  0xa3   : > { %v454_v6 = vadd.f32 %v633_v54, %v437_v0  ;;  %v456_v7 = vadd.f32 %v633_v54, %v442_v1 }
  0xa4   : > { %v451_v8 = vadd.f32 %v633_v54, %v429_v4  ;;  %v453_v9 = vadd.f32 %v633_v54, %v434_v5 }
  0xa5   : > { %462 = vst [vmem:[%s265_s20 + $0x20] sm:$0xff] %v454_v6 }
  0xa6   : > { %464 = vst [vmem:[%s265_s20 + $0x30] sm:$0xff] %v456_v7 }
  0xa7   : > { %459 = vst [vmem:[%s265_s20 + $0x8] sm:$0xff] %v451_v8 }
  0xa8   : > { %461 = vst [vmem:[%s265_s20 + $0x18] sm:$0xff] %v453_v9  ;;  %v438_v11 = vpop.f32.mrf.mxu2  ;;  %v443_v12 = vpop.f32.mrf.mxu3 }
  0xa9   : > { %v439_v13 = vadd.f32 %v438_v11, %v385_v53  ;;  %v444_v14 = vadd.f32 %v443_v12, %v395_v10 }
  0xab   : > { %v455_v15 = vadd.f32 %v633_v54, %v439_v13  ;;  %v457_v16 = vadd.f32 %v633_v54, %v444_v14 }
  0xad   : > { %463 = vst [vmem:[%s265_s20 + $0x28] sm:$0xff] %v455_v15 }
  0xae   : > { %465 = vst [vmem:[%s265_s20 + $0x38] sm:$0xff] %v457_v16 }
  0xaf PF: > { %s14_s17 = sadd.s32 1, %s656_s17   ;;  %s757_s15 = smov %s652_s16 }
  0xb0   : > { %p11_p6 = scmp.ge.s32.totalorder %s14_s17, 4   ;;  %s758_s16 = smov %s760_s18 }
  0xb2   :  { %13 = sbr.rel (!%p11_p6) target bundleno = 2 (0x2), region = 76 }

// kernel: pyramid_features.12
= control target key start
LH: loop header
LB: loop body
LE: loop exit
PB: predicated region body
PF: predicated region fallthrough
CT: control target
= control target key end

     0   :  { %9 = vsyncpa [#allocation3], 0  ;;  %s1551_s0 = inlined_call_operand.hbm [shape: f32[2,16,16,32], index: 0, kind: input, shape index: {}]   ;;  %s1552_s1 = inlined_call_operand.vmem [shape: bf16[32,128], index: 1, kind: input, shape index: {}]   ;;  %s1553_s2 = inlined_call_operand.vmem [shape: f32[1,128], index: 2, kind: input, shape index: {}]   ;;  %s1554_s3 = inlined_call_operand.vmem [shape: f32[2,8,8,128], index: 3, kind: input, shape index: {}]   ;;  %s1555_s4 = inlined_call_operand.vmem [shape: f32[512,128], index: 4, kind: output, shape index: {}]  }
   0x1   :  { %11 = vsyncpa [#allocation3 + $0x1], 0  ;;  %s1202_s15 = smov 0   ;;  %s1204_s16 = smov 0  }
   0x2   :  { %s1206_s17 = smov 0   ;;  %s1208_s18 = smov 0  }
   0x3   :  { %s1210_s19 = smov 0   ;;  %s1212_s20 = smov 0  }
   0x4 LB: > { %s986_s21 = sadd.s32 4294967295, %s1173_s20   ;;  %s29_s22 = sadd.s32 1, %s1169_s19  ;;  %s1173_s20 = sphi %s1212_s20, %s17_s20   ;;  %s1169_s19 = sphi %s1210_s19, %s1562_s19   ;;  %s1165_s18 = sphi %s1208_s18, %s1561_s18   ;;  %s1161_s17 = sphi %s1206_s17, %s1560_s17   ;;  %s1157_s16 = sphi %s1204_s16, %s1559_s16   ;;  %s1153_s15 = sphi %s1202_s15, %s1558_s15  }
   0x5   : > { %p31_p0 = scmp.ge.s32.totalorder %s29_s22, 2  ;;  %s38_s23 = sadd.s32 1, %s1161_s17 }
   0x6   : > { %p45_p1 = scmp.ne.s32.totalorder %s1161_s17, %s1157_s16  ;;  %p46_p2 = scmp.eq.s32.totalorder %s1173_s20, 0 }
   0x7   : > { %s1564_s22 = smov (%p31_p0, %s29_s22), 0  ;;  %p51_p4 = scmp.ne.s32.totalorder %s1157_s16, %s1153_s15 }
   0x8   : > { %p1238_p3 = por %p46_p2, %p45_p1  ;;  %s33_s25 = ssub.s32 %s1169_s19, %s1564_s22 }
   0x9   : > { %p52_p5 = scmp.eq.s32.totalorder %s986_s21, 0  ;;  %p36_p6 = scmp.eq.s32.totalorder %s33_s25, 0 }
   0xa   : > { %p1041_p8 = scmp.lt.s32.totalorder %s1173_s20, 2  ;;  %s179_s28 = sand.u32 1, %s1161_s17  }
   0xb   : > { %p1245_p7 = por %p52_p5, %p51_p4  ;;  %s1025_s29 = sshll.u32 %s1169_s19, 8 }
   0xc   : > { %s1251_s27 = scalar_select %p36_p6, %s1161_s17, %s38_s23  }
   0xd   : > { %s990_s30 = sshll.u32 %s179_s28, 8  ;;  %s191_s7 = scalar_lea.hbm %s1551_s0, %s1025_s29 }
   0xe   : > { %s192_s8 = sshll.u32 %s191_s7, 4  ;;  %s183_s9 = scalar_lea.vmem [#allocation2], %s990_s30  ;;  %s193_s8 = int_to_ptr.hbm [resolvable:$true] %s192_s8 }
   0xf   : > { %s194_s10 = sshll.u32 %s183_s9, 4  ;;  %p1038_p9 = pnand %p1041_p8, %p1238_p3  ;;  %s195_s10 = int_to_ptr.vmem [resolvable:$true] %s194_s10 }
  0x10   : > { %p993_p10 = scmp.ge.s32.totalorder %s1173_s20, 1  ;;  %p215_p11 = scmp.lt.s32.totalorder %s1173_s20, 3 }
  0x11   : > { %s180_s11 = scalar_lea.sflag [#allocation3], %s179_s28  ;;  %s1175_s12 = smov 128  }
  0x12   : > { %s1176_s13 = smov 8   ;;  %p216_p12 = pnand %p993_p10, %p215_p11 }
  0x13   : > { %1040 = dma.hbm_to_vmem [thread:$0]  (!%p1038_p9), %s193_s8, 4096, %s195_s10, %s180_s11, %s1175_s12, %s1175_s12, %s1176_s13  }
  0x14   : > { %219 = sbr.rel (%p216_p12) target bundleno = 245 (0xf5), region = 36  ;;  %s221_s14 = sand.u32 (!%p216_p12), 1, %s1157_s16  }
  0x15   : > { %s994_s15 = sshll.u32 (!%p216_p12), %s221_s14, 8  ;;  %s222_s21 = scalar_lea.sflag (!%p216_p12), [#allocation3], %s221_s14 }
  0x16   : > { %s1263_s23 = scalar_lea.vmem (!%p216_p12), [#allocation2], %s994_s15 }
  0x19   : > { %1148 = dma.done.wait (%p1245_p7), %s222_s21, 4096  }
  0x1a   : > { %1150 = vsyncadd (%p1245_p7), %s222_s21, 4294963200  ;;  %p263_p13 = scmp.lt.s32.totalorder %s1165_s18, 1  ;;  %v1028_v0 = vld [vmem:[%s1552_s1 + $0x8] sm:$0xff]  ;;  %v1027_v1 = vld [vmem:[%s1552_s1] sm:$0xff]  ;;  %vm680_vm0 = vcmask 261120   ;;  %s997_s8 = sshll.u32 %s1165_s18, 5 }
  0x1b   : > { %v281_v2 = vld [vmem:[%s1263_s23] sm:$0xff]  ;;  %v282_v3 = vld [vmem:[%s1263_s23 + $0x8] sm:$0xff]  ;;  %735 = vmatpush.bf16.msra.mxu0 %v1028_v0  ;;  %1029 = vmatpush.bf16.msra.mxu1 %v1028_v0  ;;  %v283_v22 = vld [vmem:[%s1263_s23 + $0x10] sm:$0xff]  ;;  %p274_p0 = scmp.lt.s32.totalorder %s997_s8, 63 }
  0x1c   : > { %s264_s24 = scalar_select %p263_p13, %s1165_s18, 1  ;;  %v289_v4 = vld [vmem:[%s1263_s23 + $0x40] sm:$0xff]  ;;  %v290_v5 = vld [vmem:[%s1263_s23 + $0x48] sm:$0xff]  ;;  %1030 = vmatpush.bf16.msra.mxu2 %v1028_v0  ;;  %1031 = vmatpush.bf16.msra.mxu3 %v1028_v0  ;;  %v313_v10 = vpack.c.bf16 %v282_v3, %v281_v2  ;;  %v284_v23 = vld [vmem:[%s1263_s23 + $0x18] sm:$0xff] }
  0x1d   : > { %v297_v6 = vld [vmem:[%s1263_s23 + $0x80] sm:$0xff]  ;;  %v298_v7 = vld [vmem:[%s1263_s23 + $0x88] sm:$0xff]  ;;  %v317_v11 = vpack.c.bf16 %v290_v5, %v289_v4  ;;  %v291_v24 = vld [vmem:[%s1263_s23 + $0x50] sm:$0xff]  ;;  %v314_v30 = vpack.c.bf16 %v284_v23, %v283_v22  ;;  %s1566_s8 = smov (!%p274_p0, %s997_s8), 63 }
  0x1e   : > { %s1026_s29 = sshll.u32 %s264_s24, 6  ;;  %v305_v8 = vld [vmem:[%s1263_s23 + $0xc0] sm:$0xff]  ;;  %v306_v9 = vld [vmem:[%s1263_s23 + $0xc8] sm:$0xff]  ;;  %v321_v12 = vpack.c.bf16 %v298_v7, %v297_v6  ;;  %v292_v25 = vld [vmem:[%s1263_s23 + $0x58] sm:$0xff]  ;;  %s998_s18 = sshll.u32 %s1566_s8, 3 }
  0x1f   : > { %s1288_s7 = scalar_lea.vmem %s1554_s3, %s1026_s29  ;;  %736 = vmatpush.bf16.msra.mxu0 %v1027_v1  ;;  %1032 = vmatpush.bf16.msra.mxu1 %v1027_v1  ;;  %v325_v13 = vpack.c.bf16 %v306_v9, %v305_v8  ;;  %v299_v26 = vld [vmem:[%s1263_s23 + $0x90] sm:$0xff]  ;;  %v300_v27 = vld [vmem:[%s1263_s23 + $0x98] sm:$0xff]  ;;  %v318_v32 = vpack.c.bf16 %v292_v25, %v291_v24  ;;  %v285_v52 = vld [vmem:[%s1263_s23 + $0x20] sm:$0xff]  ;;  %s1404_s13 = scalar_lea.vmem %s1555_s4, %s998_s18 }
  0x20   : > { %v333_v14 = vld [vmem:[%s1288_s7] sm:$0xff]  ;;  %1033 = vmatpush.bf16.msra.mxu2 %v1027_v1  ;;  %1034 = vmatpush.bf16.msra.mxu3 %v1027_v1  ;;  %v307_v28 = vld [vmem:[%s1263_s23 + $0xd0] sm:$0xff]  ;;  %v322_v36 = vpack.c.bf16 %v300_v27, %v299_v26  ;;  %v334_v38 = vld [vmem:[%s1288_s7 + $0x8] sm:$0xff] }
  0x21   : > { %v349_v15 = vrot.slane %v333_v14, 1  ;;  %v350_v16 = vrot.slane %v333_v14, 2  ;;  %v351_v17 = vrot.slane %v333_v14, 3  ;;  %v405_v18 = vperm.slane %v333_v14, 0  ;;  %v308_v29 = vld [vmem:[%s1263_s23 + $0xd8] sm:$0xff]  ;;  %v286_v53 = vld [vmem:[%s1263_s23 + $0x28] sm:$0xff] }
  0x22   : > { %1007 = vmatmul.msk.bf16.vlgmr.msra.gmra.mxu0 %vm680_vm0, %v313_v10  ;;  %1011 = vmatmul.msk.bf16.vlgmr.msra.gmra.mxu1 %vm680_vm0, %v317_v11  ;;  %v352_v33 = vrot.slane %v333_v14, 4  ;;  %v353_v34 = vrot.slane %v333_v14, 5  ;;  %v354_v35 = vrot.slane %v333_v14, 6  ;;  %v326_v37 = vpack.c.bf16 %v308_v29, %v307_v28  ;;  %v293_v54 = vld [vmem:[%s1263_s23 + $0x60] sm:$0xff]  ;;  %v294_v55 = vld [vmem:[%s1263_s23 + $0x68] sm:$0xff]  ;;  %v311_v22 = vld [vmem:[%s1263_s23 + $0xf0] sm:$0xff] }
  0x23   : > { %v406_v19 = vperm.slane %v349_v15, 0  ;;  %v407_v20 = vperm.slane %v350_v16, 0  ;;  %1015 = vmatmul.msk.bf16.vlgmr.msra.gmra.mxu2 %vm680_vm0, %v321_v12  ;;  %1019 = vmatmul.msk.bf16.vlgmr.msra.gmra.mxu3 %vm680_vm0, %v325_v13  ;;  %v408_v21 = vperm.slane %v351_v17, 0  ;;  %481 = vst [vmem:[#allocation1] ss:$4 sm:$0xff] %v405_v18  ;;  %v355_v39 = vrot.slane %v333_v14, 7 }
  0x24   : > { %v409_v40 = vperm.slane %v352_v33, 0  ;;  %v410_v41 = vperm.slane %v353_v34, 0  ;;  %v356_v42 = vrot.slane %v334_v38, 1  ;;  %v411_v43 = vperm.slane %v354_v35, 0  ;;  %v301_v56 = vld [vmem:[%s1263_s23 + $0xa0] sm:$0xff]  ;;  %v302_v57 = vld [vmem:[%s1263_s23 + $0xa8] sm:$0xff] }
  0x25   : > { %483 = vst [vmem:[#allocation1 + $0x1] ss:$4 sm:$0xff] %v406_v19  ;;  %v412_v44 = vperm.slane %v355_v39, 0  ;;  %v357_v45 = vrot.slane %v334_v38, 2  ;;  %v358_v46 = vrot.slane %v334_v38, 3  ;;  %v413_v47 = vperm.slane %v334_v38, 0 }
  0x26   : > { %485 = vst [vmem:[#allocation1 + $0x2] ss:$4 sm:$0xff] %v407_v20  ;;  %v414_v48 = vperm.slane %v356_v42, 0  ;;  %v309_v58 = vld [vmem:[%s1263_s23 + $0xe0] sm:$0xff]  ;;  %v310_v59 = vld [vmem:[%s1263_s23 + $0xe8] sm:$0xff]  ;;  %v315_v61 = vpack.c.bf16 %v286_v53, %v285_v52  ;;  %v319_v62 = vpack.c.bf16 %v294_v55, %v293_v54  ;;  %v323_v63 = vpack.c.bf16 %v302_v57, %v301_v56  ;;  %v287_v14 = vld [vmem:[%s1263_s23 + $0x30] sm:$0xff] }
  0x27   : > { %487 = vst [vmem:[#allocation1 + $0x3] ss:$4 sm:$0xff] %v408_v21  ;;  %v415_v49 = vperm.slane %v357_v45, 0  ;;  %v416_v50 = vperm.slane %v358_v46, 0  ;;  %v327_v0 = vpack.c.bf16 %v310_v59, %v309_v58  ;;  %v359_v1 = vrot.slane %v334_v38, 4  ;;  %v335_v7 = vld [vmem:[%s1288_s7 + $0x10] sm:$0xff] }
  0x28   : > { %489 = vst [vmem:[#allocation1 + $0x20] ss:$4 sm:$0xff] %v409_v40  ;;  %v360_v2 = vrot.slane %v334_v38, 5  ;;  %v361_v3 = vrot.slane %v334_v38, 6  ;;  %v362_v5 = vrot.slane %v334_v38, 7  ;;  %v363_v12 = vrot.slane %v335_v7, 1 }
  0x29   : > { %491 = vst [vmem:[#allocation1 + $0x21] ss:$4 sm:$0xff] %v410_v41  ;;  %v417_v6 = vperm.slane %v359_v1, 0  ;;  %v364_v13 = vrot.slane %v335_v7, 2  ;;  %v288_v15 = vld [vmem:[%s1263_s23 + $0x38] sm:$0xff]  ;;  %v365_v16 = vrot.slane %v335_v7, 3 }
  0x2a   : > { %493 = vst [vmem:[#allocation1 + $0x22] ss:$4 sm:$0xff] %v411_v43  ;;  %v418_v8 = vperm.slane %v360_v2, 0  ;;  %v419_v9 = vperm.slane %v361_v3, 0  ;;  %v420_v10 = vperm.slane %v362_v5, 0  ;;  %v295_v17 = vld [vmem:[%s1263_s23 + $0x70] sm:$0xff]  ;;  %v316_v26 = vpack.c.bf16 %v288_v15, %v287_v14 }
  0x2b   : > { %495 = vst [vmem:[#allocation1 + $0x23] ss:$4 sm:$0xff] %v412_v44  ;;  %v312_v23 = vld [vmem:[%s1263_s23 + $0xf8] sm:$0xff]  ;;  %v422_v24 = vperm.slane %v363_v12, 0  ;;  %v423_v25 = vperm.slane %v364_v13, 0  ;;  %v424_v28 = vperm.slane %v365_v16, 0 }
  0x2c   : > { %v366_v34 = vrot.slane %v335_v7, 4  ;;  %v367_v35 = vrot.slane %v335_v7, 5  ;;  %v369_v38 = vrot.slane %v335_v7, 7  ;;  %v336_v39 = vld [vmem:[%s1288_s7 + $0x18] sm:$0xff] }
  0x2d   : > { %v371_v46 = vrot.slane %v336_v39, 2  ;;  %v373_v55 = vrot.slane %v336_v39, 4  ;;  %v374_v56 = vrot.slane %v336_v39, 5  ;;  %v375_v58 = vrot.slane %v336_v39, 6 }
  0x2e   : > { %v1303_v31 = vld.sshfl [vmem:[#allocation1] sm:$0xff pattern:$0x73625140]  ;;  %v376_v59 = vrot.slane %v336_v39, 7 }
  0x2f   : > { %498 = vst [vmem:[#allocation1] ss:$4 sm:$0xff] %v405_v18  ;;  %v296_v18 = vld [vmem:[%s1263_s23 + $0x78] sm:$0xff] }
  0x30   : > { %499 = vst [vmem:[#allocation1 + $0x1] ss:$4 sm:$0xff] %v406_v19  ;;  %v303_v19 = vld [vmem:[%s1263_s23 + $0xb0] sm:$0xff]  ;;  %v320_v27 = vpack.c.bf16 %v296_v18, %v295_v17  ;;  %v436_v2 = vperm.slane %v376_v59, 0  ;;  %v1368_v18 = vld [vmem:[%s1288_s7 + $0x28] sm:$0xff] }
  0x31   : > { %500 = vst [vmem:[#allocation1 + $0x2] ss:$4 sm:$0xff] %v407_v20  ;;  %v421_v20 = vperm.slane %v335_v7, 0 }
  0x32   : > { %501 = vst [vmem:[#allocation1 + $0x3] ss:$4 sm:$0xff] %v408_v21  ;;  %1008 = vmatmul.msk.bf16.gmra.mxu0 %vm680_vm0, %v314_v30  ;;  %1012 = vmatmul.msk.bf16.gmra.mxu1 %vm680_vm0, %v318_v32  ;;  %v1320_v60 = vld.sshfl [vmem:[#allocation1 + $0x20] sm:$0xff pattern:$0x73625140]  ;;  %v328_v32 = vpack.c.bf16 %v312_v23, %v311_v22  ;;  %v384_v22 = vrot.slane %v1368_v18, 1 }
  0x33   : > { %1016 = vmatmul.msk.bf16.gmra.mxu2 %vm680_vm0, %v322_v36  ;;  %1020 = vmatmul.msk.bf16.gmra.mxu3 %vm680_vm0, %v326_v37  ;;  %502 = vst [vmem:[#allocation1 + $0x20] ss:$4 sm:$0xff] %v409_v40  ;;  %v304_v21 = vld [vmem:[%s1263_s23 + $0xb8] sm:$0xff]  ;;  %v368_v37 = vrot.slane %v335_v7, 6  ;;  %v425_v40 = vperm.slane %v366_v34, 0 }
  0x34   : > { %503 = vst [vmem:[#allocation1 + $0x21] ss:$4 sm:$0xff] %v410_v41  ;;  %v324_v30 = vpack.c.bf16 %v304_v21, %v303_v19  ;;  %v426_v41 = vperm.slane %v367_v35, 0 }
  0x35   : > { %504 = vst [vmem:[#allocation1 + $0x22] ss:$4 sm:$0xff] %v411_v43  ;;  %v427_v42 = vperm.slane %v368_v37, 0  ;;  %v370_v43 = vrot.slane %v336_v39, 1 }
  0x36   : > { %505 = vst [vmem:[#allocation1 + $0x23] ss:$4 sm:$0xff] %v412_v44  ;;  %v428_v44 = vperm.slane %v369_v38, 0  ;;  %v387_v38 = vrot.slane %v1368_v18, 4 }
  0x39   : > { %v1310_v51 = vld.sshfl [vmem:[#allocation1] sm:$0xff pattern:$0x73625140] }
  0x3a   : > { %508 = vst [vmem:[#allocation1] ss:$4 sm:$0xff] %v413_v47 }
  0x3b   : > { %509 = vst [vmem:[#allocation1 + $0x1] ss:$4 sm:$0xff] %v414_v48 }
  0x3c   : > { %510 = vst [vmem:[#allocation1 + $0x2] ss:$4 sm:$0xff] %v415_v49 }
  0x3d   : > { %511 = vst [vmem:[#allocation1 + $0x3] ss:$4 sm:$0xff] %v416_v50  ;;  %v1329_v11 = vld.sshfl [vmem:[#allocation1 + $0x20] sm:$0xff pattern:$0x73625140] }
  0x3e   : > { %512 = vst [vmem:[#allocation1 + $0x20] ss:$4 sm:$0xff] %v417_v6 }
  0x3f   : > { %513 = vst [vmem:[#allocation1 + $0x21] ss:$4 sm:$0xff] %v418_v8 }
  0x40   : > { %514 = vst [vmem:[#allocation1 + $0x22] ss:$4 sm:$0xff] %v419_v9 }
  0x41   : > { %515 = vst [vmem:[#allocation1 + $0x23] ss:$4 sm:$0xff] %v420_v10 }
  0x42   : > { %1009 = vmatmul.msk.bf16.gmra.mxu0 %vm680_vm0, %v315_v61  ;;  %1013 = vmatmul.msk.bf16.gmra.mxu1 %vm680_vm0, %v319_v62  ;;  %v337_v61 = vld [vmem:[%s1288_s7 + $0x20] sm:$0xff]  ;;  %v433_v62 = vperm.slane %v373_v55, 0 }
  0x43   : > { %1017 = vmatmul.msk.bf16.gmra.mxu2 %vm680_vm0, %v323_v63  ;;  %1021 = vmatmul.msk.bf16.gmra.mxu3 %vm680_vm0, %v327_v0  ;;  %v434_v63 = vperm.slane %v374_v56, 0  ;;  %v435_v0 = vperm.slane %v375_v58, 0  ;;  %v377_v1 = vrot.slane %v337_v61, 1  ;;  %v378_v5 = vrot.slane %v337_v61, 2 }
  0x44   : > { %v1326_v4 = vld.sshfl [vmem:[#allocation1] sm:$0xff pattern:$0x73625140]  ;;  %v437_v7 = vperm.slane %v337_v61, 0  ;;  %v380_v14 = vrot.slane %v337_v61, 4  ;;  %v381_v16 = vrot.slane %v337_v61, 5 }
  0x45   : > { %518 = vst [vmem:[#allocation1] ss:$4 sm:$0xff] %v413_v47  ;;  %v372_v47 = vrot.slane %v336_v39, 3  ;;  %v382_v17 = vrot.slane %v337_v61, 6  ;;  %v383_v19 = vrot.slane %v337_v61, 7 }
  0x46   : > { %519 = vst [vmem:[#allocation1 + $0x1] ss:$4 sm:$0xff] %v414_v48  ;;  %v429_v48 = vperm.slane %v336_v39, 0  ;;  %v442_v21 = vperm.slane %v381_v16, 0 }
  0x47   : > { %520 = vst [vmem:[#allocation1 + $0x2] ss:$4 sm:$0xff] %v415_v49  ;;  %v430_v49 = vperm.slane %v370_v43, 0  ;;  %v432_v52 = vperm.slane %v372_v47, 0  ;;  %v443_v23 = vperm.slane %v382_v17, 0  ;;  %v389_v43 = vrot.slane %v1368_v18, 6 }
  0x48   : > { %521 = vst [vmem:[#allocation1 + $0x3] ss:$4 sm:$0xff] %v416_v50  ;;  %v1343_v33 = vld.sshfl [vmem:[#allocation1 + $0x20] sm:$0xff pattern:$0x73625140]  ;;  %v431_v50 = vperm.slane %v371_v46, 0 }
  0x49   : > { %522 = vst [vmem:[#allocation1 + $0x20] ss:$4 sm:$0xff] %v417_v6  ;;  %v379_v6 = vrot.slane %v337_v61, 3 }
  0x4a   : > { %523 = vst [vmem:[#allocation1 + $0x21] ss:$4 sm:$0xff] %v418_v8  ;;  %v438_v8 = vperm.slane %v377_v1, 0 }
  0x4b   : > { %524 = vst [vmem:[#allocation1 + $0x22] ss:$4 sm:$0xff] %v419_v9  ;;  %v439_v9 = vperm.slane %v378_v5, 0 }
  0x4c   : > { %525 = vst [vmem:[#allocation1 + $0x23] ss:$4 sm:$0xff] %v420_v10  ;;  %v440_v10 = vperm.slane %v379_v6, 0 }
  0x4f   : > { %v1339_v29 = vld.sshfl [vmem:[#allocation1] sm:$0xff pattern:$0x73625140] }
  0x50   : > { %528 = vst [vmem:[#allocation1] ss:$4 sm:$0xff] %v421_v20 }
  0x51   : > { %529 = vst [vmem:[#allocation1 + $0x1] ss:$4 sm:$0xff] %v422_v24 }
  0x52   : > { %530 = vst [vmem:[#allocation1 + $0x2] ss:$4 sm:$0xff] %v423_v25  ;;  %1010 = vmatmul.msk.bf16.gmra.mxu0 %vm680_vm0, %v316_v26  ;;  %1014 = vmatmul.msk.bf16.gmra.mxu1 %vm680_vm0, %v320_v27  ;;  %v386_v27 = vrot.slane %v1368_v18, 3 }
  0x53   : > { %531 = vst [vmem:[#allocation1 + $0x3] ss:$4 sm:$0xff] %v424_v28  ;;  %1018 = vmatmul.msk.bf16.gmra.mxu2 %vm680_vm0, %v324_v30  ;;  %1022 = vmatmul.msk.bf16.gmra.mxu3 %vm680_vm0, %v328_v32  ;;  %v1350_v45 = vld.sshfl [vmem:[#allocation1 + $0x20] sm:$0xff pattern:$0x73625140]  ;;  %v446_v30 = vperm.slane %v384_v22, 0 }
  0x54   : > { %532 = vst [vmem:[#allocation1 + $0x20] ss:$4 sm:$0xff] %v425_v40  ;;  %v448_v34 = vperm.slane %v386_v27, 0 }
  0x55   : > { %533 = vst [vmem:[#allocation1 + $0x21] ss:$4 sm:$0xff] %v426_v41 }
  0x56   : > { %534 = vst [vmem:[#allocation1 + $0x22] ss:$4 sm:$0xff] %v427_v42 }
  0x57   : > { %535 = vst [vmem:[#allocation1 + $0x23] ss:$4 sm:$0xff] %v428_v44 }
  0x5a   : > { %v1347_v36 = vld.sshfl [vmem:[#allocation1] sm:$0xff pattern:$0x73625140] }
  0x5b   : > { %538 = vst [vmem:[#allocation1] ss:$4 sm:$0xff] %v421_v20  ;;  %v441_v20 = vperm.slane %v380_v14, 0 }
  0x5c   : > { %539 = vst [vmem:[#allocation1 + $0x1] ss:$4 sm:$0xff] %v422_v24  ;;  %v385_v24 = vrot.slane %v1368_v18, 2 }
  0x5d   : > { %540 = vst [vmem:[#allocation1 + $0x2] ss:$4 sm:$0xff] %v423_v25  ;;  %v444_v25 = vperm.slane %v383_v19, 0 }
  0x5e   : > { %541 = vst [vmem:[#allocation1 + $0x3] ss:$4 sm:$0xff] %v424_v28  ;;  %v1354_v54 = vld.sshfl [vmem:[#allocation1 + $0x20] sm:$0xff pattern:$0x73625140]  ;;  %v445_v28 = vperm.slane %v1368_v18, 0 }
  0x5f   : > { %542 = vst [vmem:[#allocation1 + $0x20] ss:$4 sm:$0xff] %v425_v40  ;;  %v447_v32 = vperm.slane %v385_v24, 0  ;;  %v388_v40 = vrot.slane %v1368_v18, 5 }
  0x60   : > { %543 = vst [vmem:[#allocation1 + $0x21] ss:$4 sm:$0xff] %v426_v41  ;;  %v1386_v41 = vld [vmem:[%s1288_s7 + $0x30] sm:$0xff] }
  0x61   : > { %544 = vst [vmem:[#allocation1 + $0x22] ss:$4 sm:$0xff] %v427_v42  ;;  %v1391_v42 = vld [vmem:[%s1553_s2] ss:$0 sm:$0xff]  ;;  %v392_v55 = vrot.slane %v1386_v41, 2  ;;  %v453_v61 = vperm.slane %v1386_v41, 0 }
  0x62   : > { %545 = vst [vmem:[#allocation1 + $0x23] ss:$4 sm:$0xff] %v428_v44  ;;  %v1394_v44 = vperm.slane %v387_v38, 0 }
  0x65   : > { %v1352_v53 = vld.sshfl [vmem:[#allocation1] sm:$0xff pattern:$0x73625140] }
  0x66   : > { %548 = vst [vmem:[#allocation1] ss:$4 sm:$0xff] %v429_v48 }
  0x67   : > { %549 = vst [vmem:[#allocation1 + $0x1] ss:$4 sm:$0xff] %v430_v49 }
  0x68   : > { %550 = vst [vmem:[#allocation1 + $0x2] ss:$4 sm:$0xff] %v431_v50 }
  0x69   : > { %551 = vst [vmem:[#allocation1 + $0x3] ss:$4 sm:$0xff] %v432_v52  ;;  %v1359_v3 = vld.sshfl [vmem:[#allocation1 + $0x20] sm:$0xff pattern:$0x73625140] }
  0x6a   : > { %552 = vst [vmem:[#allocation1 + $0x20] ss:$4 sm:$0xff] %v433_v62 }
  0x6b   : > { %553 = vst [vmem:[#allocation1 + $0x21] ss:$4 sm:$0xff] %v434_v63 }
  0x6c   : > { %554 = vst [vmem:[#allocation1 + $0x22] ss:$4 sm:$0xff] %v435_v0 }
  0x6d   : > { %555 = vst [vmem:[#allocation1 + $0x23] ss:$4 sm:$0xff] %v436_v2 }
  0x70   : > { %v1356_v57 = vld.sshfl [vmem:[#allocation1] sm:$0xff pattern:$0x73625140] }
  0x71   : > { %558 = vst [vmem:[#allocation1] ss:$4 sm:$0xff] %v429_v48  ;;  %v1396_v48 = vperm.slane %v388_v40, 0 }
  0x72   : > { %559 = vst [vmem:[#allocation1 + $0x1] ss:$4 sm:$0xff] %v430_v49 }
  0x73   : > { %560 = vst [vmem:[#allocation1 + $0x2] ss:$4 sm:$0xff] %v431_v50 }
  0x74   : > { %561 = vst [vmem:[#allocation1 + $0x3] ss:$4 sm:$0xff] %v432_v52  ;;  %v1363_v13 = vld.sshfl [vmem:[#allocation1 + $0x20] sm:$0xff pattern:$0x73625140]  ;;  %v391_v52 = vrot.slane %v1386_v41, 1 }
  0x75   : > { %562 = vst [vmem:[#allocation1 + $0x20] ss:$4 sm:$0xff] %v433_v62 }
  0x76   : > { %563 = vst [vmem:[#allocation1 + $0x21] ss:$4 sm:$0xff] %v434_v63  ;;  %v454_v62 = vperm.slane %v391_v52, 0  ;;  %v455_v63 = vperm.slane %v392_v55, 0  ;;  %v1457_v55 = vld [vmem:[%s1288_s7 + $0x38] sm:$0xff] }
  0x77   : > { %564 = vst [vmem:[#allocation1 + $0x22] ss:$4 sm:$0xff] %v435_v0  ;;  %v390_v0 = vrot.slane %v1368_v18, 7 }
  0x78   : > { %565 = vst [vmem:[#allocation1 + $0x23] ss:$4 sm:$0xff] %v436_v2 }
  0x79   : > { %v452_v19 = vperm.slane %v390_v0, 0 }
  0x7b   : > { %v1361_v12 = vld.sshfl [vmem:[#allocation1] sm:$0xff pattern:$0x73625140] }
  0x7c   : > { %568 = vst [vmem:[#allocation1] ss:$4 sm:$0xff] %v437_v7 }
  0x7d   : > { %569 = vst [vmem:[#allocation1 + $0x1] ss:$4 sm:$0xff] %v438_v8 }
  0x7e   : > { %570 = vst [vmem:[#allocation1 + $0x2] ss:$4 sm:$0xff] %v439_v9 }
  0x7f   : > { %571 = vst [vmem:[#allocation1 + $0x3] ss:$4 sm:$0xff] %v440_v10  ;;  %v1372_v26 = vld.sshfl [vmem:[#allocation1 + $0x20] sm:$0xff pattern:$0x73625140] }
  0x80   : > { %572 = vst [vmem:[#allocation1 + $0x20] ss:$4 sm:$0xff] %v441_v20 }
  0x81   : > { %573 = vst [vmem:[#allocation1 + $0x21] ss:$4 sm:$0xff] %v442_v21 }
  0x82   : > { %574 = vst [vmem:[#allocation1 + $0x22] ss:$4 sm:$0xff] %v443_v23 }
  0x83   : > { %575 = vst [vmem:[#allocation1 + $0x23] ss:$4 sm:$0xff] %v444_v25 }
  0x86   : > { %v1365_v15 = vld.sshfl [vmem:[#allocation1] sm:$0xff pattern:$0x73625140] }
  0x87   : > { %578 = vst [vmem:[#allocation1] ss:$4 sm:$0xff] %v437_v7 }
  0x88   : > { %579 = vst [vmem:[#allocation1 + $0x1] ss:$4 sm:$0xff] %v438_v8 }
  0x89   : > { %580 = vst [vmem:[#allocation1 + $0x2] ss:$4 sm:$0xff] %v439_v9 }
  0x8a   : > { %581 = vst [vmem:[#allocation1 + $0x3] ss:$4 sm:$0xff] %v440_v10  ;;  %v1379_v37 = vld.sshfl [vmem:[#allocation1 + $0x20] sm:$0xff pattern:$0x73625140] }
  0x8b   : > { %582 = vst [vmem:[#allocation1 + $0x20] ss:$4 sm:$0xff] %v441_v20 }
  0x8c   : > { %583 = vst [vmem:[#allocation1 + $0x21] ss:$4 sm:$0xff] %v442_v21 }
  0x8d   : > { %584 = vst [vmem:[#allocation1 + $0x22] ss:$4 sm:$0xff] %v443_v23 }
  0x8e   : > { %585 = vst [vmem:[#allocation1 + $0x23] ss:$4 sm:$0xff] %v444_v25 }
  0x91   : > { %v1376_v35 = vld.sshfl [vmem:[#allocation1] sm:$0xff pattern:$0x73625140] }
  0x92   : > { %588 = vst [vmem:[#allocation1] ss:$4 sm:$0xff] %v445_v28 }
  0x93   : > { %589 = vst [vmem:[#allocation1 + $0x1] ss:$4 sm:$0xff] %v446_v30 }
  0x94   : > { %590 = vst [vmem:[#allocation1 + $0x2] ss:$4 sm:$0xff] %v447_v32 }
  0x95   : > { %591 = vst [vmem:[#allocation1 + $0x3] ss:$4 sm:$0xff] %v448_v34  ;;  %v1407_v56 = vld.sshfl [vmem:[#allocation1 + $0x20] sm:$0xff pattern:$0x73625140] }
  0x96   : > { %592 = vst [vmem:[#allocation1 + $0x20] ss:$4 sm:$0xff] %v1394_v44 }
  0x97   : > { %593 = vst [vmem:[#allocation1 + $0x21] ss:$4 sm:$0xff] %v1396_v48 }
  0x98   : > { %595 = vst [vmem:[#allocation1 + $0x23] ss:$4 sm:$0xff] %v452_v19 }
  0x9c   : > { %v1382_v39 = vld.sshfl [vmem:[#allocation1] sm:$0xff pattern:$0x73625140] }
  0x9d   : > { %598 = vst [vmem:[#allocation1] ss:$4 sm:$0xff] %v445_v28 }
  0x9e   : > { %599 = vst [vmem:[#allocation1 + $0x1] ss:$4 sm:$0xff] %v446_v30 }
  0x9f   : > { %600 = vst [vmem:[#allocation1 + $0x2] ss:$4 sm:$0xff] %v447_v32  ;;  %v738_v46 = vpop.f32.mrf.mxu0  ;;  %v758_v47 = vpop.f32.mrf.mxu1 }
  0xa0   : > { %601 = vst [vmem:[#allocation1 + $0x3] ss:$4 sm:$0xff] %v448_v34  ;;  %v739_v49 = vadd.f32 %v738_v46, %v1303_v31  ;;  %v759_v50 = vadd.f32 %v758_v47, %v1347_v36  ;;  %v393_v31 = vrot.slane %v1386_v41, 3  ;;  %v451_v36 = vperm.slane %v389_v43, 0 }
  0xa1   : > { %v394_v47 = vrot.slane %v1386_v41, 4 }
  0xa2   : > { %v822_v58 = vadd.f32 %v1391_v42, %v739_v49  ;;  %v830_v59 = vadd.f32 %v1391_v42, %v759_v50  ;;  %v456_v2 = vperm.slane %v393_v31, 0  ;;  %594 = vst [vmem:[#allocation1 + $0x22] ss:$4 sm:$0xff] %v451_v36  ;;  %v395_v49 = vrot.slane %v1386_v41, 5 }
  0xa3   : > { %v397_v50 = vrot.slane %v1386_v41, 7  ;;  %v461_v31 = vperm.slane %v1457_v55, 0 }
  0xa4   : > { %854 = vst [vmem:[%s1404_s13] sm:$0xff] %v822_v58 }
  0xa5   : > { %862 = vst [vmem:[%s1404_s13 + $0x40] sm:$0xff] %v830_v59 }
  0xa6   : > { %v778_v1 = vpop.f32.mrf.mxu2  ;;  %v798_v6 = vpop.f32.mrf.mxu3 }
  0xa7   : > { %v1418_v5 = vld.sshfl [vmem:[#allocation1] sm:$0xff pattern:$0x73625140]  ;;  %v779_v7 = vadd.f32 %v778_v1, %v1365_v15  ;;  %v740_v8 = vpop.f32.mrf.mxu0  ;;  %v760_v9 = vpop.f32.mrf.mxu1 }
  0xa8   : > { %608 = vst [vmem:[#allocation1] ss:$4 sm:$0xff] %v453_v61  ;;  %v741_v10 = vadd.f32 %v740_v8, %v1320_v60  ;;  %v761_v14 = vadd.f32 %v760_v9, %v1354_v54  ;;  %v398_v9 = vrot.slane %v1457_v55, 1 }
  0xa9   : > { %609 = vst [vmem:[#allocation1 + $0x1] ss:$4 sm:$0xff] %v454_v62  ;;  %v838_v16 = vadd.f32 %v1391_v42, %v779_v7  ;;  %v1435_v28 = vld.sshfl [vmem:[#allocation1 + $0x20] sm:$0xff pattern:$0x73625140] }
  0xaa   : > { %610 = vst [vmem:[#allocation1 + $0x2] ss:$4 sm:$0xff] %v455_v63  ;;  %v823_v17 = vadd.f32 %v1391_v42, %v741_v10  ;;  %v831_v18 = vadd.f32 %v1391_v42, %v761_v14  ;;  %v399_v10 = vrot.slane %v1457_v55, 2  ;;  %v400_v14 = vrot.slane %v1457_v55, 3 }
  0xab   : > { %611 = vst [vmem:[#allocation1 + $0x3] ss:$4 sm:$0xff] %v456_v2 }
  0xac   : > { %870 = vst [vmem:[%s1404_s13 + $0x80] sm:$0xff] %v838_v16 }
  0xad   : > { %855 = vst [vmem:[%s1404_s13 + $0x8] sm:$0xff] %v823_v17  ;;  %v462_v17 = vperm.slane %v398_v9, 0 }
  0xae   : > { %863 = vst [vmem:[%s1404_s13 + $0x48] sm:$0xff] %v831_v18  ;;  %v780_v15 = vpop.f32.mrf.mxu2  ;;  %v1429_v20 = vpop.f32.mrf.mxu3 }
  0xaf   : > { %v781_v60 = vadd.f32 %v780_v15, %v1379_v37  ;;  %v743_v54 = vpop.f32.mrf.mxu0  ;;  %v763_v21 = vpop.f32.mrf.mxu1  ;;  %602 = vst [vmem:[#allocation1 + $0x20] ss:$4 sm:$0xff] %v1394_v44 }
  0xb0   : > { %v744_v27 = vadd.f32 %v743_v54, %v1310_v51  ;;  %v764_v30 = vadd.f32 %v763_v21, %v1352_v53  ;;  %603 = vst [vmem:[#allocation1 + $0x21] ss:$4 sm:$0xff] %v1396_v48  ;;  %v396_v48 = vrot.slane %v1386_v41, 6  ;;  %v458_v41 = vperm.slane %v395_v49, 0 }
  0xb1   : > { %v839_v24 = vadd.f32 %v1391_v42, %v781_v60  ;;  %604 = vst [vmem:[#allocation1 + $0x22] ss:$4 sm:$0xff] %v451_v36  ;;  %v457_v36 = vperm.slane %v394_v47, 0  ;;  %v463_v60 = vperm.slane %v399_v10, 0  ;;  %v464_v21 = vperm.slane %v400_v14, 0 }
  0xb2   : > { %v616_v22 = vld.sshfl [vmem:[#allocation1] sm:$0xff pattern:$0x73625140]  ;;  %v824_v43 = vadd.f32 %v1391_v42, %v744_v27  ;;  %v832_v53 = vadd.f32 %v1391_v42, %v764_v30  ;;  %605 = vst [vmem:[#allocation1 + $0x23] ss:$4 sm:$0xff] %v452_v19  ;;  %v404_v47 = vrot.slane %v1457_v55, 7 }
  0xb3   : > { %v799_v23 = vadd.f32 %v798_v6, %v616_v22  ;;  %618 = vst [vmem:[#allocation1] ss:$4 sm:$0xff] %v453_v61  ;;  %v460_v6 = vperm.slane %v397_v50, 0 }
  0xb4   : > { %619 = vst [vmem:[#allocation1 + $0x1] ss:$4 sm:$0xff] %v454_v62 }
  0xb5   : > { %v846_v25 = vadd.f32 %v1391_v42, %v799_v23  ;;  %620 = vst [vmem:[#allocation1 + $0x2] ss:$4 sm:$0xff] %v455_v63 }
  0xb6   : > { %621 = vst [vmem:[#allocation1 + $0x3] ss:$4 sm:$0xff] %v456_v2  ;;  %v783_v32 = vpop.f32.mrf.mxu2  ;;  %v803_v34 = vpop.f32.mrf.mxu3  ;;  %v459_v2 = vperm.slane %v396_v48, 0 }
  0xb7   : > { %878 = vst [vmem:[%s1404_s13 + $0xc0] sm:$0xff] %v846_v25  ;;  %v784_v37 = vadd.f32 %v783_v32, %v1376_v35  ;;  %v745_v38 = vpop.f32.mrf.mxu0  ;;  %v765_v40 = vpop.f32.mrf.mxu1 }
  0xb8   : > { %871 = vst [vmem:[%s1404_s13 + $0x88] sm:$0xff] %v839_v24  ;;  %v746_v51 = vadd.f32 %v745_v38, %v1329_v11  ;;  %v766_v46 = vadd.f32 %v765_v40, %v1359_v3 }
  0xb9   : > { %v840_v35 = vadd.f32 %v1391_v42, %v784_v37  ;;  %856 = vst [vmem:[%s1404_s13 + $0x10] sm:$0xff] %v824_v43  ;;  %v1470_v8 = vld.sshfl [vmem:[#allocation1 + $0x20] sm:$0xff pattern:$0x73625140]  ;;  %v402_v43 = vrot.slane %v1457_v55, 5 }
  0xba   : > { %v825_v44 = vadd.f32 %v1391_v42, %v746_v51  ;;  %v833_v3 = vadd.f32 %v1391_v42, %v766_v46  ;;  %864 = vst [vmem:[%s1404_s13 + $0x50] sm:$0xff] %v832_v53  ;;  %v403_v53 = vrot.slane %v1457_v55, 6 }
  0xbb   : > { %872 = vst [vmem:[%s1404_s13 + $0x90] sm:$0xff] %v840_v35 }
  0xbc   : > { %857 = vst [vmem:[%s1404_s13 + $0x18] sm:$0xff] %v825_v44 }
  0xbd   : > { %v626_v11 = vld.sshfl [vmem:[#allocation1] sm:$0xff pattern:$0x73625140]  ;;  %865 = vst [vmem:[%s1404_s13 + $0x58] sm:$0xff] %v833_v3 }
  0xbe   : > { %v804_v52 = vadd.f32 %v803_v34, %v626_v11  ;;  %v785_v58 = vpop.f32.mrf.mxu2  ;;  %v1460_v59 = vpop.f32.mrf.mxu3  ;;  %628 = vst [vmem:[#allocation1] ss:$4 sm:$0xff] %v461_v31  ;;  %v466_v11 = vperm.slane %v402_v43, 0 }
  0xbf   : > { %v786_v62 = vadd.f32 %v785_v58, %v1407_v56  ;;  %v748_v63 = vpop.f32.mrf.mxu0  ;;  %v768_v0 = vpop.f32.mrf.mxu1  ;;  %612 = vst [vmem:[#allocation1 + $0x20] ss:$4 sm:$0xff] %v457_v36  ;;  %v467_v58 = vperm.slane %v403_v53, 0 }
  0xc0   : > { %v848_v61 = vadd.f32 %v1391_v42, %v804_v52  ;;  %v749_v1 = vadd.f32 %v748_v63, %v1326_v4  ;;  %v769_v7 = vadd.f32 %v768_v0, %v1356_v57  ;;  %613 = vst [vmem:[#allocation1 + $0x21] ss:$4 sm:$0xff] %v458_v41 }
  0xc1   : > { %v841_v56 = vadd.f32 %v1391_v42, %v786_v62  ;;  %614 = vst [vmem:[#allocation1 + $0x22] ss:$4 sm:$0xff] %v459_v2 }
  0xc2   : > { %880 = vst [vmem:[%s1404_s13 + $0xd0] sm:$0xff] %v848_v61  ;;  %v826_v4 = vadd.f32 %v1391_v42, %v749_v1  ;;  %v834_v57 = vadd.f32 %v1391_v42, %v769_v7  ;;  %v468_v61 = vperm.slane %v404_v47, 0 }
  0xc3   : > { %615 = vst [vmem:[#allocation1 + $0x23] ss:$4 sm:$0xff] %v460_v6 }
  0xc4   : > { %873 = vst [vmem:[%s1404_s13 + $0x98] sm:$0xff] %v841_v56 }
  0xc5   : > { %858 = vst [vmem:[%s1404_s13 + $0x20] sm:$0xff] %v826_v4 }
  0xc6   : > { %v788_v16 = vpop.f32.mrf.mxu2  ;;  %866 = vst [vmem:[%s1404_s13 + $0x60] sm:$0xff] %v834_v57  ;;  %v808_v22 = vpop.f32.mrf.mxu3 }
  0xc7   : > { %v789_v18 = vadd.f32 %v788_v16, %v1382_v39  ;;  %v750_v19 = vpop.f32.mrf.mxu0  ;;  %v770_v15 = vpop.f32.mrf.mxu1  ;;  %629 = vst [vmem:[#allocation1 + $0x1] ss:$4 sm:$0xff] %v462_v17 }
  0xc8   : > { %v751_v23 = vadd.f32 %v750_v19, %v1343_v33  ;;  %630 = vst [vmem:[#allocation1 + $0x2] ss:$4 sm:$0xff] %v463_v60  ;;  %v771_v24 = vadd.f32 %v770_v15, %v1363_v13 }
  0xc9   : > { %v842_v54 = vadd.f32 %v1391_v42, %v789_v18  ;;  %631 = vst [vmem:[#allocation1 + $0x3] ss:$4 sm:$0xff] %v464_v21 }
  0xca   : > { %v617_v25 = vld.sshfl [vmem:[#allocation1 + $0x20] sm:$0xff pattern:$0x73625140]  ;;  %v827_v30 = vadd.f32 %v1391_v42, %v751_v23  ;;  %v835_v33 = vadd.f32 %v1391_v42, %v771_v24 }
  0xcb   : > { %874 = vst [vmem:[%s1404_s13 + $0xa0] sm:$0xff] %v842_v54  ;;  %v801_v39 = vadd.f32 %v1429_v20, %v617_v25  ;;  %v401_v20 = vrot.slane %v1457_v55, 4 }
  0xcc   : > { %622 = vst [vmem:[#allocation1 + $0x20] ss:$4 sm:$0xff] %v457_v36 }
  0xcd   : > { %623 = vst [vmem:[#allocation1 + $0x21] ss:$4 sm:$0xff] %v458_v41  ;;  %v847_v34 = vadd.f32 %v1391_v42, %v801_v39  ;;  %v465_v44 = vperm.slane %v401_v20, 0 }
  0xce   : > { %v790_v27 = vpop.f32.mrf.mxu2  ;;  %624 = vst [vmem:[#allocation1 + $0x22] ss:$4 sm:$0xff] %v459_v2  ;;  %v810_v38 = vpop.f32.mrf.mxu3 }
  0xcf   : > { %v753_v32 = vpop.f32.mrf.mxu0  ;;  %v773_v37 = vpop.f32.mrf.mxu1  ;;  %625 = vst [vmem:[#allocation1 + $0x23] ss:$4 sm:$0xff] %v460_v6  ;;  %v791_v13 = vadd.f32 %v790_v27, %v1435_v28 }
  0xd0   : > { %879 = vst [vmem:[%s1404_s13 + $0xc8] sm:$0xff] %v847_v34  ;;  %v636_v40 = vld.sshfl [vmem:[#allocation1] sm:$0xff pattern:$0x73625140]  ;;  %v754_v3 = vadd.f32 %v753_v32, %v1339_v29  ;;  %v774_v52 = vadd.f32 %v773_v37, %v1361_v12 }
  0xd1   : > { %859 = vst [vmem:[%s1404_s13 + $0x28] sm:$0xff] %v827_v30  ;;  %v809_v51 = vadd.f32 %v808_v22, %v636_v40  ;;  %v843_v46 = vadd.f32 %v1391_v42, %v791_v13 }
  0xd2   : > { %867 = vst [vmem:[%s1404_s13 + $0x68] sm:$0xff] %v835_v33  ;;  %v828_v29 = vadd.f32 %v1391_v42, %v754_v3  ;;  %v836_v12 = vadd.f32 %v1391_v42, %v774_v52 }
  0xd3   : > { %638 = vst [vmem:[#allocation1] ss:$4 sm:$0xff] %v461_v31  ;;  %v850_v35 = vadd.f32 %v1391_v42, %v809_v51 }
  0xd4   : > { %639 = vst [vmem:[#allocation1 + $0x1] ss:$4 sm:$0xff] %v462_v17 }
  0xd5   : > { %640 = vst [vmem:[#allocation1 + $0x2] ss:$4 sm:$0xff] %v463_v60 }
  0xd6   : > { %v793_v28 = vpop.f32.mrf.mxu2  ;;  %v627_v49 = vld.sshfl [vmem:[#allocation1 + $0x20] sm:$0xff pattern:$0x73625140]  ;;  %641 = vst [vmem:[#allocation1 + $0x3] ss:$4 sm:$0xff] %v464_v21 }
  0xd7   : > { %v755_v48 = vpop.f32.mrf.mxu0  ;;  %v806_v50 = vadd.f32 %v1460_v59, %v627_v49  ;;  %882 = vst [vmem:[%s1404_s13 + $0xe0] sm:$0xff] %v850_v35  ;;  %v794_v31 = vadd.f32 %v793_v28, %v1418_v5  ;;  %v775_v36 = vpop.f32.mrf.mxu1 }
  0xd8   : > { %875 = vst [vmem:[%s1404_s13 + $0xa8] sm:$0xff] %v843_v46  ;;  %v756_v62 = vadd.f32 %v755_v48, %v1350_v45  ;;  %v813_v59 = vpop.f32.mrf.mxu3  ;;  %v776_v5 = vadd.f32 %v775_v36, %v1372_v26 }
  0xd9   : > { %v849_v55 = vadd.f32 %v1391_v42, %v806_v50  ;;  %632 = vst [vmem:[#allocation1 + $0x20] ss:$4 sm:$0xff] %v465_v44  ;;  %v844_v63 = vadd.f32 %v1391_v42, %v794_v31 }
  0xda   : > { %633 = vst [vmem:[#allocation1 + $0x21] ss:$4 sm:$0xff] %v466_v11  ;;  %v829_v41 = vadd.f32 %v1391_v42, %v756_v62  ;;  %v837_v6 = vadd.f32 %v1391_v42, %v776_v5 }
  0xdb   : > { %881 = vst [vmem:[%s1404_s13 + $0xd8] sm:$0xff] %v849_v55 }
  0xdc   : > { %634 = vst [vmem:[#allocation1 + $0x22] ss:$4 sm:$0xff] %v467_v58 }
  0xdd   : > { %635 = vst [vmem:[#allocation1 + $0x23] ss:$4 sm:$0xff] %v468_v61  ;;  %v646_v45 = vld.sshfl [vmem:[#allocation1] sm:$0xff pattern:$0x73625140] }
  0xde   : > { %v795_v0 = vpop.f32.mrf.mxu2  ;;  %860 = vst [vmem:[%s1404_s13 + $0x30] sm:$0xff] %v828_v29  ;;  %v814_v2 = vadd.f32 %v813_v59, %v646_v45 }
  0xdf   : > { %v796_v1 = vadd.f32 %v795_v0, %v1470_v8  ;;  %868 = vst [vmem:[%s1404_s13 + $0x70] sm:$0xff] %v836_v12 }
  0xe0   : > { %876 = vst [vmem:[%s1404_s13 + $0xb0] sm:$0xff] %v844_v63  ;;  %v852_v26 = vadd.f32 %v1391_v42, %v814_v2  ;;  %v815_v4 = vpop.f32.mrf.mxu3 }
  0xe1   : > { %v845_v7 = vadd.f32 %v1391_v42, %v796_v1  ;;  %861 = vst [vmem:[%s1404_s13 + $0x38] sm:$0xff] %v829_v41 }
  0xe2   : > { %884 = vst [vmem:[%s1404_s13 + $0xf0] sm:$0xff] %v852_v26 }
  0xe3   : > { %869 = vst [vmem:[%s1404_s13 + $0x78] sm:$0xff] %v837_v6 }
  0xe4   : > { %v637_v9 = vld.sshfl [vmem:[#allocation1 + $0x20] sm:$0xff pattern:$0x73625140]  ;;  %877 = vst [vmem:[%s1404_s13 + $0xb8] sm:$0xff] %v845_v7 }
  0xe5   : > { %v811_v56 = vadd.f32 %v810_v38, %v637_v9  ;;  %642 = vst [vmem:[#allocation1 + $0x20] ss:$4 sm:$0xff] %v465_v44 }
  0xe6   : > { %643 = vst [vmem:[#allocation1 + $0x21] ss:$4 sm:$0xff] %v466_v11 }
  0xe7   : > { %v851_v8 = vadd.f32 %v1391_v42, %v811_v56  ;;  %644 = vst [vmem:[#allocation1 + $0x22] ss:$4 sm:$0xff] %v467_v58 }
  0xe8   : > { %645 = vst [vmem:[#allocation1 + $0x23] ss:$4 sm:$0xff] %v468_v61 }
  0xe9   : > { %883 = vst [vmem:[%s1404_s13 + $0xe8] sm:$0xff] %v851_v8 }
  0xef   : > { %v647_v10 = vld.sshfl [vmem:[#allocation1 + $0x20] sm:$0xff pattern:$0x73625140] }
  0xf0   : > { %v816_v57 = vadd.f32 %v815_v4, %v647_v10 }
  0xf2   : > { %v853_v14 = vadd.f32 %v1391_v42, %v816_v57 }
  0xf4   : > { %885 = vst [vmem:[%s1404_s13 + $0xf8] sm:$0xff] %v853_v14 }
  0xf5 PF: > { %s17_s20 = sadd.s32 1, %s1173_s20   ;;  %s1558_s15 = smov %s1157_s16 }
  0xf6   : > { %p14_p1 = scmp.ge.s32.totalorder %s17_s20, 4   ;;  %s1559_s16 = smov %s1161_s17 }
  0xf7   : > { %s1560_s17 = smov %s1251_s27  ;;  %s1561_s18 = smov %s1169_s19 }
  0xf8   : > { %s1562_s19 = smov %s1564_s22  ;;  %16 = sbr.rel (!%p14_p1) target bundleno = 4 (0x4), region = 86 }
  0xfd   :  { %911 = vsyncpa [#allocation3], 1 }
  0xfe   :  { %913 = vsyncpa [#allocation3 + $0x1], 1 }

// kernel: pyramid_features.11
= control target key start
LH: loop header
LB: loop body
LE: loop exit
PB: predicated region body
PF: predicated region fallthrough
CT: control target
= control target key end

     0   :  { %8 = vsyncpa [#allocation3], 0  ;;  %s3497_s0 = inlined_call_operand.vmem [shape: bf16[2,1,10,10,128], index: 0, kind: input, shape index: {}]   ;;  %s3498_s1 = inlined_call_operand.vmem [shape: bf16[9,128,128], index: 1, kind: input, shape index: {}]   ;;  %s3499_s2 = inlined_call_operand.vmem [shape: f32[1,128], index: 2, kind: input, shape index: {}]   ;;  %s3500_s3 = inlined_call_operand.hbm [shape: f32[2,1,64,128], index: 3, kind: output, shape index: {}]  }
   0x1   :  { %10 = vsyncpa [#allocation3 + $0x1], 0  ;;  %s2788_s12 = smov 0   ;;  %s2790_s13 = smov 0  }
   0x2   :  { %s2792_s14 = smov 0   ;;  %s2794_s15 = smov 0  }
   0x3   :  { %s2796_s16 = smov 0   ;;  %s2798_s17 = smov 0  }
   0x4 LB: > { %s1962_s18 = sadd.s32 4294967295, %s2764_s17   ;;  %s1963_s19 = sadd.s32 4294967294, %s2764_s17   ;;  %s2764_s17 = sphi %s2798_s17, %s16_s17   ;;  %s2760_s16 = sphi %s2796_s16, %s3511_s16   ;;  %s2756_s15 = sphi %s2794_s15, %s3510_s15   ;;  %s2752_s14 = sphi %s2792_s14, %s3509_s14   ;;  %s2748_s13 = sphi %s2790_s13, %s3508_s13   ;;  %s2744_s12 = sphi %s2788_s12, %s3507_s12  }
   0x5   : > { %s28_s20 = sadd.s32 1, %s2760_s16  ;;  %s107_s21 = sadd.s32 1, %s2752_s14 }
   0x6   : > { %p30_p0 = scmp.ge.s32.totalorder %s28_s20, 2  ;;  %p117_p1 = scmp.ne.s32.totalorder %s2752_s14, %s2748_s13 }
   0x7   : > { %p118_p2 = scmp.eq.s32.totalorder %s1962_s18, 1  ;;  %p123_p3 = scmp.ne.s32.totalorder %s2748_s13, %s2744_s12 }
   0x8   : > { %s3513_s20 = smov (%p30_p0, %s28_s20), 0  ;;  %p124_p5 = scmp.eq.s32.totalorder %s1963_s19, 1 }
   0x9   : > { %p2828_p4 = por %p118_p2, %p117_p1  ;;  %s102_s23 = ssub.s32 %s2760_s16, %s3513_s20 }
   0xa   : > { %p1966_p6 = scmp.ge.s32.totalorder %s2764_s17, 1  ;;  %p105_p7 = scmp.eq.s32.totalorder %s102_s23, 0 }
   0xb   : > { %p2835_p8 = por %p124_p5, %p123_p3  ;;  %p160_p9 = scmp.lt.s32.totalorder %s2764_s17, 3 }
   0xc   : > { %s2841_s25 = scalar_select %p105_p7, %s2752_s14, %s107_s21  }
   0xd   : > { %p161_p10 = pnand %p1966_p6, %p160_p9 }
   0xe   : > { %p188_p11 = scmp.lt.s32.totalorder (!%p161_p10), %s2756_s15, 1  ;;  %s2610_s7 = sshll.u32 (!%p161_p10), %s2756_s15, 6 }
   0xf   : > { %164 = sbr.rel (%p161_p10) target bundleno = 344 (0x158), region = 32  ;;  %s2706_s27 = scalar_lea.hbm (!%p161_p10), %s3500_s3, 128 }
  0x14   : > { %v2545_v0 = vld [vmem:[%s3498_s1 + $0x78] sm:$0xff]  ;;  %v2544_v2 = vld [vmem:[%s3498_s1 + $0x70] sm:$0xff]  ;;  %s189_s5 = scalar_select %p188_p11, %s2756_s15, 1  ;;  %v2543_v6 = vld [vmem:[%s3498_s1 + $0x68] sm:$0xff]  ;;  %vm229_vm0 = vsmask.f32 3328 }
  0x15   : > { %v2553_v1 = vld [vmem:[%s3498_s1 + $0xb8] sm:$0xff]  ;;  %2611 = vmatpush.bf16.msra.mxu1 %v2545_v0  ;;  %425 = vmatpush.bf16.msra.mxu0 %v2545_v0  ;;  %v2552_v3 = vld [vmem:[%s3498_s1 + $0xb0] sm:$0xff]  ;;  %v2551_v7 = vld [vmem:[%s3498_s1 + $0xa8] sm:$0xff]  ;;  %vm230_vm1 = vsmask.f32 7440  ;;  %vm579_vm2 = vcmask 1042432  }
  0x16   : > { %695 = vmatpush.bf16.msra.mxu2 %v2553_v1  ;;  %v2565_v4 = vld [vmem:[%s3498_s1 + $0xf8] sm:$0xff]  ;;  %s2627_s10 = smul.u32 80, %s189_s5  ;;  %v2564_v5 = vld [vmem:[%s3498_s1 + $0xf0] sm:$0xff]  ;;  %v2542_v11 = vld [vmem:[%s3498_s1 + $0x60] sm:$0xff]  ;;  %vm580_vm3 = vcmask 1046532  }
  0x17   : > { %830 = vmatpush.bf16.msra.mxu3 %v2565_v4  ;;  %v2550_v16 = vld [vmem:[%s3498_s1 + $0xa0] sm:$0xff]  ;;  %v2563_v17 = vld [vmem:[%s3498_s1 + $0xe8] sm:$0xff]  ;;  %v2541_v29 = vld [vmem:[%s3498_s1 + $0x58] sm:$0xff] }
  0x18   : > { %s2872_s29 = scalar_lea.vmem %s3497_s0, %s2627_s10  ;;  %v2562_v34 = vld [vmem:[%s3498_s1 + $0xe0] sm:$0xff]  ;;  %v2549_v44 = vld [vmem:[%s3498_s1 + $0x98] sm:$0xff]  ;;  %vm2910_vm4 = vmor %vm229_vm0, %vm230_vm1  ;;  %s1876_s10 = scalar_lea.hbm %s3500_s3, %s2610_s7 }
  0x19   : > { %2612 = vmatpush.bf16.msra.mxu1 %v2544_v2  ;;  %426 = vmatpush.bf16.msra.mxu0 %v2544_v2  ;;  %v201_v8 = vld [vmem:[%s2872_s29 + $0x20] sm:$0xf]  ;;  %v202_v9 = vld [vmem:[%s2872_s29 + $0x28] sm:$0xf]  ;;  %v2877_v10 = vld [vmem:[%s2872_s29 + $0x24] sm:$0x1] }
  0x1a   : > { %696 = vmatpush.bf16.msra.mxu2 %v2552_v3  ;;  %v2883_v12 = vld [vmem:[%s2872_s29 + $0x2c] sm:$0x1]  ;;  %v289_v13 = vshrl.u32 %v201_v8, 16  ;;  %v292_v14 = vshll.u32 %v201_v8, 16  ;;  %v303_v15 = vshrl.u32 %v202_v9, 16  ;;  %v306_v18 = vshll.u32 %v202_v9, 16  ;;  %vm2919_vm5 = vmor %vm579_vm2, %vm580_vm3 }
  0x1b   : > { %831 = vmatpush.bf16.msra.mxu3 %v2564_v5  ;;  %v197_v19 = vld [vmem:[%s2872_s29] sm:$0xf]  ;;  %v298_v22 = vshll.u32 %v2877_v10, 16  ;;  %v198_v24 = vld [vmem:[%s2872_s29 + $0x8] sm:$0xf]  ;;  %v312_v26 = vshll.u32 %v2883_v12, 16 }
  0x1c   : > { %v291_v20 = vrot.slane %v289_v13, 4  ;;  %v294_v21 = vrot.slane %v292_v14, 5  ;;  %v305_v23 = vrot.slane %v303_v15, 4  ;;  %v308_v25 = vrot.slane %v306_v18, 5  ;;  %v221_v27 = vld [vmem:[%s2872_s29 + $0x4] sm:$0x1] }
  0x1d   : > { %2613 = vmatpush.bf16.msra.mxu1 %v2543_v6  ;;  %427 = vmatpush.bf16.msra.mxu0 %v2543_v6  ;;  %v222_v28 = vld [vmem:[%s2872_s29 + $0xc] sm:$0x1]  ;;  %v233_v31 = vshrl.u32 %v197_v19, 16  ;;  %v236_v32 = vshll.u32 %v197_v19, 16  ;;  %v242_v35 = vshll.u32 %v221_v27, 16  ;;  %v247_v36 = vshrl.u32 %v198_v24, 16 }
  0x1e   : > { %697 = vmatpush.bf16.msra.mxu2 %v2551_v7  ;;  %v295_v30 = vor.u32 %v294_v21, %v291_v20  ;;  %v309_v33 = vor.u32 %v308_v25, %v305_v23  ;;  %v250_v37 = vshll.u32 %v198_v24, 16  ;;  %v555_v38 = vld [vmem:[%s2872_s29] sm:$0xe]  ;;  %v300_v39 = vrot.slane %v298_v22, 5  ;;  %v556_v43 = vld [vmem:[%s2872_s29 + $0x8] sm:$0xe] }
  0x1f   : > { %832 = vmatpush.bf16.msra.mxu3 %v2563_v17  ;;  %v235_v40 = vrot.slane %v233_v31, 4  ;;  %v238_v41 = vrot.slane %v236_v32, 5  ;;  %v256_v42 = vshll.u32 %v222_v28, 16  ;;  %v314_v46 = vrot.slane %v312_v26, 5  ;;  %v2561_v56 = vld [vmem:[%s3498_s1 + $0xd8] sm:$0xff]  ;;  %v2540_v60 = vld [vmem:[%s3498_s1 + $0x50] sm:$0xff] }
  0x20   : > { %v296_v45 = vrot.slane %v295_v30, 4  ;;  %v249_v47 = vrot.slane %v247_v36, 4  ;;  %v252_v48 = vrot.slane %v250_v37, 5  ;;  %v310_v50 = vrot.slane %v309_v33, 4  ;;  %v203_v59 = vld [vmem:[%s2872_s29 + $0x30] sm:$0xf] }
  0x21   : > { %2614 = vmatpush.bf16.msra.mxu1 %v2542_v11  ;;  %428 = vmatpush.bf16.msra.mxu0 %v2542_v11  ;;  %v239_v51 = vor.u32 %v238_v41, %v235_v40  ;;  %v2065_v52 = vrot.slane %v555_v38, 9  ;;  %v584_v53 = vrot.slane %v221_v27, 5  ;;  %v244_v54 = vrot.slane %v242_v35, 5  ;;  %v2548_v0 = vld [vmem:[%s3498_s1 + $0x90] sm:$0xff]  ;;  %v204_v3 = vld [vmem:[%s2872_s29 + $0x38] sm:$0xf] }
  0x22   : > { %698 = vmatpush.bf16.msra.mxu2 %v2550_v16  ;;  %v253_v55 = vor.u32 %v252_v48, %v249_v47  ;;  %v2066_v58 = vrot.slane %v556_v43, 9  ;;  %v258_v62 = vrot.slane %v256_v42, 5  ;;  %v588_v63 = vrot.slane %v222_v28, 5  ;;  %v199_v7 = vld [vmem:[%s2872_s29 + $0x10] sm:$0xf]  ;;  %v2539_v14 = vld [vmem:[%s3498_s1 + $0x48] sm:$0xff] }
  0x23   : > { %833 = vmatpush.bf16.msra.mxu3 %v2562_v34  ;;  %v240_v61 = vrot.slane %v239_v51, 4  ;;  %v301_v1 = vsel %vm2910_vm4, %v296_v45, %v300_v39  ;;  %v315_v4 = vsel %vm2910_vm4, %v310_v50, %v314_v46  ;;  %v585_v5 = vsel %vm2919_vm5, %v2065_v52, %v584_v53  ;;  %v2560_v11 = vld [vmem:[%s3498_s1 + $0xd0] sm:$0xff]  ;;  %v2547_v19 = vld [vmem:[%s3498_s1 + $0x88] sm:$0xff]  ;;  %v200_v22 = vld [vmem:[%s2872_s29 + $0x18] sm:$0xf]  ;;  %s1879_s18 = sshll.u32 %s1876_s10, 4  ;;  %s1880_s18 = int_to_ptr.hbm [resolvable:$true] %s1879_s18 }
  0x24   : > { %v254_v2 = vrot.slane %v253_v55, 4  ;;  %v317_v6 = vshrl.u32 %v203_v59, 16  ;;  %v589_v9 = vsel %vm2919_vm5, %v2066_v58, %v588_v63  ;;  %v320_v13 = vshll.u32 %v203_v59, 16  ;;  %v2538_v24 = vld [vmem:[%s3498_s1 + $0x40] sm:$0xff]  ;;  %v2559_v31 = vld [vmem:[%s3498_s1 + $0xc8] sm:$0xff]  ;;  %v2573_v45 = vld [vmem:[%s3498_s1 + $0x138] sm:$0xff] }
  0x25   : > { %2615 = vmatpush.bf16.msra.mxu1 %v2541_v29  ;;  %429 = vmatpush.bf16.msra.mxu0 %v2541_v29  ;;  %v245_v8 = vsel %vm2910_vm4, %v240_v61, %v244_v54  ;;  %v2948_v15 = vunpack.c.l.b16 %v301_v1  ;;  %v331_v17 = vshrl.u32 %v204_v3, 16  ;;  %v366_v18 = vunpack.c.l.b16 %v315_v4  ;;  %v2537_v29 = vld [vmem:[%s3498_s1 + $0x38] sm:$0xff]  ;;  %v2966_v32 = vld [vmem:[%s2872_s29 + $0x34] sm:$0x1]  ;;  %v2546_v42 = vld [vmem:[%s3498_s1 + $0x80] sm:$0xff]  ;;  %s2700_s19 = sshra.s32 %s1880_s18, 4  ;;  %s2701_s19 = int_to_ptr.hbm [resolvable:$true] %s2700_s19 }
  0x26   : > { %699 = vmatpush.bf16.msra.mxu2 %v2549_v44  ;;  %v259_v16 = vsel %vm2910_vm4, %v254_v2, %v258_v62  ;;  %v631_v20 = vunpack.c.l.b16 %v585_v5  ;;  %v334_v21 = vshll.u32 %v204_v3, 16  ;;  %v261_v23 = vshrl.u32 %v199_v7, 16  ;;  %v2969_v36 = vld [vmem:[%s2872_s29 + $0x3c] sm:$0x1]  ;;  %v2976_v43 = vld [vmem:[%s2872_s29 + $0x14] sm:$0x1]  ;;  %p2707_p1 = scmp.lt.s32.totalorder %s2701_s19, %s3500_s3 }
  0x27   : > { %834 = vmatpush.bf16.msra.mxu3 %v2561_v56  ;;  %v361_v25 = vunpack.c.l.b16 %v245_v8  ;;  %v632_v26 = vunpack.c.l.b16 %v589_v9  ;;  %v319_v27 = vrot.slane %v317_v6, 4  ;;  %v264_v28 = vshll.u32 %v199_v7, 16  ;;  %v2979_v44 = vld [vmem:[%s2872_s29 + $0x1c] sm:$0x1]  ;;  %v2536_v52 = vld [vmem:[%s3498_s1 + $0x30] sm:$0xff]  ;;  %v2558_v58 = vld [vmem:[%s3498_s1 + $0xc0] sm:$0xff] }
  0x28   : > { %v362_v30 = vunpack.c.l.b16 %v259_v16  ;;  %v322_v33 = vrot.slane %v320_v13, 5  ;;  %v333_v34 = vrot.slane %v331_v17, 4  ;;  %v336_v35 = vrot.slane %v334_v21, 5  ;;  %v2593_v48 = vld [vmem:[%s3498_s1 + $0x1b8] sm:$0xff]  ;;  %v2147_v63 = vld [vmem:[%s2872_s29 + $0x8] sm:$0xf] }
  0x29   : > { %2616 = vmatpush.bf16.msra.mxu1 %v2540_v60  ;;  %430 = vmatpush.bf16.msra.mxu0 %v2540_v60  ;;  %v263_v37 = vrot.slane %v261_v23, 4  ;;  %v266_v38 = vrot.slane %v264_v28, 5  ;;  %v275_v39 = vshrl.u32 %v200_v22, 16  ;;  %v278_v40 = vshll.u32 %v200_v22, 16  ;;  %v2572_v1 = vld [vmem:[%s3498_s1 + $0x130] sm:$0xff]  ;;  %v2601_v2 = vld [vmem:[%s3498_s1 + $0x1f8] sm:$0xff] }
  0x2a   : > { %700 = vmatpush.bf16.msra.mxu2 %v2548_v0  ;;  %v371_v41 = vpack.c.b16 %v366_v18, %v2948_v15  ;;  %v639_v46 = vpack.c.b16 %v632_v26, %v631_v20  ;;  %v326_v47 = vshll.u32 %v2966_v32, 16  ;;  %v369_v53 = vpack.c.b16 %v362_v30, %v361_v25  ;;  %v2554_v0 = vld [vmem:[%s2872_s29 + $0xc] sm:$0xf0]  ;;  %v558_v5 = vld [vmem:[%s2872_s29 + $0x18] sm:$0xe]  ;;  %v2571_v25 = vld [vmem:[%s3498_s1 + $0x128] sm:$0xff] }
  0x2b   : > { %835 = vmatpush.bf16.msra.mxu3 %v2560_v11  ;;  %v277_v50 = vrot.slane %v275_v39, 4  ;;  %v280_v51 = vrot.slane %v278_v40, 5  ;;  %v323_v54 = vor.u32 %v322_v33, %v319_v27  ;;  %v337_v55 = vor.u32 %v336_v35, %v333_v34  ;;  %v557_v4 = vld [vmem:[%s2872_s29 + $0x10] sm:$0xe]  ;;  %v2193_v13 = vld [vmem:[%s2872_s29 + $0x8] sm:$0xf] }
  0x2c   : > { %v340_v56 = vshll.u32 %v2969_v36, 16  ;;  %v267_v59 = vor.u32 %v266_v38, %v263_v37  ;;  %v270_v60 = vshll.u32 %v2976_v43, 16  ;;  %v284_v62 = vshll.u32 %v2979_v44, 16  ;;  %v2592_v6 = vld [vmem:[%s3498_s1 + $0x1b0] sm:$0xff]  ;;  %v2591_v26 = vld [vmem:[%s3498_s1 + $0x1a8] sm:$0xff]  ;;  %v2534_v37 = vld [vmem:[%s3498_s1 + $0x20] sm:$0xff] }
  0x2d   : > { %2617 = vmatpush.bf16.msra.mxu1 %v2539_v14  ;;  %431 = vmatpush.bf16.msra.mxu0 %v2539_v14  ;;  %v281_v61 = vor.u32 %v280_v51, %v277_v50  ;;  %v328_v3 = vrot.slane %v326_v47, 5  ;;  %v324_v7 = vrot.slane %v323_v54, 4  ;;  %v338_v8 = vrot.slane %v337_v55, 4  ;;  %v2195_v18 = vld [vmem:[%s2872_s29 + $0x10] sm:$0xf]  ;;  %v2599_v40 = vld [vmem:[%s3498_s1 + $0x1e8] sm:$0xff] }
  0x2e   : > { %701 = vmatpush.bf16.msra.mxu2 %v2547_v19  ;;  %v342_v9 = vrot.slane %v340_v56, 5  ;;  %v2148_v11 = vor.u32 %v2554_v0, %v2147_v63  ;;  %v268_v14 = vrot.slane %v267_v59, 4  ;;  %v272_v15 = vrot.slane %v270_v60, 5  ;;  %v2535_v19 = vld [vmem:[%s3498_s1 + $0x28] sm:$0xff]  ;;  %v2533_v55 = vld [vmem:[%s3498_s1 + $0x18] sm:$0xff]  ;;  %s2702_s21 = scalar_lea.hbm %s2701_s19, 64 }
  0x2f   : > { %836 = vmatpush.bf16.msra.mxu3 %v2559_v31  ;;  %v282_v16 = vrot.slane %v281_v61, 4  ;;  %v286_v17 = vrot.slane %v284_v62, 5  ;;  %v2067_v20 = vrot.slane %v557_v4, 9  ;;  %v592_v21 = vrot.slane %v2976_v43, 5  ;;  %v2570_v43 = vld [vmem:[%s3498_s1 + $0x120] sm:$0xff]  ;;  %p2703_p12 = scmp.ne.s32.totalorder %s2701_s19, %s2702_s21  ;;  %p2708_p2 = scmp.lt.s32.totalorder %s2706_s27, %s2702_s21 }
  0x30   : > { %v2068_v22 = vrot.slane %v558_v5, 9  ;;  %v596_v23 = vrot.slane %v2979_v44, 5  ;;  %v329_v27 = vsel %vm2910_vm4, %v324_v7, %v328_v3  ;;  %v343_v28 = vsel %vm2910_vm4, %v338_v8, %v342_v9  ;;  %v2590_v44 = vld [vmem:[%s3498_s1 + $0x1a0] sm:$0xff]  ;;  %v3051_v47 = vld [vmem:[%s2872_s29 + $0xc] sm:$0x1]  ;;  %v2568_v7 = vld [vmem:[%s3498_s1 + $0x110] sm:$0xff] }
  0x31   : > { %2618 = vmatpush.bf16.msra.mxu1 %v2538_v24  ;;  %432 = vmatpush.bf16.msra.mxu0 %v2538_v24  ;;  %v2600_v24 = vld [vmem:[%s3498_s1 + $0x1f0] sm:$0xff]  ;;  %v887_v30 = vshll.u32 %v2193_v13, 16  ;;  %v273_v31 = vsel %vm2910_vm4, %v268_v14, %v272_v15  ;;  %v287_v33 = vsel %vm2910_vm4, %v282_v16, %v286_v17  ;;  %v898_v34 = vshrl.u32 %v2195_v18, 16  ;;  %v2151_v62 = vld [vmem:[%s2872_s29 + $0x18] sm:$0xf]  ;;  %p2704_p13 = pnand %p2703_p12, %p2828_p4  ;;  %p2709_p3 = por %p2708_p2, %p2707_p1 }
  0x32   : > { %702 = vmatpush.bf16.msra.mxu2 %v2546_v42  ;;  %v901_v35 = vshll.u32 %v2195_v18, 16  ;;  %v593_v38 = vsel %vm2919_vm5, %v2067_v20, %v592_v21  ;;  %v597_v39 = vsel %vm2919_vm5, %v2068_v22, %v596_v23  ;;  %v368_v42 = vunpack.c.l.b16 %v343_v28  ;;  %v3057_v56 = vld [vmem:[%s2872_s29 + $0x14] sm:$0x1]  ;;  %v2555_v63 = vld [vmem:[%s2872_s29 + $0x1c] sm:$0xf0]  ;;  %v2589_v17 = vld [vmem:[%s3498_s1 + $0x198] sm:$0xff] }
  0x33   : > { %837 = vmatpush.bf16.msra.mxu3 %v2558_v58  ;;  %v889_v50 = vrot.slane %v887_v30, 5  ;;  %v633_v51 = vunpack.c.l.b16 %v593_v38  ;;  %v2569_v58 = vld [vmem:[%s3498_s1 + $0x118] sm:$0xff]  ;;  %v893_v59 = vshll.u32 %v3051_v47, 16  ;;  %v907_v4 = vshll.u32 %v3057_v56, 16  ;;  %v560_v5 = vld [vmem:[%s2872_s29 + $0x28] sm:$0xe]  ;;  %p2705_p0 = pneg %p2704_p13 }
  0x34   : > { %443 = vmatmul.bf16.vlgmr.msra.gmra.mxu1 %v371_v41  ;;  %433 = vmatmul.bf16.vlgmr.msra.gmra.mxu0 %v369_v53  ;;  %v367_v41 = vunpack.c.l.b16 %v329_v27  ;;  %v900_v53 = vrot.slane %v898_v34, 4  ;;  %v903_v54 = vrot.slane %v901_v35, 5  ;;  %v2152_v8 = vor.u32 %v2555_v63, %v2151_v62  ;;  %v2197_v20 = vld [vmem:[%s2872_s29 + $0x18] sm:$0xf]  ;;  %v2598_v21 = vld [vmem:[%s3498_s1 + $0x1e0] sm:$0xff]  ;;  %v2588_v23 = vld [vmem:[%s3498_s1 + $0x190] sm:$0xff] }
  0x35   : > { %526 = vmatpush.bf16.msrb.mxu1 %v2537_v29  ;;  %1076 = vmatpush.bf16.msrb.mxu0 %v2573_v45  ;;  %v884_v29 = vshrl.u32 %v2193_v13, 16  ;;  %v363_v45 = vunpack.c.l.b16 %v273_v31  ;;  %v895_v9 = vrot.slane %v893_v59, 5  ;;  %v600_v14 = vrot.slane %v2877_v10, 5  ;;  %v2531_v10 = vld [vmem:[%s3498_s1 + $0x8] sm:$0xff]  ;;  %v2199_v22 = vld [vmem:[%s2872_s29 + $0x20] sm:$0xf]  ;;  %p2710_p5 = pnand %p2709_p3, %p2705_p0 }
  0x36   : > { %1385 = vmatpush.bf16.msrb.mxu2 %v2593_v48  ;;  %838 = vmatmul.bf16.vlgmr.msra.gmra.mxu3 %v2148_v11  ;;  %v372_v60 = vpack.c.b16 %v368_v42, %v367_v41  ;;  %v904_v3 = vor.u32 %v903_v54, %v900_v53  ;;  %v2070_v15 = vrot.slane %v560_v5, 9  ;;  %v604_v16 = vrot.slane %v2883_v12, 5  ;;  %v2567_v12 = vld [vmem:[%s3498_s1 + $0x108] sm:$0xff]  ;;  %v2530_v34 = vld [vmem:[%s3498_s1] sm:$0xff]  ;;  %v2580_v53 = vld [vmem:[%s3498_s1 + $0x170] sm:$0xff] }
  0x37   : > { %703 = vmatmul.bf16.vlgmr.msra.gmra.mxu2 %v639_v46  ;;  %1631 = vmatpush.bf16.msrb.mxu3 %v2601_v2  ;;  %v364_v46 = vunpack.c.l.b16 %v287_v33  ;;  %v886_v48 = vrot.slane %v884_v29, 4  ;;  %v912_v28 = vshrl.u32 %v2197_v20, 16  ;;  %v915_v30 = vshll.u32 %v2197_v20, 16  ;;  %v2019_v35 = vld [vmem:[%s2872_s29] sm:$0xf] }
  0x38   : > { %v905_v18 = vrot.slane %v904_v3, 4  ;;  %v605_v27 = vsel %vm2919_vm5, %v2070_v15, %v604_v16  ;;  %v926_v31 = vshrl.u32 %v2199_v22, 16  ;;  %v929_v33 = vshll.u32 %v2199_v22, 16  ;;  %v2566_v38 = vld [vmem:[%s3498_s1 + $0x100] sm:$0xff]  ;;  %v2556_v62 = vld [vmem:[%s2872_s29 + $0x2c] sm:$0xf0] }
  0x39   : > { %527 = vmatpush.bf16.msrb.mxu1 %v2536_v52  ;;  %1077 = vmatpush.bf16.msrb.mxu0 %v2572_v1  ;;  %v634_v52 = vunpack.c.l.b16 %v597_v39  ;;  %v370_v61 = vpack.c.b16 %v364_v46, %v363_v45  ;;  %v890_v0 = vor.u32 %v889_v50, %v886_v48  ;;  %v559_v1 = vld [vmem:[%s2872_s29 + $0x20] sm:$0xe]  ;;  %v2526_v39 = vld [vmem:[%s2872_s29 + $0x4] sm:$0xf0]  ;;  %v3121_v45 = vld [vmem:[%s3498_s1 + $0x238] sm:$0xff]  ;;  %v914_v48 = vrot.slane %v912_v28, 4 }
  0x3a   : > { %1386 = vmatpush.bf16.msrb.mxu2 %v2592_v6  ;;  %v2532_v6 = vld [vmem:[%s3498_s1 + $0x10] sm:$0xff]  ;;  %v2069_v11 = vrot.slane %v559_v1, 9  ;;  %v3124_v46 = vld [vmem:[%s2872_s29 + $0x24] sm:$0x1]  ;;  %v917_v50 = vrot.slane %v915_v30, 5  ;;  %v2020_v54 = vor.u32 %v2526_v39, %v2019_v35  ;;  %v608_v20 = vrot.slane %v2966_v32, 5 }
  0x3b   : > { %1632 = vmatpush.bf16.msrb.mxu3 %v2600_v24  ;;  %v640_v2 = vpack.c.b16 %v634_v52, %v633_v51  ;;  %v891_v13 = vrot.slane %v890_v0, 4  ;;  %v2597_v24 = vld [vmem:[%s3498_s1 + $0x1d8] sm:$0xff]  ;;  %v928_v51 = vrot.slane %v926_v31, 4  ;;  %v931_v52 = vrot.slane %v929_v33, 5  ;;  %v3137_v1 = vld [vmem:[%s3498_s1 + $0x230] sm:$0xff]  ;;  %v2586_v22 = vld [vmem:[%s3498_s1 + $0x180] sm:$0xff] }
  0x3c   : > { %v935_v59 = vshll.u32 %v3124_v46, 16  ;;  %v918_v63 = vor.u32 %v917_v50, %v914_v48  ;;  %v2201_v3 = vld [vmem:[%s2872_s29 + $0x28] sm:$0xf]  ;;  %v562_v5 = vld [vmem:[%s2872_s29 + $0x38] sm:$0xe]  ;;  %v3177_v28 = vld [vmem:[%s3498_s1 + $0x220] sm:$0xff] }
  0x3d   : > { %528 = vmatpush.bf16.msrb.mxu1 %v2535_v19  ;;  %1078 = vmatpush.bf16.msrb.mxu0 %v2571_v25  ;;  %v909_v19 = vrot.slane %v907_v4, 5  ;;  %v896_v25 = vsel %vm2910_vm4, %v891_v13, %v895_v9  ;;  %v932_v0 = vor.u32 %v931_v52, %v928_v51  ;;  %v561_v4 = vld [vmem:[%s2872_s29 + $0x30] sm:$0xe]  ;;  %v940_v15 = vshrl.u32 %v2201_v3, 16  ;;  %v2595_v32 = vld [vmem:[%s3498_s1 + $0x1c8] sm:$0xff]  ;;  %v2577_v31 = vld [vmem:[%s3498_s1 + $0x158] sm:$0xff] }
  0x3e   : > { %1387 = vmatpush.bf16.msrb.mxu2 %v2591_v26  ;;  %v601_v26 = vsel %vm2919_vm5, %v2069_v11, %v600_v14  ;;  %v937_v9 = vrot.slane %v935_v59, 5  ;;  %v2203_v11 = vld [vmem:[%s2872_s29 + $0x30] sm:$0xf]  ;;  %v919_v13 = vrot.slane %v918_v63, 4  ;;  %v943_v16 = vshll.u32 %v2201_v3, 16 }
  0x3f   : > { %1633 = vmatpush.bf16.msrb.mxu3 %v2599_v40  ;;  %v910_v29 = vsel %vm2910_vm4, %v905_v18, %v909_v19  ;;  %v1012_v40 = vunpack.c.l.b16 %v896_v25  ;;  %v635_v42 = vunpack.c.l.b16 %v601_v26  ;;  %v933_v14 = vrot.slane %v932_v0, 4  ;;  %v3156_v18 = vld [vmem:[%s3498_s1 + $0x228] sm:$0xff]  ;;  %v3190_v39 = vld [vmem:[%s2872_s29 + $0x34] sm:$0x1]  ;;  %v2395_v51 = vld [vmem:[%s2872_s29 + $0x18] sm:$0xf] }
  0x40   : > { %v1013_v41 = vunpack.c.l.b16 %v910_v29  ;;  %v2071_v19 = vrot.slane %v561_v4, 9  ;;  %v942_v26 = vrot.slane %v940_v15, 4  ;;  %v3187_v33 = vld [vmem:[%s2872_s29 + $0x2c] sm:$0x1]  ;;  %v963_v59 = vshll.u32 %v3190_v39, 16 }
  0x41   : > { %529 = vmatpush.bf16.msrb.mxu1 %v2534_v37  ;;  %1079 = vmatpush.bf16.msrb.mxu0 %v2570_v43  ;;  %v2581_v37 = vld [vmem:[%s3498_s1 + $0x178] sm:$0xff]  ;;  %v636_v43 = vunpack.c.l.b16 %v605_v27  ;;  %v938_v25 = vsel %vm2910_vm4, %v933_v14, %v937_v9  ;;  %v945_v27 = vrot.slane %v943_v16, 5  ;;  %v949_v52 = vshll.u32 %v3187_v33, 16  ;;  %v2557_v63 = vld [vmem:[%s2872_s29 + $0x3c] sm:$0xf0] }
  0x42   : > { %1388 = vmatpush.bf16.msrb.mxu2 %v2590_v44  ;;  %v3116_v44 = vld [vmem:[%s2872_s29 + $0x1c] sm:$0x1]  ;;  %v609_v29 = vsel %vm2919_vm5, %v2071_v19, %v608_v20  ;;  %v2205_v0 = vld [vmem:[%s2872_s29 + $0x38] sm:$0xf]  ;;  %v965_v15 = vrot.slane %v963_v59, 5  ;;  %v2594_v19 = vld [vmem:[%s3498_s1 + $0x1c0] sm:$0xff] }
  0x43   : > { %1634 = vmatpush.bf16.msrb.mxu3 %v2598_v21  ;;  %v2072_v21 = vrot.slane %v562_v5, 9  ;;  %v946_v50 = vor.u32 %v945_v27, %v942_v26  ;;  %v3208_v5 = vld [vmem:[%s2872_s29 + $0x14] sm:$0x1]  ;;  %v2207_v16 = vld [vmem:[%s2872_s29 + $0x40] sm:$0xf]  ;;  %v971_v20 = vshll.u32 %v2205_v0, 16 }
  0x44   : > { %448 = vmatmul.bf16.gmra.mxu1 %v372_v60  ;;  %438 = vmatmul.bf16.gmra.mxu0 %v370_v61  ;;  %v641_v60 = vpack.c.b16 %v636_v43, %v635_v42  ;;  %v2155_v61 = vld [vmem:[%s2872_s29 + $0x28] sm:$0xf]  ;;  %v2527_v42 = vld [vmem:[%s2872_s29 + $0x14] sm:$0xf0]  ;;  %v637_v43 = vunpack.c.l.b16 %v609_v29  ;;  %v3230_v27 = vld [vmem:[%s3498_s1 + $0x210] sm:$0xff] }
  0x45   : > { %530 = vmatpush.bf16.msrb.mxu1 %v2533_v55  ;;  %1080 = vmatpush.bf16.msrb.mxu0 %v2569_v58  ;;  %v1020_v55 = vpack.c.b16 %v1013_v41, %v1012_v40  ;;  %v921_v58 = vshll.u32 %v3116_v44, 16  ;;  %v2393_v40 = vld [vmem:[%s2872_s29 + $0x10] sm:$0xf]  ;;  %v947_v4 = vrot.slane %v946_v50, 4  ;;  %v2257_v29 = vld [vmem:[%s2872_s29 + $0x8] sm:$0xe] }
  0x46   : > { %1389 = vmatpush.bf16.msrb.mxu2 %v2589_v17  ;;  %843 = vmatmul.bf16.gmra.mxu3 %v2152_v8  ;;  %v2596_v17 = vld [vmem:[%s3498_s1 + $0x1d0] sm:$0xff] }
  0x47   : > { %708 = vmatmul.bf16.gmra.mxu2 %v640_v2  ;;  %1635 = vmatpush.bf16.msrb.mxu3 %v2597_v24  ;;  %v2579_v2 = vld [vmem:[%s3498_s1 + $0x168] sm:$0xff]  ;;  %v923_v8 = vrot.slane %v921_v58, 5  ;;  %v957_v24 = vshll.u32 %v2203_v11, 16  ;;  %v2023_v41 = vld [vmem:[%s2872_s29 + $0x10] sm:$0xf] }
  0x49   : > { %531 = vmatpush.bf16.msrb.mxu1 %v2532_v6  ;;  %1081 = vmatpush.bf16.msrb.mxu0 %v2568_v7  ;;  %v2587_v6 = vld [vmem:[%s3498_s1 + $0x188] sm:$0xff]  ;;  %v2156_v7 = vor.u32 %v2556_v62, %v2155_v61  ;;  %v959_v35 = vrot.slane %v957_v24, 5  ;;  %v2024_v61 = vor.u32 %v2527_v42, %v2023_v41  ;;  %v3243_v42 = vld [vmem:[%s2872_s29 + $0x3c] sm:$0x1] }
  0x4a   : > { %1390 = vmatpush.bf16.msrb.mxu2 %v2588_v23  ;;  %v954_v23 = vshrl.u32 %v2203_v11, 16 }
  0x4b   : > { %1636 = vmatpush.bf16.msrb.mxu3 %v2596_v17  ;;  %v968_v17 = vshrl.u32 %v2205_v0, 16 }
  0x4d   : > { %532 = vmatpush.bf16.msrb.mxu1 %v2531_v10  ;;  %1082 = vmatpush.bf16.msrb.mxu0 %v2567_v12  ;;  %v612_v10 = vrot.slane %v2969_v36, 5  ;;  %v2578_v12 = vld [vmem:[%s3498_s1 + $0x160] sm:$0xff]  ;;  %v924_v36 = vsel %vm2910_vm4, %v919_v13, %v923_v8 }
  0x4e   : > { %1391 = vmatpush.bf16.msrb.mxu2 %v2587_v6  ;;  %v951_v6 = vrot.slane %v949_v52, 5 }
  0x4f   : > { %v613_v30 = vsel %vm2919_vm5, %v2072_v21, %v612_v10  ;;  %1637 = vmatpush.bf16.msrb.mxu3 %v2595_v32  ;;  %v1448_v10 = vshll.u32 %v3208_v5, 16  ;;  %v1143_v32 = vrot.slane %v3057_v56, 5  ;;  %v970_v56 = vrot.slane %v968_v17, 4 }
  0x50   : > { %v638_v48 = vunpack.c.l.b16 %v613_v30 }
  0x51   : > { %533 = vmatpush.bf16.msrb.mxu1 %v2530_v34  ;;  %1083 = vmatpush.bf16.msrb.mxu0 %v2566_v38  ;;  %v956_v34 = vrot.slane %v954_v23, 4  ;;  %v1015_v38 = vunpack.c.l.b16 %v938_v25  ;;  %v1139_v23 = vrot.slane %v3051_v47, 5  ;;  %v985_v25 = vshll.u32 %v2207_v16, 16 }
  0x52   : > { %1392 = vmatpush.bf16.msrb.mxu2 %v2586_v22  ;;  %v642_v3 = vpack.c.b16 %v638_v48, %v637_v43  ;;  %v952_v47 = vsel %vm2910_vm4, %v947_v4, %v951_v6  ;;  %v2347_v4 = vld [vmem:[%s2872_s29 + $0x10] sm:$0xf] }
  0x53   : > { %v960_v58 = vor.u32 %v959_v35, %v956_v34  ;;  %1638 = vmatpush.bf16.msrb.mxu3 %v2594_v19  ;;  %v2258_v34 = vld [vmem:[%s2872_s29 + $0x10] sm:$0xe]  ;;  %v2265_v35 = vrot.slane %v2257_v29, 9  ;;  %v987_v52 = vrot.slane %v985_v25, 5 }
  0x54   : > { %534 = vmatmul.bf16.vlgmr.msrb.gmra.mxu1 %v2020_v54  ;;  %1084 = vmatmul.bf16.vlgmr.msrb.gmra.mxu0 %v1020_v55  ;;  %v1442_v54 = vshll.u32 %v2393_v40, 16  ;;  %v1453_v55 = vshrl.u32 %v2395_v51, 16  ;;  %v2266_v41 = vrot.slane %v2258_v34, 9  ;;  %v2602_v34 = vld [vmem:[%s3498_s1 + $0x200] sm:$0xff] }
  0x55   : > { %1250 = vmatpush.bf16.msra.mxu1 %v2581_v37  ;;  %1805 = vmatpush.bf16.msra.mxu0 %v3121_v45  ;;  %v1014_v37 = vunpack.c.l.b16 %v924_v36  ;;  %v961_v14 = vrot.slane %v960_v58, 4  ;;  %v982_v36 = vshrl.u32 %v2207_v16, 16  ;;  %v1140_v50 = vsel %vm2919_vm5, %v2265_v35, %v1139_v23  ;;  %v3275_v23 = vld [vmem:[%s2872_s29 + $0x2c] sm:$0x1] }
  0x56   : > { %848 = vmatmul.bf16.gmra.mxu3 %v2156_v7  ;;  %2619 = vmatpush.bf16.msra.mxu2 %v3121_v45  ;;  %v2159_v45 = vld [vmem:[%s2872_s29 + $0x38] sm:$0xf]  ;;  %v3211_v7 = vld [vmem:[%s2872_s29 + $0x1c] sm:$0x1]  ;;  %v1444_v9 = vrot.slane %v1442_v54, 5  ;;  %v1455_v11 = vrot.slane %v1453_v55, 4  ;;  %v1186_v54 = vunpack.c.l.b16 %v1140_v50  ;;  %v1016_v58 = vunpack.c.l.b16 %v952_v47 }
  0x57   : > { %713 = vmatmul.bf16.gmra.mxu2 %v641_v60  ;;  %v2576_v60 = vld [vmem:[%s3498_s1 + $0x150] sm:$0xff]  ;;  %v1021_v62 = vpack.c.b16 %v1015_v38, %v1014_v37  ;;  %v2160_v13 = vor.u32 %v2557_v63, %v2159_v45  ;;  %v1462_v24 = vshll.u32 %v3211_v7, 16  ;;  %v966_v30 = vsel %vm2910_vm4, %v961_v14, %v965_v15  ;;  %v2027_v55 = vld [vmem:[%s2872_s29 + $0x20] sm:$0xf]  ;;  %v2528_v45 = vld [vmem:[%s2872_s29 + $0x24] sm:$0xf0] }
  0x58   : > { %v973_v37 = vrot.slane %v971_v20, 5  ;;  %v1017_v59 = vunpack.c.l.b16 %v966_v30  ;;  %v977_v63 = vshll.u32 %v3243_v42, 16  ;;  %v2028_v17 = vor.u32 %v2528_v45, %v2027_v55  ;;  %v2031_v55 = vld [vmem:[%s2872_s29 + $0x30] sm:$0xf] }
  0x59   : > { %1251 = vmatpush.bf16.msra.mxu1 %v2580_v53  ;;  %1806 = vmatpush.bf16.msra.mxu0 %v3137_v1  ;;  %v1439_v53 = vshrl.u32 %v2393_v40, 16  ;;  %v1450_v40 = vrot.slane %v1448_v10, 5  ;;  %v1464_v48 = vrot.slane %v1462_v24, 5 }
  0x5a   : > { %2620 = vmatpush.bf16.msra.mxu2 %v3137_v1  ;;  %v2575_v1 = vld [vmem:[%s3498_s1 + $0x148] sm:$0xff] }
  0x5b   : > { %v1441_v8 = vrot.slane %v1439_v53, 4  ;;  %v1144_v53 = vsel %vm2919_vm5, %v2266_v41, %v1143_v32 }
  0x5d   : > { %1252 = vmatpush.bf16.msra.mxu1 %v2579_v2  ;;  %1807 = vmatpush.bf16.msra.mxu0 %v3156_v18  ;;  %v1456_v2 = vshll.u32 %v2395_v51, 16  ;;  %v1445_v21 = vor.u32 %v1444_v9, %v1441_v8  ;;  %v984_v51 = vrot.slane %v982_v36, 4 }
  0x5e   : > { %2621 = vmatpush.bf16.msra.mxu2 %v3156_v18  ;;  %v2603_v18 = vld [vmem:[%s3498_s1 + $0x208] sm:$0xff] }
  0x5f   : > { %v1458_v22 = vrot.slane %v1456_v2, 5  ;;  %v1446_v38 = vrot.slane %v1445_v21, 4  ;;  %v2397_v2 = vld [vmem:[%s2872_s29 + $0x20] sm:$0xf] }
  0x60   : > { %v1467_v9 = vshrl.u32 %v2397_v2, 16 }
  0x61   : > { %1253 = vmatpush.bf16.msra.mxu1 %v2578_v12  ;;  %1808 = vmatpush.bf16.msra.mxu0 %v3177_v28  ;;  %v2605_v12 = vld [vmem:[%s3498_s1 + $0x218] sm:$0xff]  ;;  %v1459_v26 = vor.u32 %v1458_v22, %v1455_v11  ;;  %v1451_v0 = vsel %vm2910_vm4, %v1446_v38, %v1450_v40  ;;  %v1470_v11 = vshll.u32 %v2397_v2, 16  ;;  %v3272_v22 = vld [vmem:[%s2872_s29 + $0x24] sm:$0x1]  ;;  %v2260_v38 = vld [vmem:[%s2872_s29 + $0x20] sm:$0xe] }
  0x62   : > { %2622 = vmatpush.bf16.msra.mxu2 %v3177_v28  ;;  %v988_v28 = vor.u32 %v987_v52, %v984_v51  ;;  %v1469_v19 = vrot.slane %v1467_v9, 4  ;;  %v1567_v21 = vunpack.c.l.b16 %v1451_v0  ;;  %v1147_v52 = vrot.slane %v3116_v44, 5 }
  0x63   : > { %v1460_v43 = vrot.slane %v1459_v26, 4  ;;  %v1472_v20 = vrot.slane %v1470_v11, 5  ;;  %v979_v26 = vrot.slane %v977_v63, 5  ;;  %v2457_v63 = vld [vmem:[%s2872_s29 + $0x10] sm:$0xe] }
  0x64   : > { %539 = vmatmul.bf16.gmra.mxu1 %v2024_v61  ;;  %1089 = vmatmul.bf16.gmra.mxu0 %v1021_v62  ;;  %v1187_v61 = vunpack.c.l.b16 %v1144_v53  ;;  %v974_v62 = vor.u32 %v973_v37, %v970_v56  ;;  %v989_v29 = vrot.slane %v988_v28, 4  ;;  %v1476_v56 = vshll.u32 %v3272_v22, 16  ;;  %v2259_v37 = vld [vmem:[%s2872_s29 + $0x18] sm:$0xe] }
  0x65   : > { %1254 = vmatpush.bf16.msra.mxu1 %v2577_v31  ;;  %1809 = vmatpush.bf16.msra.mxu0 %v2605_v12  ;;  %v2574_v31 = vld [vmem:[%s3498_s1 + $0x140] sm:$0xff]  ;;  %v1465_v6 = vsel %vm2910_vm4, %v1460_v43, %v1464_v48  ;;  %v1473_v30 = vor.u32 %v1472_v20, %v1469_v19  ;;  %v2267_v50 = vrot.slane %v2259_v37, 9  ;;  %v2268_v53 = vrot.slane %v2260_v38, 9 }
  0x66   : > { %853 = vmatmul.bf16.gmra.mxu3 %v2160_v13  ;;  %v3267_v8 = vpack.c.b16 %v1187_v61, %v1186_v54  ;;  %v2582_v13 = vld [vmem:[%s2872_s29 + $0x14] sm:$0xf0]  ;;  %2623 = vmatpush.bf16.msra.mxu2 %v2605_v12  ;;  %v1568_v10 = vunpack.c.l.b16 %v1465_v6  ;;  %v975_v25 = vrot.slane %v974_v62, 4  ;;  %v1490_v12 = vshll.u32 %v3275_v23, 16 }
  0x67   : > { %718 = vmatmul.bf16.gmra.mxu2 %v642_v3  ;;  %v2399_v3 = vld [vmem:[%s2872_s29 + $0x28] sm:$0xf]  ;;  %v2348_v36 = vor.u32 %v2582_v13, %v2347_v4  ;;  %v1478_v43 = vrot.slane %v1476_v56, 5  ;;  %v1151_v54 = vrot.slane %v3124_v46, 5  ;;  %v1694_v62 = vrot.slane %v3208_v5, 5 }
  0x68   : > { %v1481_v15 = vshrl.u32 %v2399_v3, 16  ;;  %v1484_v16 = vshll.u32 %v2399_v3, 16  ;;  %v980_v40 = vsel %vm2910_vm4, %v975_v25, %v979_v26  ;;  %v1492_v48 = vrot.slane %v1490_v12, 5  ;;  %v2458_v3 = vld [vmem:[%s2872_s29 + $0x18] sm:$0xe] }
  0x69   : > { %1255 = vmatpush.bf16.msra.mxu1 %v2576_v60  ;;  %1810 = vmatpush.bf16.msra.mxu0 %v3230_v27  ;;  %v3256_v60 = vld [vmem:[%s2872_s29 + $0x44] sm:$0x1]  ;;  %v1018_v45 = vunpack.c.l.b16 %v980_v40  ;;  %v1152_v61 = vsel %vm2919_vm5, %v2268_v53, %v1151_v54  ;;  %v2401_v4 = vld [vmem:[%s2872_s29 + $0x30] sm:$0xf]  ;;  %v2403_v6 = vld [vmem:[%s2872_s29 + $0x38] sm:$0xf] }
  0x6a   : > { %v991_v14 = vshll.u32 %v3256_v60, 16  ;;  %v1483_v24 = vrot.slane %v1481_v15, 4  ;;  %v1486_v32 = vrot.slane %v1484_v16, 5  ;;  %2624 = vmatpush.bf16.msra.mxu2 %v3230_v27  ;;  %v1474_v27 = vrot.slane %v1473_v30, 4  ;;  %v2351_v16 = vld [vmem:[%s2872_s29 + $0x20] sm:$0xf] }
  0x6b   : > { %v1189_v0 = vunpack.c.l.b16 %v1152_v61  ;;  %v1495_v11 = vshrl.u32 %v2401_v4, 16  ;;  %v1498_v13 = vshll.u32 %v2401_v4, 16  ;;  %v1509_v5 = vshrl.u32 %v2403_v6, 16  ;;  %v2261_v53 = vld [vmem:[%s2872_s29 + $0x28] sm:$0xe] }
  0x6c   : > { %v993_v47 = vrot.slane %v991_v14, 5  ;;  %v1487_v35 = vor.u32 %v1486_v32, %v1483_v24  ;;  %v1479_v46 = vsel %vm2910_vm4, %v1474_v27, %v1478_v43  ;;  %v1698_v15 = vrot.slane %v3211_v7, 5  ;;  %v2262_v54 = vld [vmem:[%s2872_s29 + $0x30] sm:$0xe]  ;;  %v2459_v4 = vld [vmem:[%s2872_s29 + $0x20] sm:$0xe] }
  0x6d   : > { %1256 = vmatpush.bf16.msra.mxu1 %v2575_v1  ;;  %1811 = vmatpush.bf16.msra.mxu0 %v2603_v18  ;;  %v1022_v1 = vpack.c.b16 %v1017_v59, %v1016_v58  ;;  %v1148_v59 = vsel %vm2919_vm5, %v2267_v50, %v1147_v52  ;;  %v1569_v19 = vunpack.c.l.b16 %v1479_v46  ;;  %v1497_v24 = vrot.slane %v1495_v11, 4  ;;  %v2355_v50 = vld [vmem:[%s2872_s29 + $0x30] sm:$0xf]  ;;  %v2460_v11 = vld [vmem:[%s2872_s29 + $0x28] sm:$0xe] }
  0x6e   : > { %v994_v41 = vsel %vm2910_vm4, %v989_v29, %v993_v47  ;;  %2625 = vmatpush.bf16.msra.mxu2 %v2603_v18  ;;  %v1488_v51 = vrot.slane %v1487_v35, 4  ;;  %v2529_v18 = vld [vmem:[%s2872_s29 + $0x34] sm:$0xf0]  ;;  %v1188_v44 = vunpack.c.l.b16 %v1148_v59  ;;  %v1500_v32 = vrot.slane %v1498_v13, 5  ;;  %v3312_v29 = vld [vmem:[%s2872_s29 + $0x34] sm:$0x1] }
  0x6f   : > { %v1019_v58 = vunpack.c.l.b16 %v994_v41  ;;  %v2032_v28 = vor.u32 %v2529_v18, %v2031_v55  ;;  %v3315_v47 = vld [vmem:[%s2872_s29 + $0x3c] sm:$0x1]  ;;  %v2405_v55 = vld [vmem:[%s2872_s29 + $0x40] sm:$0xf]  ;;  %v2270_v59 = vrot.slane %v2262_v54, 9  ;;  %v1159_v61 = vrot.slane %v3190_v39, 5 }
  0x70   : > { %v1493_v2 = vsel %vm2910_vm4, %v1488_v51, %v1492_v48  ;;  %v3306_v9 = vpack.c.b16 %v1189_v0, %v1188_v44  ;;  %v1501_v12 = vor.u32 %v1500_v32, %v1497_v24  ;;  %v1518_v35 = vshll.u32 %v3315_v47, 16  ;;  %v2407_v18 = vld [vmem:[%s2872_s29 + $0x48] sm:$0xf] }
  0x71   : > { %1257 = vmatpush.bf16.msra.mxu1 %v2574_v31  ;;  %v1575_v31 = vpack.c.b16 %v1568_v10, %v1567_v21  ;;  %1812 = vmatpush.bf16.msra.mxu0 %v2602_v34  ;;  %v1023_v14 = vpack.c.b16 %v1019_v58, %v1018_v45  ;;  %v1570_v20 = vunpack.c.l.b16 %v1493_v2  ;;  %v2465_v21 = vrot.slane %v2457_v63, 9 }
  0x72   : > { %2626 = vmatpush.bf16.msra.mxu2 %v2602_v34  ;;  %v2466_v10 = vrot.slane %v2458_v3, 9  ;;  %v1502_v40 = vrot.slane %v1501_v12, 4  ;;  %v1520_v43 = vrot.slane %v1518_v35, 5  ;;  %v2269_v45 = vrot.slane %v2261_v53, 9 }
  0x73   : > { %v1576_v30 = vpack.c.b16 %v1570_v20, %v1569_v19  ;;  %v1695_v7 = vsel %vm2919_vm5, %v2465_v21, %v1694_v62  ;;  %v1155_v58 = vrot.slane %v3187_v33, 5  ;;  %v2584_v62 = vld [vmem:[%s2872_s29 + $0x34] sm:$0xf0]  ;;  %v1523_v63 = vshrl.u32 %v2405_v55, 16 }
  0x74   : > { %544 = vmatmul.bf16.gmra.mxu1 %v2028_v17  ;;  %1094 = vmatmul.bf16.gmra.mxu0 %v1022_v1  ;;  %v2583_v17 = vld [vmem:[%s2872_s29 + $0x24] sm:$0xf0]  ;;  %v1512_v1 = vshll.u32 %v2403_v6, 16  ;;  %v1699_v56 = vsel %vm2919_vm5, %v2466_v10, %v1698_v15  ;;  %v1741_v37 = vunpack.c.l.b16 %v1695_v7  ;;  %v1526_v44 = vshll.u32 %v2405_v55, 16  ;;  %v3342_v15 = vld [vmem:[%s2872_s29 + $0x44] sm:$0x1] }
  0x75   : > { %v2352_v26 = vor.u32 %v2583_v17, %v2351_v16  ;;  %v1742_v38 = vunpack.c.l.b16 %v1699_v56  ;;  %v1537_v0 = vshrl.u32 %v2407_v18, 16  ;;  %v1540_v46 = vshll.u32 %v2407_v18, 16  ;;  %v3345_v16 = vld [vmem:[%s2872_s29 + $0x4c] sm:$0x1] }
  0x76   : > { %1639 = vmatmul.bf16.vlgmr.msrb.gmra.mxu3 %v1575_v31  ;;  %v1514_v25 = vrot.slane %v1512_v1, 5  ;;  %v1504_v31 = vshll.u32 %v3312_v29, 16  ;;  %v1156_v6 = vsel %vm2919_vm5, %v2269_v45, %v1155_v58  ;;  %v1160_v33 = vsel %vm2919_vm5, %v2270_v59, %v1159_v61  ;;  %v2462_v61 = vld [vmem:[%s2872_s29 + $0x38] sm:$0xe] }
  0x77   : > { %1393 = vmatmul.bf16.vlgmr.msrb.gmra.mxu2 %v2348_v36  ;;  %v1511_v36 = vrot.slane %v1509_v5, 4  ;;  %v1749_v48 = vpack.c.b16 %v1742_v38, %v1741_v37  ;;  %v1190_v13 = vunpack.c.l.b16 %v1156_v6  ;;  %v1191_v39 = vunpack.c.l.b16 %v1160_v33  ;;  %v2263_v38 = vld [vmem:[%s2872_s29 + $0x38] sm:$0xe] }
  0x78   : > { %v1506_v41 = vrot.slane %v1504_v31, 5  ;;  %v1525_v5 = vrot.slane %v1523_v63, 4  ;;  %v1539_v17 = vrot.slane %v1537_v0, 4  ;;  %v1542_v1 = vrot.slane %v1540_v46, 5  ;;  %v2464_v63 = vld [vmem:[%s2872_s29 + $0x48] sm:$0xe] }
  0x79   : > { %v1515_v34 = vor.u32 %v1514_v25, %v1511_v36  ;;  %v2467_v19 = vrot.slane %v2459_v4, 9  ;;  %v3347_v20 = vpack.c.b16 %v1191_v39, %v1190_v13  ;;  %v1702_v10 = vrot.slane %v3272_v22, 5 }
  0x7a   : > { %v1507_v51 = vsel %vm2910_vm4, %v1502_v40, %v1506_v41  ;;  %v2468_v24 = vrot.slane %v2460_v11, 9  ;;  %v1706_v32 = vrot.slane %v3275_v23, 5  ;;  %v1532_v25 = vshll.u32 %v3342_v15, 16  ;;  %v2264_v40 = vld [vmem:[%s2872_s29 + $0x40] sm:$0xe] }
  0x7b   : > { %v1516_v27 = vrot.slane %v1515_v34, 4  ;;  %v1571_v2 = vunpack.c.l.b16 %v1507_v51  ;;  %v1703_v7 = vsel %vm2919_vm5, %v2467_v19, %v1702_v10  ;;  %v2271_v41 = vrot.slane %v2263_v38, 9  ;;  %v2585_v51 = vld [vmem:[%s2872_s29 + $0x44] sm:$0xf0] }
  0x7c   : > { %v1707_v22 = vsel %vm2919_vm5, %v2468_v24, %v1706_v32  ;;  %v1534_v23 = vrot.slane %v1532_v25, 5  ;;  %v1743_v31 = vunpack.c.l.b16 %v1703_v7  ;;  %v1710_v0 = vrot.slane %v3312_v29, 5 }
  0x7d   : > { %v1521_v52 = vsel %vm2910_vm4, %v1516_v27, %v1520_v43  ;;  %v1744_v34 = vunpack.c.l.b16 %v1707_v22  ;;  %v1163_v27 = vrot.slane %v3243_v42, 5  ;;  %v2272_v43 = vrot.slane %v2264_v40, 9  ;;  %v2461_v42 = vld [vmem:[%s2872_s29 + $0x30] sm:$0xe] }
  0x7e   : > { %v1572_v3 = vunpack.c.l.b16 %v1521_v52  ;;  %v2470_v46 = vrot.slane %v2462_v61, 9  ;;  %v1722_v4 = vrot.slane %v3345_v16, 5  ;;  %v2472_v33 = vrot.slane %v2464_v63, 9 }
  0x7f   : > { %v1750_v52 = vpack.c.b16 %v1744_v34, %v1743_v31  ;;  %v1164_v53 = vsel %vm2919_vm5, %v2271_v41, %v1163_v27 }
  0x80   : > { %v1577_v21 = vpack.c.b16 %v1572_v3, %v1571_v2  ;;  %v1192_v45 = vunpack.c.l.b16 %v1164_v53  ;;  %v1714_v2 = vrot.slane %v3315_v47, 5  ;;  %v1718_v3 = vrot.slane %v3342_v15, 5 }
  0x81   : > { %v1723_v29 = vsel %vm2919_vm5, %v2472_v33, %v1722_v4 }
  0x84   : > { %549 = vmatmul.bf16.gmra.mxu1 %v2032_v28  ;;  %1099 = vmatmul.bf16.gmra.mxu0 %v1023_v14  ;;  %v1528_v28 = vrot.slane %v1526_v44, 5  ;;  %v2356_v14 = vor.u32 %v2584_v62, %v2355_v50  ;;  %v2359_v50 = vld [vmem:[%s2872_s29 + $0x40] sm:$0xf]  ;;  %v2469_v44 = vrot.slane %v2461_v42, 9 }
  0x85   : > { %v2360_v59 = vor.u32 %v2585_v51, %v2359_v50  ;;  %v2463_v62 = vld [vmem:[%s2872_s29 + $0x40] sm:$0xe]  ;;  %s185_s29 = sand.u32 1, %s2748_s13  }
  0x86   : > { %1644 = vmatmul.bf16.gmra.mxu3 %v1576_v30  ;;  %v1529_v36 = vor.u32 %v1528_v28, %v1525_v5  ;;  %v1546_v30 = vshll.u32 %v3345_v16, 16  ;;  %v2471_v6 = vrot.slane %v2463_v62, 9  ;;  %v1711_v11 = vsel %vm2919_vm5, %v2469_v44, %v1710_v0  ;;  %s1967_s30 = sshll.u32 %s185_s29, 6  ;;  %s1863_s15 = scalar_lea.sflag [#allocation3], %s185_s29 }
  0x87   : > { %1398 = vmatmul.bf16.gmra.mxu2 %v2352_v26  ;;  %v1543_v26 = vor.u32 %v1542_v1, %v1539_v17  ;;  %v1745_v47 = vunpack.c.l.b16 %v1711_v11  ;;  %v1748_v28 = vunpack.c.l.b16 %v1723_v29  ;;  %s3428_s6 = scalar_lea.vmem [#allocation2], %s1967_s30 }
  0x88   : > { %v1548_v12 = vrot.slane %v1546_v30, 5  ;;  %v1719_v13 = vsel %vm2919_vm5, %v2471_v6, %v1718_v3  ;;  %s1877_s11 = sshll.u32 %s3428_s6, 4  ;;  %s1878_s11 = int_to_ptr.vmem [resolvable:$true] %s1877_s11 }
  0x89   : > { %v1544_v56 = vrot.slane %v1543_v26, 4  ;;  %v1747_v5 = vunpack.c.l.b16 %v1719_v13 }
  0x8b   : > { %v1549_v37 = vsel %vm2910_vm4, %v1544_v56, %v1548_v12  ;;  %v1752_v17 = vpack.c.b16 %v1748_v28, %v1747_v5 }
  0x8c   : > { %v1574_v55 = vunpack.c.l.b16 %v1549_v37 }
  0x94   : > { %1258 = vmatmul.bf16.vlgmr.msra.gmra.mxu1 %v3267_v8  ;;  %1813 = vmatmul.bf16.vlgmr.msra.gmra.mxu0 %v1749_v48  ;;  %v1530_v8 = vrot.slane %v1529_v36, 4  ;;  %v1167_v48 = vrot.slane %v3256_v60, 5 }
  0x96   : > { %1649 = vmatmul.bf16.gmra.mxu3 %v1577_v21  ;;  %v1535_v35 = vsel %vm2910_vm4, %v1530_v8, %v1534_v23  ;;  %v1168_v49 = vsel %vm2919_vm5, %v2272_v43, %v1167_v48 }
  0x97   : > { %1403 = vmatmul.bf16.gmra.mxu2 %v2356_v14  ;;  %v1573_v54 = vunpack.c.l.b16 %v1535_v35  ;;  %v1193_v58 = vunpack.c.l.b16 %v1168_v49 }
  0x99   : > { %v1197_v18 = vpack.c.b16 %v1193_v58, %v1192_v45  ;;  %v1578_v60 = vpack.c.b16 %v1574_v55, %v1573_v54 }
  0xa4   : > { %1263 = vmatmul.bf16.gmra.mxu1 %v3306_v9  ;;  %1818 = vmatmul.bf16.gmra.mxu0 %v1750_v52  ;;  %v1715_v9 = vsel %vm2919_vm5, %v2470_v46, %v1714_v2 }
  0xa5   : > { %v1746_v39 = vunpack.c.l.b16 %v1715_v9 }
  0xa6   : > { %1654 = vmatmul.bf16.gmra.mxu3 %v1578_v60 }
  0xa7   : > { %1408 = vmatmul.bf16.gmra.mxu2 %v2360_v59  ;;  %v1751_v14 = vpack.c.b16 %v1746_v39, %v1745_v47 }
  0xb1   : > { %v444_v15 = vpop.f32.mrf.mxu1  ;;  %v434_v16 = vpop.f32.mrf.mxu0 }
  0xb4   : > { %1268 = vmatmul.bf16.gmra.mxu1 %v3347_v20  ;;  %1823 = vmatmul.bf16.gmra.mxu0 %v1751_v14 }
  0xb7   : > { %1828 = vmatmul.bf16.vlgmr.msra.gmra.mxu2 %v1752_v17 }
  0xb9   : > { %v446_v19 = vpop.f32.mrf.mxu1  ;;  %v436_v21 = vpop.f32.mrf.mxu0 }
  0xba   : > { %v704_v1 = vpop.f32.mrf.mxu2  ;;  %v839_v10 = vpop.f32.mrf.mxu3 }
  0xc1   : > { %v449_v32 = vpop.f32.mrf.mxu1  ;;  %v439_v57 = vpop.f32.mrf.mxu0 }
  0xc2   : > { %v706_v24 = vpop.f32.mrf.mxu2  ;;  %v841_v36 = vpop.f32.mrf.mxu3 }
  0xc4   : > { %1273 = vmatmul.bf16.gmra.mxu1 %v1197_v18 }
  0xc9   : > { %v451_v26 = vpop.f32.mrf.mxu1  ;;  %v441_v30 = vpop.f32.mrf.mxu0 }
  0xca   : > { %v709_v25 = vpop.f32.mrf.mxu2  ;;  %v3390_v7 = vpop.f32.mrf.mxu3 }
  0xd1   : > { %v535_v8 = vpop.f32.mrf.mxu1  ;;  %v1085_v23 = vpop.f32.mrf.mxu0 }
  0xd2   : > { %v711_v22 = vpop.f32.mrf.mxu2  ;;  %v536_v20 = vadd.f32 %v535_v8, %v434_v16  ;;  %v3392_v12 = vpop.f32.mrf.mxu3 }
  0xd4   : > { %v724_v56 = vadd.f32 %v704_v1, %v536_v20 }
  0xd6   : > { %v859_v39 = vadd.f32 %v839_v10, %v724_v56 }
  0xd8   : > { %v1105_v28 = vadd.f32 %v1085_v23, %v859_v39 }
  0xd9   : > { %v537_v34 = vpop.f32.mrf.mxu1  ;;  %v1087_v35 = vpop.f32.mrf.mxu0 }
  0xda   : > { %v714_v31 = vpop.f32.mrf.mxu2  ;;  %v538_v37 = vadd.f32 %v537_v34, %v436_v21  ;;  %v3394_v40 = vpop.f32.mrf.mxu3 }
  0xdc   : > { %v725_v38 = vadd.f32 %v706_v24, %v538_v37 }
  0xe1   : > { %v540_v27 = vpop.f32.mrf.mxu1  ;;  %v1090_v43 = vpop.f32.mrf.mxu0 }
  0xe2   : > { %v716_v41 = vpop.f32.mrf.mxu2  ;;  %v541_v48 = vadd.f32 %v540_v27, %v439_v57  ;;  %v3396_v52 = vpop.f32.mrf.mxu3 }
  0xe4   : > { %v726_v50 = vadd.f32 %v709_v25, %v541_v48 }
  0xe6   : > { %v861_v23 = vadd.f32 %v3390_v7, %v726_v50 }
  0xe9   : > { %v542_v53 = vpop.f32.mrf.mxu1  ;;  %v3398_v49 = vpop.f32.mrf.mxu0 }
  0xea   : > { %v719_v51 = vpop.f32.mrf.mxu2  ;;  %v543_v54 = vadd.f32 %v542_v53, %v441_v30  ;;  %v3402_v61 = vpop.f32.mrf.mxu3 }
  0xec   : > { %v727_v55 = vadd.f32 %v711_v22, %v543_v54 }
  0xee   : > { %v862_v27 = vadd.f32 %v3392_v12, %v727_v55 }
  0xf0   : > { %v1108_v53 = vadd.f32 %v3398_v49, %v862_v27 }
  0xf1   : > { %v545_v58 = vpop.f32.mrf.mxu1  ;;  %v3400_v59 = vpop.f32.mrf.mxu0 }
  0xf2   : > { %v721_v45 = vpop.f32.mrf.mxu2  ;;  %v546_v42 = vadd.f32 %v545_v58, %v444_v15  ;;  %v3408_v46 = vpop.f32.mrf.mxu3 }
  0xf4   : > { %v728_v18 = vadd.f32 %v714_v31, %v546_v42  ;;  %v1107_v31 = vadd.f32 %v1090_v43, %v861_v23 }
  0xf9   : > { %v547_v63 = vpop.f32.mrf.mxu1  ;;  %v3404_v60 = vpop.f32.mrf.mxu0 }
  0xfa   : > { %v1394_v62 = vpop.f32.mrf.mxu2  ;;  %v548_v44 = vadd.f32 %v547_v63, %v446_v19  ;;  %v1640_v11 = vpop.f32.mrf.mxu3  ;;  %v860_v19 = vadd.f32 %v841_v36, %v725_v38 }
  0xfc   : > { %v3406_v0 = vadd.f32 %v716_v41, %v548_v44  ;;  %v1106_v10 = vadd.f32 %v1087_v35, %v860_v19 }
 0x101   : > { %v550_v3 = vpop.f32.mrf.mxu1  ;;  %v3410_v4 = vpop.f32.mrf.mxu0 }
 0x102   : > { %v1396_v2 = vpop.f32.mrf.mxu2  ;;  %v551_v6 = vadd.f32 %v550_v3, %v449_v32  ;;  %v1642_v14 = vpop.f32.mrf.mxu3  ;;  %v3424_v32 = vld [vmem:[%s3499_s2] ss:$0 sm:$0xff] }
 0x104   : > { %v3412_v33 = vadd.f32 %v719_v51, %v551_v6 }
 0x109   : > { %v552_v13 = vpop.f32.mrf.mxu1  ;;  %v3414_v29 = vpop.f32.mrf.mxu0 }
 0x10a   : > { %v1399_v9 = vpop.f32.mrf.mxu2  ;;  %v553_v47 = vadd.f32 %v552_v13, %v451_v26  ;;  %v1645_v8 = vpop.f32.mrf.mxu3  ;;  %v864_v13 = vadd.f32 %v3396_v52, %v3406_v0 }
 0x10c   : > { %v3416_v5 = vadd.f32 %v721_v45, %v553_v47 }
 0x111   : > { %v1259_v15 = vpop.f32.mrf.mxu1  ;;  %v1814_v16 = vpop.f32.mrf.mxu0 }
 0x112   : > { %v1279_v17 = vadd.f32 %v1259_v15, %v1105_v28  ;;  %v1401_v1 = vpop.f32.mrf.mxu2  ;;  %v1647_v48 = vpop.f32.mrf.mxu3 }
 0x114   : > { %v1414_v21 = vadd.f32 %v1394_v62, %v1279_v17  ;;  %v863_v62 = vadd.f32 %v3394_v40, %v728_v18  ;;  %v1110_v18 = vadd.f32 %v3404_v60, %v864_v13  ;;  %v865_v17 = vadd.f32 %v3402_v61, %v3412_v33 }
 0x116   : > { %v1660_v24 = vadd.f32 %v1640_v11, %v1414_v21  ;;  %v1109_v55 = vadd.f32 %v3400_v59, %v863_v62  ;;  %v1111_v19 = vadd.f32 %v3410_v4, %v865_v17 }
 0x118   : > { %v1834_v57 = vadd.f32 %v1814_v16, %v1660_v24 }
 0x119   : > { %v1261_v25 = vpop.f32.mrf.mxu1  ;;  %v1816_v26 = vpop.f32.mrf.mxu0 }
 0x11a   : > { %v1846_v30 = vadd.f32 %v3424_v32, %v1834_v57  ;;  %v1280_v22 = vadd.f32 %v1261_v25, %v1106_v10  ;;  %v1404_v20 = vpop.f32.mrf.mxu2  ;;  %v1650_v12 = vpop.f32.mrf.mxu3  ;;  %v866_v25 = vadd.f32 %v3408_v46, %v3416_v5 }
 0x11c   : > { %1854 = vst [vmem:[%s3428_s6] sm:$0xff] %v1846_v30  ;;  %v1415_v36 = vadd.f32 %v1396_v2, %v1280_v22  ;;  %v1112_v30 = vadd.f32 %v3414_v29, %v866_v25 }
 0x11e   : > { %v1661_v56 = vadd.f32 %v1642_v14, %v1415_v36 }
 0x120   : > { %v1835_v34 = vadd.f32 %v1816_v26, %v1661_v56 }
 0x121   : > { %v1264_v35 = vpop.f32.mrf.mxu1  ;;  %v1819_v37 = vpop.f32.mrf.mxu0 }
 0x122   : > { %v1847_v38 = vadd.f32 %v3424_v32, %v1835_v34  ;;  %v1281_v41 = vadd.f32 %v1264_v35, %v1107_v31  ;;  %v1406_v51 = vpop.f32.mrf.mxu2  ;;  %v1652_v28 = vpop.f32.mrf.mxu3 }
 0x124   : > { %1855 = vst [vmem:[%s3428_s6 + $0x8] sm:$0xff] %v1847_v38  ;;  %v1416_v7 = vadd.f32 %v1399_v9, %v1281_v41 }
 0x126   : > { %v1662_v50 = vadd.f32 %v1645_v8, %v1416_v7 }
 0x128   : > { %v1836_v54 = vadd.f32 %v1819_v37, %v1662_v50 }
 0x129   : > { %v1266_v45 = vpop.f32.mrf.mxu1  ;;  %v1821_v58 = vpop.f32.mrf.mxu0 }
 0x12a   : > { %v1848_v43 = vadd.f32 %v3424_v32, %v1836_v54  ;;  %v1282_v42 = vadd.f32 %v1266_v45, %v1108_v53  ;;  %v1409_v3 = vpop.f32.mrf.mxu2  ;;  %v1655_v57 = vpop.f32.mrf.mxu3 }
 0x12c   : > { %1856 = vst [vmem:[%s3428_s6 + $0x10] sm:$0xff] %v1848_v43  ;;  %v1417_v63 = vadd.f32 %v1401_v1, %v1282_v42 }
 0x12e   : > { %v1663_v44 = vadd.f32 %v1647_v48, %v1417_v63 }
 0x130   : > { %v1837_v2 = vadd.f32 %v1821_v58, %v1663_v44 }
 0x131   : > { %v1269_v6 = vpop.f32.mrf.mxu1  ;;  %v1824_v9 = vpop.f32.mrf.mxu0 }
 0x132   : > { %v1849_v49 = vadd.f32 %v3424_v32, %v1837_v2  ;;  %v1283_v11 = vadd.f32 %v1269_v6, %v1109_v55  ;;  %v1411_v16 = vpop.f32.mrf.mxu2  ;;  %v1657_v5 = vpop.f32.mrf.mxu3 }
 0x134   : > { %1857 = vst [vmem:[%s3428_s6 + $0x18] sm:$0xff] %v1849_v49  ;;  %v1418_v47 = vadd.f32 %v1404_v20, %v1283_v11 }
 0x136   : > { %v1664_v40 = vadd.f32 %v1650_v12, %v1418_v47 }
 0x138   : > { %v1838_v39 = vadd.f32 %v1824_v9, %v1664_v40 }
 0x139   : > { %v1271_v14 = vpop.f32.mrf.mxu1  ;;  %v1826_v52 = vpop.f32.mrf.mxu0 }
 0x13a   : > { %v1850_v59 = vadd.f32 %v3424_v32, %v1838_v39  ;;  %v1284_v15 = vadd.f32 %v1271_v14, %v1110_v18  ;;  %v1829_v33 = vpop.f32.mrf.mxu2 }
 0x13c   : > { %1858 = vst [vmem:[%s3428_s6 + $0x20] sm:$0xff] %v1850_v59  ;;  %v1419_v1 = vadd.f32 %v1406_v51, %v1284_v15 }
 0x13e   : > { %v1665_v0 = vadd.f32 %v1652_v28, %v1419_v1 }
 0x140   : > { %v1839_v21 = vadd.f32 %v1826_v52, %v1665_v0 }
 0x141   : > { %v1274_v60 = vpop.f32.mrf.mxu1 }
 0x142   : > { %v1851_v24 = vadd.f32 %v3424_v32, %v1839_v21  ;;  %v1285_v10 = vadd.f32 %v1274_v60, %v1111_v19  ;;  %v1831_v29 = vpop.f32.mrf.mxu2 }
 0x144   : > { %1859 = vst [vmem:[%s3428_s6 + $0x28] sm:$0xff] %v1851_v24  ;;  %v1420_v61 = vadd.f32 %v1409_v3, %v1285_v10 }
 0x146   : > { %v1666_v26 = vadd.f32 %v1655_v57, %v1420_v61 }
 0x148   : > { %v1840_v22 = vadd.f32 %v1829_v33, %v1666_v26 }
 0x149   : > { %v1276_v4 = vpop.f32.mrf.mxu1 }
 0x14a   : > { %v1852_v8 = vadd.f32 %v3424_v32, %v1840_v22  ;;  %v1286_v23 = vadd.f32 %v1276_v4, %v1112_v30 }
 0x14c   : > { %1860 = vst [vmem:[%s3428_s6 + $0x30] sm:$0xff] %v1852_v8  ;;  %v1421_v46 = vadd.f32 %v1411_v16, %v1286_v23 }
 0x14e   : > { %v1667_v36 = vadd.f32 %v1657_v5, %v1421_v46 }
 0x150   : > { %v1841_v20 = vadd.f32 %v1831_v29, %v1667_v36 }
 0x152   : > { %v1853_v56 = vadd.f32 %v3424_v32, %v1841_v20 }
 0x154   : > { %1861 = vst [vmem:[%s3428_s6 + $0x38] sm:$0xff] %v1853_v56 }
 0x155   : > { %2713 = shalt.err (!%p2710_p5)
}
 0x156   : > { %s2766_s29 = smov 128   ;;  %s2767_s4 = smov 8  }
 0x157   : > { %2628 = dma.vmem_to_hbm [thread:$0]  (%p2828_p4), %s1878_s11, 1024, %s1880_s18, %s1863_s15, %s2766_s29, %s2766_s29, %s2767_s4  }
 0x158 PF: > { %p2634_p6 = scmp.ge.s32.totalorder %s2764_s17, 2  ;;  %s1894_s5 = sand.u32 1, %s2744_s12  }
 0x159   : > { %s1895_s6 = scalar_lea.sflag [#allocation3], %s1894_s5 }
 0x15a   : > { %p2631_p7 = pnand %p2634_p6, %p2835_p8 }
 0x15c   : > { %p2632_p9 = pneg %p2631_p7 }
 0x15e   : > { %2739 = dma.done.wait (%p2632_p9), %s1895_s6, 1024  }
 0x15f   : > { %2741 = vsyncadd (%p2632_p9), %s1895_s6, 4294966272  ;;  %s16_s17 = sadd.s32 1, %s2764_s17   ;;  %s3507_s12 = smov %s2748_s13 }
 0x160   : > { %p13_p10 = scmp.ge.s32.totalorder %s16_s17, 4   ;;  %s3508_s13 = smov %s2752_s14 }
 0x161   : > { %s3509_s14 = smov %s2841_s25  ;;  %s3510_s15 = smov %s2760_s16 }
 0x162   : > { %s3511_s16 = smov %s3513_s20  ;;  %15 = sbr.rel (!%p13_p10) target bundleno = 4 (0x4), region = 77 }
 0x167   :  { %1901 = vsyncpa [#allocation3], 1 }
 0x168   :  { %1903 = vsyncpa [#allocation3 + $0x1], 1 }

// kernel: pyramid_features.13
= control target key start
LH: loop header
LB: loop body
LE: loop exit
PB: predicated region body
PF: predicated region fallthrough
CT: control target
= control target key end

     0   :  { %8 = vsyncpa [#allocation3], 0  ;;  %s7299_s0 = inlined_call_operand.vmem [shape: bf16[2,1,18,18,128], index: 0, kind: input, shape index: {}]   ;;  %s7300_s1 = inlined_call_operand.vmem [shape: bf16[9,128,128], index: 1, kind: input, shape index: {}]   ;;  %s7301_s2 = inlined_call_operand.vmem [shape: f32[1,128], index: 2, kind: input, shape index: {}]   ;;  %s7302_s3 = inlined_call_operand.hbm [shape: f32[2,1,256,128], index: 3, kind: output, shape index: {}]  }
   0x1   :  { %10 = vsyncpa [#allocation3 + $0x1], 0  ;;  %s5746_s12 = smov 0   ;;  %s5748_s13 = smov 0  }
   0x2   :  { %s5750_s14 = smov 0   ;;  %s5752_s15 = smov 0  }
   0x3   :  { %s5754_s16 = smov 0   ;;  %s5756_s17 = smov 0  }
   0x4 LB: > { %s4526_s18 = sadd.s32 4294967295, %s5722_s17   ;;  %s4527_s19 = sadd.s32 4294967294, %s5722_s17   ;;  %s5722_s17 = sphi %s5756_s17, %s16_s17   ;;  %s5718_s16 = sphi %s5754_s16, %s7317_s16   ;;  %s5714_s15 = sphi %s5752_s15, %s7316_s15   ;;  %s5710_s14 = sphi %s5750_s14, %s7315_s14   ;;  %s5706_s13 = sphi %s5748_s13, %s7314_s13   ;;  %s5702_s12 = sphi %s5746_s12, %s7313_s12  }
   0x5   : > { %s28_s20 = sadd.s32 1, %s5718_s16  ;;  %s107_s21 = sadd.s32 1, %s5710_s14 }
   0x6   : > { %p30_p0 = scmp.ge.s32.totalorder %s28_s20, 2  ;;  %p117_p1 = scmp.ne.s32.totalorder %s5710_s14, %s5706_s13 }
   0x7   : > { %p118_p2 = scmp.eq.s32.totalorder %s4526_s18, 1  ;;  %p123_p3 = scmp.ne.s32.totalorder %s5706_s13, %s5702_s12 }
   0x8   : > { %s7319_s20 = smov (%p30_p0, %s28_s20), 0  ;;  %p124_p5 = scmp.eq.s32.totalorder %s4527_s19, 1 }
   0x9   : > { %p5786_p4 = por %p118_p2, %p117_p1  ;;  %s102_s23 = ssub.s32 %s5718_s16, %s7319_s20 }
   0xa   : > { %p4530_p6 = scmp.ge.s32.totalorder %s5722_s17, 1  ;;  %p105_p7 = scmp.eq.s32.totalorder %s102_s23, 0 }
   0xb   : > { %p5793_p8 = por %p124_p5, %p123_p3  ;;  %p160_p9 = scmp.lt.s32.totalorder %s5722_s17, 3 }
   0xc   : > { %s5799_s25 = scalar_select %p105_p7, %s5710_s14, %s107_s21  }
   0xd   : > { %p161_p10 = pnand %p4530_p6, %p160_p9 }
   0xf   : > { %164 = sbr.rel (%p161_p10) target bundleno = 769 (0x301), region = 32 }
  0x14   : > { %v5417_v0 = vld [vmem:[%s7300_s1 + $0x78] sm:$0xff]  ;;  %p188_p11 = scmp.lt.s32.totalorder %s5714_s15, 1  ;;  %v5416_v1 = vld [vmem:[%s7300_s1 + $0x70] sm:$0xff]  ;;  %v5415_v2 = vld [vmem:[%s7300_s1 + $0x68] sm:$0xff]  ;;  %vm261_vm0 = vsmask.f32 3328 }
  0x15   : > { %5507 = vmatpush.bf16.msra.mxu1 %v5417_v0  ;;  %5508 = vmatpush.bf16.msra.mxu2 %v5417_v0  ;;  %vm262_vm1 = vsmask.f32 7440  ;;  %v5414_v6 = vld [vmem:[%s7300_s1 + $0x60] sm:$0xff]  ;;  %v5413_v35 = vld [vmem:[%s7300_s1 + $0x58] sm:$0xff]  ;;  %v5412_v54 = vld [vmem:[%s7300_s1 + $0x50] sm:$0xff]  ;;  %vm1147_vm3 = vcmask 1042432  }
  0x16   : > { %s189_s30 = scalar_select %p188_p11, %s5714_s15, 1  ;;  %5509 = vmatpush.bf16.msra.mxu3 %v5417_v0  ;;  %777 = vmatpush.bf16.msra.mxu0 %v5417_v0  ;;  %vm5830_vm2 = vmor %vm261_vm0, %vm262_vm1  ;;  %vm1148_vm4 = vcmask 1046532  }
  0x17   : > { %vm6130_vm5 = vmor %vm1147_vm3, %vm1148_vm4  ;;  %s5506_s10 = sshll.u32 %s5714_s15, 8 }
  0x18   : > { %s5531_s4 = smul.u32 216, %s189_s30  ;;  %s185_s30 = sand.u32 1, %s5706_s13  }
  0x19   : > { %5510 = vmatpush.bf16.msra.mxu1 %v5416_v1  ;;  %5511 = vmatpush.bf16.msra.mxu2 %v5416_v1  ;;  %s4440_s19 = scalar_lea.hbm %s7302_s3, %s5506_s10  ;;  %s4427_s15 = scalar_lea.sflag [#allocation3], %s185_s30 }
  0x1a   : > { %s5815_s9 = scalar_lea.vmem %s7299_s0, %s5531_s4  ;;  %5512 = vmatpush.bf16.msra.mxu3 %v5416_v1  ;;  %778 = vmatpush.bf16.msra.mxu0 %v5416_v1  ;;  %s6966_s4 = sshll.u32 %s185_s30, 8 }
  0x1b   : > { %v205_v3 = vld [vmem:[%s5815_s9 + $0x30] sm:$0xf]  ;;  %v206_v4 = vld [vmem:[%s5815_s9 + $0x34] sm:$0xf]  ;;  %v249_v5 = vld [vmem:[%s5815_s9 + $0x38] sm:$0x1] }
  0x1c   : > { %v361_v7 = vshrl.u32 %v205_v3, 16  ;;  %v364_v8 = vshll.u32 %v205_v3, 16  ;;  %v370_v9 = vshll.u32 %v206_v4, 16  ;;  %v374_v10 = vshrl.u32 %v206_v4, 16  ;;  %v213_v11 = vld [vmem:[%s5815_s9 + $0x60] sm:$0xf] }
  0x1d   : > { %v380_v12 = vshll.u32 %v249_v5, 16  ;;  %v214_v13 = vld [vmem:[%s5815_s9 + $0x64] sm:$0xf]  ;;  %v253_v14 = vld [vmem:[%s5815_s9 + $0x68] sm:$0x1]  ;;  %v457_v15 = vshrl.u32 %v213_v11, 16  ;;  %5513 = vmatpush.bf16.msra.mxu1 %v5415_v2  ;;  %5514 = vmatpush.bf16.msra.mxu2 %v5415_v2 }
  0x1e   : > { %v363_v16 = vrot.slane %v361_v7, 4  ;;  %v366_v17 = vrot.slane %v364_v8, 5  ;;  %v372_v18 = vrot.slane %v370_v9, 5  ;;  %v376_v19 = vrot.slane %v374_v10, 4  ;;  %v221_v20 = vld [vmem:[%s5815_s9 + $0x90] sm:$0xf]  ;;  %5515 = vmatpush.bf16.msra.mxu3 %v5415_v2  ;;  %779 = vmatpush.bf16.msra.mxu0 %v5415_v2 }
  0x1f   : > { %v382_v21 = vrot.slane %v380_v12, 5  ;;  %v459_v22 = vrot.slane %v457_v15, 4  ;;  %v460_v23 = vshll.u32 %v213_v11, 16  ;;  %v466_v24 = vshll.u32 %v214_v13, 16  ;;  %v222_v29 = vld [vmem:[%s5815_s9 + $0x94] sm:$0xf] }
  0x20   : > { %v367_v25 = vor.u32 %v366_v17, %v363_v16  ;;  %v377_v26 = vor.u32 %v376_v19, %v372_v18  ;;  %v470_v27 = vshrl.u32 %v214_v13, 16  ;;  %v476_v28 = vshll.u32 %v253_v14, 16  ;;  %v257_v41 = vld [vmem:[%s5815_s9 + $0x98] sm:$0x1]  ;;  %v197_v49 = vld [vmem:[%s5815_s9] sm:$0xf] }
  0x21   : > { %v462_v31 = vrot.slane %v460_v23, 5  ;;  %v468_v32 = vrot.slane %v466_v24, 5  ;;  %v553_v33 = vshrl.u32 %v221_v20, 16  ;;  %v556_v34 = vshll.u32 %v221_v20, 16  ;;  %5516 = vmatpush.bf16.msra.mxu1 %v5414_v6  ;;  %5517 = vmatpush.bf16.msra.mxu2 %v5414_v6  ;;  %v5855_v62 = vld [vmem:[%s5815_s9 + $0x4] sm:$0xf] }
  0x22   : > { %v368_v36 = vrot.slane %v367_v25, 4  ;;  %v378_v37 = vrot.slane %v377_v26, 4  ;;  %v472_v38 = vrot.slane %v470_v27, 4  ;;  %v478_v39 = vrot.slane %v476_v28, 5  ;;  %5518 = vmatpush.bf16.msra.mxu3 %v5414_v6  ;;  %780 = vmatpush.bf16.msra.mxu0 %v5414_v6  ;;  %v5862_v4 = vld [vmem:[%s5815_s9 + $0x8] sm:$0x1] }
  0x23   : > { %v463_v40 = vor.u32 %v462_v31, %v459_v22  ;;  %v555_v42 = vrot.slane %v553_v33, 4  ;;  %v558_v43 = vrot.slane %v556_v34, 5  ;;  %v562_v44 = vshll.u32 %v222_v29, 16  ;;  %v207_v5 = vld [vmem:[%s5815_s9 + $0x3c] sm:$0xf]  ;;  %v5411_v10 = vld [vmem:[%s7300_s1 + $0x48] sm:$0xff] }
  0x24   : > { %v373_v45 = vsel %vm5830_vm2, %v368_v36, %v372_v18  ;;  %v383_v46 = vsel %vm5830_vm2, %v378_v37, %v382_v21  ;;  %v473_v47 = vor.u32 %v472_v38, %v468_v32  ;;  %v566_v48 = vshrl.u32 %v222_v29, 16  ;;  %v208_v15 = vld [vmem:[%s5815_s9 + $0x40] sm:$0xf]  ;;  %v250_v19 = vld [vmem:[%s5815_s9 + $0x44] sm:$0x1]  ;;  %v5425_v37 = vld [vmem:[%s7300_s1 + $0xb8] sm:$0xff] }
  0x25   : > { %v5843_v50 = vunpack.c.l.b16 %v373_v45  ;;  %v5845_v51 = vunpack.c.l.b16 %v383_v46  ;;  %v464_v52 = vrot.slane %v463_v40, 4  ;;  %v559_v53 = vor.u32 %v558_v43, %v555_v42  ;;  %5519 = vmatpush.bf16.msra.mxu1 %v5413_v35  ;;  %5520 = vmatpush.bf16.msra.mxu2 %v5413_v35  ;;  %v215_v25 = vld [vmem:[%s5815_s9 + $0x6c] sm:$0xf]  ;;  %v5410_v31 = vld [vmem:[%s7300_s1 + $0x40] sm:$0xff]  ;;  %v216_v40 = vld [vmem:[%s5815_s9 + $0x70] sm:$0xf] }
  0x26   : > { %v474_v55 = vrot.slane %v473_v47, 4  ;;  %v564_v56 = vrot.slane %v562_v44, 5  ;;  %v568_v57 = vrot.slane %v566_v48, 4  ;;  %v572_v58 = vshll.u32 %v257_v41, 16  ;;  %5521 = vmatpush.bf16.msra.mxu3 %v5413_v35  ;;  %781 = vmatpush.bf16.msra.mxu0 %v5413_v35  ;;  %v5449_v43 = vld [vmem:[%s7300_s1 + $0xf8] sm:$0xff]  ;;  %s6991_s7 = scalar_lea.vmem [#allocation2], %s6966_s4 }
  0x27   : > { %v701_v59 = vpack.c.b16 %v5845_v51, %v5843_v50  ;;  %v469_v60 = vsel %vm5830_vm2, %v464_v52, %v468_v32  ;;  %v560_v61 = vrot.slane %v559_v53, 4  ;;  %v265_v63 = vshrl.u32 %v197_v49, 16  ;;  %v254_v47 = vld [vmem:[%s5815_s9 + $0x74] sm:$0x1]  ;;  %s4441_s21 = sshll.u32 %s6991_s7, 4  ;;  %s4443_s23 = sshll.u32 %s4440_s19, 4  ;;  %s4442_s21 = int_to_ptr.vmem [resolvable:$true] %s4441_s21  ;;  %s4444_s23 = int_to_ptr.hbm [resolvable:$true] %s4443_s23 }
  0x28   : > { %v479_v0 = vsel %vm5830_vm2, %v474_v55, %v478_v39  ;;  %v5859_v1 = vunpack.c.l.b16 %v469_v60  ;;  %v569_v2 = vor.u32 %v568_v57, %v564_v56  ;;  %v574_v3 = vrot.slane %v572_v58, 5  ;;  %v5409_v57 = vld [vmem:[%s7300_s1 + $0x38] sm:$0xff]  ;;  %s5658_s26 = sshra.s32 %s4444_s23, 4  ;;  %s5664_s4 = scalar_lea.hbm %s7302_s3, 512  ;;  %s5659_s26 = int_to_ptr.hbm [resolvable:$true] %s5658_s26 }
  0x29   : > { %v5865_v6 = vunpack.c.l.b16 %v479_v0  ;;  %v565_v7 = vsel %vm5830_vm2, %v560_v61, %v564_v56  ;;  %v267_v8 = vrot.slane %v265_v63, 4  ;;  %v268_v9 = vshll.u32 %v197_v49, 16  ;;  %5522 = vmatpush.bf16.msra.mxu1 %v5412_v54  ;;  %5523 = vmatpush.bf16.msra.mxu2 %v5412_v54  ;;  %v5424_v63 = vld [vmem:[%s7300_s1 + $0xb0] sm:$0xff]  ;;  %s5660_s27 = scalar_lea.hbm %s5659_s26, 256  ;;  %p5665_p1 = scmp.lt.s32.totalorder %s5659_s26, %s7302_s3 }
  0x2a   : > { %v570_v11 = vrot.slane %v569_v2, 4  ;;  %v5872_v12 = vunpack.c.l.b16 %v565_v7  ;;  %v274_v13 = vshll.u32 %v5855_v62, 16  ;;  %v278_v14 = vshrl.u32 %v5855_v62, 16  ;;  %5524 = vmatpush.bf16.msra.mxu3 %v5412_v54  ;;  %782 = vmatpush.bf16.msra.mxu0 %v5412_v54  ;;  %v223_v54 = vld [vmem:[%s5815_s9 + $0x9c] sm:$0xf]  ;;  %p5661_p12 = scmp.ne.s32.totalorder %s5659_s26, %s5660_s27  ;;  %p5666_p2 = scmp.lt.s32.totalorder %s5664_s4, %s5660_s27 }
  0x2b   : > { %v705_v16 = vpack.c.b16 %v5865_v6, %v5859_v1  ;;  %v270_v17 = vrot.slane %v268_v9, 5  ;;  %v284_v18 = vshll.u32 %v5862_v4, 16  ;;  %v385_v20 = vshrl.u32 %v207_v5, 16 }
  0x2c   : > { %v575_v21 = vsel %vm5830_vm2, %v570_v11, %v574_v3  ;;  %v276_v22 = vrot.slane %v274_v13, 5  ;;  %v280_v23 = vrot.slane %v278_v14, 4  ;;  %v388_v24 = vshll.u32 %v207_v5, 16  ;;  %v5448_v3 = vld [vmem:[%s7300_s1 + $0xf0] sm:$0xff]  ;;  %v5457_v11 = vld [vmem:[%s7300_s1 + $0x138] sm:$0xff]  ;;  %p5662_p13 = pnand %p5661_p12, %p5786_p4  ;;  %p5667_p3 = por %p5666_p2, %p5665_p1 }
  0x2d   : > { %v690_v26 = vunpack.c.l.b16 %v575_v21  ;;  %v271_v27 = vor.u32 %v270_v17, %v267_v8  ;;  %v286_v28 = vrot.slane %v284_v18, 5  ;;  %v387_v29 = vrot.slane %v385_v20, 4  ;;  %5525 = vmatpush.bf16.msra.mxu1 %v5411_v10  ;;  %5526 = vmatpush.bf16.msra.mxu2 %v5411_v10  ;;  %v224_v8 = vld [vmem:[%s5815_s9 + $0xa0] sm:$0xf]  ;;  %v199_v17 = vld [vmem:[%s5815_s9 + $0xc] sm:$0xf] }
  0x2e   : > { %v281_v32 = vor.u32 %v280_v23, %v276_v22  ;;  %v390_v33 = vrot.slane %v388_v24, 5  ;;  %v394_v34 = vshll.u32 %v208_v15, 16  ;;  %v398_v35 = vshrl.u32 %v208_v15, 16  ;;  %5527 = vmatpush.bf16.msra.mxu3 %v5411_v10  ;;  %783 = vmatpush.bf16.msra.mxu0 %v5411_v10  ;;  %v258_v15 = vld [vmem:[%s5815_s9 + $0xa4] sm:$0x1]  ;;  %v5408_v18 = vld [vmem:[%s7300_s1 + $0x30] sm:$0xff]  ;;  %p5663_p0 = pneg %p5662_p13 }
  0x2f   : > { %v709_v36 = vpack.c.b16 %v690_v26, %v5872_v12  ;;  %v272_v38 = vrot.slane %v271_v27, 4  ;;  %v404_v39 = vshll.u32 %v250_v19, 16  ;;  %v481_v41 = vshrl.u32 %v215_v25, 16  ;;  %v5423_v23 = vld [vmem:[%s7300_s1 + $0xa8] sm:$0xff]  ;;  %v5934_v27 = vld [vmem:[%s5815_s9 + $0x10] sm:$0xf] }
  0x30   : > { %v282_v42 = vrot.slane %v281_v32, 4  ;;  %v391_v44 = vor.u32 %v390_v33, %v387_v29  ;;  %v396_v45 = vrot.slane %v394_v34, 5  ;;  %v400_v46 = vrot.slane %v398_v35, 4  ;;  %v5447_v29 = vld [vmem:[%s7300_s1 + $0xe8] sm:$0xff]  ;;  %v5944_v35 = vld [vmem:[%s5815_s9 + $0x14] sm:$0x1]  ;;  %p5668_p5 = pnand %p5667_p3, %p5663_p0 }
  0x31   : > { %v277_v48 = vsel %vm5830_vm2, %v272_v38, %v276_v22  ;;  %v406_v49 = vrot.slane %v404_v39, 5  ;;  %v483_v52 = vrot.slane %v481_v41, 4  ;;  %v484_v53 = vshll.u32 %v215_v25, 16  ;;  %5528 = vmatpush.bf16.msra.mxu1 %v5410_v31  ;;  %5529 = vmatpush.bf16.msra.mxu2 %v5410_v31  ;;  %v5407_v41 = vld [vmem:[%s7300_s1 + $0x28] sm:$0xff] }
  0x32   : > { %v287_v55 = vsel %vm5830_vm2, %v282_v42, %v286_v28  ;;  %v665_v56 = vunpack.c.l.b16 %v277_v48  ;;  %v392_v58 = vrot.slane %v391_v44, 4  ;;  %v401_v60 = vor.u32 %v400_v46, %v396_v45  ;;  %5530 = vmatpush.bf16.msra.mxu3 %v5410_v31  ;;  %784 = vmatpush.bf16.msra.mxu0 %v5410_v31  ;;  %v209_v46 = vld [vmem:[%s5815_s9 + $0x48] sm:$0xf] }
  0x33   : > { %v666_v61 = vunpack.c.l.b16 %v287_v55  ;;  %v486_v0 = vrot.slane %v484_v53, 5  ;;  %v490_v1 = vshll.u32 %v216_v40, 16  ;;  %v494_v2 = vshrl.u32 %v216_v40, 16  ;;  %v5422_v53 = vld [vmem:[%s7300_s1 + $0xa0] sm:$0xff] }
  0x34   : > { %v397_v5 = vsel %vm5830_vm2, %v392_v58, %v396_v45  ;;  %v402_v6 = vrot.slane %v401_v60, 4  ;;  %v500_v7 = vshll.u32 %v254_v47, 16  ;;  %v577_v9 = vshrl.u32 %v223_v54, 16  ;;  %805 = vmatmul.bf16.vlgmr.msra.gmra.mxu1 %v701_v59  ;;  %825 = vmatmul.bf16.vlgmr.msra.gmra.mxu2 %v705_v16  ;;  %v5455_v60 = vld [vmem:[%s7300_s1 + $0x128] sm:$0xff] }
  0x35   : > { %1391 = vmatpush.bf16.msrb.mxu2 %v5425_v37  ;;  %v697_v10 = vpack.c.b16 %v666_v61, %v665_v56  ;;  %v5919_v12 = vunpack.c.l.b16 %v397_v5  ;;  %v487_v13 = vor.u32 %v486_v0, %v483_v52  ;;  %v492_v14 = vrot.slane %v490_v1, 5  ;;  %845 = vmatmul.bf16.vlgmr.msra.gmra.mxu3 %v709_v36  ;;  %v5456_v36 = vld [vmem:[%s7300_s1 + $0x130] sm:$0xff]  ;;  %v5406_v61 = vld [vmem:[%s7300_s1 + $0x20] sm:$0xff] }
  0x36   : > { %1706 = vmatpush.bf16.msrb.mxu3 %v5449_v43  ;;  %1010 = vmatpush.bf16.msrb.mxu1 %v5409_v57  ;;  %v407_v50 = vsel %vm5830_vm2, %v402_v6, %v406_v49  ;;  %v496_v51 = vrot.slane %v494_v2, 4  ;;  %v502_v59 = vrot.slane %v500_v7, 5  ;;  %v579_v16 = vrot.slane %v577_v9, 4  ;;  %v5973_v2 = vld [vmem:[%s5815_s9 + $0x4c] sm:$0xf] }
  0x37   : > { %785 = vmatmul.bf16.vlgmr.msra.gmra.mxu0 %v697_v10  ;;  %v5928_v19 = vunpack.c.l.b16 %v407_v50  ;;  %v488_v20 = vrot.slane %v487_v13, 4  ;;  %v580_v21 = vshll.u32 %v223_v54, 16  ;;  %v586_v22 = vshll.u32 %v224_v8, 16  ;;  %v5446_v54 = vld [vmem:[%s7300_s1 + $0xe0] sm:$0xff]  ;;  %v217_v10 = vld [vmem:[%s5815_s9 + $0x78] sm:$0xf] }
  0x38   : > { %v497_v24 = vor.u32 %v496_v51, %v492_v14  ;;  %v590_v25 = vshrl.u32 %v224_v8, 16  ;;  %v596_v26 = vshll.u32 %v258_v15, 16  ;;  %v289_v28 = vshrl.u32 %v199_v17, 16  ;;  %2388 = vmatpush.bf16.msrb.mxu0 %v5457_v11  ;;  %v251_v8 = vld [vmem:[%s5815_s9 + $0x50] sm:$0x1] }
  0x39   : > { %1392 = vmatpush.bf16.msrb.mxu2 %v5424_v63  ;;  %v702_v31 = vpack.c.b16 %v5928_v19, %v5919_v12  ;;  %v493_v32 = vsel %vm5830_vm2, %v488_v20, %v492_v14  ;;  %v582_v33 = vrot.slane %v580_v21, 5  ;;  %v588_v34 = vrot.slane %v586_v22, 5 }
  0x3a   : > { %1707 = vmatpush.bf16.msrb.mxu3 %v5448_v3  ;;  %1011 = vmatpush.bf16.msrb.mxu1 %v5408_v18  ;;  %v498_v37 = vrot.slane %v497_v24, 4  ;;  %v5949_v38 = vunpack.c.l.b16 %v493_v32  ;;  %v592_v39 = vrot.slane %v590_v25, 4  ;;  %v598_v40 = vrot.slane %v596_v26, 5  ;;  %v5445_v18 = vld [vmem:[%s7300_s1 + $0xd8] sm:$0xff]  ;;  %v5454_v24 = vld [vmem:[%s7300_s1 + $0x120] sm:$0xff] }
  0x3b   : > { %v583_v42 = vor.u32 %v582_v33, %v579_v16  ;;  %v291_v43 = vrot.slane %v289_v28, 4  ;;  %v292_v44 = vshll.u32 %v199_v17, 16  ;;  %v298_v45 = vshll.u32 %v5934_v27, 16  ;;  %v5421_v17 = vld [vmem:[%s7300_s1 + $0x98] sm:$0xff]  ;;  %v255_v33 = vld [vmem:[%s5815_s9 + $0x80] sm:$0x1] }
  0x3c   : > { %v503_v47 = vsel %vm5830_vm2, %v498_v37, %v502_v59  ;;  %v593_v48 = vor.u32 %v592_v39, %v588_v34  ;;  %v302_v49 = vshrl.u32 %v5934_v27, 16  ;;  %v308_v52 = vshll.u32 %v5944_v35, 16  ;;  %2389 = vmatpush.bf16.msrb.mxu0 %v5456_v36  ;;  %v218_v32 = vld [vmem:[%s5815_s9 + $0x7c] sm:$0xf] }
  0x3d   : > { %1393 = vmatpush.bf16.msrb.mxu2 %v5423_v23  ;;  %v684_v55 = vunpack.c.l.b16 %v503_v47  ;;  %v584_v56 = vrot.slane %v583_v42, 4  ;;  %v294_v57 = vrot.slane %v292_v44, 5  ;;  %v300_v58 = vrot.slane %v298_v45, 5  ;;  %v5444_v42 = vld [vmem:[%s7300_s1 + $0xd0] sm:$0xff] }
  0x3e   : > { %1708 = vmatpush.bf16.msrb.mxu3 %v5447_v29  ;;  %v594_v63 = vrot.slane %v593_v48, 4  ;;  %v304_v0 = vrot.slane %v302_v49, 4  ;;  %v310_v1 = vrot.slane %v308_v52, 5  ;;  %1012 = vmatpush.bf16.msrb.mxu1 %v5407_v41  ;;  %v409_v3 = vshrl.u32 %v209_v46, 16  ;;  %v5420_v41 = vld [vmem:[%s7300_s1 + $0x90] sm:$0xff] }
  0x3f   : > { %v706_v5 = vpack.c.b16 %v684_v55, %v5949_v38  ;;  %v589_v6 = vsel %vm5830_vm2, %v584_v56, %v588_v34  ;;  %v295_v7 = vor.u32 %v294_v57, %v291_v43  ;;  %v412_v9 = vshll.u32 %v209_v46, 16  ;;  %v5405_v34 = vld [vmem:[%s7300_s1 + $0x18] sm:$0xff]  ;;  %v5404_v56 = vld [vmem:[%s7300_s1 + $0x10] sm:$0xff] }
  0x40   : > { %v599_v11 = vsel %vm5830_vm2, %v594_v63, %v598_v40  ;;  %v691_v13 = vunpack.c.l.b16 %v589_v6  ;;  %v305_v14 = vor.u32 %v304_v0, %v300_v58  ;;  %v411_v15 = vrot.slane %v409_v3, 4  ;;  %2390 = vmatpush.bf16.msrb.mxu0 %v5455_v60  ;;  %v225_v40 = vld [vmem:[%s5815_s9 + $0xa8] sm:$0xf]  ;;  %v259_v63 = vld [vmem:[%s5815_s9 + $0xb0] sm:$0x1] }
  0x41   : > { %1394 = vmatpush.bf16.msrb.mxu2 %v5422_v53  ;;  %v692_v50 = vunpack.c.l.b16 %v599_v11  ;;  %v296_v51 = vrot.slane %v295_v7, 4  ;;  %v414_v59 = vrot.slane %v412_v9, 5  ;;  %v418_v16 = vshll.u32 %v5973_v2, 16  ;;  %v5453_v53 = vld [vmem:[%s7300_s1 + $0x118] sm:$0xff] }
  0x42   : > { %1709 = vmatpush.bf16.msrb.mxu3 %v5446_v54  ;;  %v306_v20 = vrot.slane %v305_v14, 4  ;;  %1013 = vmatpush.bf16.msrb.mxu1 %v5406_v61  ;;  %v422_v21 = vshrl.u32 %v5973_v2, 16  ;;  %v428_v22 = vshll.u32 %v251_v8, 16  ;;  %v505_v23 = vshrl.u32 %v217_v10, 16  ;;  %v201_v6 = vld [vmem:[%s5815_s9 + $0x18] sm:$0xf] }
  0x43   : > { %v710_v25 = vpack.c.b16 %v692_v50, %v691_v13  ;;  %v301_v26 = vsel %vm5830_vm2, %v296_v51, %v300_v58  ;;  %v415_v28 = vor.u32 %v414_v59, %v411_v15  ;;  %v420_v29 = vrot.slane %v418_v16, 5  ;;  %v6031_v59 = vld [vmem:[%s5815_s9 + $0x1c] sm:$0xf] }
  0x44   : > { %v311_v36 = vsel %vm5830_vm2, %v306_v20, %v310_v1  ;;  %v667_v37 = vunpack.c.l.b16 %v301_v26  ;;  %v424_v38 = vrot.slane %v422_v21, 4  ;;  %v430_v39 = vrot.slane %v428_v22, 5  ;;  %810 = vmatmul.bf16.gmra.mxu1 %v702_v31  ;;  %830 = vmatmul.bf16.gmra.mxu2 %v706_v5  ;;  %v226_v31 = vld [vmem:[%s5815_s9 + $0xac] sm:$0xf] }
  0x45   : > { %1395 = vmatpush.bf16.msrb.mxu2 %v5421_v17  ;;  %v668_v43 = vunpack.c.l.b16 %v311_v36  ;;  %v416_v44 = vrot.slane %v415_v28, 4  ;;  %v507_v45 = vrot.slane %v505_v23, 4  ;;  %v508_v46 = vshll.u32 %v217_v10, 16  ;;  %850 = vmatmul.bf16.gmra.mxu3 %v710_v25  ;;  %v5419_v17 = vld [vmem:[%s7300_s1 + $0x88] sm:$0xff]  ;;  %v211_v25 = vld [vmem:[%s5815_s9 + $0x54] sm:$0xf] }
  0x46   : > { %1710 = vmatpush.bf16.msrb.mxu3 %v5445_v18  ;;  %v425_v47 = vor.u32 %v424_v38, %v420_v29  ;;  %v514_v48 = vshll.u32 %v218_v32, 16  ;;  %v518_v49 = vshrl.u32 %v218_v32, 16  ;;  %v524_v52 = vshll.u32 %v255_v33, 16  ;;  %2391 = vmatpush.bf16.msrb.mxu0 %v5454_v24  ;;  %v6037_v24 = vld [vmem:[%s5815_s9 + $0x20] sm:$0x1]  ;;  %v5443_v38 = vld [vmem:[%s7300_s1 + $0xc8] sm:$0xff] }
  0x47   : > { %v698_v54 = vpack.c.b16 %v668_v43, %v667_v37  ;;  %v421_v12 = vsel %vm5830_vm2, %v416_v44, %v420_v29  ;;  %v510_v19 = vrot.slane %v508_v46, 5  ;;  %v601_v55 = vshrl.u32 %v225_v40, 16  ;;  %1014 = vmatpush.bf16.msrb.mxu1 %v5405_v34 }
  0x48   : > { %v426_v57 = vrot.slane %v425_v47, 4  ;;  %v6021_v58 = vunpack.c.l.b16 %v421_v12  ;;  %v516_v60 = vrot.slane %v514_v48, 5  ;;  %v520_v61 = vrot.slane %v518_v49, 4 }
  0x49   : > { %1396 = vmatpush.bf16.msrb.mxu2 %v5420_v41  ;;  %790 = vmatmul.bf16.gmra.mxu0 %v698_v54  ;;  %v511_v0 = vor.u32 %v510_v19, %v507_v45  ;;  %v526_v1 = vrot.slane %v524_v52, 5  ;;  %v603_v3 = vrot.slane %v601_v55, 4  ;;  %v604_v5 = vshll.u32 %v225_v40, 16  ;;  %v5403_v40 = vld [vmem:[%s7300_s1 + $0x8] sm:$0xff]  ;;  %v5418_v45 = vld [vmem:[%s7300_s1 + $0x80] sm:$0xff] }
  0x4a   : > { %1711 = vmatpush.bf16.msrb.mxu3 %v5444_v42  ;;  %v431_v7 = vsel %vm5830_vm2, %v426_v57, %v430_v39  ;;  %v521_v8 = vor.u32 %v520_v61, %v516_v60  ;;  %v610_v9 = vshll.u32 %v226_v31, 16  ;;  %v614_v10 = vshrl.u32 %v226_v31, 16  ;;  %2392 = vmatpush.bf16.msrb.mxu0 %v5453_v53  ;;  %v5452_v39 = vld [vmem:[%s7300_s1 + $0x110] sm:$0xff]  ;;  %v6060_v52 = vld [vmem:[%s5815_s9 + $0x58] sm:$0xf]  ;;  %v5451_v57 = vld [vmem:[%s7300_s1 + $0x108] sm:$0xff] }
  0x4b   : > { %v678_v11 = vunpack.c.l.b16 %v431_v7  ;;  %v512_v13 = vrot.slane %v511_v0, 4  ;;  %v606_v14 = vrot.slane %v604_v5, 5  ;;  %v620_v15 = vshll.u32 %v259_v63, 16  ;;  %1015 = vmatpush.bf16.msrb.mxu1 %v5404_v56  ;;  %v6063_v53 = vld [vmem:[%s5815_s9 + $0x5c] sm:$0x1]  ;;  %v5442_v56 = vld [vmem:[%s7300_s1 + $0xc0] sm:$0xff] }
  0x4c   : > { %v522_v18 = vrot.slane %v521_v8, 4  ;;  %v612_v50 = vrot.slane %v610_v9, 5  ;;  %v616_v51 = vrot.slane %v614_v10, 4  ;;  %v313_v16 = vshrl.u32 %v201_v6, 16  ;;  %v219_v55 = vld [vmem:[%s5815_s9 + $0x84] sm:$0xf] }
  0x4d   : > { %v703_v20 = vpack.c.b16 %v678_v11, %v6021_v58  ;;  %v517_v21 = vsel %vm5830_vm2, %v512_v13, %v516_v60  ;;  %v607_v22 = vor.u32 %v606_v14, %v603_v3  ;;  %v622_v23 = vrot.slane %v620_v15, 5  ;;  %1397 = vmatpush.bf16.msrb.mxu2 %v5419_v17  ;;  %v5402_v0 = vld [vmem:[%s7300_s1] sm:$0xff]  ;;  %v220_v10 = vld [vmem:[%s5815_s9 + $0x88] sm:$0xf] }
  0x4e   : > { %v527_v26 = vsel %vm5830_vm2, %v522_v18, %v526_v1  ;;  %v685_v28 = vunpack.c.l.b16 %v517_v21  ;;  %v617_v29 = vor.u32 %v616_v51, %v612_v50  ;;  %v315_v32 = vrot.slane %v313_v16, 4  ;;  %1712 = vmatpush.bf16.msrb.mxu3 %v5443_v38  ;;  %2393 = vmatpush.bf16.msrb.mxu0 %v5452_v39  ;;  %v5450_v18 = vld [vmem:[%s7300_s1 + $0x100] sm:$0xff]  ;;  %v256_v16 = vld [vmem:[%s5815_s9 + $0x8c] sm:$0x1]  ;;  %v228_v39 = vld [vmem:[%s5815_s9 + $0xb8] sm:$0xf] }
  0x4f   : > { %v686_v33 = vunpack.c.l.b16 %v527_v26  ;;  %v608_v34 = vrot.slane %v607_v22, 4  ;;  %v316_v36 = vshll.u32 %v201_v6, 16  ;;  %v322_v37 = vshll.u32 %v6031_v59, 16  ;;  %1016 = vmatpush.bf16.msrb.mxu1 %v5403_v40  ;;  %v227_v22 = vld [vmem:[%s5815_s9 + $0xb4] sm:$0xf] }
  0x50   : > { %v618_v41 = vrot.slane %v617_v29, 4  ;;  %v326_v42 = vshrl.u32 %v6031_v59, 16  ;;  %v332_v43 = vshll.u32 %v6037_v24, 16  ;;  %v433_v44 = vshrl.u32 %v211_v25, 16 }
  0x51   : > { %v707_v46 = vpack.c.b16 %v686_v33, %v685_v28  ;;  %v613_v47 = vsel %vm5830_vm2, %v608_v34, %v612_v50  ;;  %v318_v48 = vrot.slane %v316_v36, 5  ;;  %v324_v49 = vrot.slane %v322_v37, 5  ;;  %1398 = vmatpush.bf16.msrb.mxu2 %v5418_v45  ;;  %v260_v45 = vld [vmem:[%s5815_s9 + $0xbc] sm:$0x1] }
  0x52   : > { %v623_v54 = vsel %vm5830_vm2, %v618_v41, %v622_v23  ;;  %v693_v12 = vunpack.c.l.b16 %v613_v47  ;;  %v328_v19 = vrot.slane %v326_v42, 4  ;;  %v334_v31 = vrot.slane %v332_v43, 5  ;;  %1713 = vmatpush.bf16.msrb.mxu3 %v5442_v56  ;;  %2394 = vmatpush.bf16.msrb.mxu0 %v5451_v57  ;;  %v5489_v47 = vld [vmem:[%s7300_s1 + $0x1b8] sm:$0xff] }
  0x53   : > { %v694_v58 = vunpack.c.l.b16 %v623_v54  ;;  %v319_v60 = vor.u32 %v318_v48, %v315_v32  ;;  %v435_v61 = vrot.slane %v433_v44, 4  ;;  %v436_v63 = vshll.u32 %v211_v25, 16  ;;  %1017 = vmatpush.bf16.msrb.mxu1 %v5402_v0 }
  0x54   : > { %v329_v1 = vor.u32 %v328_v19, %v324_v49  ;;  %v442_v3 = vshll.u32 %v6060_v52, 16  ;;  %v446_v5 = vshrl.u32 %v6060_v52, 16  ;;  %v452_v6 = vshll.u32 %v6063_v53, 16  ;;  %815 = vmatmul.bf16.gmra.mxu1 %v703_v20  ;;  %835 = vmatmul.bf16.gmra.mxu2 %v707_v46  ;;  %v203_v46 = vld [vmem:[%s5815_s9 + $0x24] sm:$0xf] }
  0x55   : > { %v711_v7 = vpack.c.b16 %v694_v58, %v693_v12  ;;  %v320_v8 = vrot.slane %v319_v60, 4  ;;  %v438_v9 = vrot.slane %v436_v63, 5  ;;  %v529_v11 = vshrl.u32 %v219_v55, 16  ;;  %3129 = vmatpush.bf16.msra.mxu2 %v5489_v47 }
  0x56   : > { %v330_v13 = vrot.slane %v329_v1, 4  ;;  %v444_v14 = vrot.slane %v442_v3, 5  ;;  %v448_v15 = vrot.slane %v446_v5, 4  ;;  %v454_v17 = vrot.slane %v452_v6, 5  ;;  %2395 = vmatpush.bf16.msrb.mxu0 %v5450_v18  ;;  %v5497_v6 = vld [vmem:[%s7300_s1 + $0x1f8] sm:$0xff] }
  0x57   : > { %855 = vmatmul.bf16.gmra.mxu3 %v711_v7  ;;  %v325_v50 = vsel %vm5830_vm2, %v320_v8, %v324_v49  ;;  %v439_v51 = vor.u32 %v438_v9, %v435_v61  ;;  %v531_v20 = vrot.slane %v529_v11, 4  ;;  %v532_v21 = vshll.u32 %v219_v55, 16  ;;  %v6101_v61 = vld [vmem:[%s5815_s9 + $0x28] sm:$0xf]  ;;  %v5465_v7 = vld [vmem:[%s7300_s1 + $0x178] sm:$0xff] }
  0x58   : > { %v335_v23 = vsel %vm5830_vm2, %v330_v13, %v334_v31  ;;  %v669_v25 = vunpack.c.l.b16 %v325_v50  ;;  %v449_v26 = vor.u32 %v448_v15, %v444_v14  ;;  %v538_v28 = vshll.u32 %v220_v10, 16  ;;  %v5505_v8 = vld [vmem:[%s7300_s1 + $0x238] sm:$0xff]  ;;  %3811 = vmatpush.bf16.msra.mxu3 %v5497_v6  ;;  %2814 = vmatpush.bf16.msra.mxu1 %v5465_v7 }
  0x59   : > { %v670_v29 = vunpack.c.l.b16 %v335_v23  ;;  %v440_v32 = vrot.slane %v439_v51, 4  ;;  %v534_v33 = vrot.slane %v532_v21, 5  ;;  %v542_v34 = vshrl.u32 %v220_v10, 16 }
  0x5a   : > { %v450_v36 = vrot.slane %v449_v26, 4  ;;  %v540_v37 = vrot.slane %v538_v28, 5  ;;  %v548_v38 = vshll.u32 %v256_v16, 16  ;;  %v625_v40 = vshrl.u32 %v227_v22, 16  ;;  %4237 = vmatpush.bf16.msra.mxu0 %v5505_v8  ;;  %v1099_v26 = vld [vmem:[%s5815_s9] sm:$0xe] }
  0x5b   : > { %v699_v41 = vpack.c.b16 %v670_v29, %v669_v25  ;;  %v445_v42 = vsel %vm5830_vm2, %v440_v32, %v444_v14  ;;  %v535_v43 = vor.u32 %v534_v33, %v531_v20  ;;  %v544_v44 = vrot.slane %v542_v34, 4  ;;  %v6115_v14 = vld [vmem:[%s5815_s9 + $0x2c] sm:$0x1] }
  0x5c   : > { %v455_v48 = vsel %vm5830_vm2, %v450_v36, %v454_v17  ;;  %v679_v49 = vunpack.c.l.b16 %v445_v42  ;;  %v550_v54 = vrot.slane %v548_v38, 5  ;;  %v627_v12 = vrot.slane %v625_v40, 4  ;;  %v4885_v38 = vld [vmem:[%s5815_s9 + $0xc] sm:$0xf] }
  0x5d   : > { %795 = vmatmul.bf16.gmra.mxu0 %v699_v41  ;;  %v680_v19 = vunpack.c.l.b16 %v455_v48  ;;  %v536_v31 = vrot.slane %v535_v43, 4  ;;  %v545_v55 = vor.u32 %v544_v44, %v540_v37  ;;  %v628_v56 = vshll.u32 %v227_v22, 16 }
  0x5e   : > { %v634_v57 = vshll.u32 %v228_v39, 16  ;;  %v638_v58 = vshrl.u32 %v228_v39, 16  ;;  %v644_v60 = vshll.u32 %v260_v45, 16  ;;  %v337_v63 = vshrl.u32 %v203_v46, 16  ;;  %v4886_v39 = vld [vmem:[%s5815_s9 + $0x10] sm:$0xf] }
  0x5f   : > { %v704_v0 = vpack.c.b16 %v680_v19, %v679_v49  ;;  %v541_v1 = vsel %vm5830_vm2, %v536_v31, %v540_v37  ;;  %v546_v3 = vrot.slane %v545_v55, 4  ;;  %v630_v5 = vrot.slane %v628_v56, 5 }
  0x60   : > { %v687_v9 = vunpack.c.l.b16 %v541_v1  ;;  %v636_v10 = vrot.slane %v634_v57, 5  ;;  %v640_v11 = vrot.slane %v638_v58, 4  ;;  %v646_v13 = vrot.slane %v644_v60, 5  ;;  %v4887_v58 = vld [vmem:[%s5815_s9 + $0x14] sm:$0x1] }
  0x61   : > { %v551_v15 = vsel %vm5830_vm2, %v546_v3, %v550_v54  ;;  %v631_v17 = vor.u32 %v630_v5, %v627_v12  ;;  %v339_v18 = vrot.slane %v337_v63, 4  ;;  %v340_v50 = vshll.u32 %v203_v46, 16 }
  0x62   : > { %v688_v51 = vunpack.c.l.b16 %v551_v15  ;;  %v641_v16 = vor.u32 %v640_v11, %v636_v10  ;;  %v346_v20 = vshll.u32 %v6101_v61, 16  ;;  %v350_v21 = vshrl.u32 %v6101_v61, 16 }
  0x63   : > { %v632_v22 = vrot.slane %v631_v17, 4  ;;  %v342_v23 = vrot.slane %v340_v50, 5  ;;  %v356_v25 = vshll.u32 %v6115_v14, 16  ;;  %v4677_v44 = vrot.slane %v1099_v26, 9  ;;  %v4888_v50 = vld [vmem:[%s5815_s9 + $0x18] sm:$0xf] }
  0x64   : > { %v708_v28 = vpack.c.b16 %v688_v51, %v687_v9  ;;  %v642_v29 = vrot.slane %v641_v16, 4  ;;  %v348_v32 = vrot.slane %v346_v20, 5  ;;  %v352_v33 = vrot.slane %v350_v21, 4  ;;  %820 = vmatmul.bf16.gmra.mxu1 %v704_v0  ;;  %v5386_v51 = vld [vmem:[%s5815_s9] sm:$0xff]  ;;  %v4889_v16 = vld [vmem:[%s5815_s9 + $0x1c] sm:$0xf] }
  0x65   : > { %v637_v34 = vsel %vm5830_vm2, %v632_v22, %v636_v10  ;;  %v343_v36 = vor.u32 %v342_v23, %v339_v18  ;;  %v358_v37 = vrot.slane %v356_v25, 5  ;;  %v1152_v47 = vrot.slane %v5855_v62, 5  ;;  %v1100_v21 = vld [vmem:[%s5815_s9 + $0xc] sm:$0xe] }
  0x66   : > { %840 = vmatmul.bf16.gmra.mxu2 %v708_v28  ;;  %v647_v40 = vsel %vm5830_vm2, %v642_v29, %v646_v13  ;;  %v695_v41 = vunpack.c.l.b16 %v637_v34  ;;  %v353_v42 = vor.u32 %v352_v33, %v348_v32  ;;  %v1155_v48 = vrot.slane %v5862_v4, 5  ;;  %v5426_v34 = vld [vmem:[%s5815_s9 + $0xc] sm:$0xff] }
  0x67   : > { %v696_v45 = vunpack.c.l.b16 %v647_v40  ;;  %v344_v46 = vrot.slane %v343_v36, 4  ;;  %v1876_v54 = vshrl.u32 %v4885_v38, 16  ;;  %v1879_v12 = vshll.u32 %v4885_v38, 16 }
  0x68   : > { %v354_v49 = vrot.slane %v353_v42, 4  ;;  %v1885_v19 = vshll.u32 %v4886_v39, 16  ;;  %v1153_v56 = vsel %vm6130_vm5, %v4677_v44, %v1152_v47  ;;  %v1154_v57 = vrot.slane %v1152_v47, 4  ;;  %v4890_v44 = vld [vmem:[%s5815_s9 + $0x20] sm:$0x1] }
  0x69   : > { %v712_v31 = vpack.c.b16 %v696_v45, %v695_v41  ;;  %v349_v55 = vsel %vm5830_vm2, %v344_v46, %v348_v32  ;;  %v1279_v62 = vunpack.c.l.b16 %v1153_v56  ;;  %v1878_v0 = vrot.slane %v1876_v54, 4  ;;  %v5464_v56 = vld [vmem:[%s7300_s1 + $0x170] sm:$0xff] }
  0x6a   : > { %v359_v60 = vsel %vm5830_vm2, %v354_v49, %v358_v37  ;;  %v671_v63 = vunpack.c.l.b16 %v349_v55  ;;  %v1156_v1 = vsel %vm6130_vm5, %v1154_v57, %v1155_v48  ;;  %v1881_v3 = vrot.slane %v1879_v12, 5  ;;  %v5488_v48 = vld [vmem:[%s7300_s1 + $0x1b0] sm:$0xff]  ;;  %2815 = vmatpush.bf16.msra.mxu1 %v5464_v56 }
  0x6b   : > { %860 = vmatmul.bf16.gmra.mxu3 %v712_v31  ;;  %v672_v4 = vunpack.c.l.b16 %v359_v60  ;;  %v1280_v5 = vunpack.c.l.b16 %v1156_v1  ;;  %v1887_v6 = vrot.slane %v1885_v19, 5  ;;  %v1889_v7 = vshrl.u32 %v4886_v39, 16  ;;  %3130 = vmatpush.bf16.msra.mxu2 %v5488_v48  ;;  %v4891_v31 = vld [vmem:[%s5815_s9 + $0x24] sm:$0xf]  ;;  %v5496_v55 = vld [vmem:[%s7300_s1 + $0x1f0] sm:$0xff] }
  0x6c   : > { %v1895_v8 = vshll.u32 %v4887_v58, 16  ;;  %v1882_v10 = vor.u32 %v1881_v3, %v1878_v0  ;;  %v1159_v22 = vrot.slane %v5934_v27, 5  ;;  %v1900_v23 = vshrl.u32 %v4888_v50, 16  ;;  %v5504_v57 = vld [vmem:[%s7300_s1 + $0x230] sm:$0xff]  ;;  %3812 = vmatpush.bf16.msra.mxu3 %v5496_v55  ;;  %v1102_v48 = vld [vmem:[%s5815_s9 + $0x24] sm:$0xe] }
  0x6d   : > { %v700_v9 = vpack.c.b16 %v672_v4, %v671_v63  ;;  %v1311_v11 = vpack.c.b16 %v1280_v5, %v1279_v62  ;;  %v1891_v13 = vrot.slane %v1889_v7, 4  ;;  %v1903_v25 = vshll.u32 %v4888_v50, 16  ;;  %v4892_v62 = vld [vmem:[%s5815_s9 + $0x28] sm:$0xf]  ;;  %v5387_v0 = vld [vmem:[%s5815_s9 + $0xc] sm:$0xff]  ;;  %4238 = vmatpush.bf16.msra.mxu0 %v5504_v57 }
  0x6e   : > { %v1883_v15 = vrot.slane %v1882_v10, 4  ;;  %v1897_v18 = vrot.slane %v1895_v8, 5  ;;  %v1909_v29 = vshll.u32 %v4889_v16, 16  ;;  %v1913_v32 = vshrl.u32 %v4889_v16, 16 }
  0x6f   : > { %800 = vmatmul.bf16.gmra.mxu0 %v700_v9  ;;  %v1892_v17 = vor.u32 %v1891_v13, %v1887_v6  ;;  %v4678_v33 = vrot.slane %v1100_v21, 9  ;;  %v1161_v38 = vrot.slane %v1159_v22, 4  ;;  %v1162_v27 = vrot.slane %v5944_v35, 5  ;;  %v4893_v21 = vld [vmem:[%s5815_s9 + $0x2c] sm:$0x1] }
  0x70   : > { %v1888_v26 = vsel %vm5830_vm2, %v1883_v15, %v1887_v6  ;;  %v1902_v39 = vrot.slane %v1900_v23, 4  ;;  %v1905_v40 = vrot.slane %v1903_v25, 5  ;;  %v1911_v41 = vrot.slane %v1909_v29, 5  ;;  %v1101_v6 = vld [vmem:[%s5815_s9 + $0x18] sm:$0xe] }
  0x71   : > { %v1893_v20 = vrot.slane %v1892_v17, 4  ;;  %v2276_v36 = vunpack.c.l.b16 %v1888_v26  ;;  %v1915_v42 = vrot.slane %v1913_v32, 4  ;;  %v1160_v46 = vsel %vm6130_vm5, %v4678_v33, %v1159_v22 }
  0x72   : > { %v1163_v47 = vsel %vm6130_vm5, %v1161_v38, %v1162_v27  ;;  %v1906_v35 = vor.u32 %v1905_v40, %v1902_v39  ;;  %v1919_v54 = vshll.u32 %v4890_v44, 16  ;;  %v1281_v12 = vunpack.c.l.b16 %v1160_v46  ;;  %v4895_v38 = vld [vmem:[%s5815_s9 + $0x34] sm:$0xf]  ;;  %v5388_v27 = vld [vmem:[%s5815_s9 + $0x18] sm:$0xff] }
  0x73   : > { %v1898_v28 = vsel %vm5830_vm2, %v1893_v20, %v1897_v18  ;;  %v1916_v49 = vor.u32 %v1915_v42, %v1911_v41  ;;  %v1282_v19 = vunpack.c.l.b16 %v1163_v47  ;;  %v1166_v1 = vrot.slane %v6031_v59, 5  ;;  %v5427_v18 = vld [vmem:[%s5815_s9 + $0x18] sm:$0xff] }
  0x74   : > { %1018 = vmatmul.bf16.vlgmr.msrb.gmra.mxu1 %v5386_v51  ;;  %v2277_v37 = vunpack.c.l.b16 %v1898_v28  ;;  %v1907_v58 = vrot.slane %v1906_v35, 4  ;;  %v1921_v63 = vrot.slane %v1919_v54, 5  ;;  %v1924_v3 = vshrl.u32 %v4891_v31, 16 }
  0x75   : > { %v1917_v60 = vrot.slane %v1916_v49, 4  ;;  %v1312_v4 = vpack.c.b16 %v1282_v19, %v1281_v12  ;;  %v1927_v5 = vshll.u32 %v4891_v31, 16  ;;  %v1933_v7 = vshll.u32 %v4892_v62, 16  ;;  %v5428_v31 = vld [vmem:[%s5815_s9 + $0x24] sm:$0xff] }
  0x76   : > { %1399 = vmatmul.bf16.vlgmr.msrb.gmra.mxu2 %v1311_v11  ;;  %v2308_v45 = vpack.c.b16 %v2277_v37, %v2276_v36  ;;  %v1937_v8 = vshrl.u32 %v4892_v62, 16  ;;  %v1912_v9 = vsel %vm5830_vm2, %v1907_v58, %v1911_v41  ;;  %v1169_v11 = vrot.slane %v6037_v24, 5  ;;  %v4894_v37 = vld [vmem:[%s5815_s9 + $0x30] sm:$0xf] }
  0x77   : > { %v1922_v10 = vsel %vm5830_vm2, %v1917_v60, %v1921_v63  ;;  %v4679_v13 = vrot.slane %v1101_v6, 9  ;;  %v1168_v59 = vrot.slane %v1166_v1, 4  ;;  %v1926_v15 = vrot.slane %v1924_v3, 4  ;;  %v4897_v6 = vld [vmem:[%s5815_s9 + $0x3c] sm:$0xf] }
  0x78   : > { %v1929_v17 = vrot.slane %v1927_v5, 5  ;;  %v2278_v50 = vunpack.c.l.b16 %v1912_v9  ;;  %v2279_v51 = vunpack.c.l.b16 %v1922_v10  ;;  %v1935_v16 = vrot.slane %v1933_v7, 5  ;;  %v4898_v7 = vld [vmem:[%s5815_s9 + $0x40] sm:$0xf] }
  0x79   : > { %v1939_v20 = vrot.slane %v1937_v8, 4  ;;  %v1167_v22 = vsel %vm6130_vm5, %v4679_v13, %v1166_v1  ;;  %v1170_v25 = vsel %vm6130_vm5, %v1168_v59, %v1169_v11  ;;  %v1943_v28 = vshll.u32 %v4893_v21, 16  ;;  %v5487_v1 = vld [vmem:[%s7300_s1 + $0x1a8] sm:$0xff]  ;;  %v5590_v21 = vld [vmem:[%s5815_s9 + $0x34] sm:$0xf] }
  0x7a   : > { %v1930_v23 = vor.u32 %v1929_v17, %v1926_v15  ;;  %v2309_v24 = vpack.c.b16 %v2279_v51, %v2278_v50  ;;  %v1283_v29 = vunpack.c.l.b16 %v1167_v22  ;;  %v1284_v32 = vunpack.c.l.b16 %v1170_v25  ;;  %3131 = vmatpush.bf16.msra.mxu2 %v5487_v1  ;;  %v5495_v11 = vld [vmem:[%s7300_s1 + $0x1e8] sm:$0xff]  ;;  %v1104_v1 = vld [vmem:[%s5815_s9 + $0x3c] sm:$0xe] }
  0x7b   : > { %1714 = vmatmul.bf16.vlgmr.msrb.gmra.mxu3 %v5426_v34  ;;  %v1940_v26 = vor.u32 %v1939_v20, %v1935_v16  ;;  %v1945_v36 = vrot.slane %v1943_v28, 5  ;;  %v1948_v41 = vshrl.u32 %v4894_v37, 16  ;;  %v1951_v42 = vshll.u32 %v4894_v37, 16  ;;  %v5463_v13 = vld [vmem:[%s7300_s1 + $0x168] sm:$0xff]  ;;  %v5591_v37 = vld [vmem:[%s5815_s9 + $0x38] sm:$0x1] }
  0x7c   : > { %v1931_v33 = vrot.slane %v1930_v23, 4  ;;  %v1313_v39 = vpack.c.b16 %v1284_v32, %v1283_v29  ;;  %v1957_v46 = vshll.u32 %v4895_v38, 16  ;;  %v1961_v47 = vshrl.u32 %v4895_v38, 16  ;;  %v5503_v59 = vld [vmem:[%s7300_s1 + $0x228] sm:$0xff]  ;;  %3813 = vmatpush.bf16.msra.mxu3 %v5495_v11  ;;  %2816 = vmatpush.bf16.msra.mxu1 %v5463_v13  ;;  %v5593_v13 = vld [vmem:[%s5815_s9 + $0x44] sm:$0x1] }
  0x7d   : > { %v1941_v34 = vrot.slane %v1940_v26, 4  ;;  %v1176_v54 = vrot.slane %v6115_v14, 5  ;;  %v1950_v12 = vrot.slane %v1948_v41, 4  ;;  %v1953_v19 = vrot.slane %v1951_v42, 5  ;;  %v5389_v15 = vld [vmem:[%s5815_s9 + $0x24] sm:$0xff]  ;;  %4239 = vmatpush.bf16.msra.mxu0 %v5503_v59 }
  0x7e   : > { %v1936_v40 = vsel %vm5830_vm2, %v1931_v33, %v1935_v16  ;;  %v4680_v55 = vrot.slane %v1102_v48, 9  ;;  %v1959_v57 = vrot.slane %v1957_v46, 5  ;;  %v1963_v58 = vrot.slane %v1961_v47, 4  ;;  %v5429_v33 = vld [vmem:[%s5815_s9 + $0x30] sm:$0xff] }
  0x7f   : > { %2396 = vmatmul.bf16.vlgmr.msrb.gmra.mxu0 %v2308_v45  ;;  %v1946_v44 = vsel %vm5830_vm2, %v1941_v34, %v1945_v36  ;;  %v1173_v45 = vrot.slane %v6101_v61, 5  ;;  %v2280_v35 = vunpack.c.l.b16 %v1936_v40  ;;  %v4896_v61 = vld [vmem:[%s5815_s9 + $0x38] sm:$0x1]  ;;  %v1954_v63 = vor.u32 %v1953_v19, %v1950_v12  ;;  %v4900_v12 = vld [vmem:[%s5815_s9 + $0x48] sm:$0xf] }
  0x80   : > { %v2281_v49 = vunpack.c.l.b16 %v1946_v44  ;;  %v1964_v14 = vor.u32 %v1963_v58, %v1959_v57  ;;  %v1972_v17 = vshrl.u32 %v4897_v6, 16  ;;  %v1981_v51 = vshll.u32 %v4898_v7, 16  ;;  %v4901_v19 = vld [vmem:[%s5815_s9 + $0x4c] sm:$0xf] }
  0x81   : > { %v1175_v56 = vrot.slane %v1173_v45, 4  ;;  %v1174_v62 = vsel %vm6130_vm5, %v4680_v55, %v1173_v45  ;;  %v1955_v8 = vrot.slane %v1954_v63, 4  ;;  %v1180_v22 = vrot.slane %v5590_v21, 5 }
  0x82   : > { %v2310_v60 = vpack.c.b16 %v2281_v49, %v2280_v35  ;;  %v1285_v3 = vunpack.c.l.b16 %v1174_v62  ;;  %v1965_v9 = vrot.slane %v1964_v14, 4  ;;  %v1985_v23 = vshrl.u32 %v4898_v7, 16  ;;  %v5592_v62 = vld [vmem:[%s5815_s9 + $0x40] sm:$0xf] }
  0x83   : > { %v1960_v16 = vsel %vm5830_vm2, %v1955_v8, %v1959_v57  ;;  %v1974_v25 = vrot.slane %v1972_v17, 4  ;;  %v1983_v32 = vrot.slane %v1981_v51, 5  ;;  %v1182_v36 = vrot.slane %v1180_v22, 4 }
  0x84   : > { %1023 = vmatmul.bf16.gmra.mxu1 %v5387_v0  ;;  %v1177_v0 = vsel %vm6130_vm5, %v1175_v56, %v1176_v54  ;;  %v2282_v28 = vunpack.c.l.b16 %v1960_v16  ;;  %v1183_v38 = vrot.slane %v5591_v37, 5  ;;  %v1996_v58 = vshrl.u32 %v4900_v12, 16  ;;  %v4904_v37 = vld [vmem:[%s5815_s9 + $0x58] sm:$0xf] }
  0x85   : > { %v1286_v5 = vunpack.c.l.b16 %v1177_v0  ;;  %v1187_v0 = vrot.slane %v5592_v62, 5  ;;  %v2009_v14 = vshrl.u32 %v4901_v19, 16  ;;  %v1190_v59 = vrot.slane %v5593_v13, 5 }
  0x86   : > { %1404 = vmatmul.bf16.gmra.mxu2 %v1312_v4  ;;  %v1967_v4 = vshll.u32 %v4896_v61, 16  ;;  %v1184_v44 = vsel %vm6130_vm5, %v1182_v36, %v1183_v38  ;;  %v1999_v61 = vshll.u32 %v4900_v12, 16  ;;  %v5494_v38 = vld [vmem:[%s7300_s1 + $0x1e0] sm:$0xff]  ;;  %v2033_v12 = vshrl.u32 %v4904_v37, 16 }
  0x87   : > { %v1314_v50 = vpack.c.b16 %v1286_v5, %v1285_v3  ;;  %v1288_v35 = vunpack.c.l.b16 %v1184_v44  ;;  %v1189_v11 = vrot.slane %v1187_v0, 4  ;;  %3814 = vmatpush.bf16.msra.mxu3 %v5494_v38 }
  0x88   : > { %v1969_v10 = vrot.slane %v1967_v4, 5  ;;  %v2001_v7 = vrot.slane %v1999_v61, 5 }
  0x8a   : > { %v1970_v20 = vsel %vm5830_vm2, %v1965_v9, %v1969_v10  ;;  %v5430_v9 = vld [vmem:[%s5815_s9 + $0x3c] sm:$0xff]  ;;  %v4682_v10 = vrot.slane %v1104_v1, 9 }
  0x8b   : > { %1719 = vmatmul.bf16.gmra.mxu3 %v5427_v18  ;;  %v1975_v18 = vshll.u32 %v4897_v6, 16  ;;  %v2283_v29 = vunpack.c.l.b16 %v1970_v20  ;;  %v1998_v6 = vrot.slane %v1996_v58, 4 }
  0x8c   : > { %v1188_v21 = vsel %vm6130_vm5, %v4682_v10, %v1187_v0 }
  0x8d   : > { %v1977_v26 = vrot.slane %v1975_v18, 5  ;;  %v2311_v41 = vpack.c.b16 %v2283_v29, %v2282_v28  ;;  %v4902_v18 = vld [vmem:[%s5815_s9 + $0x50] sm:$0x1]  ;;  %v2002_v20 = vor.u32 %v2001_v7, %v1998_v6  ;;  %v1289_v28 = vunpack.c.l.b16 %v1188_v21 }
  0x8f   : > { %2401 = vmatmul.bf16.gmra.mxu0 %v2309_v24  ;;  %v1103_v24 = vld [vmem:[%s5815_s9 + $0x30] sm:$0xe]  ;;  %v1978_v40 = vor.u32 %v1977_v26, %v1974_v25  ;;  %v5486_v25 = vld [vmem:[%s7300_s1 + $0x1a0] sm:$0xff] }
  0x90   : > { %v4681_v34 = vrot.slane %v1103_v24, 9  ;;  %v2015_v24 = vshll.u32 %v4902_v18, 16  ;;  %3132 = vmatpush.bf16.msra.mxu2 %v5486_v25 }
  0x91   : > { %v1979_v47 = vrot.slane %v1978_v40, 4 }
  0x92   : > { %v1181_v42 = vsel %vm6130_vm5, %v4681_v34, %v1180_v22  ;;  %v1191_v22 = vsel %vm6130_vm5, %v1189_v11, %v1190_v59  ;;  %v2017_v36 = vrot.slane %v2015_v24, 5 }
  0x93   : > { %v1287_v48 = vunpack.c.l.b16 %v1181_v42  ;;  %v1984_v55 = vsel %vm5830_vm2, %v1979_v47, %v1983_v32  ;;  %v1290_v29 = vunpack.c.l.b16 %v1191_v22  ;;  %v2029_v47 = vshll.u32 %v4904_v37, 16  ;;  %v4906_v22 = vld [vmem:[%s5815_s9 + $0x60] sm:$0xf] }
  0x94   : > { %1028 = vmatmul.bf16.gmra.mxu1 %v5388_v27  ;;  %v1987_v27 = vrot.slane %v1985_v23, 4  ;;  %v2284_v3 = vunpack.c.l.b16 %v1984_v55  ;;  %v2047_v37 = vshll.u32 %v4906_v22, 16 }
  0x95   : > { %v1315_v57 = vpack.c.b16 %v1288_v35, %v1287_v48  ;;  %v5502_v48 = vld [vmem:[%s7300_s1 + $0x220] sm:$0xff] }
  0x96   : > { %1409 = vmatmul.bf16.gmra.mxu2 %v1313_v39  ;;  %v4899_v39 = vld [vmem:[%s5815_s9 + $0x44] sm:$0x1]  ;;  %v1988_v45 = vor.u32 %v1987_v27, %v1983_v32  ;;  %v2003_v32 = vrot.slane %v2002_v20, 4  ;;  %4240 = vmatpush.bf16.msra.mxu0 %v5502_v48 }
  0x97   : > { %v1991_v46 = vshll.u32 %v4899_v39, 16  ;;  %v5462_v27 = vld [vmem:[%s7300_s1 + $0x160] sm:$0xff] }
  0x98   : > { %v1989_v49 = vrot.slane %v1988_v45, 4  ;;  %2817 = vmatpush.bf16.msra.mxu1 %v5462_v27 }
  0x99   : > { %v1993_v54 = vrot.slane %v1991_v46, 5  ;;  %v1316_v46 = vpack.c.b16 %v1290_v29, %v1289_v28  ;;  %v5392_v29 = vld [vmem:[%s5815_s9 + $0x48] sm:$0xff] }
  0x9b   : > { %1724 = vmatmul.bf16.gmra.mxu3 %v5428_v31  ;;  %v5390_v31 = vld [vmem:[%s5815_s9 + $0x30] sm:$0xff]  ;;  %v1994_v63 = vsel %vm5830_vm2, %v1989_v49, %v1993_v54  ;;  %v1194_v54 = vrot.slane %v5973_v2, 5 }
  0x9c   : > { %v2285_v5 = vunpack.c.l.b16 %v1994_v63  ;;  %v5431_v63 = vld [vmem:[%s5815_s9 + $0x48] sm:$0xff] }
  0x9d   : > { %v1196_v0 = vrot.slane %v1194_v54, 4 }
  0x9e   : > { %v2312_v51 = vpack.c.b16 %v2285_v5, %v2284_v3  ;;  %v2035_v3 = vrot.slane %v2033_v12, 4  ;;  %v4905_v5 = vld [vmem:[%s5815_s9 + $0x5c] sm:$0x1] }
  0x9f   : > { %2406 = vmatmul.bf16.gmra.mxu0 %v2310_v60  ;;  %v2005_v60 = vshll.u32 %v4901_v19, 16  ;;  %v1105_v19 = vld [vmem:[%s5815_s9 + $0x48] sm:$0xe]  ;;  %v2039_v59 = vshll.u32 %v4905_v5, 16  ;;  %v5485_v5 = vld [vmem:[%s7300_s1 + $0x198] sm:$0xff] }
  0xa0   : > { %v4683_v62 = vrot.slane %v1105_v19, 9  ;;  %3133 = vmatpush.bf16.msra.mxu2 %v5485_v5 }
  0xa1   : > { %v2007_v8 = vrot.slane %v2005_v60, 5  ;;  %v2031_v60 = vrot.slane %v2029_v47, 5  ;;  %v2041_v21 = vrot.slane %v2039_v59, 5  ;;  %v4909_v59 = vld [vmem:[%s5815_s9 + $0x6c] sm:$0xf] }
  0xa2   : > { %v1195_v10 = vsel %vm6130_vm5, %v4683_v62, %v1194_v54  ;;  %v5432_v54 = vld [vmem:[%s5815_s9 + $0x54] sm:$0xff] }
  0xa3   : > { %v2008_v35 = vsel %vm5830_vm2, %v2003_v32, %v2007_v8  ;;  %v2036_v13 = vor.u32 %v2035_v3, %v2031_v60  ;;  %v1291_v18 = vunpack.c.l.b16 %v1195_v10 }
  0xa4   : > { %1033 = vmatmul.bf16.gmra.mxu1 %v5389_v15  ;;  %v2011_v15 = vrot.slane %v2009_v14, 4  ;;  %v2286_v58 = vunpack.c.l.b16 %v2008_v35  ;;  %v5594_v14 = vld [vmem:[%s5815_s9 + $0x50] sm:$0x1]  ;;  %v2049_v35 = vrot.slane %v2047_v37, 5  ;;  %v5595_v37 = vld [vmem:[%s5815_s9 + $0x64] sm:$0xf] }
  0xa5   : > { %v1197_v1 = vrot.slane %v5594_v14, 5  ;;  %v2037_v20 = vrot.slane %v2036_v13, 4 }
  0xa6   : > { %1414 = vmatmul.bf16.gmra.mxu2 %v1314_v50  ;;  %v2012_v23 = vor.u32 %v2011_v15, %v2007_v8 }
  0xa7   : > { %v1198_v11 = vsel %vm6130_vm5, %v1196_v0, %v1197_v1  ;;  %v2042_v27 = vsel %vm5830_vm2, %v2037_v20, %v2041_v21  ;;  %v5393_v20 = vld [vmem:[%s5815_s9 + $0x54] sm:$0xff]  ;;  %v4910_v21 = vld [vmem:[%s5815_s9 + $0x70] sm:$0xf] }
  0xa8   : > { %v2013_v34 = vrot.slane %v2012_v23, 4  ;;  %v4907_v23 = vld [vmem:[%s5815_s9 + $0x64] sm:$0xf]  ;;  %v2289_v47 = vunpack.c.l.b16 %v2042_v27  ;;  %v2071_v27 = vshll.u32 %v4909_v59, 16 }
  0xa9   : > { %v2053_v38 = vshll.u32 %v4907_v23, 16 }
  0xaa   : > { %v2018_v49 = vsel %vm5830_vm2, %v2013_v34, %v2017_v36  ;;  %v2044_v36 = vshrl.u32 %v4906_v22, 16 }
  0xab   : > { %1729 = vmatmul.bf16.gmra.mxu3 %v5429_v33  ;;  %v4903_v33 = vld [vmem:[%s5815_s9 + $0x54] sm:$0xf]  ;;  %v2287_v61 = vunpack.c.l.b16 %v2018_v49  ;;  %v2055_v49 = vrot.slane %v2053_v38, 5  ;;  %v1208_v38 = vrot.slane %v5595_v37, 5 }
  0xac   : > { %v2020_v42 = vshrl.u32 %v4903_v33, 16  ;;  %v2023_v44 = vshll.u32 %v4903_v33, 16  ;;  %v2046_v48 = vrot.slane %v2044_v36, 4 }
  0xad   : > { %v2313_v8 = vpack.c.b16 %v2287_v61, %v2286_v58  ;;  %v4908_v61 = vld [vmem:[%s5815_s9 + $0x68] sm:$0x1] }
  0xae   : > { %v2025_v55 = vrot.slane %v2023_v44, 5  ;;  %v1106_v44 = vld [vmem:[%s5815_s9 + $0x54] sm:$0xe]  ;;  %v2050_v62 = vor.u32 %v2049_v35, %v2046_v48  ;;  %v2063_v3 = vshll.u32 %v4908_v61, 16  ;;  %v2073_v61 = vrot.slane %v2071_v27, 5  ;;  %v5394_v27 = vld [vmem:[%s5815_s9 + $0x60] sm:$0xff] }
  0xaf   : > { %2411 = vmatmul.bf16.gmra.mxu0 %v2311_v41  ;;  %v5391_v41 = vld [vmem:[%s5815_s9 + $0x3c] sm:$0xff]  ;;  %v4684_v12 = vrot.slane %v1106_v44, 9  ;;  %v2077_v44 = vshll.u32 %v4910_v21, 16 }
  0xb0   : > { %v2051_v10 = vrot.slane %v2050_v62, 4  ;;  %v2065_v13 = vrot.slane %v2063_v3, 5 }
  0xb1   : > { %v6238_v56 = vpop.f32.mrf.mxu1 }
  0xb4   : > { %v6243_v4 = vpop.f32.mrf.mxu0  ;;  %1038 = vmatmul.bf16.gmra.mxu1 %v5390_v31  ;;  %v2022_v31 = vrot.slane %v2020_v42, 4  ;;  %v2057_v42 = vshrl.u32 %v4907_v23, 16 }
  0xb6   : > { %1419 = vmatmul.bf16.gmra.mxu2 %v1315_v57  ;;  %v2026_v7 = vor.u32 %v2025_v55, %v2022_v31  ;;  %v1204_v31 = vrot.slane %v6063_v53, 5  ;;  %v2059_v55 = vrot.slane %v2057_v42, 4  ;;  %v1107_v42 = vld [vmem:[%s5815_s9 + $0x60] sm:$0xe] }
  0xb7   : > { %v6248_v17 = vpop.f32.mrf.mxu2 }
  0xb8   : > { %v6251_v50 = vpop.f32.mrf.mxu3  ;;  %v2027_v15 = vrot.slane %v2026_v7, 4  ;;  %v2060_v1 = vor.u32 %v2059_v55, %v2055_v49 }
  0xb9   : > { %v6253_v16 = vpop.f32.mrf.mxu1 }
  0xba   : > { %v2032_v32 = vsel %vm5830_vm2, %v2027_v15, %v2031_v60  ;;  %v5493_v15 = vld [vmem:[%s7300_s1 + $0x1d8] sm:$0xff] }
  0xbb   : > { %1734 = vmatmul.bf16.gmra.mxu3 %v5430_v9 }
  0xbc   : > { %v6262_v26 = vpop.f32.mrf.mxu0  ;;  %3815 = vmatpush.bf16.msra.mxu3 %v5493_v15 }
  0xbf   : > { %2416 = vmatmul.bf16.gmra.mxu0 %v2312_v51  ;;  %v6272_v39 = vpop.f32.mrf.mxu2  ;;  %v1292_v51 = vunpack.c.l.b16 %v1198_v11  ;;  %v2061_v11 = vrot.slane %v2060_v1, 4 }
  0xc0   : > { %v6274_v40 = vpop.f32.mrf.mxu3 }
  0xc1   : > { %v6277_v45 = vpop.f32.mrf.mxu1  ;;  %v1317_v34 = vpack.c.b16 %v1292_v51, %v1291_v18  ;;  %v5461_v18 = vld [vmem:[%s7300_s1 + $0x158] sm:$0xff]  ;;  %v2066_v36 = vsel %vm5830_vm2, %v2061_v11, %v2065_v13 }
  0xc2   : > { %2818 = vmatpush.bf16.msra.mxu1 %v5461_v18  ;;  %v2291_v35 = vunpack.c.l.b16 %v2066_v36 }
  0xc4   : > { %1043 = vmatmul.bf16.gmra.mxu1 %v5391_v41  ;;  %v1201_v41 = vrot.slane %v6060_v52, 5 }
  0xc6   : > { %v6288_v57 = vpop.f32.mrf.mxu0  ;;  %1424 = vmatmul.bf16.gmra.mxu2 %v1316_v46  ;;  %v2288_v46 = vunpack.c.l.b16 %v2032_v32  ;;  %v1203_v19 = vrot.slane %v1201_v41, 4  ;;  %v1202_v14 = vsel %vm6130_vm5, %v4684_v12, %v1201_v41  ;;  %v4685_v12 = vrot.slane %v1107_v42, 9 }
  0xc7   : > { %v6292_v2 = vpop.f32.mrf.mxu2  ;;  %v1293_v7 = vunpack.c.l.b16 %v1202_v14 }
  0xc8   : > { %v6295_v6 = vpop.f32.mrf.mxu3  ;;  %v2314_v60 = vpack.c.b16 %v2289_v47, %v2288_v46  ;;  %v1205_v53 = vsel %vm6130_vm5, %v1203_v19, %v1204_v31  ;;  %v2081_v46 = vshrl.u32 %v4910_v21, 16  ;;  %v5501_v47 = vld [vmem:[%s7300_s1 + $0x218] sm:$0xff]  ;;  %v1210_v19 = vrot.slane %v1208_v38, 4  ;;  %v5596_v31 = vld [vmem:[%s5815_s9 + $0x68] sm:$0x1] }
  0xc9   : > { %v6297_v9 = vpop.f32.mrf.mxu1  ;;  %4241 = vmatpush.bf16.msra.mxu0 %v5501_v47  ;;  %v1211_v55 = vrot.slane %v5596_v31, 5  ;;  %v1209_v5 = vsel %vm6130_vm5, %v4685_v12, %v1208_v38  ;;  %v4913_v21 = vld [vmem:[%s5815_s9 + $0x7c] sm:$0xf]  ;;  %v5597_v47 = vld [vmem:[%s5815_s9 + $0x70] sm:$0xf] }
  0xca   : > { %v2083_v62 = vrot.slane %v2081_v46, 4  ;;  %v1295_v18 = vunpack.c.l.b16 %v1209_v5  ;;  %v2101_v42 = vshll.u32 %v4913_v21, 16 }
  0xcb   : > { %1739 = vmatmul.bf16.gmra.mxu3 %v5431_v63 }
  0xce   : > { %v6305_v24 = vpop.f32.mrf.mxu0 }
  0xcf   : > { %2421 = vmatmul.bf16.gmra.mxu0 %v2313_v8  ;;  %v6307_v25 = vpop.f32.mrf.mxu2  ;;  %v1294_v8 = vunpack.c.l.b16 %v1205_v53  ;;  %v4911_v53 = vld [vmem:[%s5815_s9 + $0x74] sm:$0x1] }
  0xd0   : > { %v6309_v28 = vpop.f32.mrf.mxu3  ;;  %v2087_v13 = vshll.u32 %v4911_v53, 16 }
  0xd1   : > { %v6314_v33 = vpop.f32.mrf.mxu1  ;;  %v1318_v23 = vpack.c.b16 %v1294_v8, %v1293_v7  ;;  %v1212_v7 = vsel %vm6130_vm5, %v1210_v19, %v1211_v55 }
  0xd4   : > { %1048 = vmatmul.bf16.gmra.mxu1 %v5392_v29  ;;  %v2068_v29 = vshrl.u32 %v4909_v59, 16  ;;  %v4912_v59 = vld [vmem:[%s5815_s9 + $0x78] sm:$0xf] }
  0xd5   : > { %v2092_v36 = vshrl.u32 %v4912_v59, 16  ;;  %v2095_v37 = vshll.u32 %v4912_v59, 16 }
  0xd6   : > { %1429 = vmatmul.bf16.gmra.mxu2 %v1317_v34  ;;  %v2056_v34 = vsel %vm5830_vm2, %v2051_v10, %v2055_v49  ;;  %v2070_v49 = vrot.slane %v2068_v29, 4 }
  0xd7   : > { %v6322_v58 = vpop.f32.mrf.mxu2  ;;  %v2290_v48 = vunpack.c.l.b16 %v2056_v34  ;;  %v2089_v34 = vrot.slane %v2087_v13, 5  ;;  %v2094_v55 = vrot.slane %v2092_v36, 4  ;;  %v5434_v13 = vld [vmem:[%s5815_s9 + $0x6c] sm:$0xff] }
  0xd8   : > { %v2074_v8 = vor.u32 %v2073_v61, %v2070_v49  ;;  %v2097_v61 = vrot.slane %v2095_v37, 5 }
  0xd9   : > { %v6329_v0 = vpop.f32.mrf.mxu1  ;;  %v2315_v1 = vpack.c.b16 %v2291_v35, %v2290_v48  ;;  %v1215_v48 = vrot.slane %v5597_v47, 5  ;;  %v5484_v47 = vld [vmem:[%s7300_s1 + $0x190] sm:$0xff] }
  0xda   : > { %v6325_v52 = vpop.f32.mrf.mxu0  ;;  %v6327_v63 = vpop.f32.mrf.mxu3  ;;  %3134 = vmatpush.bf16.msra.mxu2 %v5484_v47 }
  0xdb   : > { %1744 = vmatmul.bf16.gmra.mxu3 %v5432_v54  ;;  %v5433_v54 = vld [vmem:[%s5815_s9 + $0x60] sm:$0xff] }
  0xdf   : > { %2426 = vmatmul.bf16.gmra.mxu0 %v2314_v60  ;;  %v6345_v51 = vpop.f32.mrf.mxu2  ;;  %v2079_v60 = vrot.slane %v2077_v44, 5  ;;  %v2105_v44 = vshrl.u32 %v4913_v21, 16 }
  0xe1   : > { %v6351_v32 = vpop.f32.mrf.mxu1  ;;  %v2084_v11 = vor.u32 %v2083_v62, %v2079_v60  ;;  %v2103_v62 = vrot.slane %v2101_v42, 5  ;;  %v2107_v53 = vrot.slane %v2105_v44, 4 }
  0xe2   : > { %v6349_v22 = vpop.f32.mrf.mxu0  ;;  %v6358_v41 = vpop.f32.mrf.mxu3 }
  0xe3   : > { %v2085_v29 = vrot.slane %v2084_v11, 4  ;;  %v4914_v11 = vld [vmem:[%s5815_s9 + $0x80] sm:$0x1]  ;;  %v2108_v21 = vor.u32 %v2107_v53, %v2103_v62  ;;  %v5460_v53 = vld [vmem:[%s7300_s1 + $0x150] sm:$0xff] }
  0xe4   : > { %1053 = vmatmul.bf16.gmra.mxu1 %v5393_v20  ;;  %v1296_v20 = vunpack.c.l.b16 %v1212_v7  ;;  %v5598_v7 = vld [vmem:[%s5815_s9 + $0x74] sm:$0x1] }
  0xe5   : > { %v2090_v31 = vsel %vm5830_vm2, %v2085_v29, %v2089_v34  ;;  %2819 = vmatpush.bf16.msra.mxu1 %v5460_v53 }
  0xe6   : > { %1434 = vmatmul.bf16.gmra.mxu2 %v1318_v23  ;;  %v2075_v23 = vrot.slane %v2074_v8, 4  ;;  %v1319_v46 = vpack.c.b16 %v1296_v20, %v1295_v18  ;;  %v1218_v8 = vrot.slane %v5598_v7, 5  ;;  %v2293_v18 = vunpack.c.l.b16 %v2090_v31  ;;  %v4915_v31 = vld [vmem:[%s5815_s9 + $0x84] sm:$0xf]  ;;  %v5395_v7 = vld [vmem:[%s5815_s9 + $0x6c] sm:$0xff] }
  0xe8   : > { %v2080_v49 = vsel %vm5830_vm2, %v2075_v23, %v2079_v60  ;;  %v1217_v60 = vrot.slane %v1215_v48, 4  ;;  %v2111_v23 = vshll.u32 %v4914_v11, 16 }
  0xe9   : > { %v6366_v14 = vpop.f32.mrf.mxu2  ;;  %v6369_v3 = vpop.f32.mrf.mxu1  ;;  %v2292_v59 = vunpack.c.l.b16 %v2080_v49 }
  0xea   : > { %v1219_v36 = vsel %vm6130_vm5, %v1217_v60, %v1218_v8 }
  0xeb   : > { %1749 = vmatmul.bf16.gmra.mxu3 %v5433_v54  ;;  %v1108_v54 = vld [vmem:[%s5815_s9 + $0x6c] sm:$0xe]  ;;  %v2316_v37 = vpack.c.b16 %v2293_v18, %v2292_v59  ;;  %v1298_v49 = vunpack.c.l.b16 %v1219_v36 }
  0xec   : > { %v6375_v10 = vpop.f32.mrf.mxu0  ;;  %v4686_v5 = vrot.slane %v1108_v54, 9  ;;  %v2109_v54 = vrot.slane %v2108_v21, 4 }
  0xee   : > { %v6378_v15 = vpop.f32.mrf.mxu3  ;;  %v1216_v34 = vsel %vm6130_vm5, %v4686_v5, %v1215_v48  ;;  %v2113_v48 = vrot.slane %v2111_v23, 5 }
  0xef   : > { %2431 = vmatmul.bf16.gmra.mxu0 %v2315_v1 }
  0xf0   : > { %v2114_v11 = vsel %vm5830_vm2, %v2109_v54, %v2113_v48 }
  0xf1   : > { %v6381_v38 = vpop.f32.mrf.mxu2  ;;  %v1019_v35 = vpop.f32.mrf.mxu1 }
  0xf2   : > { %v1020_v19 = vadd.f32 %v1019_v35, %v6243_v4  ;;  %v2098_v4 = vor.u32 %v2097_v61, %v2094_v55  ;;  %v1297_v35 = vunpack.c.l.b16 %v1216_v34  ;;  %v4916_v61 = vld [vmem:[%s5815_s9 + $0x88] sm:$0xf] }
  0xf3   : > { %v2129_v21 = vshrl.u32 %v4916_v61, 16 }
  0xf4   : > { %v6388_v12 = vpop.f32.mrf.mxu0  ;;  %1058 = vmatmul.bf16.gmra.mxu1 %v5394_v27  ;;  %v1320_v8 = vpack.c.b16 %v1298_v49, %v1297_v35 }
  0xf5   : > { %v2131_v54 = vrot.slane %v2129_v21, 4 }
  0xf6   : > { %v6393_v1 = vpop.f32.mrf.mxu3  ;;  %1439 = vmatmul.bf16.gmra.mxu2 %v1319_v46  ;;  %v2099_v46 = vrot.slane %v2098_v4, 4  ;;  %v2119_v4 = vshll.u32 %v4915_v31, 16 }
  0xf8   : > { %v2104_v5 = vsel %vm5830_vm2, %v2099_v46, %v2103_v62  ;;  %v2121_v35 = vrot.slane %v2119_v4, 5 }
  0xf9   : > { %v1400_v20 = vpop.f32.mrf.mxu2  ;;  %v1021_v27 = vpop.f32.mrf.mxu1 }
  0xfa   : > { %v1480_v29 = vadd.f32 %v1400_v20, %v1020_v19  ;;  %v1022_v44 = vadd.f32 %v1021_v27, %v6262_v26  ;;  %v5492_v26 = vld [vmem:[%s7300_s1 + $0x1d0] sm:$0xff]  ;;  %v2125_v20 = vshll.u32 %v4916_v61, 16 }
  0xfb   : > { %1754 = vmatmul.bf16.gmra.mxu3 %v5434_v13  ;;  %v2116_v13 = vshrl.u32 %v4915_v31, 16  ;;  %v5500_v27 = vld [vmem:[%s7300_s1 + $0x210] sm:$0xff] }
  0xfc   : > { %v2397_v42 = vpop.f32.mrf.mxu0  ;;  %3816 = vmatpush.bf16.msra.mxu3 %v5492_v26  ;;  %v2127_v49 = vrot.slane %v2125_v20, 5  ;;  %4242 = vmatpush.bf16.msra.mxu0 %v5500_v27  ;;  %v4917_v26 = vld [vmem:[%s5815_s9 + $0x8c] sm:$0x1] }
  0xfd   : > { %v2118_v47 = vrot.slane %v2116_v13, 4  ;;  %v2135_v4 = vshll.u32 %v4917_v26, 16  ;;  %v5601_v26 = vld [vmem:[%s5815_s9 + $0x88] sm:$0xf] }
  0xfe   : > { %v1715_v19 = vpop.f32.mrf.mxu3 }
  0xff   : > { %2436 = vmatmul.bf16.gmra.mxu0 %v2316_v37  ;;  %v1795_v55 = vadd.f32 %v1715_v19, %v1480_v29  ;;  %v5599_v29 = vld [vmem:[%s5815_s9 + $0x7c] sm:$0xf]  ;;  %v1109_v37 = vld [vmem:[%s5815_s9 + $0x78] sm:$0xe] }
 0x100   : > { %v1222_v34 = vrot.slane %v5599_v29, 5  ;;  %v5435_v19 = vld [vmem:[%s5815_s9 + $0x78] sm:$0xff] }
 0x101   : > { %v1402_v60 = vpop.f32.mrf.mxu2  ;;  %v6419_v59 = vadd.f32 %v2397_v42, %v1795_v55  ;;  %v1024_v23 = vpop.f32.mrf.mxu1  ;;  %v2294_v42 = vunpack.c.l.b16 %v2104_v5  ;;  %v5600_v55 = vld [vmem:[%s5815_s9 + $0x80] sm:$0x1] }
 0x102   : > { %v1481_v18 = vadd.f32 %v1402_v60, %v1022_v44  ;;  %v1025_v36 = vadd.f32 %v1024_v23, %v6288_v57  ;;  %v2295_v44 = vunpack.c.l.b16 %v2114_v11  ;;  %v4687_v57 = vrot.slane %v1109_v37, 9 }
 0x103   : > { %v1224_v31 = vrot.slane %v1222_v34, 4  ;;  %v1225_v61 = vrot.slane %v5600_v55, 5  ;;  %v2122_v23 = vor.u32 %v2121_v35, %v2118_v47  ;;  %v5396_v47 = vld [vmem:[%s5815_s9 + $0x78] sm:$0xff]  ;;  %v4919_v35 = vld [vmem:[%s5815_s9 + $0x94] sm:$0xf] }
 0x104   : > { %v2399_v62 = vpop.f32.mrf.mxu0  ;;  %1063 = vmatmul.bf16.gmra.mxu1 %v5395_v7  ;;  %v2317_v60 = vpack.c.b16 %v2295_v44, %v2294_v42  ;;  %v1223_v11 = vsel %vm6130_vm5, %v4687_v57, %v1222_v34  ;;  %v2137_v44 = vrot.slane %v2135_v4, 5  ;;  %v4918_v34 = vld [vmem:[%s5815_s9 + $0x90] sm:$0xf] }
 0x105   : > { %v1226_v13 = vsel %vm6130_vm5, %v1224_v31, %v1225_v61  ;;  %v2123_v27 = vrot.slane %v2122_v23, 4  ;;  %v2140_v57 = vshrl.u32 %v4918_v34, 16  ;;  %v1110_v23 = vld [vmem:[%s5815_s9 + $0x84] sm:$0xe] }
 0x106   : > { %v1717_v46 = vpop.f32.mrf.mxu3  ;;  %1444 = vmatmul.bf16.gmra.mxu2 %v1320_v8 }
 0x107   : > { %v1796_v48 = vadd.f32 %v1717_v46, %v1481_v18  ;;  %v2132_v18 = vor.u32 %v2131_v54, %v2127_v49  ;;  %v2128_v55 = vsel %vm5830_vm2, %v2123_v27, %v2127_v49  ;;  %v2142_v49 = vrot.slane %v2140_v57, 4 }
 0x109   : > { %v1405_v53 = vpop.f32.mrf.mxu2  ;;  %v6430_v5 = vadd.f32 %v2399_v62, %v1796_v48  ;;  %v1026_v8 = vpop.f32.mrf.mxu1  ;;  %v1300_v62 = vunpack.c.l.b16 %v1226_v13  ;;  %v2133_v42 = vrot.slane %v2132_v18, 4  ;;  %v2296_v18 = vunpack.c.l.b16 %v2128_v55 }
 0x10a   : > { %v1482_v7 = vadd.f32 %v1405_v53, %v1025_v36  ;;  %v1027_v21 = vadd.f32 %v1026_v8, %v6305_v24  ;;  %v1299_v36 = vunpack.c.l.b16 %v1223_v11  ;;  %v2143_v24 = vshll.u32 %v4918_v34, 16  ;;  %v4920_v34 = vld [vmem:[%s5815_s9 + $0x98] sm:$0x1] }
 0x10b   : > { %1759 = vmatmul.bf16.gmra.mxu3 %v5435_v19  ;;  %v2138_v61 = vsel %vm5830_vm2, %v2133_v42, %v2137_v44  ;;  %v1229_v53 = vrot.slane %v5601_v26, 5  ;;  %v2149_v8 = vshll.u32 %v4919_v35, 16  ;;  %v2153_v11 = vshrl.u32 %v4919_v35, 16 }
 0x10c   : > { %v2402_v20 = vpop.f32.mrf.mxu0  ;;  %v1321_v19 = vpack.c.b16 %v1300_v62, %v1299_v36  ;;  %v2297_v4 = vunpack.c.l.b16 %v2138_v61  ;;  %v4688_v36 = vrot.slane %v1110_v23, 9  ;;  %v2159_v26 = vshll.u32 %v4920_v34, 16 }
 0x10d   : > { %v1231_v62 = vrot.slane %v1229_v53, 4  ;;  %v6451_v42 = vrot.slane %v2149_v8, 5 }
 0x10e   : > { %v1720_v29 = vpop.f32.mrf.mxu3  ;;  %v2318_v35 = vpack.c.b16 %v2297_v4, %v2296_v18  ;;  %v5459_v4 = vld [vmem:[%s7300_s1 + $0x148] sm:$0xff] }
 0x10f   : > { %2441 = vmatmul.bf16.gmra.mxu0 %v2317_v60  ;;  %v1797_v37 = vadd.f32 %v1720_v29, %v1482_v7  ;;  %v5436_v29 = vld [vmem:[%s5815_s9 + $0x84] sm:$0xff]  ;;  %2820 = vmatpush.bf16.msra.mxu1 %v5459_v4 }
 0x111   : > { %v1407_v46 = vpop.f32.mrf.mxu2  ;;  %v6440_v48 = vadd.f32 %v2402_v20, %v1797_v37  ;;  %v1029_v31 = vpop.f32.mrf.mxu1  ;;  %v2145_v20 = vrot.slane %v2143_v24, 5  ;;  %v5602_v37 = vld [vmem:[%s5815_s9 + $0x8c] sm:$0x1] }
 0x112   : > { %v1483_v54 = vadd.f32 %v1407_v46, %v1027_v21  ;;  %v1030_v7 = vadd.f32 %v1029_v31, %v6325_v52  ;;  %v1232_v27 = vrot.slane %v5602_v37, 5  ;;  %v2155_v52 = vrot.slane %v2153_v11, 4 }
 0x113   : > { %v2146_v24 = vor.u32 %v2145_v20, %v2142_v49  ;;  %v2161_v20 = vrot.slane %v2159_v26, 5 }
 0x114   : > { %v2404_v60 = vpop.f32.mrf.mxu0  ;;  %1068 = vmatmul.bf16.gmra.mxu1 %v5396_v47  ;;  %v1233_v57 = vsel %vm6130_vm5, %v1231_v62, %v1232_v27  ;;  %v2156_v61 = vor.u32 %v2155_v52, %v6451_v42  ;;  %v5397_v62 = vld [vmem:[%s5815_s9 + $0x84] sm:$0xff] }
 0x115   : > { %v1302_v11 = vunpack.c.l.b16 %v1233_v57  ;;  %v2147_v18 = vrot.slane %v2146_v24, 4  ;;  %v1111_v57 = vld [vmem:[%s5815_s9 + $0x90] sm:$0xe] }
 0x116   : > { %v1722_v13 = vpop.f32.mrf.mxu3  ;;  %1449 = vmatmul.bf16.gmra.mxu2 %v1321_v19  ;;  %v2157_v49 = vrot.slane %v2156_v61, 4 }
 0x117   : > { %v1798_v21 = vadd.f32 %v1722_v13, %v1483_v54  ;;  %v1230_v54 = vsel %vm6130_vm5, %v4688_v36, %v1229_v53  ;;  %v4922_v53 = vld [vmem:[%s5815_s9 + $0xa0] sm:$0xf] }
 0x118   : > { %v1301_v8 = vunpack.c.l.b16 %v1230_v54  ;;  %v2173_v37 = vshll.u32 %v4922_v53, 16  ;;  %v2177_v27 = vshrl.u32 %v4922_v53, 16  ;;  %v2152_v54 = vsel %vm5830_vm2, %v2147_v18, %v6451_v42  ;;  %v5604_v53 = vld [vmem:[%s5815_s9 + $0x98] sm:$0x1] }
 0x119   : > { %v1410_v44 = vpop.f32.mrf.mxu2  ;;  %v6454_v47 = vadd.f32 %v2404_v60, %v1798_v21  ;;  %v1031_v19 = vpop.f32.mrf.mxu1  ;;  %v5483_v60 = vld [vmem:[%s7300_s1 + $0x188] sm:$0xff]  ;;  %v2162_v26 = vsel %vm5830_vm2, %v2157_v49, %v2161_v20  ;;  %v4689_v42 = vrot.slane %v1111_v57, 9  ;;  %v2298_v4 = vunpack.c.l.b16 %v2152_v54 }
 0x11a   : > { %v1484_v46 = vadd.f32 %v1410_v44, %v1030_v7  ;;  %v1032_v55 = vadd.f32 %v1031_v19, %v6349_v22  ;;  %v4921_v7 = vld [vmem:[%s5815_s9 + $0x9c] sm:$0xf]  ;;  %3135 = vmatpush.bf16.msra.mxu2 %v5483_v60  ;;  %v5491_v22 = vld [vmem:[%s7300_s1 + $0x1c8] sm:$0xff]  ;;  %v1322_v34 = vpack.c.b16 %v1302_v11, %v1301_v8  ;;  %v2299_v49 = vunpack.c.l.b16 %v2162_v26 }
 0x11b   : > { %1764 = vmatmul.bf16.gmra.mxu3 %v5436_v29  ;;  %v2164_v21 = vshrl.u32 %v4921_v7, 16  ;;  %v2167_v29 = vshll.u32 %v4921_v7, 16  ;;  %v5499_v60 = vld [vmem:[%s7300_s1 + $0x208] sm:$0xff]  ;;  %v2175_v7 = vrot.slane %v2173_v37, 5 }
 0x11c   : > { %v2407_v31 = vpop.f32.mrf.mxu0  ;;  %3817 = vmatpush.bf16.msra.mxu3 %v5491_v22  ;;  %4243 = vmatpush.bf16.msra.mxu0 %v5499_v60  ;;  %v5437_v22 = vld [vmem:[%s5815_s9 + $0x90] sm:$0xff] }
 0x11e   : > { %v1725_v23 = vpop.f32.mrf.mxu3 }
 0x11f   : > { %2446 = vmatmul.bf16.gmra.mxu0 %v2318_v35  ;;  %v1799_v13 = vadd.f32 %v1725_v23, %v1484_v46  ;;  %v5603_v46 = vld [vmem:[%s5815_s9 + $0x94] sm:$0xf]  ;;  %v2179_v23 = vrot.slane %v2177_v27, 4 }
 0x120   : > { %v1236_v35 = vrot.slane %v5603_v46, 5 }
 0x121   : > { %v1412_v36 = vpop.f32.mrf.mxu2  ;;  %v6474_v52 = vadd.f32 %v2407_v31, %v1799_v13  ;;  %v1034_v19 = vpop.f32.mrf.mxu1  ;;  %v2166_v31 = vrot.slane %v2164_v21, 4  ;;  %v1239_v13 = vrot.slane %v5604_v53, 5 }
 0x122   : > { %v1485_v44 = vadd.f32 %v1412_v36, %v1032_v55  ;;  %v1035_v61 = vadd.f32 %v1034_v19, %v6375_v10  ;;  %v2169_v55 = vrot.slane %v2167_v29, 5  ;;  %v1238_v11 = vrot.slane %v1236_v35, 4  ;;  %v4923_v10 = vld [vmem:[%s5815_s9 + $0xa4] sm:$0x1] }
 0x123   : > { %v2180_v29 = vor.u32 %v2179_v23, %v2175_v7  ;;  %v2183_v36 = vshll.u32 %v4923_v10, 16  ;;  %v1237_v37 = vsel %vm6130_vm5, %v4689_v42, %v1236_v35  ;;  %v4924_v35 = vld [vmem:[%s5815_s9 + $0xa8] sm:$0xf] }
 0x124   : > { %v2409_v24 = vpop.f32.mrf.mxu0  ;;  %1073 = vmatmul.bf16.gmra.mxu1 %v5397_v62  ;;  %v2170_v20 = vor.u32 %v2169_v55, %v2166_v31  ;;  %v1240_v27 = vsel %vm6130_vm5, %v1238_v11, %v1239_v13  ;;  %v1303_v26 = vunpack.c.l.b16 %v1237_v37  ;;  %v5398_v11 = vld [vmem:[%s5815_s9 + $0x90] sm:$0xff]  ;;  %v2188_v13 = vshrl.u32 %v4924_v35, 16 }
 0x125   : > { %v1304_v31 = vunpack.c.l.b16 %v1240_v27  ;;  %v2185_v55 = vrot.slane %v2183_v36, 5 }
 0x126   : > { %v1727_v8 = vpop.f32.mrf.mxu3  ;;  %1454 = vmatmul.bf16.gmra.mxu2 %v1322_v34  ;;  %v2171_v57 = vrot.slane %v2170_v20, 4 }
 0x127   : > { %v1800_v18 = vadd.f32 %v1727_v8, %v1485_v44  ;;  %v2319_v44 = vpack.c.b16 %v2299_v49, %v2298_v4  ;;  %v4925_v8 = vld [vmem:[%s5815_s9 + $0xac] sm:$0xf]  ;;  %v1323_v53 = vpack.c.b16 %v1304_v31, %v1303_v26  ;;  %v5438_v26 = vld [vmem:[%s5815_s9 + $0x9c] sm:$0xff] }
 0x128   : > { %v2197_v4 = vshll.u32 %v4925_v8, 16  ;;  %v2201_v49 = vshrl.u32 %v4925_v8, 16 }
 0x129   : > { %v1415_v21 = vpop.f32.mrf.mxu2  ;;  %v6494_v34 = vadd.f32 %v2409_v24, %v1800_v18  ;;  %v1036_v46 = vpop.f32.mrf.mxu1  ;;  %v2176_v24 = vsel %vm5830_vm2, %v2171_v57, %v2175_v7  ;;  %v1112_v7 = vld [vmem:[%s5815_s9 + $0x9c] sm:$0xe] }
 0x12a   : > { %v1486_v62 = vadd.f32 %v1415_v21, %v1035_v61  ;;  %v1037_v54 = vadd.f32 %v1036_v46, %v6388_v12  ;;  %v2181_v61 = vrot.slane %v2180_v29, 4  ;;  %v5605_v21 = vld [vmem:[%s5815_s9 + $0xa0] sm:$0xf]  ;;  %v4690_v31 = vrot.slane %v1112_v7, 9  ;;  %v4927_v7 = vld [vmem:[%s5815_s9 + $0xb4] sm:$0xf] }
 0x12b   : > { %1769 = vmatmul.bf16.gmra.mxu3 %v5437_v22  ;;  %v2191_v22 = vshll.u32 %v4924_v35, 16  ;;  %v1243_v29 = vrot.slane %v5605_v21, 5 }
 0x12c   : > { %v2412_v19 = vpop.f32.mrf.mxu0  ;;  %v2186_v12 = vsel %vm5830_vm2, %v2181_v61, %v2185_v55  ;;  %v5606_v55 = vld [vmem:[%s5815_s9 + $0xa4] sm:$0x1] }
 0x12d   : > { %v2301_v37 = vunpack.c.l.b16 %v2186_v12  ;;  %v2193_v46 = vrot.slane %v2191_v22, 5  ;;  %v1245_v61 = vrot.slane %v1243_v29, 4 }
 0x12e   : > { %v1730_v60 = vpop.f32.mrf.mxu3 }
 0x12f   : > { %2451 = vmatmul.bf16.gmra.mxu0 %v2319_v44  ;;  %v1801_v23 = vadd.f32 %v1730_v60, %v1486_v62  ;;  %v2300_v62 = vunpack.c.l.b16 %v2176_v24  ;;  %v2190_v44 = vrot.slane %v2188_v13, 4  ;;  %v1246_v60 = vrot.slane %v5606_v55, 5 }
 0x130   : > { %v1244_v13 = vsel %vm6130_vm5, %v4690_v31, %v1243_v29  ;;  %v4928_v31 = vld [vmem:[%s5815_s9 + $0xb8] sm:$0xf]  ;;  %v2215_v55 = vshll.u32 %v4927_v7, 16 }
 0x131   : > { %v1417_v42 = vpop.f32.mrf.mxu2  ;;  %v6504_v10 = vadd.f32 %v2412_v19, %v1801_v23  ;;  %v1039_v20 = vpop.f32.mrf.mxu1  ;;  %v2199_v19 = vrot.slane %v2197_v4, 5  ;;  %v4926_v23 = vld [vmem:[%s5815_s9 + $0xb0] sm:$0x1]  ;;  %v1305_v21 = vunpack.c.l.b16 %v1244_v13  ;;  %v1113_v13 = vld [vmem:[%s5815_s9 + $0xa8] sm:$0xe] }
 0x132   : > { %v1487_v18 = vadd.f32 %v1417_v42, %v1037_v54  ;;  %v2203_v54 = vrot.slane %v2201_v49, 4  ;;  %v1040_v35 = vadd.f32 %v1039_v20, %v6238_v56  ;;  %v2320_v42 = vpack.c.b16 %v2301_v37, %v2300_v62  ;;  %v5482_v56 = vld [vmem:[%s7300_s1 + $0x180] sm:$0xff] }
 0x133   : > { %v2207_v4 = vshll.u32 %v4926_v23, 16  ;;  %3136 = vmatpush.bf16.msra.mxu2 %v5482_v56  ;;  %v2217_v56 = vrot.slane %v2215_v55, 5 }
 0x134   : > { %v2414_v36 = vpop.f32.mrf.mxu0  ;;  %1078 = vmatmul.bf16.gmra.mxu1 %v5398_v11  ;;  %v2194_v11 = vor.u32 %v2193_v46, %v2190_v44  ;;  %v2204_v22 = vor.u32 %v2203_v54, %v2199_v19  ;;  %v5490_v44 = vld [vmem:[%s7300_s1 + $0x1c0] sm:$0xff] }
 0x135   : > { %v5458_v46 = vld [vmem:[%s7300_s1 + $0x140] sm:$0xff]  ;;  %3818 = vmatpush.bf16.msra.mxu3 %v5490_v44 }
 0x136   : > { %v1732_v27 = vpop.f32.mrf.mxu3  ;;  %1459 = vmatmul.bf16.gmra.mxu2 %v1323_v53  ;;  %v2195_v29 = vrot.slane %v2194_v11, 4  ;;  %v2205_v37 = vrot.slane %v2204_v22, 4  ;;  %2821 = vmatpush.bf16.msra.mxu1 %v5458_v46  ;;  %v2225_v22 = vshrl.u32 %v4928_v31, 16 }
 0x137   : > { %v1802_v57 = vadd.f32 %v1732_v27, %v1487_v18  ;;  %v1247_v18 = vsel %vm6130_vm5, %v1245_v61, %v1246_v60  ;;  %v2209_v27 = vrot.slane %v2207_v4, 5  ;;  %v2212_v61 = vshrl.u32 %v4927_v7, 16  ;;  %v5498_v4 = vld [vmem:[%s7300_s1 + $0x200] sm:$0xff]  ;;  %v5439_v7 = vld [vmem:[%s5815_s9 + $0xa8] sm:$0xff] }
 0x138   : > { %4244 = vmatpush.bf16.msra.mxu0 %v5498_v4  ;;  %v4930_v4 = vld [vmem:[%s5815_s9 + $0xc0] sm:$0xf] }
 0x139   : > { %v1420_v8 = vpop.f32.mrf.mxu2  ;;  %v6512_v12 = vadd.f32 %v2414_v36, %v1802_v57  ;;  %v1041_v53 = vpop.f32.mrf.mxu1  ;;  %v1306_v36 = vunpack.c.l.b16 %v1247_v18  ;;  %v2221_v18 = vshll.u32 %v4928_v31, 16 }
 0x13a   : > { %v1488_v24 = vadd.f32 %v1420_v8, %v1040_v35  ;;  %v1042_v54 = vadd.f32 %v1041_v53, %v6253_v16  ;;  %v5607_v16 = vld [vmem:[%s5815_s9 + $0xac] sm:$0xf] }
 0x13b   : > { %1774 = vmatmul.bf16.gmra.mxu3 %v5438_v26  ;;  %v5399_v26 = vld [vmem:[%s5815_s9 + $0x9c] sm:$0xff]  ;;  %v1324_v23 = vpack.c.b16 %v1306_v36, %v1305_v21  ;;  %v1250_v11 = vrot.slane %v5607_v16, 5  ;;  %v2223_v46 = vrot.slane %v2221_v18, 5 }
 0x13c   : > { %v2417_v49 = vpop.f32.mrf.mxu0 }
 0x13e   : > { %v1735_v20 = vpop.f32.mrf.mxu3 }
 0x13f   : > { %2456 = vmatmul.bf16.gmra.mxu0 %v2320_v42  ;;  %v1803_v62 = vadd.f32 %v1735_v20, %v1488_v24  ;;  %v2200_v42 = vsel %vm5830_vm2, %v2195_v29, %v2199_v19  ;;  %v2210_v24 = vsel %vm5830_vm2, %v2205_v37, %v2209_v27  ;;  %v1252_v29 = vrot.slane %v1250_v11, 4  ;;  %v5608_v37 = vld [vmem:[%s5815_s9 + $0xb0] sm:$0x1] }
 0x140   : > { %v2302_v20 = vunpack.c.l.b16 %v2200_v42  ;;  %v2303_v21 = vunpack.c.l.b16 %v2210_v24  ;;  %v1253_v27 = vrot.slane %v5608_v37, 5  ;;  %v2236_v37 = vshrl.u32 %v4930_v4, 16 }
 0x141   : > { %v1422_v57 = vpop.f32.mrf.mxu2  ;;  %v6531_v60 = vadd.f32 %v2417_v49, %v1803_v62  ;;  %v1044_v8 = vpop.f32.mrf.mxu1  ;;  %v2214_v49 = vrot.slane %v2212_v61, 4  ;;  %v4691_v62 = vrot.slane %v1113_v13, 9 }
 0x142   : > { %v1489_v35 = vadd.f32 %v1422_v57, %v1042_v54  ;;  %v1045_v44 = vadd.f32 %v1044_v8, %v6277_v45  ;;  %v2227_v54 = vrot.slane %v2225_v22, 4  ;;  %v1254_v45 = vsel %vm6130_vm5, %v1252_v29, %v1253_v27 }
 0x143   : > { %v2218_v31 = vor.u32 %v2217_v56, %v2214_v49  ;;  %v1251_v42 = vsel %vm6130_vm5, %v4691_v62, %v1250_v11  ;;  %v4931_v56 = vld [vmem:[%s5815_s9 + $0xc4] sm:$0xf]  ;;  %v5400_v62 = vld [vmem:[%s5815_s9 + $0xa8] sm:$0xff]  ;;  %v2239_v27 = vshll.u32 %v4930_v4, 16 }
 0x144   : > { %v2419_v53 = vpop.f32.mrf.mxu0  ;;  %1083 = vmatmul.bf16.gmra.mxu1 %v5399_v26  ;;  %v4929_v26 = vld [vmem:[%s5815_s9 + $0xbc] sm:$0x1]  ;;  %v2228_v24 = vor.u32 %v2227_v54, %v2223_v46  ;;  %v1307_v22 = vunpack.c.l.b16 %v1251_v42 }
 0x145   : > { %v2231_v16 = vshll.u32 %v4929_v26, 16  ;;  %v2219_v13 = vrot.slane %v2218_v31, 4  ;;  %v2245_v26 = vshll.u32 %v4931_v56, 16  ;;  %v2249_v31 = vshrl.u32 %v4931_v56, 16 }
 0x146   : > { %v1737_v19 = vpop.f32.mrf.mxu3  ;;  %1464 = vmatmul.bf16.gmra.mxu2 %v1324_v23 }
 0x147   : > { %v1804_v36 = vadd.f32 %v1737_v19, %v1489_v35  ;;  %v2321_v35 = vpack.c.b16 %v2303_v21, %v2302_v20  ;;  %v5609_v19 = vld [vmem:[%s5815_s9 + $0x10] sm:$0xf]  ;;  %v2229_v21 = vrot.slane %v2228_v24, 4  ;;  %v2224_v29 = vsel %vm5830_vm2, %v2219_v13, %v2223_v46 }
 0x148   : > { %v2575_v20 = vrot.slane %v5609_v19, 5  ;;  %v2238_v13 = vrot.slane %v2236_v37, 4  ;;  %v2251_v56 = vrot.slane %v2249_v31, 4 }
 0x149   : > { %v1425_v57 = vpop.f32.mrf.mxu2  ;;  %v6546_v55 = vadd.f32 %v2419_v53, %v1804_v36  ;;  %v1046_v23 = vpop.f32.mrf.mxu1  ;;  %v1308_v53 = vunpack.c.l.b16 %v1254_v45  ;;  %v2233_v36 = vrot.slane %v2231_v16, 5  ;;  %v5611_v45 = vld [vmem:[%s5815_s9 + $0x14] sm:$0x1] }
 0x14a   : > { %v1490_v61 = vadd.f32 %v1425_v57, %v1045_v44  ;;  %v1047_v11 = vadd.f32 %v1046_v23, %v6297_v9  ;;  %v5610_v9 = vld [vmem:[%s5815_s9 + $0xb8] sm:$0xf]  ;;  %v2577_v42 = vrot.slane %v2575_v20, 4  ;;  %v2578_v24 = vrot.slane %v5611_v45, 5 }
 0x14b   : > { %7309 = vst [vmem:[#allocation5_spill] sm:$0xff] %v6546_v55  ;;  %1779 = vmatmul.bf16.gmra.mxu3 %v5439_v7  ;;  %v1325_v57 = vpack.c.b16 %v1308_v53, %v1307_v22  ;;  %v1257_v23 = vrot.slane %v5610_v9, 5  ;;  %v2234_v46 = vsel %vm5830_vm2, %v2229_v21, %v2233_v36  ;;  %v4981_v22 = vld [vmem:[%s5815_s9 + $0xc] sm:$0xe]  ;;  %v4932_v21 = vld [vmem:[%s5815_s9 + $0xc8] sm:$0x1] }
 0x14c   : > { %v2422_v8 = vpop.f32.mrf.mxu0  ;;  %v4997_v19 = vrot.slane %v4981_v22, 9  ;;  %v2305_v9 = vunpack.c.l.b16 %v2234_v46 }
 0x14d   : > { %v1259_v45 = vrot.slane %v1257_v23, 4 }
 0x14e   : > { %v1740_v18 = vpop.f32.mrf.mxu3 }
 0x14f   : > { %2461 = vmatmul.bf16.gmra.mxu0 %v2321_v35  ;;  %v1805_v49 = vadd.f32 %v1740_v18, %v1490_v61  ;;  %v1114_v35 = vld [vmem:[%s5815_s9 + $0xb4] sm:$0xe]  ;;  %v2241_v18 = vrot.slane %v2239_v27, 5 }
 0x150   : > { %v4692_v4 = vrot.slane %v1114_v35, 9  ;;  %v2255_v35 = vshll.u32 %v4932_v21, 16  ;;  %v5401_v21 = vld [vmem:[%s5815_s9 + $0xb4] sm:$0xff] }
 0x151   : > { %v1427_v7 = vpop.f32.mrf.mxu2  ;;  %v6559_v44 = vadd.f32 %v2422_v8, %v1805_v49  ;;  %v1049_v61 = vpop.f32.mrf.mxu1  ;;  %v2304_v8 = vunpack.c.l.b16 %v2224_v29  ;;  %v2247_v49 = vrot.slane %v2245_v26, 5  ;;  %v2579_v29 = vsel %vm6130_vm5, %v2577_v42, %v2578_v24  ;;  %v5205_v42 = vld [vmem:[%s5815_s9 + $0x18] sm:$0xf] }
 0x152   : > { %v1491_v54 = vadd.f32 %v1427_v7, %v1047_v11  ;;  %v5440_v7 = vld [vmem:[%s5815_s9 + $0xb4] sm:$0xff]  ;;  %v1050_v36 = vadd.f32 %v1049_v61, %v6314_v33  ;;  %v2242_v27 = vor.u32 %v2241_v18, %v2238_v13  ;;  %v1258_v31 = vsel %vm6130_vm5, %v4692_v4, %v1257_v23  ;;  %v6585_v18 = vld [vmem:[%s5815_s9 + $0x1c] sm:$0xf] }
 0x153   : > { %7310 = vst [vmem:[#allocation6_spill] sm:$0xff] %v6559_v44  ;;  %v5612_v44 = vld [vmem:[%s5815_s9 + $0xbc] sm:$0x1]  ;;  %v2322_v33 = vpack.c.b16 %v2305_v9, %v2304_v8  ;;  %v1309_v22 = vunpack.c.l.b16 %v1258_v31  ;;  %v3299_v8 = vshrl.u32 %v5205_v42, 16  ;;  %v3302_v9 = vshll.u32 %v5205_v42, 16 }
 0x154   : > { %v2424_v16 = vpop.f32.mrf.mxu0  ;;  %1088 = vmatmul.bf16.gmra.mxu1 %v5400_v62  ;;  %v1260_v55 = vrot.slane %v5612_v44, 5  ;;  %v2576_v62 = vsel %vm6130_vm5, %v4997_v19, %v2575_v20  ;;  %v2252_v44 = vor.u32 %v2251_v56, %v2247_v49  ;;  %v2257_v19 = vrot.slane %v2255_v35, 5  ;;  %v5207_v35 = vld [vmem:[%s5815_s9 + $0x20] sm:$0x1] }
 0x156   : > { %v1742_v53 = vpop.f32.mrf.mxu3  ;;  %1469 = vmatmul.bf16.gmra.mxu2 %v1325_v57  ;;  %v2702_v57 = vunpack.c.l.b16 %v2576_v62  ;;  %v1261_v20 = vsel %vm6130_vm5, %v1259_v45, %v1260_v55  ;;  %v2253_v56 = vrot.slane %v2252_v44, 4  ;;  %v3308_v55 = vshll.u32 %v6585_v18, 16 }
 0x157   : > { %v1806_v11 = vadd.f32 %v1742_v53, %v1491_v54  ;;  %v2703_v54 = vunpack.c.l.b16 %v2579_v29  ;;  %v2243_v53 = vrot.slane %v2242_v27, 4  ;;  %v1310_v4 = vunpack.c.l.b16 %v1261_v20 }
 0x158   : > { %v2258_v27 = vsel %vm5830_vm2, %v2253_v56, %v2257_v19  ;;  %v3310_v31 = vrot.slane %v3308_v55, 5  ;;  %v5208_v56 = vld [vmem:[%s5815_s9 + $0x24] sm:$0xf] }
 0x159   : > { %v1430_v37 = vpop.f32.mrf.mxu2  ;;  %v1051_v61 = vpop.f32.mrf.mxu1  ;;  %v6579_v46 = vpack.c.b16 %v2703_v54, %v2702_v57  ;;  %v6582_v24 = vadd.f32 %v2424_v16, %v1806_v11  ;;  %v3312_v16 = vshrl.u32 %v6585_v18, 16  ;;  %v1326_v29 = vpack.c.b16 %v1310_v4, %v1309_v22 }
 0x15a   : > { %v1492_v26 = vadd.f32 %v1430_v37, %v1050_v36  ;;  %v1052_v11 = vadd.f32 %v1051_v61, %v6329_v0  ;;  %v2248_v37 = vsel %vm5830_vm2, %v2243_v53, %v2247_v49  ;;  %v3301_v54 = vrot.slane %v3299_v8, 4 }
 0x15b   : > { %1784 = vmatmul.bf16.gmra.mxu3 %v5440_v7  ;;  %v3314_v44 = vrot.slane %v3312_v16, 4  ;;  %v2306_v61 = vunpack.c.l.b16 %v2248_v37  ;;  %v2307_v20 = vunpack.c.l.b16 %v2258_v27  ;;  %v3318_v53 = vshll.u32 %v5207_v35, 16 }
 0x15c   : > { %v2427_v13 = vpop.f32.mrf.mxu0  ;;  %v3323_v37 = vshrl.u32 %v5208_v56, 16  ;;  %v3326_v27 = vshll.u32 %v5208_v56, 16  ;;  %v5613_v56 = vld [vmem:[%s5815_s9 + $0x1c] sm:$0xf] }
 0x15d   : > { %v3315_v22 = vor.u32 %v3314_v44, %v3310_v31  ;;  %v2323_v19 = vpack.c.b16 %v2307_v20, %v2306_v61  ;;  %v4001_v20 = vrot.slane %v5207_v35, 5 }
 0x15e   : > { %v1745_v23 = vpop.f32.mrf.mxu3 }
 0x15f   : > { %2466 = vmatmul.bf16.gmra.mxu0 %v2322_v33  ;;  %v1807_v7 = vadd.f32 %v1745_v23, %v1492_v26  ;;  %v3304_v26 = vrot.slane %v3302_v9, 5  ;;  %v3316_v16 = vrot.slane %v3315_v22, 4 }
 0x161   : > { %v1432_v45 = vpop.f32.mrf.mxu2  ;;  %v6591_v36 = vadd.f32 %v2427_v13, %v1807_v7  ;;  %v1054_v57 = vpop.f32.mrf.mxu1  ;;  %v5441_v13 = vld [vmem:[%s5815_s9 + $0xc0] sm:$0xff]  ;;  %v3305_v49 = vor.u32 %v3304_v26, %v3301_v54  ;;  %v6602_v7 = vld [vmem:[%s5815_s9 + $0x28] sm:$0xf] }
 0x162   : > { %v1493_v62 = vadd.f32 %v1432_v45, %v1052_v11  ;;  %v1055_v23 = vadd.f32 %v1054_v57, %v6351_v32  ;;  %v3320_v11 = vrot.slane %v3318_v53, 5  ;;  %v3332_v32 = vshll.u32 %v6602_v7, 16 }
 0x163   : > { %v3306_v55 = vrot.slane %v3305_v49, 4  ;;  %v3336_v57 = vshrl.u32 %v6602_v7, 16  ;;  %v3328_v49 = vrot.slane %v3326_v27, 5 }
 0x164   : > { %v2429_v0 = vpop.f32.mrf.mxu0  ;;  %1093 = vmatmul.bf16.gmra.mxu1 %v5401_v21  ;;  %v6615_v22 = vrot.slane %v3332_v32, 5 }
 0x165   : > { %v3311_v44 = vsel %vm5830_vm2, %v3306_v55, %v3310_v31  ;;  %v3338_v53 = vrot.slane %v3336_v57, 4  ;;  %v5466_v31 = vld [vmem:[%s5815_s9 + $0x18] sm:$0xff] }
 0x166   : > { %v1747_v33 = vpop.f32.mrf.mxu3  ;;  %1474 = vmatmul.bf16.gmra.mxu2 %v1326_v29  ;;  %v3998_v29 = vrot.slane %v6585_v18, 5 }
 0x167   : > { %v1808_v42 = vadd.f32 %v1747_v33, %v1493_v62  ;;  %v5301_v62 = vld [vmem:[%s5815_s9 + $0x18] sm:$0xe] }
 0x168   : > { %v5317_v33 = vrot.slane %v5301_v62, 9  ;;  %v4000_v61 = vrot.slane %v3998_v29, 4 }
 0x169   : > { %v1435_v4 = vpop.f32.mrf.mxu2  ;;  %v1056_v9 = vpop.f32.mrf.mxu1  ;;  %v6604_v45 = vadd.f32 %v2429_v0, %v1808_v42  ;;  %v3321_v0 = vsel %vm5830_vm2, %v3316_v16, %v3320_v11  ;;  %v3325_v42 = vrot.slane %v3323_v37, 4  ;;  %v4982_v16 = vld [vmem:[%s5815_s9 + $0x18] sm:$0xe]  ;;  %v3339_v37 = vor.u32 %v3338_v53, %v6615_v22 }
 0x16a   : > { %v1494_v8 = vadd.f32 %v1435_v4, %v1055_v23  ;;  %v1057_v18 = vadd.f32 %v1056_v9, %v6369_v3  ;;  %v3699_v3 = vunpack.c.l.b16 %v3311_v44  ;;  %v3700_v9 = vunpack.c.l.b16 %v3321_v0 }
 0x16b   : > { %1789 = vmatmul.bf16.gmra.mxu3 %v5441_v13  ;;  %v3999_v11 = vsel %vm6130_vm5, %v5317_v33, %v3998_v29  ;;  %v4002_v62 = vsel %vm6130_vm5, %v4000_v61, %v4001_v20  ;;  %v4998_v57 = vrot.slane %v4982_v16, 9  ;;  %v5211_v16 = vld [vmem:[%s5815_s9 + $0x30] sm:$0xf] }
 0x16c   : > { %v2432_v21 = vpop.f32.mrf.mxu0  ;;  %v4125_v29 = vunpack.c.l.b16 %v3999_v11  ;;  %v4126_v33 = vunpack.c.l.b16 %v4002_v62  ;;  %v6644_v11 = vld [vmem:[%s5815_s9 + $0x34] sm:$0xf] }
 0x16e   : > { %v1750_v54 = vpop.f32.mrf.mxu3 }
 0x16f   : > { %2471 = vmatmul.bf16.gmra.mxu0 %v2323_v19  ;;  %v1809_v26 = vadd.f32 %v1750_v54, %v1494_v8  ;;  %v2582_v19 = vrot.slane %v5613_v56, 5  ;;  %v6622_v8 = vld [vmem:[%s5815_s9 + $0x2c] sm:$0x1]  ;;  %v5302_v56 = vld [vmem:[%s5815_s9 + $0x24] sm:$0xe] }
 0x170   : > { %v3342_v27 = vshll.u32 %v6622_v8, 16 }
 0x171   : > { %v1437_v13 = vpop.f32.mrf.mxu2  ;;  %v6617_v23 = vadd.f32 %v2432_v21, %v1809_v26  ;;  %v1059_v55 = vpop.f32.mrf.mxu1  ;;  %v3329_v21 = vor.u32 %v3328_v49, %v3325_v42  ;;  %v2584_v54 = vrot.slane %v2582_v19, 4  ;;  %v5614_v26 = vld [vmem:[%s5815_s9 + $0x20] sm:$0x1]  ;;  %v3340_v42 = vrot.slane %v3339_v37, 4 }
 0x172   : > { %v1495_v4 = vadd.f32 %v1437_v13, %v1057_v18  ;;  %v2585_v44 = vrot.slane %v5614_v26, 5  ;;  %v3731_v18 = vpack.c.b16 %v3700_v9, %v3699_v3  ;;  %v1060_v61 = vadd.f32 %v1059_v55, %v6248_v17 }
 0x173   : > { %v3330_v20 = vrot.slane %v3329_v21, 4  ;;  %v3344_v13 = vrot.slane %v3342_v27, 5  ;;  %v2583_v53 = vsel %vm6130_vm5, %v4998_v57, %v2582_v19  ;;  %v4157_v3 = vpack.c.b16 %v4126_v33, %v4125_v29 }
 0x174   : > { %v2434_v35 = vpop.f32.mrf.mxu0  ;;  %2822 = vmatmul.bf16.vlgmr.msra.gmra.mxu1 %v6579_v46  ;;  %v2704_v62 = vunpack.c.l.b16 %v2583_v53  ;;  %v5318_v37 = vrot.slane %v5302_v56, 9  ;;  %v3347_v57 = vshrl.u32 %v5211_v16, 16  ;;  %v4008_v26 = vrot.slane %v6622_v8, 5  ;;  %v4983_v53 = vld [vmem:[%s5815_s9 + $0x24] sm:$0xe] }
 0x175   : > { %v3335_v19 = vsel %vm5830_vm2, %v3330_v20, %v6615_v22 }
 0x176   : > { %v1752_v32 = vpop.f32.mrf.mxu3  ;;  %3137 = vmatmul.bf16.vlgmr.msra.gmra.mxu2 %v5466_v31  ;;  %v2586_v31 = vsel %vm6130_vm5, %v2584_v54, %v2585_v44  ;;  %v3356_v44 = vshll.u32 %v6644_v11, 16  ;;  %v3701_v33 = vunpack.c.l.b16 %v3335_v19  ;;  %v3349_v8 = vrot.slane %v3347_v57, 4 }
 0x177   : > { %v1810_v0 = vadd.f32 %v1752_v32, %v1495_v4  ;;  %v4005_v4 = vrot.slane %v6602_v7, 5  ;;  %v2705_v21 = vunpack.c.l.b16 %v2586_v31  ;;  %v3345_v7 = vsel %vm5830_vm2, %v3340_v42, %v3344_v13  ;;  %v5467_v13 = vld [vmem:[%s5815_s9 + $0x24] sm:$0xff] }
 0x179   : > { %v1440_v46 = vpop.f32.mrf.mxu2  ;;  %v1061_v9 = vpop.f32.mrf.mxu1  ;;  %v6641_v17 = vadd.f32 %v2434_v35, %v1810_v0  ;;  %v4007_v32 = vrot.slane %v4005_v4, 4  ;;  %v3350_v35 = vshll.u32 %v5211_v16, 16  ;;  %v3360_v0 = vshrl.u32 %v6644_v11, 16 }
 0x17a   : > { %v1496_v49 = vadd.f32 %v1440_v46, %v1060_v61  ;;  %v1062_v22 = vadd.f32 %v1061_v9, %v6272_v39  ;;  %v2735_v29 = vpack.c.b16 %v2705_v21, %v2704_v62  ;;  %v5615_v61 = vld [vmem:[%s5815_s9 + $0x28] sm:$0xf]  ;;  %v6664_v9 = vrot.slane %v3356_v44, 5 }
 0x17b   : > { %3819 = vmatmul.bf16.vlgmr.msra.gmra.mxu3 %v3731_v18  ;;  %v2589_v46 = vrot.slane %v5615_v61, 5  ;;  %v3352_v31 = vrot.slane %v3350_v35, 5  ;;  %v4009_v39 = vsel %vm6130_vm5, %v4007_v32, %v4008_v26  ;;  %v3362_v16 = vrot.slane %v3360_v0, 4  ;;  %v5214_v61 = vld [vmem:[%s5815_s9 + $0x3c] sm:$0xf] }
 0x17c   : > { %v2437_v55 = vpop.f32.mrf.mxu0  ;;  %v4999_v21 = vrot.slane %v4983_v53, 9 }
 0x17d   : > { %v2591_v19 = vrot.slane %v2589_v46, 4  ;;  %v3363_v26 = vor.u32 %v3362_v16, %v6664_v9  ;;  %v5303_v16 = vld [vmem:[%s5815_s9 + $0x30] sm:$0xe] }
 0x17e   : > { %v1755_v27 = vpop.f32.mrf.mxu3 }
 0x17f   : > { %4245 = vmatmul.bf16.vlgmr.msra.gmra.mxu0 %v4157_v3  ;;  %v1811_v54 = vadd.f32 %v1755_v27, %v1496_v49  ;;  %v3702_v49 = vunpack.c.l.b16 %v3345_v7  ;;  %v4006_v3 = vsel %vm6130_vm5, %v5318_v37, %v4005_v4  ;;  %v5616_v27 = vld [vmem:[%s5815_s9 + $0x2c] sm:$0x1]  ;;  %v4128_v4 = vunpack.c.l.b16 %v4009_v39 }
 0x180   : > { %v2592_v7 = vrot.slane %v5616_v27, 5  ;;  %v4127_v35 = vunpack.c.l.b16 %v4006_v3  ;;  %v3353_v37 = vor.u32 %v3352_v31, %v3349_v8 }
 0x181   : > { %v1442_v18 = vpop.f32.mrf.mxu2  ;;  %v6656_v20 = vadd.f32 %v2437_v55, %v1811_v54  ;;  %v1064_v56 = vpop.f32.mrf.mxu1  ;;  %v6667_v55 = vld [vmem:[%s5815_s9 + $0x38] sm:$0x1]  ;;  %v3732_v32 = vpack.c.b16 %v3702_v49, %v3701_v33  ;;  %v3364_v49 = vrot.slane %v3363_v26, 4 }
 0x182   : > { %v1497_v42 = vadd.f32 %v1442_v18, %v1062_v22  ;;  %v3366_v44 = vshll.u32 %v6667_v55, 16  ;;  %v1065_v0 = vadd.f32 %v1064_v56, %v6292_v2  ;;  %v2590_v18 = vsel %vm6130_vm5, %v4999_v21, %v2589_v46 }
 0x183   : > { %v3354_v8 = vrot.slane %v3353_v37, 4  ;;  %v4012_v2 = vrot.slane %v6644_v11, 5  ;;  %v2706_v46 = vunpack.c.l.b16 %v2590_v18  ;;  %v3371_v21 = vshrl.u32 %v5214_v61, 16 }
 0x184   : > { %v2439_v62 = vpop.f32.mrf.mxu0  ;;  %2827 = vmatmul.bf16.gmra.mxu1 %v2735_v29  ;;  %v2593_v29 = vsel %vm6130_vm5, %v2591_v19, %v2592_v7  ;;  %v3368_v31 = vrot.slane %v3366_v44, 5  ;;  %v3374_v19 = vshll.u32 %v5214_v61, 16  ;;  %v4015_v26 = vrot.slane %v6667_v55, 5 }
 0x185   : > { %v2707_v39 = vunpack.c.l.b16 %v2593_v29  ;;  %v4014_v37 = vrot.slane %v4012_v2, 4  ;;  %v3373_v44 = vrot.slane %v3371_v21, 4 }
 0x186   : > { %v1757_v57 = vpop.f32.mrf.mxu3  ;;  %3142 = vmatmul.bf16.gmra.mxu2 %v5467_v13  ;;  %v4158_v13 = vpack.c.b16 %v4128_v4, %v4127_v35  ;;  %v3359_v35 = vsel %vm5830_vm2, %v3354_v8, %v6664_v9  ;;  %v5319_v4 = vrot.slane %v5303_v16, 9 }
 0x187   : > { %v1812_v54 = vadd.f32 %v1757_v57, %v1497_v42  ;;  %v6679_v42 = vld [vmem:[%s5815_s9 + $0x40] sm:$0xf]  ;;  %v4016_v16 = vsel %vm6130_vm5, %v4014_v37, %v4015_v26 }
 0x188   : > { %v3380_v27 = vshll.u32 %v6679_v42, 16  ;;  %v3384_v7 = vshrl.u32 %v6679_v42, 16 }
 0x189   : > { %v1445_v22 = vpop.f32.mrf.mxu2  ;;  %v1066_v33 = vpop.f32.mrf.mxu1  ;;  %v6682_v56 = vadd.f32 %v2439_v62, %v1812_v54  ;;  %v3369_v62 = vsel %vm5830_vm2, %v3364_v49, %v3368_v31  ;;  %v6701_v49 = vld [vmem:[%s5815_s9 + $0x44] sm:$0x1] }
 0x18a   : > { %v1498_v53 = vadd.f32 %v1445_v22, %v1065_v0  ;;  %v1067_v54 = vadd.f32 %v1066_v33, %v6307_v25  ;;  %v3376_v22 = vrot.slane %v3374_v19, 5  ;;  %v6694_v9 = vrot.slane %v3380_v27, 5 }
 0x18b   : > { %3824 = vmatmul.bf16.gmra.mxu3 %v3732_v32  ;;  %v2736_v32 = vpack.c.b16 %v2707_v39, %v2706_v46  ;;  %v3386_v18 = vrot.slane %v3384_v7, 4  ;;  %v3703_v33 = vunpack.c.l.b16 %v3359_v35  ;;  %v3704_v31 = vunpack.c.l.b16 %v3369_v62  ;;  %v4984_v46 = vld [vmem:[%s5815_s9 + $0x30] sm:$0xe]  ;;  %v5618_v35 = vld [vmem:[%s5815_s9 + $0x38] sm:$0x1] }
 0x18c   : > { %v2442_v3 = vpop.f32.mrf.mxu0  ;;  %v4013_v39 = vsel %vm6130_vm5, %v5319_v4, %v4012_v2  ;;  %v3390_v19 = vshll.u32 %v6701_v49, 16  ;;  %v5000_v7 = vrot.slane %v4984_v46, 9  ;;  %v4130_v4 = vunpack.c.l.b16 %v4016_v16  ;;  %v5217_v46 = vld [vmem:[%s5815_s9 + $0x48] sm:$0xf] }
 0x18d   : > { %v3387_v21 = vor.u32 %v3386_v18, %v6694_v9  ;;  %v4129_v2 = vunpack.c.l.b16 %v4013_v39  ;;  %v6722_v39 = vld [vmem:[%s5815_s9 + $0x4c] sm:$0xf] }
 0x18e   : > { %v1760_v57 = vpop.f32.mrf.mxu3 }
 0x18f   : > { %4250 = vmatmul.bf16.gmra.mxu0 %v4158_v13  ;;  %v1813_v11 = vadd.f32 %v1760_v57, %v1498_v53  ;;  %v5468_v13 = vld [vmem:[%s5815_s9 + $0x30] sm:$0xff] }
 0x190   : > { %v5617_v53 = vld [vmem:[%s5815_s9 + $0x34] sm:$0xf] }
 0x191   : > { %v1447_v0 = vpop.f32.mrf.mxu2  ;;  %v6696_v29 = vadd.f32 %v2442_v3, %v1813_v11  ;;  %v2596_v8 = vrot.slane %v5617_v53, 5  ;;  %v1069_v25 = vpop.f32.mrf.mxu1  ;;  %v3377_v3 = vor.u32 %v3376_v22, %v3373_v44  ;;  %v2599_v11 = vrot.slane %v5618_v35, 5  ;;  %v5304_v53 = vld [vmem:[%s5815_s9 + $0x3c] sm:$0xe] }
 0x192   : > { %v1499_v61 = vadd.f32 %v1447_v0, %v1067_v54  ;;  %v3733_v54 = vpack.c.b16 %v3704_v31, %v3703_v33  ;;  %v1070_v37 = vadd.f32 %v1069_v25, %v6322_v58  ;;  %v3388_v44 = vrot.slane %v3387_v21, 4 }
 0x193   : > { %v2598_v57 = vrot.slane %v2596_v8, 4  ;;  %v3378_v26 = vrot.slane %v3377_v3, 4  ;;  %v3392_v0 = vrot.slane %v3390_v19, 5  ;;  %v2597_v18 = vsel %vm6130_vm5, %v5000_v7, %v2596_v8 }
 0x194   : > { %v2444_v55 = vpop.f32.mrf.mxu0  ;;  %2832 = vmatmul.bf16.gmra.mxu1 %v2736_v32  ;;  %v4159_v33 = vpack.c.b16 %v4130_v4, %v4129_v2  ;;  %v2708_v16 = vunpack.c.l.b16 %v2597_v18  ;;  %v5320_v21 = vrot.slane %v5304_v53, 9  ;;  %v3395_v7 = vshrl.u32 %v5217_v46, 16  ;;  %v4985_v18 = vld [vmem:[%s5815_s9 + $0x3c] sm:$0xe] }
 0x195   : > { %v3383_v8 = vsel %vm5830_vm2, %v3378_v26, %v6694_v9  ;;  %v4022_v35 = vrot.slane %v6701_v49, 5 }
 0x196   : > { %v1762_v27 = vpop.f32.mrf.mxu3  ;;  %3147 = vmatmul.bf16.gmra.mxu2 %v5468_v13  ;;  %v2600_v13 = vsel %vm6130_vm5, %v2598_v57, %v2599_v11  ;;  %v3404_v11 = vshll.u32 %v6722_v39, 16  ;;  %v3705_v4 = vunpack.c.l.b16 %v3383_v8  ;;  %v3397_v49 = vrot.slane %v3395_v7, 4 }
 0x197   : > { %v1814_v62 = vadd.f32 %v1762_v27, %v1499_v61  ;;  %v4019_v61 = vrot.slane %v6679_v42, 5  ;;  %v2709_v3 = vunpack.c.l.b16 %v2600_v13  ;;  %v3393_v42 = vsel %vm5830_vm2, %v3388_v44, %v3392_v0  ;;  %v5469_v0 = vld [vmem:[%s5815_s9 + $0x3c] sm:$0xff] }
 0x199   : > { %v1450_v32 = vpop.f32.mrf.mxu2  ;;  %v1071_v31 = vpop.f32.mrf.mxu1  ;;  %v6719_v58 = vadd.f32 %v2444_v55, %v1814_v62  ;;  %v4021_v27 = vrot.slane %v4019_v61, 4  ;;  %v3398_v55 = vshll.u32 %v5217_v46, 16  ;;  %v3408_v62 = vshrl.u32 %v6722_v39, 16 }
 0x19a   : > { %v1500_v22 = vadd.f32 %v1450_v32, %v1070_v37  ;;  %v1072_v9 = vadd.f32 %v1071_v31, %v6345_v51  ;;  %v2737_v2 = vpack.c.b16 %v2709_v3, %v2708_v16  ;;  %v5619_v37 = vld [vmem:[%s5815_s9 + $0x40] sm:$0xf]  ;;  %v6742_v31 = vrot.slane %v3404_v11, 5 }
 0x19b   : > { %3829 = vmatmul.bf16.gmra.mxu3 %v3733_v54  ;;  %v2603_v32 = vrot.slane %v5619_v37, 5  ;;  %v3400_v13 = vrot.slane %v3398_v55, 5  ;;  %v4023_v51 = vsel %vm6130_vm5, %v4021_v27, %v4022_v35  ;;  %v3410_v46 = vrot.slane %v3408_v62, 4  ;;  %v5220_v37 = vld [vmem:[%s5815_s9 + $0x54] sm:$0xf] }
 0x19c   : > { %v2447_v25 = vpop.f32.mrf.mxu0  ;;  %v5001_v3 = vrot.slane %v4985_v18, 9 }
 0x19d   : > { %v2605_v8 = vrot.slane %v2603_v32, 4  ;;  %v3411_v35 = vor.u32 %v3410_v46, %v6742_v31  ;;  %v5305_v46 = vld [vmem:[%s5815_s9 + $0x48] sm:$0xe] }
 0x19e   : > { %v1765_v19 = vpop.f32.mrf.mxu3 }
 0x19f   : > { %4255 = vmatmul.bf16.gmra.mxu0 %v4159_v33  ;;  %v1815_v57 = vadd.f32 %v1765_v19, %v1500_v22  ;;  %v3706_v22 = vunpack.c.l.b16 %v3393_v42  ;;  %v4020_v33 = vsel %vm6130_vm5, %v5320_v21, %v4019_v61  ;;  %v5620_v19 = vld [vmem:[%s5815_s9 + $0x44] sm:$0x1]  ;;  %v4132_v61 = vunpack.c.l.b16 %v4023_v51 }
 0x1a0   : > { %v2606_v42 = vrot.slane %v5620_v19, 5  ;;  %v4131_v55 = vunpack.c.l.b16 %v4020_v33  ;;  %v3401_v21 = vor.u32 %v3400_v13, %v3397_v49 }
 0x1a1   : > { %v1452_v54 = vpop.f32.mrf.mxu2  ;;  %v6734_v26 = vadd.f32 %v2447_v25, %v1815_v57  ;;  %v1074_v53 = vpop.f32.mrf.mxu1  ;;  %v6745_v25 = vld [vmem:[%s5815_s9 + $0x50] sm:$0x1]  ;;  %v3734_v27 = vpack.c.b16 %v3706_v22, %v3705_v4  ;;  %v3412_v22 = vrot.slane %v3411_v35, 4 }
 0x1a2   : > { %v1501_v44 = vadd.f32 %v1452_v54, %v1072_v9  ;;  %v3414_v11 = vshll.u32 %v6745_v25, 16  ;;  %v1075_v62 = vadd.f32 %v1074_v53, %v6366_v14  ;;  %v2604_v54 = vsel %vm6130_vm5, %v5001_v3, %v2603_v32 }
 0x1a3   : > { %v3402_v49 = vrot.slane %v3401_v21, 4  ;;  %v4026_v14 = vrot.slane %v6722_v39, 5  ;;  %v2710_v32 = vunpack.c.l.b16 %v2604_v54  ;;  %v3419_v3 = vshrl.u32 %v5220_v37, 16 }
 0x1a4   : > { %v2449_v16 = vpop.f32.mrf.mxu0  ;;  %2837 = vmatmul.bf16.gmra.mxu1 %v2737_v2  ;;  %v2607_v2 = vsel %vm6130_vm5, %v2605_v8, %v2606_v42  ;;  %v3416_v13 = vrot.slane %v3414_v11, 5  ;;  %v3422_v8 = vshll.u32 %v5220_v37, 16  ;;  %v4029_v35 = vrot.slane %v6745_v25, 5 }
 0x1a5   : > { %v2711_v51 = vunpack.c.l.b16 %v2607_v2  ;;  %v4028_v21 = vrot.slane %v4026_v14, 4  ;;  %v3421_v11 = vrot.slane %v3419_v3, 4 }
 0x1a6   : > { %v1767_v7 = vpop.f32.mrf.mxu3  ;;  %3152 = vmatmul.bf16.gmra.mxu2 %v5469_v0  ;;  %v4160_v0 = vpack.c.b16 %v4132_v61, %v4131_v55  ;;  %v3407_v55 = vsel %vm5830_vm2, %v3402_v49, %v6742_v31  ;;  %v5321_v61 = vrot.slane %v5305_v46, 9 }
 0x1a7   : > { %v1816_v57 = vadd.f32 %v1767_v7, %v1501_v44  ;;  %v6757_v44 = vld [vmem:[%s5815_s9 + $0x58] sm:$0xf]  ;;  %v4030_v46 = vsel %vm6130_vm5, %v4028_v21, %v4029_v35 }
 0x1a8   : > { %v3428_v19 = vshll.u32 %v6757_v44, 16  ;;  %v3432_v42 = vshrl.u32 %v6757_v44, 16 }
 0x1a9   : > { %v1455_v9 = vpop.f32.mrf.mxu2  ;;  %v1076_v4 = vpop.f32.mrf.mxu1  ;;  %v6760_v53 = vadd.f32 %v2449_v16, %v1816_v57  ;;  %v3417_v16 = vsel %vm5830_vm2, %v3412_v22, %v3416_v13  ;;  %v6779_v22 = vld [vmem:[%s5815_s9 + $0x5c] sm:$0x1] }
 0x1aa   : > { %v1502_v18 = vadd.f32 %v1455_v9, %v1075_v62  ;;  %v1077_v57 = vadd.f32 %v1076_v4, %v6381_v38  ;;  %v3424_v9 = vrot.slane %v3422_v8, 5  ;;  %v6772_v31 = vrot.slane %v3428_v19, 5 }
 0x1ab   : > { %3834 = vmatmul.bf16.gmra.mxu3 %v3734_v27  ;;  %v2738_v27 = vpack.c.b16 %v2711_v51, %v2710_v32  ;;  %v3434_v54 = vrot.slane %v3432_v42, 4  ;;  %v3707_v4 = vunpack.c.l.b16 %v3407_v55  ;;  %v3708_v13 = vunpack.c.l.b16 %v3417_v16  ;;  %v4986_v32 = vld [vmem:[%s5815_s9 + $0x48] sm:$0xe]  ;;  %v5622_v55 = vld [vmem:[%s5815_s9 + $0x50] sm:$0x1] }
 0x1ac   : > { %v2452_v33 = vpop.f32.mrf.mxu0  ;;  %v4027_v51 = vsel %vm6130_vm5, %v5321_v61, %v4026_v14  ;;  %v3438_v8 = vshll.u32 %v6779_v22, 16  ;;  %v5002_v42 = vrot.slane %v4986_v32, 9  ;;  %v4134_v61 = vunpack.c.l.b16 %v4030_v46  ;;  %v5223_v32 = vld [vmem:[%s5815_s9 + $0x60] sm:$0xf] }
 0x1ad   : > { %v3435_v3 = vor.u32 %v3434_v54, %v6772_v31  ;;  %v4133_v14 = vunpack.c.l.b16 %v4027_v51  ;;  %v6800_v51 = vld [vmem:[%s5815_s9 + $0x64] sm:$0xf] }
 0x1ae   : > { %v1770_v7 = vpop.f32.mrf.mxu3 }
 0x1af   : > { %4260 = vmatmul.bf16.gmra.mxu0 %v4160_v0  ;;  %v1817_v39 = vadd.f32 %v1770_v7, %v1502_v18  ;;  %v5470_v0 = vld [vmem:[%s5815_s9 + $0x48] sm:$0xff] }
 0x1b0   : > { %v5621_v18 = vld [vmem:[%s5815_s9 + $0x4c] sm:$0xf] }
 0x1b1   : > { %v1457_v62 = vpop.f32.mrf.mxu2  ;;  %v6774_v2 = vadd.f32 %v2452_v33, %v1817_v39  ;;  %v2610_v49 = vrot.slane %v5621_v18, 5  ;;  %v1079_v38 = vpop.f32.mrf.mxu1  ;;  %v3425_v33 = vor.u32 %v3424_v9, %v3421_v11  ;;  %v2613_v39 = vrot.slane %v5622_v55, 5  ;;  %v5306_v18 = vld [vmem:[%s5815_s9 + $0x54] sm:$0xe] }
 0x1b2   : > { %v1503_v37 = vadd.f32 %v1457_v62, %v1077_v57  ;;  %v3735_v57 = vpack.c.b16 %v3708_v13, %v3707_v4  ;;  %v1080_v21 = vadd.f32 %v1079_v38, %v6251_v50  ;;  %v3436_v11 = vrot.slane %v3435_v3, 4 }
 0x1b3   : > { %v2612_v7 = vrot.slane %v2610_v49, 4  ;;  %v3426_v35 = vrot.slane %v3425_v33, 4  ;;  %v3440_v62 = vrot.slane %v3438_v8, 5  ;;  %v2611_v54 = vsel %vm6130_vm5, %v5002_v42, %v2610_v49 }
 0x1b4   : > { %v2454_v25 = vpop.f32.mrf.mxu0  ;;  %2842 = vmatmul.bf16.gmra.mxu1 %v2738_v27  ;;  %v4161_v4 = vpack.c.b16 %v4134_v61, %v4133_v14  ;;  %v2712_v46 = vunpack.c.l.b16 %v2611_v54  ;;  %v5322_v3 = vrot.slane %v5306_v18, 9  ;;  %v3443_v42 = vshrl.u32 %v5223_v32, 16  ;;  %v4987_v54 = vld [vmem:[%s5815_s9 + $0x54] sm:$0xe] }
 0x1b5   : > { %v3431_v49 = vsel %vm5830_vm2, %v3426_v35, %v6772_v31  ;;  %v4036_v55 = vrot.slane %v6779_v22, 5 }
 0x1b6   : > { %v1772_v19 = vpop.f32.mrf.mxu3  ;;  %3157 = vmatmul.bf16.gmra.mxu2 %v5470_v0  ;;  %v2614_v0 = vsel %vm6130_vm5, %v2612_v7, %v2613_v39  ;;  %v3452_v39 = vshll.u32 %v6800_v51, 16  ;;  %v3709_v61 = vunpack.c.l.b16 %v3431_v49  ;;  %v3445_v22 = vrot.slane %v3443_v42, 4 }
 0x1b7   : > { %v1818_v16 = vadd.f32 %v1772_v19, %v1503_v37  ;;  %v4033_v37 = vrot.slane %v6757_v44, 5  ;;  %v2713_v33 = vunpack.c.l.b16 %v2614_v0  ;;  %v3441_v44 = vsel %vm5830_vm2, %v3436_v11, %v3440_v62  ;;  %v5471_v62 = vld [vmem:[%s5815_s9 + $0x54] sm:$0xff] }
 0x1b9   : > { %v1460_v27 = vpop.f32.mrf.mxu2  ;;  %v1081_v13 = vpop.f32.mrf.mxu1  ;;  %v6797_v50 = vadd.f32 %v2454_v25, %v1818_v16  ;;  %v4035_v19 = vrot.slane %v4033_v37, 4  ;;  %v3446_v25 = vshll.u32 %v5223_v32, 16  ;;  %v3456_v16 = vshrl.u32 %v6800_v51, 16 }
 0x1ba   : > { %v1504_v9 = vadd.f32 %v1460_v27, %v1080_v21  ;;  %v1082_v31 = vadd.f32 %v1081_v13, %v6274_v40  ;;  %v2739_v14 = vpack.c.b16 %v2713_v33, %v2712_v46  ;;  %v5623_v21 = vld [vmem:[%s5815_s9 + $0x58] sm:$0xf]  ;;  %v6820_v13 = vrot.slane %v3452_v39, 5 }
 0x1bb   : > { %3839 = vmatmul.bf16.gmra.mxu3 %v3735_v57  ;;  %v2617_v27 = vrot.slane %v5623_v21, 5  ;;  %v3448_v0 = vrot.slane %v3446_v25, 5  ;;  %v4037_v40 = vsel %vm6130_vm5, %v4035_v19, %v4036_v55  ;;  %v3458_v32 = vrot.slane %v3456_v16, 4  ;;  %v5226_v21 = vld [vmem:[%s5815_s9 + $0x6c] sm:$0xf] }
 0x1bc   : > { %v2457_v38 = vpop.f32.mrf.mxu0  ;;  %v5003_v33 = vrot.slane %v4987_v54, 9 }
 0x1bd   : > { %v2619_v49 = vrot.slane %v2617_v27, 4  ;;  %v3459_v55 = vor.u32 %v3458_v32, %v6820_v13  ;;  %v5307_v32 = vld [vmem:[%s5815_s9 + $0x60] sm:$0xe] }
 0x1be   : > { %v1775_v8 = vpop.f32.mrf.mxu3 }
 0x1bf   : > { %4265 = vmatmul.bf16.gmra.mxu0 %v4161_v4  ;;  %v1819_v7 = vadd.f32 %v1775_v8, %v1504_v9  ;;  %v3710_v9 = vunpack.c.l.b16 %v3441_v44  ;;  %v4034_v4 = vsel %vm6130_vm5, %v5322_v3, %v4033_v37  ;;  %v5624_v8 = vld [vmem:[%s5815_s9 + $0x5c] sm:$0x1]  ;;  %v4136_v37 = vunpack.c.l.b16 %v4037_v40 }
 0x1c0   : > { %v2620_v44 = vrot.slane %v5624_v8, 5  ;;  %v4135_v25 = vunpack.c.l.b16 %v4034_v4  ;;  %v3449_v3 = vor.u32 %v3448_v0, %v3445_v22 }
 0x1c1   : > { %v1462_v57 = vpop.f32.mrf.mxu2  ;;  %v6812_v35 = vadd.f32 %v2457_v38, %v1819_v7  ;;  %v1084_v18 = vpop.f32.mrf.mxu1  ;;  %v6823_v38 = vld [vmem:[%s5815_s9 + $0x68] sm:$0x1]  ;;  %v3736_v19 = vpack.c.b16 %v3710_v9, %v3709_v61  ;;  %v3460_v9 = vrot.slane %v3459_v55, 4 }
 0x1c2   : > { %v1505_v11 = vadd.f32 %v1462_v57, %v1082_v31  ;;  %v3462_v39 = vshll.u32 %v6823_v38, 16  ;;  %v1085_v16 = vadd.f32 %v1084_v18, %v6295_v6  ;;  %v2618_v57 = vsel %vm6130_vm5, %v5003_v33, %v2617_v27 }
 0x1c3   : > { %v3450_v22 = vrot.slane %v3449_v3, 4  ;;  %v4040_v6 = vrot.slane %v6800_v51, 5  ;;  %v2714_v27 = vunpack.c.l.b16 %v2618_v57  ;;  %v3467_v33 = vshrl.u32 %v5226_v21, 16 }
 0x1c4   : > { %v2459_v46 = vpop.f32.mrf.mxu0  ;;  %2847 = vmatmul.bf16.gmra.mxu1 %v2739_v14  ;;  %v2621_v14 = vsel %vm6130_vm5, %v2619_v49, %v2620_v44  ;;  %v3464_v0 = vrot.slane %v3462_v39, 5  ;;  %v3470_v49 = vshll.u32 %v5226_v21, 16  ;;  %v4043_v55 = vrot.slane %v6823_v38, 5 }
 0x1c5   : > { %v2715_v40 = vunpack.c.l.b16 %v2621_v14  ;;  %v4042_v3 = vrot.slane %v4040_v6, 4  ;;  %v3469_v39 = vrot.slane %v3467_v33, 4 }
 0x1c6   : > { %v1777_v42 = vpop.f32.mrf.mxu3  ;;  %3162 = vmatmul.bf16.gmra.mxu2 %v5471_v62  ;;  %v4162_v62 = vpack.c.b16 %v4136_v37, %v4135_v25  ;;  %v3455_v25 = vsel %vm5830_vm2, %v3450_v22, %v6820_v13  ;;  %v5323_v37 = vrot.slane %v5307_v32, 9 }
 0x1c7   : > { %v1820_v7 = vadd.f32 %v1777_v42, %v1505_v11  ;;  %v6835_v11 = vld [vmem:[%s5815_s9 + $0x70] sm:$0xf]  ;;  %v4044_v32 = vsel %vm6130_vm5, %v4042_v3, %v4043_v55 }
 0x1c8   : > { %v3476_v8 = vshll.u32 %v6835_v11, 16  ;;  %v3480_v44 = vshrl.u32 %v6835_v11, 16 }
 0x1c9   : > { %v1465_v31 = vpop.f32.mrf.mxu2  ;;  %v1086_v61 = vpop.f32.mrf.mxu1  ;;  %v6838_v18 = vadd.f32 %v2459_v46, %v1820_v7  ;;  %v3465_v46 = vsel %vm5830_vm2, %v3460_v9, %v3464_v0  ;;  %v6857_v9 = vld [vmem:[%s5815_s9 + $0x74] sm:$0x1] }
 0x1ca   : > { %v1506_v54 = vadd.f32 %v1465_v31, %v1085_v16  ;;  %v1087_v7 = vadd.f32 %v1086_v61, %v6309_v28  ;;  %v3472_v31 = vrot.slane %v3470_v49, 5  ;;  %v6850_v13 = vrot.slane %v3476_v8, 5 }
 0x1cb   : > { %3844 = vmatmul.bf16.gmra.mxu3 %v3736_v19  ;;  %v2740_v19 = vpack.c.b16 %v2715_v40, %v2714_v27  ;;  %v3482_v57 = vrot.slane %v3480_v44, 4  ;;  %v3711_v61 = vunpack.c.l.b16 %v3455_v25  ;;  %v3712_v0 = vunpack.c.l.b16 %v3465_v46  ;;  %v4988_v27 = vld [vmem:[%s5815_s9 + $0x60] sm:$0xe]  ;;  %v5626_v25 = vld [vmem:[%s5815_s9 + $0x68] sm:$0x1] }
 0x1cc   : > { %v2462_v4 = vpop.f32.mrf.mxu0  ;;  %v4041_v40 = vsel %vm6130_vm5, %v5323_v37, %v4040_v6  ;;  %v3486_v49 = vshll.u32 %v6857_v9, 16  ;;  %v5004_v44 = vrot.slane %v4988_v27, 9  ;;  %v4138_v37 = vunpack.c.l.b16 %v4044_v32  ;;  %v5229_v27 = vld [vmem:[%s5815_s9 + $0x78] sm:$0xf] }
 0x1cd   : > { %v3483_v33 = vor.u32 %v3482_v57, %v6850_v13  ;;  %v4137_v6 = vunpack.c.l.b16 %v4041_v40  ;;  %v6878_v40 = vld [vmem:[%s5815_s9 + $0x7c] sm:$0xf] }
 0x1ce   : > { %v1780_v42 = vpop.f32.mrf.mxu3 }
 0x1cf   : > { %4270 = vmatmul.bf16.gmra.mxu0 %v4162_v62  ;;  %v1821_v51 = vadd.f32 %v1780_v42, %v1506_v54  ;;  %v5472_v62 = vld [vmem:[%s5815_s9 + $0x60] sm:$0xff] }
 0x1d0   : > { %v5625_v54 = vld [vmem:[%s5815_s9 + $0x64] sm:$0xf] }
 0x1d1   : > { %v1467_v16 = vpop.f32.mrf.mxu2  ;;  %v6852_v14 = vadd.f32 %v2462_v4, %v1821_v51  ;;  %v2624_v22 = vrot.slane %v5625_v54, 5  ;;  %v1089_v28 = vpop.f32.mrf.mxu1  ;;  %v3473_v4 = vor.u32 %v3472_v31, %v3469_v39  ;;  %v2627_v51 = vrot.slane %v5626_v25, 5  ;;  %v5308_v54 = vld [vmem:[%s5815_s9 + $0x6c] sm:$0xe] }
 0x1d2   : > { %v1507_v21 = vadd.f32 %v1467_v16, %v1087_v7  ;;  %v3737_v7 = vpack.c.b16 %v3712_v0, %v3711_v61  ;;  %v1090_v3 = vadd.f32 %v1089_v28, %v6327_v63  ;;  %v3484_v39 = vrot.slane %v3483_v33, 4 }
 0x1d3   : > { %v2626_v42 = vrot.slane %v2624_v22, 4  ;;  %v3474_v55 = vrot.slane %v3473_v4, 4  ;;  %v3488_v16 = vrot.slane %v3486_v49, 5  ;;  %v2625_v57 = vsel %vm6130_vm5, %v5004_v44, %v2624_v22 }
 0x1d4   : > { %v2464_v38 = vpop.f32.mrf.mxu0  ;;  %2852 = vmatmul.bf16.gmra.mxu1 %v2740_v19  ;;  %v4163_v61 = vpack.c.b16 %v4138_v37, %v4137_v6  ;;  %v2716_v32 = vunpack.c.l.b16 %v2625_v57  ;;  %v5324_v33 = vrot.slane %v5308_v54, 9  ;;  %v3491_v44 = vshrl.u32 %v5229_v27, 16  ;;  %v4989_v57 = vld [vmem:[%s5815_s9 + $0x6c] sm:$0xe] }
 0x1d5   : > { %v3479_v22 = vsel %vm5830_vm2, %v3474_v55, %v6850_v13  ;;  %v4050_v25 = vrot.slane %v6857_v9, 5 }
 0x1d6   : > { %v1782_v8 = vpop.f32.mrf.mxu3  ;;  %3167 = vmatmul.bf16.gmra.mxu2 %v5472_v62  ;;  %v2628_v62 = vsel %vm6130_vm5, %v2626_v42, %v2627_v51  ;;  %v3500_v51 = vshll.u32 %v6878_v40, 16  ;;  %v3713_v37 = vunpack.c.l.b16 %v3479_v22  ;;  %v3493_v9 = vrot.slane %v3491_v44, 4 }
 0x1d7   : > { %v1822_v46 = vadd.f32 %v1782_v8, %v1507_v21  ;;  %v4047_v21 = vrot.slane %v6835_v11, 5  ;;  %v2717_v4 = vunpack.c.l.b16 %v2628_v62  ;;  %v3489_v11 = vsel %vm5830_vm2, %v3484_v39, %v3488_v16  ;;  %v5473_v16 = vld [vmem:[%s5815_s9 + $0x6c] sm:$0xff] }
 0x1d9   : > { %v1470_v19 = vpop.f32.mrf.mxu2  ;;  %v1091_v0 = vpop.f32.mrf.mxu1  ;;  %v6875_v63 = vadd.f32 %v2464_v38, %v1822_v46  ;;  %v4049_v8 = vrot.slane %v4047_v21, 4  ;;  %v3494_v38 = vshll.u32 %v5229_v27, 16  ;;  %v3504_v46 = vshrl.u32 %v6878_v40, 16 }
 0x1da   : > { %v1508_v31 = vadd.f32 %v1470_v19, %v1090_v3  ;;  %v1092_v13 = vadd.f32 %v1091_v0, %v6358_v41  ;;  %v2741_v6 = vpack.c.b16 %v2717_v4, %v2716_v32  ;;  %v5627_v3 = vld [vmem:[%s5815_s9 + $0x70] sm:$0xf]  ;;  %v6898_v0 = vrot.slane %v3500_v51, 5 }
 0x1db   : > { %3849 = vmatmul.bf16.gmra.mxu3 %v3737_v7  ;;  %v2631_v19 = vrot.slane %v5627_v3, 5  ;;  %v3496_v62 = vrot.slane %v3494_v38, 5  ;;  %v4051_v41 = vsel %vm6130_vm5, %v4049_v8, %v4050_v25  ;;  %v3506_v27 = vrot.slane %v3504_v46, 4  ;;  %v5232_v3 = vld [vmem:[%s5815_s9 + $0x84] sm:$0xf] }
 0x1dc   : > { %v2467_v28 = vpop.f32.mrf.mxu0  ;;  %v5005_v4 = vrot.slane %v4989_v57, 9 }
 0x1dd   : > { %v2633_v22 = vrot.slane %v2631_v19, 4  ;;  %v3507_v25 = vor.u32 %v3506_v27, %v6898_v0  ;;  %v5309_v27 = vld [vmem:[%s5815_s9 + $0x78] sm:$0xe] }
 0x1de   : > { %v1785_v49 = vpop.f32.mrf.mxu3 }
 0x1df   : > { %4275 = vmatmul.bf16.gmra.mxu0 %v4163_v61  ;;  %v1823_v42 = vadd.f32 %v1785_v49, %v1508_v31  ;;  %v3714_v31 = vunpack.c.l.b16 %v3489_v11  ;;  %v4048_v61 = vsel %vm6130_vm5, %v5324_v33, %v4047_v21  ;;  %v5628_v49 = vld [vmem:[%s5815_s9 + $0x74] sm:$0x1]  ;;  %v4140_v21 = vunpack.c.l.b16 %v4051_v41 }
 0x1e0   : > { %v2634_v11 = vrot.slane %v5628_v49, 5  ;;  %v4139_v38 = vunpack.c.l.b16 %v4048_v61  ;;  %v3497_v33 = vor.u32 %v3496_v62, %v3493_v9 }
 0x1e1   : > { %v1472_v7 = vpop.f32.mrf.mxu2  ;;  %v6890_v55 = vadd.f32 %v2467_v28, %v1823_v42  ;;  %v1094_v54 = vpop.f32.mrf.mxu1  ;;  %v6901_v28 = vld [vmem:[%s5815_s9 + $0x80] sm:$0x1]  ;;  %v3738_v8 = vpack.c.b16 %v3714_v31, %v3713_v37  ;;  %v3508_v31 = vrot.slane %v3507_v25, 4 }
 0x1e2   : > { %v1509_v39 = vadd.f32 %v1472_v7, %v1092_v13  ;;  %v3510_v51 = vshll.u32 %v6901_v28, 16  ;;  %v1095_v46 = vadd.f32 %v1094_v54, %v6378_v15  ;;  %v2632_v7 = vsel %vm6130_vm5, %v5005_v4, %v2631_v19 }
 0x1e3   : > { %v3498_v9 = vrot.slane %v3497_v33, 4  ;;  %v4054_v15 = vrot.slane %v6878_v40, 5  ;;  %v2718_v19 = vunpack.c.l.b16 %v2632_v7  ;;  %v3515_v4 = vshrl.u32 %v5232_v3, 16 }
 0x1e4   : > { %v2469_v32 = vpop.f32.mrf.mxu0  ;;  %2857 = vmatmul.bf16.gmra.mxu1 %v2741_v6  ;;  %v2635_v6 = vsel %vm6130_vm5, %v2633_v22, %v2634_v11  ;;  %v3512_v62 = vrot.slane %v3510_v51, 5  ;;  %v3518_v22 = vshll.u32 %v5232_v3, 16  ;;  %v4057_v25 = vrot.slane %v6901_v28, 5 }
 0x1e5   : > { %v2719_v41 = vunpack.c.l.b16 %v2635_v6  ;;  %v4056_v33 = vrot.slane %v4054_v15, 4  ;;  %v3517_v51 = vrot.slane %v3515_v4, 4 }
 0x1e6   : > { %v1787_v44 = vpop.f32.mrf.mxu3  ;;  %3172 = vmatmul.bf16.gmra.mxu2 %v5473_v16  ;;  %v4164_v16 = vpack.c.b16 %v4140_v21, %v4139_v38  ;;  %v3503_v38 = vsel %vm5830_vm2, %v3498_v9, %v6898_v0  ;;  %v5325_v21 = vrot.slane %v5309_v27, 9 }
 0x1e7   : > { %v1824_v42 = vadd.f32 %v1787_v44, %v1509_v39  ;;  %v6913_v39 = vld [vmem:[%s5815_s9 + $0x88] sm:$0xf]  ;;  %v4058_v27 = vsel %vm6130_vm5, %v4056_v33, %v4057_v25 }
 0x1e8   : > { %v3524_v49 = vshll.u32 %v6913_v39, 16  ;;  %v3528_v11 = vshrl.u32 %v6913_v39, 16 }
 0x1e9   : > { %v1475_v13 = vpop.f32.mrf.mxu2  ;;  %v1096_v37 = vpop.f32.mrf.mxu1  ;;  %v6916_v54 = vadd.f32 %v2469_v32, %v1824_v42  ;;  %v3513_v32 = vsel %vm5830_vm2, %v3508_v31, %v3512_v62  ;;  %v6935_v31 = vld [vmem:[%s5815_s9 + $0x8c] sm:$0x1] }
 0x1ea   : > { %v1510_v57 = vadd.f32 %v1475_v13, %v1095_v46  ;;  %v1097_v42 = vadd.f32 %v1096_v37, %v6393_v1  ;;  %v3520_v13 = vrot.slane %v3518_v22, 5  ;;  %v6928_v0 = vrot.slane %v3524_v49, 5 }
 0x1eb   : > { %3854 = vmatmul.bf16.gmra.mxu3 %v3738_v8  ;;  %v2742_v8 = vpack.c.b16 %v2719_v41, %v2718_v19  ;;  %v3530_v7 = vrot.slane %v3528_v11, 4  ;;  %v3715_v37 = vunpack.c.l.b16 %v3503_v38  ;;  %v3716_v62 = vunpack.c.l.b16 %v3513_v32  ;;  %v4990_v19 = vld [vmem:[%s5815_s9 + $0x78] sm:$0xe]  ;;  %v5630_v38 = vld [vmem:[%s5815_s9 + $0x80] sm:$0x1] }
 0x1ec   : > { %v2472_v61 = vpop.f32.mrf.mxu0  ;;  %v4055_v41 = vsel %vm6130_vm5, %v5325_v21, %v4054_v15  ;;  %v3534_v22 = vshll.u32 %v6935_v31, 16  ;;  %v5006_v11 = vrot.slane %v4990_v19, 9  ;;  %v4142_v21 = vunpack.c.l.b16 %v4058_v27 }
 0x1ed   : > { %v3531_v4 = vor.u32 %v3530_v7, %v6928_v0  ;;  %v4141_v15 = vunpack.c.l.b16 %v4055_v41  ;;  %v5310_v41 = vld [vmem:[%s5815_s9 + $0x84] sm:$0xe] }
 0x1ee   : > { %v1790_v44 = vpop.f32.mrf.mxu3 }
 0x1ef   : > { %4280 = vmatmul.bf16.gmra.mxu0 %v4164_v16  ;;  %v1825_v40 = vadd.f32 %v1790_v44, %v1510_v57  ;;  %v5474_v16 = vld [vmem:[%s5815_s9 + $0x78] sm:$0xff] }
 0x1f0   : > { %v5629_v57 = vld [vmem:[%s5815_s9 + $0x7c] sm:$0xf] }
 0x1f1   : > { %v1477_v46 = vpop.f32.mrf.mxu2  ;;  %v6930_v6 = vadd.f32 %v2472_v61, %v1825_v40  ;;  %v2638_v9 = vrot.slane %v5629_v57, 5  ;;  %v2823_v1 = vpop.f32.mrf.mxu1  ;;  %v3521_v61 = vor.u32 %v3520_v13, %v3517_v51  ;;  %v2641_v40 = vrot.slane %v5630_v38, 5 }
 0x1f2   : > { %v1511_v3 = vadd.f32 %v1477_v46, %v1097_v42  ;;  %v3739_v42 = vpack.c.b16 %v3716_v62, %v3715_v37  ;;  %v2903_v33 = vadd.f32 %v2823_v1, %v6419_v59  ;;  %v3532_v51 = vrot.slane %v3531_v4, 4  ;;  %v5235_v59 = vld [vmem:[%s5815_s9 + $0x90] sm:$0xf]  ;;  %v6954_v1 = vld [vmem:[%s5815_s9 + $0x94] sm:$0xf] }
 0x1f3   : > { %v2640_v44 = vrot.slane %v2638_v9, 4  ;;  %v3522_v25 = vrot.slane %v3521_v61, 4  ;;  %v3536_v46 = vrot.slane %v3534_v22, 5  ;;  %v2639_v13 = vsel %vm6130_vm5, %v5006_v11, %v2638_v9 }
 0x1f4   : > { %v2474_v28 = vpop.f32.mrf.mxu0  ;;  %2862 = vmatmul.bf16.gmra.mxu1 %v2742_v8  ;;  %v4061_v37 = vrot.slane %v6913_v39, 5  ;;  %v2720_v27 = vunpack.c.l.b16 %v2639_v13  ;;  %v3539_v22 = vshrl.u32 %v5235_v59, 16  ;;  %v3552_v11 = vshrl.u32 %v6954_v1, 16 }
 0x1f5   : > { %v2642_v7 = vsel %vm6130_vm5, %v2640_v44, %v2641_v40  ;;  %v3527_v61 = vsel %vm5830_vm2, %v3522_v25, %v6928_v0  ;;  %v3537_v4 = vsel %vm5830_vm2, %v3532_v51, %v3536_v46  ;;  %v6973_v0 = vld [vmem:[%s7301_s2] ss:$0 sm:$0xff]  ;;  %v5326_v38 = vrot.slane %v5310_v41, 9  ;;  %v5475_v51 = vld [vmem:[%s5815_s9 + $0x84] sm:$0xff] }
 0x1f6   : > { %v1792_v49 = vpop.f32.mrf.mxu3  ;;  %3177 = vmatmul.bf16.gmra.mxu2 %v5474_v16  ;;  %v2721_v9 = vunpack.c.l.b16 %v2642_v7  ;;  %v4063_v40 = vrot.slane %v4061_v37, 4  ;;  %v5631_v46 = vld [vmem:[%s5815_s9 + $0x88] sm:$0xf]  ;;  %v4991_v7 = vld [vmem:[%s5815_s9 + $0x84] sm:$0xe]  ;;  %v3554_v41 = vrot.slane %v3552_v11, 4 }
 0x1f7   : > { %v1826_v32 = vadd.f32 %v1792_v49, %v1511_v3  ;;  %v4165_v3 = vpack.c.b16 %v4142_v21, %v4141_v15  ;;  %v3542_v49 = vshll.u32 %v5235_v59, 16  ;;  %v3718_v15 = vunpack.c.l.b16 %v3537_v4 }
 0x1f8   : > { %v2743_v25 = vpack.c.b16 %v2721_v9, %v2720_v27  ;;  %v2645_v13 = vrot.slane %v5631_v46, 5  ;;  %v6988_v9 = vld [vmem:[%s5815_s9 + $0x98] sm:$0x1]  ;;  %v5007_v4 = vrot.slane %v4991_v7, 9 }
 0x1f9   : > { %v3138_v8 = vpop.f32.mrf.mxu2  ;;  %v2825_v57 = vpop.f32.mrf.mxu1  ;;  %v6956_v62 = vadd.f32 %v2474_v28, %v1826_v32  ;;  %v3548_v28 = vshll.u32 %v6954_v1, 16  ;;  %v4064_v32 = vrot.slane %v6935_v31, 5 }
 0x1fa   : > { %v3218_v16 = vadd.f32 %v3138_v8, %v2903_v33  ;;  %v2904_v33 = vadd.f32 %v2825_v57, %v6430_v5  ;;  %v4062_v5 = vsel %vm6130_vm5, %v5326_v38, %v4061_v37  ;;  %v2646_v46 = vsel %vm6130_vm5, %v5007_v4, %v2645_v13 }
 0x1fb   : > { %3859 = vmatmul.bf16.gmra.mxu3 %v3739_v42  ;;  %v3717_v42 = vunpack.c.l.b16 %v3527_v61  ;;  %v6980_v59 = vrot.slane %v3548_v28, 5  ;;  %v4065_v57 = vsel %vm6130_vm5, %v4063_v40, %v4064_v32  ;;  %v4143_v11 = vunpack.c.l.b16 %v4062_v5 }
 0x1fc   : > { %v4246_v19 = vpop.f32.mrf.mxu0  ;;  %v4144_v37 = vunpack.c.l.b16 %v4065_v57  ;;  %v2722_v5 = vunpack.c.l.b16 %v2646_v46  ;;  %v5311_v57 = vld [vmem:[%s5815_s9 + $0x90] sm:$0xe] }
 0x1fd   : > { %v3555_v38 = vor.u32 %v3554_v41, %v6980_v59  ;;  %v3740_v32 = vpack.c.b16 %v3718_v15, %v3717_v42  ;;  %v5238_v41 = vld [vmem:[%s5815_s9 + $0x9c] sm:$0xf]  ;;  %v5476_v46 = vld [vmem:[%s5815_s9 + $0x90] sm:$0xff] }
 0x1fe   : > { %v3820_v39 = vpop.f32.mrf.mxu3  ;;  %v4166_v7 = vpack.c.b16 %v4144_v37, %v4143_v11  ;;  %v3563_v4 = vshrl.u32 %v5238_v41, 16  ;;  %v5327_v11 = vrot.slane %v5311_v57, 9 }
 0x1ff   : > { %4285 = vmatmul.bf16.gmra.mxu0 %v4165_v3  ;;  %v3900_v44 = vadd.f32 %v3820_v39, %v3218_v16  ;;  %v3541_v3 = vrot.slane %v3539_v22, 4  ;;  %v3544_v16 = vrot.slane %v3542_v49, 5  ;;  %v2647_v39 = vrot.slane %v2645_v13, 4  ;;  %v5632_v22 = vld [vmem:[%s5815_s9 + $0x8c] sm:$0x1] }
 0x200   : > { %v2648_v49 = vrot.slane %v5632_v22, 5 }
 0x201   : > { %v4326_v21 = vadd.f32 %v4246_v19, %v3900_v44  ;;  %v3140_v8 = vpop.f32.mrf.mxu2  ;;  %v2828_v19 = vpop.f32.mrf.mxu1  ;;  %v3545_v44 = vor.u32 %v3544_v16, %v3541_v3  ;;  %v3556_v16 = vrot.slane %v3555_v38, 4  ;;  %v4071_v38 = vrot.slane %v6988_v9, 5 }
 0x202   : > { %v3219_v61 = vadd.f32 %v3140_v8, %v2904_v33  ;;  %v2905_v8 = vadd.f32 %v2828_v19, %v6440_v48 }
 0x203   : > { %v4362_v31 = vadd.f32 %v6973_v0, %v4326_v21  ;;  %v3558_v21 = vshll.u32 %v6988_v9, 16  ;;  %v3546_v3 = vrot.slane %v3545_v44, 4 }
 0x204   : > { %v4248_v27 = vpop.f32.mrf.mxu0  ;;  %2867 = vmatmul.bf16.gmra.mxu1 %v2743_v25 }
 0x205   : > { %4394 = vst [vmem:[%s6991_s7] sm:$0xff] %v4362_v31  ;;  %v3560_v48 = vrot.slane %v3558_v21, 5 }
 0x206   : > { %v3822_v28 = vpop.f32.mrf.mxu3  ;;  %3182 = vmatmul.bf16.gmra.mxu2 %v5475_v51  ;;  %v2649_v51 = vsel %vm6130_vm5, %v2647_v39, %v2648_v49  ;;  %v3566_v39 = vshll.u32 %v5238_v41, 16  ;;  %v3551_v49 = vsel %vm5830_vm2, %v3546_v3, %v6980_v59 }
 0x207   : > { %v3901_v40 = vadd.f32 %v3822_v28, %v3219_v61  ;;  %v4068_v61 = vrot.slane %v6954_v1, 5  ;;  %v2723_v13 = vunpack.c.l.b16 %v2649_v51  ;;  %v3561_v1 = vsel %vm5830_vm2, %v3556_v16, %v3560_v48  ;;  %v5633_v51 = vld [vmem:[%s5815_s9 + $0x94] sm:$0xf] }
 0x208   : > { %v3719_v41 = vunpack.c.l.b16 %v3551_v49  ;;  %v5634_v49 = vld [vmem:[%s5815_s9 + $0x98] sm:$0x1] }
 0x209   : > { %v4327_v33 = vadd.f32 %v4248_v27, %v3901_v40  ;;  %v3143_v25 = vpop.f32.mrf.mxu2  ;;  %v2830_v31 = vpop.f32.mrf.mxu1  ;;  %v7008_v27 = vld [vmem:[%s5815_s9 + $0xa0] sm:$0xf]  ;;  %v4070_v37 = vrot.slane %v4068_v61, 4  ;;  %v2744_v44 = vpack.c.b16 %v2723_v13, %v2722_v5  ;;  %v7029_v13 = vld [vmem:[%s5815_s9 + $0xa4] sm:$0x1] }
 0x20a   : > { %v3220_v15 = vadd.f32 %v3143_v25, %v2905_v8  ;;  %v3572_v40 = vshll.u32 %v7008_v27, 16  ;;  %v3565_v8 = vrot.slane %v3563_v4, 4  ;;  %v3568_v25 = vrot.slane %v3566_v39, 5 }
 0x20b   : > { %v4363_v42 = vadd.f32 %v6973_v0, %v4327_v33  ;;  %3864 = vmatmul.bf16.gmra.mxu3 %v3740_v32  ;;  %v3576_v32 = vshrl.u32 %v7008_v27, 16  ;;  %v2906_v33 = vadd.f32 %v2830_v31, %v6454_v47  ;;  %v4069_v47 = vsel %vm6130_vm5, %v5327_v11, %v4068_v61 }
 0x20c   : > { %v4251_v19 = vpop.f32.mrf.mxu0  ;;  %v4072_v31 = vsel %vm6130_vm5, %v4070_v37, %v4071_v38  ;;  %v3569_v57 = vor.u32 %v3568_v25, %v3565_v8  ;;  %v4145_v61 = vunpack.c.l.b16 %v4069_v47  ;;  %v3582_v38 = vshll.u32 %v7029_v13, 16  ;;  %v5312_v25 = vld [vmem:[%s5815_s9 + $0x9c] sm:$0xe] }
 0x20d   : > { %4395 = vst [vmem:[%s6991_s7 + $0x8] sm:$0xff] %v4363_v42  ;;  %v3720_v42 = vunpack.c.l.b16 %v3561_v1  ;;  %v3578_v5 = vrot.slane %v3576_v32, 4  ;;  %v4146_v11 = vunpack.c.l.b16 %v4072_v31 }
 0x20e   : > { %v3825_v22 = vpop.f32.mrf.mxu3 }
 0x20f   : > { %4290 = vmatmul.bf16.gmra.mxu0 %v4166_v7  ;;  %v3902_v28 = vadd.f32 %v3825_v22, %v3220_v15  ;;  %v2652_v7 = vrot.slane %v5633_v51, 5  ;;  %v4992_v15 = vld [vmem:[%s5815_s9 + $0x90] sm:$0xe]  ;;  %v4167_v51 = vpack.c.b16 %v4146_v11, %v4145_v61 }
 0x210   : > { %v5008_v39 = vrot.slane %v4992_v15, 9 }
 0x211   : > { %v4328_v21 = vadd.f32 %v4251_v19, %v3902_v28  ;;  %v3145_v59 = vpop.f32.mrf.mxu2  ;;  %v2833_v9 = vpop.f32.mrf.mxu1  ;;  %v3574_v19 = vrot.slane %v3572_v40, 5  ;;  %v2654_v22 = vrot.slane %v2652_v7, 4  ;;  %v2655_v28 = vrot.slane %v5634_v49, 5 }
 0x212   : > { %v3221_v16 = vadd.f32 %v3145_v59, %v2906_v33  ;;  %v2907_v40 = vadd.f32 %v2833_v9, %v6474_v52  ;;  %v3570_v33 = vrot.slane %v3569_v57, 4  ;;  %v2653_v59 = vsel %vm6130_vm5, %v5008_v39, %v2652_v7  ;;  %v7043_v52 = vld [vmem:[%s5815_s9 + $0xac] sm:$0xf] }
 0x213   : > { %v4364_v3 = vadd.f32 %v6973_v0, %v4328_v21  ;;  %v3741_v21 = vpack.c.b16 %v3720_v42, %v3719_v41  ;;  %v3579_v37 = vor.u32 %v3578_v5, %v3574_v19  ;;  %v2656_v8 = vsel %vm6130_vm5, %v2654_v22, %v2655_v28  ;;  %v5241_v42 = vld [vmem:[%s5815_s9 + $0xa8] sm:$0xf] }
 0x214   : > { %v4253_v48 = vpop.f32.mrf.mxu0  ;;  %2872 = vmatmul.bf16.gmra.mxu1 %v2744_v44  ;;  %v4075_v41 = vrot.slane %v7008_v27, 5  ;;  %v2724_v7 = vunpack.c.l.b16 %v2653_v59  ;;  %v2725_v47 = vunpack.c.l.b16 %v2656_v8  ;;  %v3575_v31 = vsel %vm5830_vm2, %v3570_v33, %v3574_v19  ;;  %v5635_v19 = vld [vmem:[%s5815_s9 + $0xa0] sm:$0xf]  ;;  %v4993_v33 = vld [vmem:[%s5815_s9 + $0x9c] sm:$0xe] }
 0x215   : > { %4396 = vst [vmem:[%s6991_s7 + $0x10] sm:$0xff] %v4364_v3  ;;  %v3580_v15 = vrot.slane %v3579_v37, 4  ;;  %v5328_v5 = vrot.slane %v5312_v25, 9  ;;  %v3590_v39 = vshll.u32 %v5241_v42, 16  ;;  %v3596_v27 = vshll.u32 %v7043_v52, 16  ;;  %v5477_v59 = vld [vmem:[%s5815_s9 + $0x9c] sm:$0xff] }
 0x216   : > { %v3827_v4 = vpop.f32.mrf.mxu3  ;;  %3187 = vmatmul.bf16.gmra.mxu2 %v5476_v46  ;;  %v3600_v22 = vshrl.u32 %v7043_v52, 16  ;;  %v4077_v28 = vrot.slane %v4075_v41, 4  ;;  %v3721_v61 = vunpack.c.l.b16 %v3575_v31  ;;  %v2659_v11 = vrot.slane %v5635_v19, 5 }
 0x217   : > { %v3903_v1 = vadd.f32 %v3827_v4, %v3221_v16  ;;  %v3587_v4 = vshrl.u32 %v5241_v42, 16  ;;  %v3592_v8 = vrot.slane %v3590_v39, 5  ;;  %v7059_v25 = vrot.slane %v3596_v27, 5 }
 0x219   : > { %v4329_v44 = vadd.f32 %v4253_v48, %v3903_v1  ;;  %v3148_v32 = vpop.f32.mrf.mxu2  ;;  %v2835_v16 = vpop.f32.mrf.mxu1  ;;  %v3584_v48 = vrot.slane %v3582_v38, 5  ;;  %v4078_v1 = vrot.slane %v7029_v13, 5  ;;  %v3589_v13 = vrot.slane %v3587_v4, 4 }
 0x21a   : > { %v3222_v3 = vadd.f32 %v3148_v32, %v2907_v40  ;;  %v2908_v38 = vadd.f32 %v2835_v16, %v6494_v34  ;;  %v2745_v40 = vpack.c.b16 %v2725_v47, %v2724_v7  ;;  %v4076_v32 = vsel %vm6130_vm5, %v5328_v5, %v4075_v41  ;;  %v7065_v16 = vld [vmem:[%s5815_s9 + $0xb0] sm:$0x1]  ;;  %v5636_v7 = vld [vmem:[%s5815_s9 + $0xa4] sm:$0x1] }
 0x21b   : > { %v4365_v46 = vadd.f32 %v6973_v0, %v4329_v44  ;;  %3869 = vmatmul.bf16.gmra.mxu3 %v3741_v21  ;;  %v3585_v21 = vsel %vm5830_vm2, %v3580_v15, %v3584_v48  ;;  %v4079_v34 = vsel %vm6130_vm5, %v4077_v28, %v4078_v1  ;;  %v5009_v15 = vrot.slane %v4993_v33, 9 }
 0x21c   : > { %v4256_v9 = vpop.f32.mrf.mxu0  ;;  %v2661_v48 = vrot.slane %v2659_v11, 4  ;;  %v2662_v47 = vrot.slane %v5636_v7, 5  ;;  %v4147_v31 = vunpack.c.l.b16 %v4076_v32  ;;  %v3593_v4 = vor.u32 %v3592_v8, %v3589_v13 }
 0x21d   : > { %4397 = vst [vmem:[%s6991_s7 + $0x18] sm:$0xff] %v4365_v46  ;;  %v3602_v46 = vrot.slane %v3600_v22, 4  ;;  %v3606_v27 = vshll.u32 %v7065_v16, 16  ;;  %v2660_v28 = vsel %vm6130_vm5, %v5009_v15, %v2659_v11 }
 0x21e   : > { %v3830_v57 = vpop.f32.mrf.mxu3  ;;  %v2663_v1 = vsel %vm6130_vm5, %v2661_v48, %v2662_v47  ;;  %v2726_v8 = vunpack.c.l.b16 %v2660_v28 }
 0x21f   : > { %4295 = vmatmul.bf16.gmra.mxu0 %v4167_v51  ;;  %v3904_v49 = vadd.f32 %v3830_v57, %v3222_v3  ;;  %v4148_v57 = vunpack.c.l.b16 %v4079_v34  ;;  %v3603_v39 = vor.u32 %v3602_v46, %v7059_v25  ;;  %v3608_v33 = vrot.slane %v3606_v27, 5 }
 0x220   : > { %v2727_v46 = vunpack.c.l.b16 %v2663_v1  ;;  %v5478_v1 = vld [vmem:[%s5815_s9 + $0xa8] sm:$0xff] }
 0x221   : > { %v4330_v37 = vadd.f32 %v4256_v9, %v3904_v49  ;;  %v3150_v44 = vpop.f32.mrf.mxu2  ;;  %v2838_v42 = vpop.f32.mrf.mxu1  ;;  %v3722_v9 = vunpack.c.l.b16 %v3585_v21  ;;  %v3604_v32 = vrot.slane %v3603_v39, 4 }
 0x222   : > { %v3223_v3 = vadd.f32 %v3150_v44, %v2908_v38  ;;  %v2909_v19 = vadd.f32 %v2838_v42, %v6504_v10  ;;  %v5244_v38 = vld [vmem:[%s5815_s9 + $0xb4] sm:$0xf]  ;;  %v4168_v44 = vpack.c.b16 %v4148_v57, %v4147_v31  ;;  %v4082_v10 = vrot.slane %v7043_v52, 5 }
 0x223   : > { %v4366_v51 = vadd.f32 %v6973_v0, %v4330_v37  ;;  %v3742_v49 = vpack.c.b16 %v3722_v9, %v3721_v61  ;;  %v3611_v42 = vshrl.u32 %v5244_v38, 16  ;;  %v3614_v9 = vshll.u32 %v5244_v38, 16 }
 0x224   : > { %v4258_v41 = vpop.f32.mrf.mxu0  ;;  %2877 = vmatmul.bf16.gmra.mxu1 %v2745_v40  ;;  %v3594_v40 = vrot.slane %v3593_v4, 4  ;;  %v2746_v47 = vpack.c.b16 %v2727_v46, %v2726_v8  ;;  %v3609_v52 = vsel %vm5830_vm2, %v3604_v32, %v3608_v33  ;;  %v4085_v57 = vrot.slane %v7065_v16, 5  ;;  %v4994_v33 = vld [vmem:[%s5815_s9 + $0xa8] sm:$0xe] }
 0x225   : > { %4398 = vst [vmem:[%s6991_s7 + $0x20] sm:$0xff] %v4366_v51  ;;  %v3613_v4 = vrot.slane %v3611_v42, 4  ;;  %v3616_v39 = vrot.slane %v3614_v9, 5  ;;  %v3724_v32 = vunpack.c.l.b16 %v3609_v52  ;;  %v5638_v9 = vld [vmem:[%s5815_s9 + $0xb0] sm:$0x1] }
 0x226   : > { %v3832_v5 = vpop.f32.mrf.mxu3  ;;  %3192 = vmatmul.bf16.gmra.mxu2 %v5477_v59  ;;  %v7078_v59 = vld [vmem:[%s5815_s9 + $0xb8] sm:$0xf]  ;;  %v3599_v48 = vsel %vm5830_vm2, %v3594_v40, %v7059_v25 }
 0x227   : > { %v3905_v22 = vadd.f32 %v3832_v5, %v3223_v3  ;;  %v5313_v3 = vld [vmem:[%s5815_s9 + $0xa8] sm:$0xe]  ;;  %v3620_v34 = vshll.u32 %v7078_v59, 16  ;;  %v4084_v5 = vrot.slane %v4082_v10, 4  ;;  %v3723_v40 = vunpack.c.l.b16 %v3599_v48 }
 0x228   : > { %v5329_v31 = vrot.slane %v5313_v3, 9  ;;  %v5010_v3 = vrot.slane %v4994_v33, 9 }
 0x229   : > { %v4331_v21 = vadd.f32 %v4258_v41, %v3905_v22  ;;  %v3153_v37 = vpop.f32.mrf.mxu2  ;;  %v2840_v13 = vpop.f32.mrf.mxu1  ;;  %v3624_v41 = vshrl.u32 %v7078_v59, 16  ;;  %v7093_v25 = vrot.slane %v3620_v34, 5  ;;  %v2669_v34 = vrot.slane %v5638_v9, 5  ;;  %v7311_v9 = vld [vmem:[#allocation5_spill] sm:$0xff] }
 0x22a   : > { %v3224_v11 = vadd.f32 %v3153_v37, %v2909_v19  ;;  %v2910_v22 = vadd.f32 %v2840_v13, %v6512_v12  ;;  %v7098_v37 = vld [vmem:[%s5815_s9 + $0xbc] sm:$0x1]  ;;  %v4083_v12 = vsel %vm6130_vm5, %v5329_v31, %v4082_v10  ;;  %v3617_v13 = vor.u32 %v3616_v39, %v3613_v4 }
 0x22b   : > { %v4367_v61 = vadd.f32 %v6973_v0, %v4331_v21  ;;  %3874 = vmatmul.bf16.gmra.mxu3 %v3742_v49  ;;  %v3626_v28 = vrot.slane %v3624_v41, 4  ;;  %v5637_v21 = vld [vmem:[%s5815_s9 + $0xac] sm:$0xf]  ;;  %v3630_v46 = vshll.u32 %v7098_v37, 16  ;;  %v4149_v10 = vunpack.c.l.b16 %v4083_v12 }
 0x22c   : > { %v4261_v51 = vpop.f32.mrf.mxu0  ;;  %v2666_v19 = vrot.slane %v5637_v21, 5  ;;  %v5247_v21 = vld [vmem:[%s5815_s9 + $0xc0] sm:$0xf]  ;;  %v4092_v12 = vrot.slane %v7098_v37, 5 }
 0x22d   : > { %4399 = vst [vmem:[%s6991_s7 + $0x28] sm:$0xff] %v4367_v61  ;;  %v3627_v8 = vor.u32 %v3626_v28, %v7093_v25 }
 0x22e   : > { %v3835_v15 = vpop.f32.mrf.mxu3  ;;  %v2668_v42 = vrot.slane %v2666_v19, 4  ;;  %v2667_v4 = vsel %vm6130_vm5, %v5010_v3, %v2666_v19 }
 0x22f   : > { %4300 = vmatmul.bf16.gmra.mxu0 %v4168_v44  ;;  %v3906_v7 = vadd.f32 %v3835_v15, %v3224_v11  ;;  %v4086_v11 = vsel %vm6130_vm5, %v4084_v5, %v4085_v57  ;;  %v3743_v15 = vpack.c.b16 %v3724_v32, %v3723_v40  ;;  %v3628_v5 = vrot.slane %v3627_v8, 4 }
 0x230   : > { %v4150_v48 = vunpack.c.l.b16 %v4086_v11  ;;  %v3632_v57 = vrot.slane %v3630_v46, 5  ;;  %v2670_v39 = vsel %vm6130_vm5, %v2668_v42, %v2669_v34  ;;  %v2728_v19 = vunpack.c.l.b16 %v2667_v4 }
 0x231   : > { %v4332_v27 = vadd.f32 %v4261_v51, %v3906_v7  ;;  %v3155_v49 = vpop.f32.mrf.mxu2  ;;  %v2843_v16 = vpop.f32.mrf.mxu1  ;;  %v3618_v7 = vrot.slane %v3617_v13, 4  ;;  %v2729_v40 = vunpack.c.l.b16 %v2670_v39  ;;  %v3635_v11 = vshrl.u32 %v5247_v21, 16  ;;  %v4995_v39 = vld [vmem:[%s5815_s9 + $0xb4] sm:$0xe] }
 0x232   : > { %v3225_v44 = vadd.f32 %v3155_v49, %v2910_v22  ;;  %v4089_v22 = vrot.slane %v7078_v59, 5  ;;  %v4169_v28 = vpack.c.b16 %v4150_v48, %v4149_v10  ;;  %v3633_v59 = vsel %vm5830_vm2, %v3628_v5, %v3632_v57  ;;  %v5479_v10 = vld [vmem:[%s5815_s9 + $0xb4] sm:$0xff] }
 0x233   : > { %v4368_v38 = vadd.f32 %v6973_v0, %v4332_v27  ;;  %v5314_v27 = vld [vmem:[%s5815_s9 + $0xb4] sm:$0xe]  ;;  %v3638_v13 = vshll.u32 %v5247_v21, 16  ;;  %v3726_v3 = vunpack.c.l.b16 %v3633_v59 }
 0x234   : > { %v4263_v61 = vpop.f32.mrf.mxu0  ;;  %2882 = vmatmul.bf16.gmra.mxu1 %v2746_v47  ;;  %v2911_v47 = vadd.f32 %v2843_v16, %v6531_v60  ;;  %v7123_v16 = vld [vmem:[%s5815_s9 + $0xc4] sm:$0xf]  ;;  %v5330_v32 = vrot.slane %v5314_v27, 9 }
 0x235   : > { %4400 = vst [vmem:[%s6991_s7 + $0x30] sm:$0xff] %v4368_v38  ;;  %v3648_v46 = vshrl.u32 %v7123_v16, 16 }
 0x236   : > { %v3837_v51 = vpop.f32.mrf.mxu3  ;;  %3197 = vmatmul.bf16.gmra.mxu2 %v5478_v1  ;;  %v4090_v37 = vsel %vm6130_vm5, %v5330_v32, %v4089_v22 }
 0x237   : > { %v3907_v41 = vadd.f32 %v3837_v51, %v3225_v44  ;;  %v3623_v44 = vsel %vm5830_vm2, %v3618_v7, %v7093_v25  ;;  %v3644_v25 = vshll.u32 %v7123_v16, 16  ;;  %v5639_v7 = vld [vmem:[%s5815_s9 + $0xb8] sm:$0xf] }
 0x238   : > { %v3725_v51 = vunpack.c.l.b16 %v3623_v44 }
 0x239   : > { %v4333_v52 = vadd.f32 %v4263_v61, %v3907_v41  ;;  %v3158_v31 = vpop.f32.mrf.mxu2  ;;  %v2845_v60 = vpop.f32.mrf.mxu1  ;;  %v4091_v61 = vrot.slane %v4089_v22, 4  ;;  %v3646_v27 = vrot.slane %v3644_v25, 5  ;;  %v4151_v22 = vunpack.c.l.b16 %v4090_v37 }
 0x23a   : > { %v3226_v1 = vadd.f32 %v3158_v31, %v2911_v47  ;;  %v2912_v34 = vadd.f32 %v2845_v60, %v7311_v9  ;;  %v3637_v47 = vrot.slane %v3635_v11, 4  ;;  %v3640_v31 = vrot.slane %v3638_v13, 5  ;;  %v7312_v13 = vld [vmem:[#allocation6_spill] sm:$0xff] }
 0x23b   : > { %v4369_v49 = vadd.f32 %v6973_v0, %v4333_v52  ;;  %3879 = vmatmul.bf16.gmra.mxu3 %v3743_v15  ;;  %v2747_v15 = vpack.c.b16 %v2729_v40, %v2728_v19  ;;  %v4093_v48 = vsel %vm6130_vm5, %v4091_v61, %v4092_v12  ;;  %v2673_v52 = vrot.slane %v5639_v7, 5  ;;  %v5640_v19 = vld [vmem:[%s5815_s9 + $0xbc] sm:$0x1] }
 0x23c   : > { %v4266_v38 = vpop.f32.mrf.mxu0  ;;  %v4152_v60 = vunpack.c.l.b16 %v4093_v48  ;;  %v2676_v40 = vrot.slane %v5640_v19, 5  ;;  %v3641_v59 = vor.u32 %v3640_v31, %v3637_v47  ;;  %v4096_v7 = vrot.slane %v7123_v16, 5  ;;  %v5250_v47 = vld [vmem:[%s5815_s9 + $0xcc] sm:$0xf] }
 0x23d   : > { %4401 = vst [vmem:[%s6991_s7 + $0x38] sm:$0xff] %v4369_v49  ;;  %v3650_v49 = vrot.slane %v3648_v46, 4  ;;  %v2675_v44 = vrot.slane %v2673_v52, 4  ;;  %v3662_v16 = vshll.u32 %v5250_v47, 16 }
 0x23e   : > { %v3840_v33 = vpop.f32.mrf.mxu3  ;;  %v4170_v46 = vpack.c.b16 %v4152_v60, %v4151_v22  ;;  %v3659_v22 = vshrl.u32 %v5250_v47, 16  ;;  %v4098_v60 = vrot.slane %v4096_v7, 4  ;;  %v5642_v47 = vld [vmem:[%s5815_s9 + $0xc8] sm:$0x1] }
 0x23f   : > { %4305 = vmatmul.bf16.gmra.mxu0 %v4169_v28  ;;  %v3908_v8 = vadd.f32 %v3840_v33, %v3226_v1  ;;  %v7141_v1 = vld [vmem:[%s5815_s9 + $0xc8] sm:$0x1]  ;;  %v3744_v33 = vpack.c.b16 %v3726_v3, %v3725_v51  ;;  %v3651_v61 = vor.u32 %v3650_v49, %v3646_v27  ;;  %v2677_v9 = vsel %vm6130_vm5, %v2675_v44, %v2676_v40 }
 0x240   : > { %v3654_v12 = vshll.u32 %v7141_v1, 16 }
 0x241   : > { %v4334_v42 = vadd.f32 %v4266_v38, %v3908_v8  ;;  %v3160_v41 = vpop.f32.mrf.mxu2  ;;  %v2848_v4 = vpop.f32.mrf.mxu1  ;;  %v5011_v38 = vrot.slane %v4995_v39, 9 }
 0x242   : > { %v3227_v57 = vadd.f32 %v3160_v41, %v2912_v34  ;;  %v2913_v8 = vadd.f32 %v2848_v4, %v7312_v13  ;;  %v3642_v34 = vrot.slane %v3641_v59, 4  ;;  %v3656_v37 = vrot.slane %v3654_v12, 5  ;;  %v5641_v12 = vld [vmem:[%s5815_s9 + $0xc4] sm:$0xf] }
 0x243   : > { %v4370_v5 = vadd.f32 %v6973_v0, %v4334_v42  ;;  %v2674_v42 = vsel %vm6130_vm5, %v5011_v38, %v2673_v52  ;;  %v2731_v52 = vunpack.c.l.b16 %v2677_v9 }
 0x244   : > { %v4268_v28 = vpop.f32.mrf.mxu0  ;;  %2887 = vmatmul.bf16.gmra.mxu1 %v2747_v15  ;;  %v3652_v15 = vrot.slane %v3651_v61, 4  ;;  %v2730_v31 = vunpack.c.l.b16 %v2674_v42  ;;  %v3647_v4 = vsel %vm5830_vm2, %v3642_v34, %v3646_v27  ;;  %v3664_v42 = vrot.slane %v3662_v16, 5 }
 0x245   : > { %4402 = vst [vmem:[%s6991_s7 + $0x40] sm:$0xff] %v4370_v5  ;;  %v7157_v5 = vld [vmem:[%s5815_s9 + $0xd0] sm:$0xf] }
 0x246   : > { %v3842_v21 = vpop.f32.mrf.mxu3  ;;  %3202 = vmatmul.bf16.gmra.mxu2 %v5479_v10  ;;  %v5315_v10 = vld [vmem:[%s5815_s9 + $0xc0] sm:$0xe]  ;;  %v3668_v38 = vshll.u32 %v7157_v5, 16  ;;  %v3672_v44 = vshrl.u32 %v7157_v5, 16  ;;  %v2748_v59 = vpack.c.b16 %v2731_v52, %v2730_v31  ;;  %v2683_v31 = vrot.slane %v5642_v47, 5 }
 0x247   : > { %v3909_v32 = vadd.f32 %v3842_v21, %v3227_v57  ;;  %v5331_v39 = vrot.slane %v5315_v10, 9  ;;  %v4099_v21 = vrot.slane %v7141_v1, 5 }
 0x249   : > { %v4335_v11 = vadd.f32 %v4268_v28, %v3909_v32  ;;  %v3163_v25 = vpop.f32.mrf.mxu2  ;;  %v2850_v41 = vpop.f32.mrf.mxu1  ;;  %v3657_v28 = vsel %vm5830_vm2, %v3652_v15, %v3656_v37  ;;  %v5480_v32 = vld [vmem:[%s5815_s9 + $0xc0] sm:$0xff]  ;;  %v4100_v34 = vsel %vm6130_vm5, %v4098_v60, %v4099_v21 }
 0x24a   : > { %v3228_v3 = vadd.f32 %v3163_v25, %v2913_v8  ;;  %v2914_v27 = vadd.f32 %v2850_v41, %v6582_v24  ;;  %v3728_v61 = vunpack.c.l.b16 %v3657_v28  ;;  %v4996_v25 = vld [vmem:[%s5815_s9 + $0xc0] sm:$0xe]  ;;  %v4097_v24 = vsel %vm6130_vm5, %v5331_v39, %v4096_v7  ;;  %v5252_v41 = vld [vmem:[%s5815_s9 + $0xd4] sm:$0x1] }
 0x24b   : > { %v4371_v51 = vadd.f32 %v6973_v0, %v4335_v11  ;;  %3884 = vmatmul.bf16.gmra.mxu3 %v3744_v33  ;;  %v3727_v33 = vunpack.c.l.b16 %v3647_v4  ;;  %v2680_v11 = vrot.slane %v5641_v12, 5  ;;  %v5012_v10 = vrot.slane %v4996_v25, 9 }
 0x24c   : > { %v4271_v48 = vpop.f32.mrf.mxu0  ;;  %v4154_v4 = vunpack.c.l.b16 %v4100_v34  ;;  %v3678_v39 = vshll.u32 %v5252_v41, 16 }
 0x24d   : > { %4403 = vst [vmem:[%s6991_s7 + $0x48] sm:$0xff] %v4371_v51  ;;  %v3670_v51 = vrot.slane %v3668_v38, 5  ;;  %v3745_v37 = vpack.c.b16 %v3728_v61, %v3727_v33  ;;  %v2681_v60 = vsel %vm6130_vm5, %v5012_v10, %v2680_v11 }
 0x24e   : > { %v3845_v57 = vpop.f32.mrf.mxu3  ;;  %v3680_v33 = vrot.slane %v3678_v39, 5  ;;  %v2732_v61 = vunpack.c.l.b16 %v2681_v60 }
 0x24f   : > { %4310 = vmatmul.bf16.gmra.mxu0 %v4170_v46  ;;  %v3910_v49 = vadd.f32 %v3845_v57, %v3228_v3  ;;  %v3661_v46 = vrot.slane %v3659_v22, 4  ;;  %v3674_v3 = vrot.slane %v3672_v44, 4  ;;  %v4153_v57 = vunpack.c.l.b16 %v4097_v24 }
 0x251   : > { %v4336_v19 = vadd.f32 %v4271_v48, %v3910_v49  ;;  %v3165_v40 = vpop.f32.mrf.mxu2  ;;  %v2853_v1 = vpop.f32.mrf.mxu1  ;;  %v2682_v48 = vrot.slane %v2680_v11, 4  ;;  %v3665_v49 = vor.u32 %v3664_v42, %v3661_v46  ;;  %v3675_v7 = vor.u32 %v3674_v3, %v3670_v51  ;;  %v5316_v11 = vld [vmem:[%s5815_s9 + $0xcc] sm:$0xe] }
 0x252   : > { %v3229_v8 = vadd.f32 %v3165_v40, %v2914_v27  ;;  %v2915_v22 = vadd.f32 %v2853_v1, %v6591_v36  ;;  %v4171_v44 = vpack.c.b16 %v4154_v4, %v4153_v57  ;;  %v4103_v36 = vrot.slane %v7157_v5, 5 }
 0x253   : > { %v4372_v13 = vadd.f32 %v6973_v0, %v4336_v19  ;;  %v2684_v21 = vsel %vm6130_vm5, %v2682_v48, %v2683_v31  ;;  %v3666_v40 = vrot.slane %v3665_v49, 4  ;;  %v5332_v46 = vrot.slane %v5316_v11, 9 }
 0x254   : > { %v4273_v9 = vpop.f32.mrf.mxu0  ;;  %2892 = vmatmul.bf16.gmra.mxu1 %v2748_v59  ;;  %v2733_v12 = vunpack.c.l.b16 %v2684_v21  ;;  %v4105_v42 = vrot.slane %v4103_v36, 4 }
 0x255   : > { %4404 = vst [vmem:[%s6991_s7 + $0x50] sm:$0xff] %v4372_v13  ;;  %v3671_v1 = vsel %vm5830_vm2, %v3666_v40, %v3670_v51  ;;  %v4104_v30 = vsel %vm6130_vm5, %v5332_v46, %v4103_v36 }
 0x256   : > { %v3847_v15 = vpop.f32.mrf.mxu3  ;;  %3207 = vmatmul.bf16.gmra.mxu2 %v5480_v32  ;;  %v3676_v32 = vrot.slane %v3675_v7, 4  ;;  %v2749_v3 = vpack.c.b16 %v2733_v12, %v2732_v61  ;;  %v3729_v47 = vunpack.c.l.b16 %v3671_v1  ;;  %v4155_v4 = vunpack.c.l.b16 %v4104_v30 }
 0x257   : > { %v3911_v52 = vadd.f32 %v3847_v15, %v3229_v8  ;;  %v5481_v15 = vld [vmem:[%s5815_s9 + $0xcc] sm:$0xff] }
 0x258   : > { %v3681_v25 = vsel %vm5830_vm2, %v3676_v32, %v3680_v33 }
 0x259   : > { %v4337_v28 = vadd.f32 %v4273_v9, %v3911_v52  ;;  %v3168_v16 = vpop.f32.mrf.mxu2  ;;  %v2855_v27 = vpop.f32.mrf.mxu1  ;;  %v4106_v9 = vrot.slane %v5252_v41, 5  ;;  %v3730_v31 = vunpack.c.l.b16 %v3681_v25 }
 0x25a   : > { %v3230_v19 = vadd.f32 %v3168_v16, %v2915_v22  ;;  %v2916_v5 = vadd.f32 %v2855_v27, %v6604_v45 }
 0x25b   : > { %v4373_v38 = vadd.f32 %v6973_v0, %v4337_v28  ;;  %3889 = vmatmul.bf16.gmra.mxu3 %v3745_v37  ;;  %v4107_v52 = vsel %vm6130_vm5, %v4105_v42, %v4106_v9  ;;  %v3746_v57 = vpack.c.b16 %v3730_v31, %v3729_v47 }
 0x25c   : > { %v4276_v59 = vpop.f32.mrf.mxu0  ;;  %v4156_v49 = vunpack.c.l.b16 %v4107_v52 }
 0x25d   : > { %4405 = vst [vmem:[%s6991_s7 + $0x58] sm:$0xff] %v4373_v38 }
 0x25e   : > { %v3850_v13 = vpop.f32.mrf.mxu3  ;;  %v4172_v16 = vpack.c.b16 %v4156_v49, %v4155_v4 }
 0x25f   : > { %4315 = vmatmul.bf16.gmra.mxu0 %v4171_v44  ;;  %v3912_v8 = vadd.f32 %v3850_v13, %v3230_v19 }
 0x261   : > { %v4338_v24 = vadd.f32 %v4276_v59, %v3912_v8  ;;  %v3170_v34 = vpop.f32.mrf.mxu2  ;;  %v2858_v48 = vpop.f32.mrf.mxu1 }
 0x262   : > { %v3231_v10 = vadd.f32 %v3170_v34, %v2916_v5  ;;  %v2917_v39 = vadd.f32 %v2858_v48, %v6617_v23 }
 0x263   : > { %v4374_v37 = vadd.f32 %v6973_v0, %v4338_v24 }
 0x264   : > { %v4278_v51 = vpop.f32.mrf.mxu0  ;;  %2897 = vmatmul.bf16.gmra.mxu1 %v2749_v3 }
 0x265   : > { %4406 = vst [vmem:[%s6991_s7 + $0x60] sm:$0xff] %v4374_v37 }
 0x266   : > { %v3852_v45 = vpop.f32.mrf.mxu3  ;;  %3212 = vmatmul.bf16.gmra.mxu2 %v5481_v15 }
 0x267   : > { %v3913_v41 = vadd.f32 %v3852_v45, %v3231_v10 }
 0x269   : > { %v4339_v7 = vadd.f32 %v4278_v51, %v3913_v41  ;;  %v3173_v28 = vpop.f32.mrf.mxu2  ;;  %v2860_v60 = vpop.f32.mrf.mxu1 }
 0x26a   : > { %v3232_v43 = vadd.f32 %v3173_v28, %v2917_v39  ;;  %v2918_v27 = vadd.f32 %v2860_v60, %v6641_v17 }
 0x26b   : > { %v4375_v22 = vadd.f32 %v6973_v0, %v4339_v7  ;;  %3894 = vmatmul.bf16.gmra.mxu3 %v3746_v57 }
 0x26c   : > { %v4281_v21 = vpop.f32.mrf.mxu0 }
 0x26d   : > { %4407 = vst [vmem:[%s6991_s7 + $0x68] sm:$0xff] %v4375_v22 }
 0x26e   : > { %v3855_v38 = vpop.f32.mrf.mxu3 }
 0x26f   : > { %4320 = vmatmul.bf16.gmra.mxu0 %v4172_v16  ;;  %v3914_v44 = vadd.f32 %v3855_v38, %v3232_v43 }
 0x271   : > { %v4340_v19 = vadd.f32 %v4281_v21, %v3914_v44  ;;  %v3175_v40 = vpop.f32.mrf.mxu2  ;;  %v2863_v32 = vpop.f32.mrf.mxu1 }
 0x272   : > { %v3233_v59 = vadd.f32 %v3175_v40, %v2918_v27  ;;  %v2919_v11 = vadd.f32 %v2863_v32, %v6656_v20 }
 0x273   : > { %v4376_v23 = vadd.f32 %v6973_v0, %v4340_v19 }
 0x274   : > { %v4283_v33 = vpop.f32.mrf.mxu0 }
 0x275   : > { %4408 = vst [vmem:[%s6991_s7 + $0x70] sm:$0xff] %v4376_v23 }
 0x276   : > { %v3857_v36 = vpop.f32.mrf.mxu3 }
 0x277   : > { %v3915_v61 = vadd.f32 %v3857_v36, %v3233_v59 }
 0x279   : > { %v4341_v12 = vadd.f32 %v4283_v33, %v3915_v61  ;;  %v3178_v13 = vpop.f32.mrf.mxu2  ;;  %v2865_v25 = vpop.f32.mrf.mxu1 }
 0x27a   : > { %v3234_v1 = vadd.f32 %v3178_v13, %v2919_v11  ;;  %v2920_v24 = vadd.f32 %v2865_v25, %v6682_v56 }
 0x27b   : > { %v4377_v8 = vadd.f32 %v6973_v0, %v4341_v12 }
 0x27c   : > { %v4286_v17 = vpop.f32.mrf.mxu0 }
 0x27d   : > { %4409 = vst [vmem:[%s6991_s7 + $0x78] sm:$0xff] %v4377_v8 }
 0x27e   : > { %v3860_v46 = vpop.f32.mrf.mxu3 }
 0x27f   : > { %v3916_v42 = vadd.f32 %v3860_v46, %v3234_v1 }
 0x281   : > { %v4342_v9 = vadd.f32 %v4286_v17, %v3916_v42  ;;  %v3180_v5 = vpop.f32.mrf.mxu2  ;;  %v2868_v15 = vpop.f32.mrf.mxu1 }
 0x282   : > { %v3235_v3 = vadd.f32 %v3180_v5, %v2920_v24  ;;  %v2921_v47 = vadd.f32 %v2868_v15, %v6696_v29 }
 0x283   : > { %v4378_v34 = vadd.f32 %v6973_v0, %v4342_v9 }
 0x284   : > { %v4288_v20 = vpop.f32.mrf.mxu0 }
 0x285   : > { %4410 = vst [vmem:[%s6991_s7 + $0x80] sm:$0xff] %v4378_v34 }
 0x286   : > { %v3862_v37 = vpop.f32.mrf.mxu3 }
 0x287   : > { %v3917_v10 = vadd.f32 %v3862_v37, %v3235_v3  ;;  %v7230_v3 = vld [vmem:[%s7301_s2] ss:$0 sm:$0xff] }
 0x289   : > { %v4343_v48 = vadd.f32 %v4288_v20, %v3917_v10  ;;  %v3183_v31 = vpop.f32.mrf.mxu2  ;;  %v2870_v52 = vpop.f32.mrf.mxu1 }
 0x28a   : > { %v3236_v30 = vadd.f32 %v3183_v31, %v2921_v47  ;;  %v2922_v4 = vadd.f32 %v2870_v52, %v6719_v58 }
 0x28b   : > { %v4379_v51 = vadd.f32 %v6973_v0, %v4343_v48 }
 0x28c   : > { %v4291_v56 = vpop.f32.mrf.mxu0 }
 0x28d   : > { %4411 = vst [vmem:[%s6991_s7 + $0x88] sm:$0xff] %v4379_v51 }
 0x28e   : > { %v3865_v45 = vpop.f32.mrf.mxu3 }
 0x28f   : > { %v3918_v41 = vadd.f32 %v3865_v45, %v3236_v30 }
 0x291   : > { %v4344_v57 = vadd.f32 %v4291_v56, %v3918_v41  ;;  %v3185_v49 = vpop.f32.mrf.mxu2  ;;  %v2873_v28 = vpop.f32.mrf.mxu1 }
 0x292   : > { %v3237_v39 = vadd.f32 %v3185_v49, %v2922_v4  ;;  %v2923_v60 = vadd.f32 %v2873_v28, %v6734_v26 }
 0x293   : > { %v4380_v7 = vadd.f32 %v6973_v0, %v4344_v57 }
 0x294   : > { %v4293_v29 = vpop.f32.mrf.mxu0 }
 0x295   : > { %4412 = vst [vmem:[%s6991_s7 + $0x90] sm:$0xff] %v4380_v7 }
 0x296   : > { %v3867_v22 = vpop.f32.mrf.mxu3 }
 0x297   : > { %v3919_v16 = vadd.f32 %v3867_v22, %v3237_v39 }
 0x299   : > { %v4345_v43 = vadd.f32 %v4293_v29, %v3919_v16  ;;  %v3188_v21 = vpop.f32.mrf.mxu2  ;;  %v2875_v19 = vpop.f32.mrf.mxu1 }
 0x29a   : > { %v3238_v44 = vadd.f32 %v3188_v21, %v2923_v60  ;;  %v2924_v59 = vadd.f32 %v2875_v19, %v6760_v53 }
 0x29b   : > { %v4381_v38 = vadd.f32 %v6973_v0, %v4345_v43 }
 0x29c   : > { %v4296_v58 = vpop.f32.mrf.mxu0 }
 0x29d   : > { %4413 = vst [vmem:[%s6991_s7 + $0x98] sm:$0xff] %v4381_v38 }
 0x29e   : > { %v3870_v27 = vpop.f32.mrf.mxu3 }
 0x29f   : > { %v3920_v40 = vadd.f32 %v3870_v27, %v3238_v44 }
 0x2a1   : > { %v4346_v23 = vadd.f32 %v4296_v58, %v3920_v40  ;;  %v3190_v32 = vpop.f32.mrf.mxu2  ;;  %v2878_v61 = vpop.f32.mrf.mxu1 }
 0x2a2   : > { %v3239_v36 = vadd.f32 %v3190_v32, %v2924_v59  ;;  %v2925_v8 = vadd.f32 %v2878_v61, %v6774_v2 }
 0x2a3   : > { %v4382_v33 = vadd.f32 %v6973_v0, %v4346_v23 }
 0x2a4   : > { %v4298_v26 = vpop.f32.mrf.mxu0 }
 0x2a5   : > { %4414 = vst [vmem:[%s6991_s7 + $0xa0] sm:$0xff] %v4382_v33 }
 0x2a6   : > { %v3872_v12 = vpop.f32.mrf.mxu3 }
 0x2a7   : > { %v3921_v11 = vadd.f32 %v3872_v12, %v3239_v36 }
 0x2a9   : > { %v4347_v13 = vadd.f32 %v4298_v26, %v3921_v11  ;;  %v3193_v1 = vpop.f32.mrf.mxu2  ;;  %v2880_v46 = vpop.f32.mrf.mxu1 }
 0x2aa   : > { %v3240_v17 = vadd.f32 %v3193_v1, %v2925_v8  ;;  %v2926_v5 = vadd.f32 %v2880_v46, %v6797_v50 }
 0x2ab   : > { %v4383_v25 = vadd.f32 %v6973_v0, %v4347_v13 }
 0x2ac   : > { %v4301_v53 = vpop.f32.mrf.mxu0 }
 0x2ad   : > { %4415 = vst [vmem:[%s6991_s7 + $0xa8] sm:$0xff] %v4383_v25 }
 0x2ae   : > { %v3875_v42 = vpop.f32.mrf.mxu3 }
 0x2af   : > { %v3922_v9 = vadd.f32 %v3875_v42, %v3240_v17 }
 0x2b1   : > { %v4348_v24 = vadd.f32 %v4301_v53, %v3922_v9  ;;  %v3195_v34 = vpop.f32.mrf.mxu2  ;;  %v2883_v0 = vpop.f32.mrf.mxu1 }
 0x2b2   : > { %v3241_v15 = vadd.f32 %v3195_v34, %v2926_v5  ;;  %v2927_v47 = vadd.f32 %v2883_v0, %v6812_v35 }
 0x2b3   : > { %v4384_v2 = vadd.f32 %v7230_v3, %v4348_v24 }
 0x2b4   : > { %v4303_v20 = vpop.f32.mrf.mxu0 }
 0x2b5   : > { %4416 = vst [vmem:[%s6991_s7 + $0xb0] sm:$0xff] %v4384_v2 }
 0x2b6   : > { %v3877_v37 = vpop.f32.mrf.mxu3 }
 0x2b7   : > { %v3923_v10 = vadd.f32 %v3877_v37, %v3241_v15 }
 0x2b9   : > { %v4349_v48 = vadd.f32 %v4303_v20, %v3923_v10  ;;  %v3198_v50 = vpop.f32.mrf.mxu2  ;;  %v2885_v30 = vpop.f32.mrf.mxu1 }
 0x2ba   : > { %v3242_v51 = vadd.f32 %v3198_v50, %v2927_v47  ;;  %v2928_v57 = vadd.f32 %v2885_v30, %v6838_v18 }
 0x2bb   : > { %v4385_v31 = vadd.f32 %v7230_v3, %v4349_v48 }
 0x2bc   : > { %v4306_v52 = vpop.f32.mrf.mxu0 }
 0x2bd   : > { %4417 = vst [vmem:[%s6991_s7 + $0xb8] sm:$0xff] %v4385_v31 }
 0x2be   : > { %v3880_v56 = vpop.f32.mrf.mxu3 }
 0x2bf   : > { %v3924_v45 = vadd.f32 %v3880_v56, %v3242_v51 }
 0x2c1   : > { %v4350_v41 = vadd.f32 %v4306_v52, %v3924_v45  ;;  %v3200_v4 = vpop.f32.mrf.mxu2  ;;  %v2888_v39 = vpop.f32.mrf.mxu1 }
 0x2c2   : > { %v3243_v7 = vadd.f32 %v3200_v4, %v2928_v57  ;;  %v2929_v16 = vadd.f32 %v2888_v39, %v6852_v14 }
 0x2c3   : > { %v4386_v49 = vadd.f32 %v7230_v3, %v4350_v41 }
 0x2c4   : > { %v4308_v35 = vpop.f32.mrf.mxu0 }
 0x2c5   : > { %4418 = vst [vmem:[%s6991_s7 + $0xc0] sm:$0xff] %v4386_v49 }
 0x2c6   : > { %v3882_v28 = vpop.f32.mrf.mxu3 }
 0x2c7   : > { %v3925_v29 = vadd.f32 %v3882_v28, %v3243_v7 }
 0x2c9   : > { %v4351_v22 = vadd.f32 %v4308_v35, %v3925_v29  ;;  %v3203_v43 = vpop.f32.mrf.mxu2  ;;  %v2890_v38 = vpop.f32.mrf.mxu1 }
 0x2ca   : > { %v3244_v21 = vadd.f32 %v3203_v43, %v2929_v16  ;;  %v2930_v27 = vadd.f32 %v2890_v38, %v6875_v63 }
 0x2cb   : > { %v4387_v60 = vadd.f32 %v7230_v3, %v4351_v22 }
 0x2cc   : > { %v4311_v18 = vpop.f32.mrf.mxu0 }
 0x2cd   : > { %4419 = vst [vmem:[%s6991_s7 + $0xc8] sm:$0xff] %v4387_v60 }
 0x2ce   : > { %v3885_v44 = vpop.f32.mrf.mxu3 }
 0x2cf   : > { %v3926_v19 = vadd.f32 %v3885_v44, %v3244_v21 }
 0x2d1   : > { %v4352_v58 = vadd.f32 %v4311_v18, %v3926_v19  ;;  %v3205_v40 = vpop.f32.mrf.mxu2  ;;  %v2893_v32 = vpop.f32.mrf.mxu1 }
 0x2d2   : > { %v3245_v59 = vadd.f32 %v3205_v40, %v2930_v27  ;;  %v2931_v26 = vadd.f32 %v2893_v32, %v6890_v55 }
 0x2d3   : > { %v4388_v23 = vadd.f32 %v7230_v3, %v4352_v58 }
 0x2d4   : > { %v4313_v14 = vpop.f32.mrf.mxu0 }
 0x2d5   : > { %4420 = vst [vmem:[%s6991_s7 + $0xd0] sm:$0xff] %v4388_v23 }
 0x2d6   : > { %v3887_v33 = vpop.f32.mrf.mxu3 }
 0x2d7   : > { %v3927_v36 = vadd.f32 %v3887_v33, %v3245_v59 }
 0x2d9   : > { %v4353_v61 = vadd.f32 %v4313_v14, %v3927_v36  ;;  %v3208_v12 = vpop.f32.mrf.mxu2  ;;  %v2895_v8 = vpop.f32.mrf.mxu1 }
 0x2da   : > { %v3246_v13 = vadd.f32 %v3208_v12, %v2931_v26  ;;  %v2932_v46 = vadd.f32 %v2895_v8, %v6916_v54 }
 0x2db   : > { %v4389_v11 = vadd.f32 %v7230_v3, %v4353_v61 }
 0x2dc   : > { %v4316_v63 = vpop.f32.mrf.mxu0 }
 0x2dd   : > { %4421 = vst [vmem:[%s6991_s7 + $0xd8] sm:$0xff] %v4389_v11 }
 0x2de   : > { %v3890_v1 = vpop.f32.mrf.mxu3 }
 0x2df   : > { %v3928_v25 = vadd.f32 %v3890_v1, %v3246_v13 }
 0x2e1   : > { %v4354_v17 = vadd.f32 %v4316_v63, %v3928_v25  ;;  %v3210_v53 = vpop.f32.mrf.mxu2  ;;  %v2898_v24 = vpop.f32.mrf.mxu1 }
 0x2e2   : > { %v3247_v9 = vadd.f32 %v3210_v53, %v2932_v46  ;;  %v2933_v15 = vadd.f32 %v2898_v24, %v6930_v6 }
 0x2e3   : > { %v4390_v42 = vadd.f32 %v7230_v3, %v4354_v17 }
 0x2e4   : > { %v4318_v55 = vpop.f32.mrf.mxu0 }
 0x2e5   : > { %4422 = vst [vmem:[%s6991_s7 + $0xe0] sm:$0xff] %v4390_v42 }
 0x2e6   : > { %v3892_v5 = vpop.f32.mrf.mxu3 }
 0x2e7   : > { %v3929_v34 = vadd.f32 %v3892_v5, %v3247_v9 }
 0x2e9   : > { %v4355_v2 = vadd.f32 %v4318_v55, %v3929_v34  ;;  %v3213_v0 = vpop.f32.mrf.mxu2  ;;  %v2900_v54 = vpop.f32.mrf.mxu1 }
 0x2ea   : > { %v3248_v37 = vadd.f32 %v3213_v0, %v2933_v15  ;;  %v2934_v31 = vadd.f32 %v2900_v54, %v6956_v62 }
 0x2eb   : > { %v4391_v20 = vadd.f32 %v7230_v3, %v4355_v2 }
 0x2ec   : > { %v4321_v10 = vpop.f32.mrf.mxu0 }
 0x2ed   : > { %4423 = vst [vmem:[%s6991_s7 + $0xe8] sm:$0xff] %v4391_v20 }
 0x2ee   : > { %v3895_v48 = vpop.f32.mrf.mxu3 }
 0x2ef   : > { %v3930_v47 = vadd.f32 %v3895_v48, %v3248_v37 }
 0x2f1   : > { %v4356_v50 = vadd.f32 %v4321_v10, %v3930_v47  ;;  %v3215_v51 = vpop.f32.mrf.mxu2 }
 0x2f2   : > { %v3249_v30 = vadd.f32 %v3215_v51, %v2934_v31 }
 0x2f3   : > { %v4392_v6 = vadd.f32 %v7230_v3, %v4356_v50 }
 0x2f4   : > { %v4323_v45 = vpop.f32.mrf.mxu0 }
 0x2f5   : > { %4424 = vst [vmem:[%s6991_s7 + $0xf0] sm:$0xff] %v4392_v6 }
 0x2f6   : > { %v3897_v52 = vpop.f32.mrf.mxu3 }
 0x2f7   : > { %v3931_v56 = vadd.f32 %v3897_v52, %v3249_v30 }
 0x2f9   : > { %v4357_v41 = vadd.f32 %v4323_v45, %v3931_v56 }
 0x2fb   : > { %v4393_v62 = vadd.f32 %v7230_v3, %v4357_v41 }
 0x2fd   : > { %4425 = vst [vmem:[%s6991_s7 + $0xf8] sm:$0xff] %v4393_v62 }
 0x2fe   : > { %5671 = shalt.err (!%p5668_p5)
}
 0x2ff   : > { %s5724_s30 = smov 128   ;;  %s5725_s7 = smov 8  }
 0x300   : > { %5532 = dma.vmem_to_hbm [thread:$0]  (%p5786_p4), %s4442_s21, 4096, %s4444_s23, %s4427_s15, %s5724_s30, %s5724_s30, %s5725_s7  }
 0x301 PF: > { %p5538_p6 = scmp.ge.s32.totalorder %s5722_s17, 2  ;;  %s4458_s9 = sand.u32 1, %s5702_s12  }
 0x302   : > { %s4459_s8 = scalar_lea.sflag [#allocation3], %s4458_s9 }
 0x303   : > { %p5535_p7 = pnand %p5538_p6, %p5793_p8 }
 0x305   : > { %p5536_p9 = pneg %p5535_p7 }
 0x307   : > { %5697 = dma.done.wait (%p5536_p9), %s4459_s8, 4096  }
 0x308   : > { %5699 = vsyncadd (%p5536_p9), %s4459_s8, 4294963200  ;;  %s16_s17 = sadd.s32 1, %s5722_s17   ;;  %s7313_s12 = smov %s5706_s13 }
 0x309   : > { %p13_p10 = scmp.ge.s32.totalorder %s16_s17, 4   ;;  %s7314_s13 = smov %s5710_s14 }
 0x30a   : > { %s7315_s14 = smov %s5799_s25  ;;  %s7316_s15 = smov %s5718_s16 }
 0x30b   : > { %s7317_s16 = smov %s7319_s20  ;;  %15 = sbr.rel (!%p13_p10) target bundleno = 4 (0x4), region = 77 }
 0x310   :  { %4465 = vsyncpa [#allocation3], 1 }
 0x311   :  { %4467 = vsyncpa [#allocation3 + $0x1], 1 }

// kernel: pyramid_features.9
= control target key start
LH: loop header
LB: loop body
LE: loop exit
PB: predicated region body
PF: predicated region fallthrough
CT: control target
= control target key end

     0   :  { %8 = vsyncpa [#allocation3], 0  ;;  %s2793_s0 = inlined_call_operand.vmem [shape: bf16[2,1,6,6,128], index: 0, kind: input, shape index: {}]   ;;  %s2794_s1 = inlined_call_operand.vmem [shape: bf16[9,128,128], index: 1, kind: input, shape index: {}]   ;;  %s2795_s2 = inlined_call_operand.vmem [shape: f32[1,128], index: 2, kind: input, shape index: {}]   ;;  %s2796_s3 = inlined_call_operand.hbm [shape: f32[2,1,16,128], index: 3, kind: output, shape index: {}]  }
   0x1   :  { %10 = vsyncpa [#allocation3 + $0x1], 0  ;;  %s2318_s12 = smov 0   ;;  %s2320_s13 = smov 0  }
   0x2   :  { %s2322_s14 = smov 0   ;;  %s2324_s15 = smov 0  }
   0x3   :  { %s2326_s16 = smov 0   ;;  %s2328_s17 = smov 0  }
   0x4 LB: > { %s1608_s18 = sadd.s32 4294967295, %s2294_s17   ;;  %s1609_s19 = sadd.s32 4294967294, %s2294_s17   ;;  %s2294_s17 = sphi %s2328_s17, %s16_s17   ;;  %s2290_s16 = sphi %s2326_s16, %s2811_s16   ;;  %s2286_s15 = sphi %s2324_s15, %s2810_s15   ;;  %s2282_s14 = sphi %s2322_s14, %s2809_s14   ;;  %s2278_s13 = sphi %s2320_s13, %s2808_s13   ;;  %s2274_s12 = sphi %s2318_s12, %s2807_s12  }
   0x5   : > { %s28_s20 = sadd.s32 1, %s2290_s16  ;;  %s107_s21 = sadd.s32 1, %s2282_s14 }
   0x6   : > { %p30_p0 = scmp.ge.s32.totalorder %s28_s20, 2  ;;  %p117_p1 = scmp.ne.s32.totalorder %s2282_s14, %s2278_s13 }
   0x7   : > { %p118_p2 = scmp.eq.s32.totalorder %s1608_s18, 1  ;;  %p123_p3 = scmp.ne.s32.totalorder %s2278_s13, %s2274_s12 }
   0x8   : > { %s2813_s20 = smov (%p30_p0, %s28_s20), 0  ;;  %p124_p5 = scmp.eq.s32.totalorder %s1609_s19, 1 }
   0x9   : > { %p2358_p4 = por %p118_p2, %p117_p1  ;;  %s102_s23 = ssub.s32 %s2290_s16, %s2813_s20 }
   0xa   : > { %p1612_p6 = scmp.ge.s32.totalorder %s2294_s17, 1  ;;  %p105_p7 = scmp.eq.s32.totalorder %s102_s23, 0 }
   0xb   : > { %p2365_p8 = por %p124_p5, %p123_p3  ;;  %p160_p9 = scmp.lt.s32.totalorder %s2294_s17, 3 }
   0xc   : > { %s2371_s25 = scalar_select %p105_p7, %s2282_s14, %s107_s21  }
   0xd   : > { %p161_p10 = pnand %p1612_p6, %p160_p9 }
   0xe   : > { %p188_p11 = scmp.lt.s32.totalorder (!%p161_p10), %s2286_s15, 1  ;;  %s2156_s5 = sshll.u32 (!%p161_p10), %s2286_s15, 4 }
   0xf   : > { %164 = sbr.rel (%p161_p10) target bundleno = 283 (0x11b), region = 32  ;;  %s1522_s8 = scalar_lea.hbm (!%p161_p10), %s2796_s3, %s2156_s5 }
  0x10   : > { %s1525_s18 = sshll.u32 (!%p161_p10), %s1522_s8, 4  ;;  %s2236_s27 = scalar_lea.hbm (!%p161_p10), %s2796_s3, 32  ;;  %s1526_s18 = int_to_ptr.hbm [resolvable:$true] %s1525_s18 }
  0x14   : > { %v2099_v0 = vld [vmem:[%s2794_s1 + $0x78] sm:$0xff]  ;;  %v2098_v2 = vld [vmem:[%s2794_s1 + $0x70] sm:$0xff]  ;;  %s189_s9 = scalar_select %p188_p11, %s2286_s15, 1  ;;  %v2097_v8 = vld [vmem:[%s2794_s1 + $0x68] sm:$0xff]  ;;  %vm229_vm0 = vcmask 1041408   ;;  %vm233_vm1 = vcmask 1043458  }
  0x15   : > { %v2091_v1 = vld [vmem:[%s2794_s1 + $0x38] sm:$0xff]  ;;  %392 = vmatpush.bf16.msra.mxu0 %v2099_v0  ;;  %v2090_v3 = vld [vmem:[%s2794_s1 + $0x30] sm:$0xff]  ;;  %v2089_v9 = vld [vmem:[%s2794_s1 + $0x28] sm:$0xff]  ;;  %vm255_vm2 = vsmask.f32 1280  ;;  %vm521_vm9 = vcmask 1040384  }
  0x16   : > { %467 = vmatpush.bf16.msra.mxu1 %v2091_v1  ;;  %v2107_v4 = vld [vmem:[%s2794_s1 + $0xb8] sm:$0xff]  ;;  %v2106_v6 = vld [vmem:[%s2794_s1 + $0xb0] sm:$0xff]  ;;  %s2157_s30 = smul.u32 24, %s189_s9  ;;  %v2105_v10 = vld [vmem:[%s2794_s1 + $0xa8] sm:$0xff]  ;;  %vm256_vm3 = vsmask.f32 3336 }
  0x17   : > { %v2115_v5 = vld [vmem:[%s2794_s1 + $0xf8] sm:$0xff]  ;;  %622 = vmatpush.bf16.msra.mxu2 %v2107_v4  ;;  %v2114_v7 = vld [vmem:[%s2794_s1 + $0xf0] sm:$0xff]  ;;  %v2113_v11 = vld [vmem:[%s2794_s1 + $0xe8] sm:$0xff]  ;;  %vm258_vm4 = vsmask.f32 5392  ;;  %vm522_vm10 = vcmask 1042434  }
  0x18   : > { %721 = vmatpush.bf16.msra.mxu3 %v2115_v5  ;;  %v2096_v12 = vld [vmem:[%s2794_s1 + $0x60] sm:$0xff]  ;;  %s2420_s21 = scalar_lea.vmem %s2793_s0, %s2157_s30  ;;  %v2095_v14 = vld [vmem:[%s2794_s1 + $0x58] sm:$0xff]  ;;  %v2094_v36 = vld [vmem:[%s2794_s1 + $0x50] sm:$0xff]  ;;  %vm260_vm7 = vsmask.f32 7448  ;;  %vm524_vm12 = vcmask 1044484  }
  0x19   : > { %393 = vmatpush.bf16.msra.mxu0 %v2098_v2  ;;  %v2088_v13 = vld [vmem:[%s2794_s1 + $0x20] sm:$0xff]  ;;  %v219_v19 = vld [vmem:[%s2420_s21 + $0x8] sm:$0x7]  ;;  %v2087_v20 = vld [vmem:[%s2794_s1 + $0x18] sm:$0xff]  ;;  %vm526_vm14 = vcmask 1046534   ;;  %s2230_s9 = sshra.s32 %s1526_s18, 4  ;;  %s2231_s9 = int_to_ptr.hbm [resolvable:$true] %s2230_s9 }
  0x1a   : > { %468 = vmatpush.bf16.msra.mxu1 %v2090_v3  ;;  %v2104_v15 = vld [vmem:[%s2794_s1 + $0xa0] sm:$0xff]  ;;  %v220_v21 = vld [vmem:[%s2420_s21 + $0xc] sm:$0x7]  ;;  %v227_v24 = vrot.slane %v219_v19, 2  ;;  %v2103_v26 = vld [vmem:[%s2794_s1 + $0x98] sm:$0xff]  ;;  %s2232_s19 = scalar_lea.hbm %s2231_s9, 16  ;;  %p2237_p1 = scmp.lt.s32.totalorder %s2231_s9, %s2796_s3 }
  0x1b   : > { %623 = vmatpush.bf16.msra.mxu2 %v2106_v6  ;;  %v2112_v16 = vld [vmem:[%s2794_s1 + $0xe0] sm:$0xff]  ;;  %v228_v25 = vrot.slane %v220_v21, 2  ;;  %v2111_v31 = vld [vmem:[%s2794_s1 + $0xd8] sm:$0xff]  ;;  %v2086_v37 = vld [vmem:[%s2794_s1 + $0x10] sm:$0xff]  ;;  %p2233_p12 = scmp.ne.s32.totalorder %s2231_s9, %s2232_s19  ;;  %p2238_p2 = scmp.lt.s32.totalorder %s2236_s27, %s2232_s19 }
  0x1c   : > { %722 = vmatpush.bf16.msra.mxu3 %v2114_v7  ;;  %v217_v17 = vld [vmem:[%s2420_s21] sm:$0x7]  ;;  %v218_v18 = vld [vmem:[%s2420_s21 + $0x4] sm:$0x7]  ;;  %v245_v34 = vsel %vm229_vm0, %v219_v19, %v227_v24  ;;  %v246_v35 = vsel %vm233_vm1, %v219_v19, %v227_v24  ;;  %vm257_vm5 = vmor %vm255_vm2, %vm256_vm3 }
  0x1d   : > { %394 = vmatpush.bf16.msra.mxu0 %v2097_v8  ;;  %v225_v22 = vrot.slane %v217_v17, 2  ;;  %v226_v23 = vrot.slane %v218_v18, 2  ;;  %v248_v38 = vrot.slane %v246_v35, 2  ;;  %v251_v39 = vsel %vm229_vm0, %v220_v21, %v228_v25  ;;  %v2102_v46 = vld [vmem:[%s2794_s1 + $0x90] sm:$0xff]  ;;  %vm2467_vm6 = vmor %vm257_vm5, %vm258_vm4  ;;  %v2093_v56 = vld [vmem:[%s2794_s1 + $0x48] sm:$0xff]  ;;  %p2234_p13 = pnand %p2233_p12, %p2358_p4  ;;  %p2239_p3 = por %p2238_p2, %p2237_p1 }
  0x1e   : > { %469 = vmatpush.bf16.msra.mxu1 %v2089_v9  ;;  %v252_v40 = vsel %vm233_vm1, %v220_v21, %v228_v25  ;;  %v288_v50 = vshrl.u32 %v245_v34, 16  ;;  %v2110_v51 = vld [vmem:[%s2794_s1 + $0xd0] sm:$0xff]  ;;  %v291_v55 = vshll.u32 %v245_v34, 16  ;;  %v2085_v57 = vld [vmem:[%s2794_s1 + $0x8] sm:$0xff]  ;;  %v301_v0 = vshrl.u32 %v251_v39, 16  ;;  %vm2483_vm8 = vmor %vm2467_vm6, %vm260_vm7 }
  0x1f   : > { %624 = vmatpush.bf16.msra.mxu2 %v2105_v10  ;;  %v232_v27 = vsel %vm229_vm0, %v217_v17, %v225_v22  ;;  %v234_v28 = vsel %vm233_vm1, %v217_v17, %v225_v22  ;;  %v239_v29 = vsel %vm229_vm0, %v218_v18, %v226_v23  ;;  %v240_v30 = vsel %vm233_vm1, %v218_v18, %v226_v23  ;;  %v2101_v2 = vld [vmem:[%s2794_s1 + $0x88] sm:$0xff]  ;;  %v2131_v17 = vld [vmem:[%s2794_s1 + $0x178] sm:$0xff]  ;;  %v2100_v22 = vld [vmem:[%s2794_s1 + $0x80] sm:$0xff]  ;;  %p2235_p0 = pneg %p2234_p13 }
  0x20   : > { %723 = vmatpush.bf16.msra.mxu3 %v2113_v11  ;;  %v236_v32 = vrot.slane %v234_v28, 2  ;;  %v242_v33 = vrot.slane %v240_v30, 2  ;;  %v262_v41 = vshrl.u32 %v232_v27, 16  ;;  %v254_v42 = vrot.slane %v252_v40, 2  ;;  %v2109_v8 = vld [vmem:[%s2794_s1 + $0xc8] sm:$0xff]  ;;  %v2139_v24 = vld [vmem:[%s2794_s1 + $0x1b8] sm:$0xff]  ;;  %vm523_vm11 = vmor %vm521_vm9, %vm522_vm10 }
  0x21   : > { %395 = vmatpush.bf16.msra.mxu0 %v2096_v12  ;;  %v265_v43 = vshll.u32 %v232_v27, 16  ;;  %v275_v45 = vshrl.u32 %v239_v29, 16  ;;  %v278_v48 = vshll.u32 %v239_v29, 16  ;;  %v290_v60 = vrot.slane %v288_v50, 6  ;;  %v2108_v27 = vld [vmem:[%s2794_s1 + $0xc0] sm:$0xff]  ;;  %v2122_v28 = vld [vmem:[%s2794_s1 + $0x130] sm:$0xff]  ;;  %vm2558_vm13 = vmor %vm523_vm11, %vm524_vm12  ;;  %p2240_p5 = pnand %p2239_p3, %p2235_p0 }
  0x22   : > { %470 = vmatpush.bf16.msra.mxu1 %v2088_v13  ;;  %v271_v44 = vshll.u32 %v236_v32, 16  ;;  %v264_v47 = vrot.slane %v262_v41, 6  ;;  %v284_v49 = vshll.u32 %v242_v33, 16  ;;  %v297_v61 = vshll.u32 %v248_v38, 16  ;;  %v2092_v13 = vld [vmem:[%s2794_s1 + $0x40] sm:$0xff]  ;;  %v2130_v29 = vld [vmem:[%s2794_s1 + $0x170] sm:$0xff]  ;;  %vm2582_vm15 = vmor %vm2558_vm13, %vm526_vm14 }
  0x23   : > { %625 = vmatpush.bf16.msra.mxu2 %v2104_v15  ;;  %v267_v53 = vrot.slane %v265_v43, 7  ;;  %v277_v54 = vrot.slane %v275_v45, 6  ;;  %v280_v59 = vrot.slane %v278_v48, 7  ;;  %v293_v63 = vrot.slane %v291_v55, 7  ;;  %v481_v32 = vld [vmem:[%s2420_s21] sm:$0x6] }
  0x24   : > { %724 = vmatpush.bf16.msra.mxu3 %v2112_v16  ;;  %v273_v58 = vrot.slane %v271_v44, 7  ;;  %v304_v1 = vshll.u32 %v251_v39, 16  ;;  %v286_v5 = vrot.slane %v284_v49, 7  ;;  %v299_v6 = vrot.slane %v297_v61, 7  ;;  %v2123_v16 = vld [vmem:[%s2794_s1 + $0x138] sm:$0xff]  ;;  %v2121_v33 = vld [vmem:[%s2794_s1 + $0x128] sm:$0xff] }
  0x25   : > { %396 = vmatpush.bf16.msra.mxu0 %v2095_v14  ;;  %v268_v62 = vor.u32 %v267_v53, %v264_v47  ;;  %v281_v4 = vor.u32 %v280_v59, %v277_v54  ;;  %v310_v7 = vshll.u32 %v254_v42, 16  ;;  %v294_v10 = vor.u32 %v293_v63, %v290_v60  ;;  %v2084_v14 = vld [vmem:[%s2794_s1] sm:$0xff]  ;;  %v2129_v34 = vld [vmem:[%s2794_s1 + $0x168] sm:$0xff]  ;;  %v2147_v50 = vld [vmem:[%s2794_s1 + $0x1f8] sm:$0xff] }
  0x26   : > { %471 = vmatpush.bf16.msra.mxu1 %v2087_v20  ;;  %v303_v11 = vrot.slane %v301_v0, 6  ;;  %v306_v12 = vrot.slane %v304_v1, 7  ;;  %v482_v35 = vld [vmem:[%s2420_s21 + $0x4] sm:$0x6]  ;;  %v484_v39 = vld [vmem:[%s2420_s21 + $0xc] sm:$0x6] }
  0x27   : > { %626 = vmatpush.bf16.msra.mxu2 %v2103_v26  ;;  %v269_v9 = vrot.slane %v268_v62, 2  ;;  %v282_v15 = vrot.slane %v281_v4, 2  ;;  %v295_v19 = vrot.slane %v294_v10, 2  ;;  %v312_v21 = vrot.slane %v310_v7, 7  ;;  %v198_v38 = vld [vmem:[%s2420_s21 + $0x4] sm:$0x3] }
  0x28   : > { %725 = vmatpush.bf16.msra.mxu3 %v2111_v31  ;;  %v307_v20 = vor.u32 %v306_v12, %v303_v11  ;;  %v2138_v31 = vld [vmem:[%s2794_s1 + $0x1b0] sm:$0xff]  ;;  %v489_v40 = vrot.slane %v481_v32, 2  ;;  %v2120_v41 = vld [vmem:[%s2794_s1 + $0x120] sm:$0xff]  ;;  %v199_v42 = vld [vmem:[%s2420_s21 + $0x8] sm:$0x3]  ;;  %v490_v44 = vrot.slane %v482_v35, 2 }
  0x29   : > { %397 = vmatpush.bf16.msra.mxu0 %v2094_v36  ;;  %v274_v18 = vsel %vm2483_vm8, %v269_v9, %v273_v58  ;;  %v287_v23 = vsel %vm2483_vm8, %v282_v15, %v286_v5  ;;  %v300_v25 = vsel %vm2483_vm8, %v295_v19, %v299_v6  ;;  %v197_v36 = vld [vmem:[%s2420_s21] sm:$0x3]  ;;  %v200_v43 = vld [vmem:[%s2420_s21 + $0xc] sm:$0x3]  ;;  %v492_v48 = vrot.slane %v484_v39, 2  ;;  %v2119_v60 = vld [vmem:[%s2794_s1 + $0x118] sm:$0xff] }
  0x2a   : > { %472 = vmatpush.bf16.msra.mxu1 %v2086_v37  ;;  %332 = vst [vmem:[#allocation1] ss:$4 sm:$0xff] %v274_v18  ;;  %v308_v26 = vrot.slane %v307_v20, 2  ;;  %v483_v37 = vld [vmem:[%s2420_s21 + $0x8] sm:$0x6]  ;;  %v2128_v47 = vld [vmem:[%s2794_s1 + $0x160] sm:$0xff]  ;;  %v497_v52 = vsel %vm233_vm1, %v481_v32, %v489_v40  ;;  %v502_v53 = vsel %vm229_vm0, %v482_v35, %v490_v44  ;;  %v504_v54 = vsel %vm233_vm1, %v482_v35, %v490_v44 }
  0x2b   : > { %627 = vmatpush.bf16.msra.mxu2 %v2102_v46  ;;  %335 = vst [vmem:[#allocation1 + $0x1] ss:$4 sm:$0xff] %v287_v23  ;;  %v491_v46 = vrot.slane %v483_v37, 2  ;;  %v2137_v49 = vld [vmem:[%s2794_s1 + $0x1a8] sm:$0xff]  ;;  %v2127_v61 = vld [vmem:[%s2794_s1 + $0x158] sm:$0xff]  ;;  %v516_v62 = vsel %vm229_vm0, %v484_v39, %v492_v48  ;;  %v518_v63 = vsel %vm233_vm1, %v484_v39, %v492_v48  ;;  %v1696_v1 = vrot.slane %v497_v52, 9 }
  0x2c   : > { %726 = vmatpush.bf16.msra.mxu3 %v2110_v51  ;;  %338 = vst [vmem:[#allocation1 + $0x2] ss:$4 sm:$0xff] %v300_v25  ;;  %v313_v30 = vsel %vm2483_vm8, %v308_v26, %v312_v21  ;;  %v495_v51 = vsel %vm229_vm0, %v481_v32, %v489_v40  ;;  %v1697_v5 = vrot.slane %v502_v53, 9  ;;  %v1698_v6 = vrot.slane %v504_v54, 9  ;;  %v1804_v7 = vld [vmem:[%s2420_s21 + $0x8] sm:$0x7] }
  0x2d   : > { %398 = vmatpush.bf16.msra.mxu0 %v2093_v56  ;;  %341 = vst [vmem:[#allocation1 + $0x3] ss:$4 sm:$0xff] %v313_v30  ;;  %v2136_v56 = vld [vmem:[%s2794_s1 + $0x1a0] sm:$0xff]  ;;  %v509_v58 = vsel %vm229_vm0, %v483_v37, %v491_v46  ;;  %v511_v59 = vsel %vm233_vm1, %v483_v37, %v491_v46  ;;  %v1695_v0 = vrot.slane %v495_v51, 9  ;;  %v2135_v10 = vld [vmem:[%s2794_s1 + $0x198] sm:$0xff]  ;;  %v2145_v11 = vld [vmem:[%s2794_s1 + $0x1e8] sm:$0xff] }
  0x2e   : > { %473 = vmatpush.bf16.msra.mxu1 %v2085_v57  ;;  %v2146_v57 = vld [vmem:[%s2794_s1 + $0x1f0] sm:$0xff]  ;;  %v1700_v9 = vrot.slane %v511_v59, 9  ;;  %v1805_v12 = vld [vmem:[%s2420_s21 + $0xc] sm:$0x7]  ;;  %v746_v20 = vrot.slane %v1804_v7, 2  ;;  %v535_v21 = vsel %vm2582_vm15, %v1697_v5, %v1698_v6  ;;  %v2144_v32 = vld [vmem:[%s2794_s1 + $0x1e0] sm:$0xff] }
  0x2f   : > { %628 = vmatpush.bf16.msra.mxu2 %v2101_v2  ;;  %v1803_v2 = vld [vmem:[%s2420_s21 + $0x4] sm:$0x7]  ;;  %v2118_v15 = vld [vmem:[%s2794_s1 + $0x110] sm:$0xff]  ;;  %v531_v18 = vsel %vm2582_vm15, %v1695_v0, %v1696_v1  ;;  %v1753_v55 = vld [vmem:[%s2420_s21 + $0xc] sm:$0x3] }
  0x30   : > { %727 = vmatpush.bf16.msra.mxu3 %v2109_v8  ;;  %v1699_v8 = vrot.slane %v509_v58, 9  ;;  %v2126_v19 = vld [vmem:[%s2794_s1 + $0x150] sm:$0xff]  ;;  %v757_v30 = vsel %vm229_vm0, %v1804_v7, %v746_v20  ;;  %v2116_v37 = vld [vmem:[%s2794_s1 + $0x100] sm:$0xff] }
  0x31   : > { %399 = vmatpush.bf16.msra.mxu0 %v2092_v13  ;;  %v1701_v13 = vrot.slane %v516_v62, 9  ;;  %v786_v39 = vshrl.u32 %v757_v30, 16  ;;  %v789_v40 = vshll.u32 %v757_v30, 16  ;;  %v1751_v46 = vld [vmem:[%s2420_s21 + $0x4] sm:$0x3] }
  0x32   : > { %474 = vmatpush.bf16.msra.mxu1 %v2084_v14  ;;  %v1702_v14 = vrot.slane %v518_v63, 9  ;;  %v1754_v59 = vld [vmem:[%s2420_s21 + $0x10] sm:$0x3]  ;;  %v1857_v30 = vld [vmem:[%s2420_s21 + $0xc] sm:$0x6] }
  0x33   : > { %629 = vmatpush.bf16.msra.mxu2 %v2100_v22  ;;  %v747_v22 = vrot.slane %v1805_v12, 2  ;;  %v791_v58 = vrot.slane %v789_v40, 7  ;;  %v2154_v63 = vld [vmem:[%s2794_s1 + $0x230] sm:$0xff] }
  0x34   : > { %728 = vmatpush.bf16.msra.mxu3 %v2108_v27  ;;  %v342_v45 = vld.sshfl [vmem:[#allocation1] sm:$0xff pattern:$0x73625140]  ;;  %v543_v26 = vsel %vm2582_vm15, %v1701_v13, %v1702_v14  ;;  %v2117_v27 = vld [vmem:[%s2794_s1 + $0x108] sm:$0xff] }
  0x35   : > { %903 = vmatpush.bf16.msrb.mxu0 %v2123_v16  ;;  %407 = vst [vmem:[#allocation1] ss:$4 sm:$0xff] %v197_v36  ;;  %v1806_v16 = vld [vmem:[%s2420_s21 + $0x10] sm:$0x7]  ;;  %v2153_v14 = vld [vmem:[%s2794_s1 + $0x228] sm:$0xff] }
  0x36   : > { %1053 = vmatpush.bf16.msrb.mxu1 %v2131_v17  ;;  %400 = vmatmul.bf16.vlgmr.msra.gmra.mxu0 %v342_v45  ;;  %410 = vst [vmem:[#allocation1 + $0x1] ss:$4 sm:$0xff] %v198_v38  ;;  %v745_v17 = vrot.slane %v1803_v2, 2  ;;  %v748_v25 = vrot.slane %v1806_v16, 2  ;;  %v2124_v45 = vld [vmem:[%s2794_s1 + $0x140] sm:$0xff] }
  0x37   : > { %1152 = vmatpush.bf16.msrb.mxu2 %v2139_v24  ;;  %413 = vst [vmem:[#allocation1 + $0x2] ss:$4 sm:$0xff] %v199_v42  ;;  %v539_v24 = vsel %vm2582_vm15, %v1699_v8, %v1700_v9  ;;  %v758_v42 = vsel %vm233_vm1, %v1804_v7, %v746_v20  ;;  %v2133_v8 = vld [vmem:[%s2794_s1 + $0x188] sm:$0xff]  ;;  %v2143_v9 = vld [vmem:[%s2794_s1 + $0x1d8] sm:$0xff] }
  0x38   : > { %1334 = vmatpush.bf16.msrb.mxu3 %v2147_v50  ;;  %416 = vst [vmem:[#allocation1 + $0x3] ss:$4 sm:$0xff] %v200_v43  ;;  %v752_v38 = vsel %vm233_vm1, %v1803_v2, %v745_v17  ;;  %v1752_v50 = vld [vmem:[%s2420_s21 + $0x8] sm:$0x3]  ;;  %v770_v52 = vsel %vm233_vm1, %v1806_v16, %v748_v25 }
  0x39   : > { %904 = vmatpush.bf16.msrb.mxu0 %v2122_v28  ;;  %v751_v28 = vsel %vm229_vm0, %v1803_v2, %v745_v17  ;;  %v754_v51 = vrot.slane %v752_v38, 2  ;;  %v772_v1 = vrot.slane %v770_v52, 2  ;;  %v929_v38 = vrot.slane %v1857_v30, 2 }
  0x3a   : > { %1054 = vmatpush.bf16.msrb.mxu1 %v2130_v29  ;;  %v2125_v29 = vld [vmem:[%s2794_s1 + $0x148] sm:$0xff]  ;;  %v773_v35 = vshrl.u32 %v751_v28, 16  ;;  %v776_v36 = vshll.u32 %v751_v28, 16 }
  0x3b   : > { %1153 = vmatpush.bf16.msrb.mxu2 %v2138_v31  ;;  %v2134_v31 = vld [vmem:[%s2794_s1 + $0x190] sm:$0xff]  ;;  %v782_v7 = vshll.u32 %v754_v51, 16  ;;  %v821_v17 = vshll.u32 %v772_v1, 16 }
  0x3c   : > { %1335 = vmatpush.bf16.msrb.mxu3 %v2146_v57  ;;  %v775_v53 = vrot.slane %v773_v35, 6  ;;  %v778_v54 = vrot.slane %v776_v36, 7  ;;  %v788_v57 = vrot.slane %v786_v39, 6 }
  0x3d   : > { %905 = vmatpush.bf16.msrb.mxu0 %v2121_v33  ;;  %v763_v33 = vsel %vm229_vm0, %v1805_v12, %v747_v22  ;;  %v784_v20 = vrot.slane %v782_v7, 7 }
  0x3e   : > { %1055 = vmatpush.bf16.msrb.mxu1 %v2129_v34  ;;  %v769_v34 = vsel %vm229_vm0, %v1806_v16, %v748_v25  ;;  %v799_v43 = vshrl.u32 %v763_v33, 16  ;;  %v802_v44 = vshll.u32 %v763_v33, 16  ;;  %v779_v6 = vor.u32 %v778_v54, %v775_v53 }
  0x3f   : > { %1154 = vmatpush.bf16.msrb.mxu2 %v2137_v49  ;;  %v417_v23 = vld.sshfl [vmem:[#allocation1] sm:$0xff pattern:$0x73625140]  ;;  %v812_v48 = vshrl.u32 %v769_v34, 16  ;;  %v815_v49 = vshll.u32 %v769_v34, 16 }
  0x40   : > { %1336 = vmatpush.bf16.msrb.mxu3 %v2145_v11  ;;  %562 = vst [vmem:[#allocation1] ss:$4 sm:$0xff] %v531_v18  ;;  %475 = vmatmul.bf16.vlgmr.msra.gmra.mxu1 %v417_v23  ;;  %v804_v62 = vrot.slane %v802_v44, 7  ;;  %v2142_v18 = vld [vmem:[%s2794_s1 + $0x1d0] sm:$0xff]  ;;  %v1855_v23 = vld [vmem:[%s2420_s21 + $0x4] sm:$0x6] }
  0x41   : > { %906 = vmatpush.bf16.msrb.mxu0 %v2120_v41  ;;  %565 = vst [vmem:[#allocation1 + $0x1] ss:$4 sm:$0xff] %v535_v21  ;;  %v2155_v41 = vld [vmem:[%s2794_s1 + $0x238] sm:$0xff]  ;;  %v814_v2 = vrot.slane %v812_v48, 6  ;;  %v817_v5 = vrot.slane %v815_v49, 7  ;;  %v927_v33 = vrot.slane %v1855_v23, 2  ;;  %v947_v48 = vsel %vm229_vm0, %v1857_v30, %v929_v38 }
  0x42   : > { %1056 = vmatpush.bf16.msrb.mxu1 %v2128_v47  ;;  %568 = vst [vmem:[#allocation1 + $0x2] ss:$4 sm:$0xff] %v539_v24  ;;  %v764_v47 = vsel %vm233_vm1, %v1805_v12, %v747_v22  ;;  %v949_v49 = vsel %vm233_vm1, %v1857_v30, %v929_v38  ;;  %v1917_v38 = vld [vmem:[%s2420_s21 + $0x10] sm:$0x3] }
  0x43   : > { %1155 = vmatpush.bf16.msrb.mxu2 %v2136_v56  ;;  %571 = vst [vmem:[#allocation1 + $0x3] ss:$4 sm:$0xff] %v543_v26  ;;  %v760_v56 = vrot.slane %v758_v42, 2  ;;  %v818_v16 = vor.u32 %v817_v5, %v814_v2  ;;  %v1856_v26 = vld [vmem:[%s2420_s21 + $0x8] sm:$0x6]  ;;  %v2151_v42 = vld [vmem:[%s2794_s1 + $0x218] sm:$0xff]  ;;  %v935_v44 = vsel %vm233_vm1, %v1855_v23, %v927_v33 }
  0x44   : > { %1337 = vmatpush.bf16.msrb.mxu3 %v2144_v32  ;;  %v1858_v32 = vld [vmem:[%s2420_s21 + $0x10] sm:$0x6]  ;;  %v928_v35 = vrot.slane %v1856_v26, 2  ;;  %v1860_v54 = vrot.slane %v935_v44, 9 }
  0x45   : > { %907 = vmatpush.bf16.msrb.mxu0 %v2119_v60  ;;  %v766_v60 = vrot.slane %v764_v47, 2  ;;  %v795_v11 = vshll.u32 %v760_v56, 16  ;;  %v819_v28 = vrot.slane %v818_v16, 2  ;;  %v930_v40 = vrot.slane %v1858_v32, 2  ;;  %v2140_v47 = vld [vmem:[%s2794_s1 + $0x1c0] sm:$0xff] }
  0x46   : > { %1057 = vmatpush.bf16.msrb.mxu1 %v2127_v61  ;;  %v801_v61 = vrot.slane %v799_v43, 6  ;;  %v933_v43 = vsel %vm229_vm0, %v1855_v23, %v927_v33 }
  0x47   : > { %1156 = vmatpush.bf16.msrb.mxu2 %v2135_v10  ;;  %v792_v10 = vor.u32 %v791_v58, %v788_v57  ;;  %v808_v13 = vshll.u32 %v766_v60, 16  ;;  %v797_v22 = vrot.slane %v795_v11, 7  ;;  %v954_v51 = vsel %vm229_vm0, %v1858_v32, %v930_v40  ;;  %v1968_v58 = vld [vmem:[%s2420_s21 + $0xc] sm:$0x7] }
  0x48   : > { %v805_v12 = vor.u32 %v804_v62, %v801_v61  ;;  %1338 = vmatpush.bf16.msrb.mxu3 %v2143_v9  ;;  %v956_v52 = vsel %vm233_vm1, %v1858_v32, %v930_v40  ;;  %v1859_v53 = vrot.slane %v933_v43, 9  ;;  %v1864_v60 = vrot.slane %v949_v49, 9  ;;  %v1969_v61 = vld [vmem:[%s2420_s21 + $0x10] sm:$0x7] }
  0x49   : > { %908 = vmatpush.bf16.msrb.mxu0 %v2118_v15  ;;  %v2132_v15 = vld [vmem:[%s2794_s1 + $0x180] sm:$0xff]  ;;  %v793_v21 = vrot.slane %v792_v10, 2  ;;  %v810_v25 = vrot.slane %v808_v13, 7  ;;  %v1865_v62 = vrot.slane %v954_v51, 9  ;;  %v1177_v5 = vrot.slane %v1968_v58, 2 }
  0x4a   : > { %1058 = vmatpush.bf16.msrb.mxu1 %v2126_v19  ;;  %v572_v0 = vld.sshfl [vmem:[#allocation1] sm:$0xff pattern:$0x73625140]  ;;  %v780_v19 = vrot.slane %v779_v6, 2  ;;  %v806_v24 = vrot.slane %v805_v12, 2  ;;  %v962_v2 = vsel %vm2582_vm15, %v1859_v53, %v1860_v54  ;;  %v1178_v7 = vrot.slane %v1969_v61, 2 }
  0x4b   : > { %1157 = vmatpush.bf16.msrb.mxu2 %v2134_v31  ;;  %661 = vst [vmem:[#allocation1] ss:$4 sm:$0xff] %v1751_v46  ;;  %v798_v34 = vsel %vm2483_vm8, %v793_v21, %v797_v22  ;;  %v942_v46 = vsel %vm233_vm1, %v1856_v26, %v928_v35  ;;  %v1188_v13 = vsel %vm229_vm0, %v1968_v58, %v1177_v5 }
  0x4c   : > { %630 = vmatmul.bf16.vlgmr.msra.gmra.mxu2 %v572_v0  ;;  %664 = vst [vmem:[#allocation1 + $0x1] ss:$4 sm:$0xff] %v1752_v50  ;;  %1339 = vmatpush.bf16.msrb.mxu3 %v2142_v18  ;;  %v785_v31 = vsel %vm2483_vm8, %v780_v19, %v784_v20  ;;  %v2150_v50 = vld [vmem:[%s2794_s1 + $0x210] sm:$0xff]  ;;  %v1862_v57 = vrot.slane %v942_v46, 9  ;;  %v2149_v18 = vld [vmem:[%s2794_s1 + $0x208] sm:$0xff]  ;;  %v1217_v20 = vshrl.u32 %v1188_v13, 16  ;;  %v1189_v22 = vsel %vm233_vm1, %v1968_v58, %v1177_v5 }
  0x4d   : > { %909 = vmatpush.bf16.msrb.mxu0 %v2117_v27  ;;  %667 = vst [vmem:[#allocation1 + $0x2] ss:$4 sm:$0xff] %v1753_v55  ;;  %v2152_v27 = vld [vmem:[%s2794_s1 + $0x220] sm:$0xff]  ;;  %v1967_v55 = vld [vmem:[%s2420_s21 + $0x8] sm:$0x7]  ;;  %v1220_v21 = vshll.u32 %v1188_v13, 16 }
  0x4e   : > { %1059 = vmatpush.bf16.msrb.mxu1 %v2125_v29  ;;  %670 = vst [vmem:[#allocation1 + $0x3] ss:$4 sm:$0xff] %v1754_v59  ;;  %v823_v29 = vrot.slane %v821_v17, 7  ;;  %v1863_v59 = vrot.slane %v947_v48, 9  ;;  %v1970_v0 = vld [vmem:[%s2420_s21 + $0x14] sm:$0x7] }
  0x4f   : > { %1158 = vmatpush.bf16.msrb.mxu2 %v2133_v8  ;;  %v1176_v1 = vrot.slane %v1967_v55, 2  ;;  %v1179_v10 = vrot.slane %v1970_v0, 2  ;;  %v1918_v46 = vld [vmem:[%s2420_s21 + $0x14] sm:$0x3] }
  0x50   : > { %v824_v39 = vsel %vm2483_vm8, %v819_v28, %v823_v29  ;;  %v970_v9 = vsel %vm2582_vm15, %v1863_v59, %v1864_v60  ;;  %v1915_v29 = vld [vmem:[%s2420_s21 + $0x8] sm:$0x3]  ;;  %v2022_v5 = vld [vmem:[%s2420_s21 + $0x14] sm:$0x6] }
  0x51   : > { %910 = vmatpush.bf16.msrb.mxu0 %v2116_v37  ;;  %v811_v37 = vsel %vm2483_vm8, %v806_v24, %v810_v25  ;;  %v1182_v12 = vsel %vm229_vm0, %v1967_v55, %v1176_v1  ;;  %v1183_v19 = vsel %vm233_vm1, %v1967_v55, %v1176_v1  ;;  %v2148_v25 = vld [vmem:[%s2794_s1 + $0x200] sm:$0xff]  ;;  %v2019_v59 = vld [vmem:[%s2420_s21 + $0x8] sm:$0x6]  ;;  %v2021_v1 = vld [vmem:[%s2420_s21 + $0x10] sm:$0x6]  ;;  %v1361_v13 = vrot.slane %v2022_v5, 2 }
  0x52   : > { %1060 = vmatpush.bf16.msrb.mxu1 %v2124_v45  ;;  %v940_v45 = vsel %vm229_vm0, %v1856_v26, %v928_v35  ;;  %v1204_v16 = vshrl.u32 %v1182_v12, 16  ;;  %v1207_v17 = vshll.u32 %v1182_v12, 16  ;;  %v1195_v26 = vsel %vm233_vm1, %v1969_v61, %v1178_v7 }
  0x53   : > { %1159 = vmatpush.bf16.msrb.mxu2 %v2132_v15  ;;  %v1861_v56 = vrot.slane %v940_v45, 9  ;;  %v1200_v15 = vsel %vm229_vm0, %v1970_v0, %v1179_v10  ;;  %v1185_v30 = vrot.slane %v1183_v19, 2  ;;  %v1191_v35 = vrot.slane %v1189_v22, 2 }
  0x54   : > { %v1246_v28 = vshll.u32 %v1200_v15, 16  ;;  %v1206_v32 = vrot.slane %v1204_v16, 6  ;;  %v1209_v33 = vrot.slane %v1207_v17, 7  ;;  %v1385_v3 = vsel %vm229_vm0, %v2022_v5, %v1361_v13 }
  0x55   : > { %1484 = vmatpush.bf16.msra.mxu0 %v2155_v41  ;;  %v671_v36 = vld.sshfl [vmem:[#allocation1] sm:$0xff pattern:$0x73625140]  ;;  %v2141_v41 = vld [vmem:[%s2794_s1 + $0x1c8] sm:$0xff]  ;;  %v966_v6 = vsel %vm2582_vm15, %v1861_v56, %v1862_v57  ;;  %v1213_v48 = vshll.u32 %v1185_v30, 16 }
  0x56   : > { %729 = vmatmul.bf16.vlgmr.msra.gmra.mxu3 %v671_v36  ;;  %843 = vst [vmem:[#allocation1] ss:$4 sm:$0xff] %v785_v31  ;;  %v1201_v31 = vsel %vm233_vm1, %v1970_v0, %v1179_v10  ;;  %v1219_v36 = vrot.slane %v1217_v20, 6  ;;  %v1248_v45 = vrot.slane %v1246_v28, 7  ;;  %v1387_v20 = vsel %vm233_vm1, %v2022_v5, %v1361_v13 }
  0x57   : > { %846 = vst [vmem:[#allocation1 + $0x1] ss:$4 sm:$0xff] %v798_v34  ;;  %1340 = vmatpush.bf16.msrb.mxu3 %v2141_v41  ;;  %v1916_v34 = vld [vmem:[%s2420_s21 + $0xc] sm:$0x3]  ;;  %v1203_v43 = vrot.slane %v1201_v31, 2  ;;  %v1215_v56 = vrot.slane %v1213_v48, 7 }
  0x58   : > { %849 = vst [vmem:[#allocation1 + $0x2] ss:$4 sm:$0xff] %v811_v37  ;;  %v1222_v37 = vrot.slane %v1220_v21, 7  ;;  %v2030_v28 = vrot.slane %v1387_v20, 9 }
  0x59   : > { %1485 = vmatpush.bf16.msra.mxu0 %v2154_v63  ;;  %852 = vst [vmem:[#allocation1 + $0x3] ss:$4 sm:$0xff] %v824_v39  ;;  %v1866_v63 = vrot.slane %v956_v52, 9  ;;  %v1197_v39 = vrot.slane %v1195_v26, 2  ;;  %v1252_v54 = vshll.u32 %v1203_v43, 16 }
  0x5a   : > { %v1223_v49 = vor.u32 %v1222_v37, %v1219_v36 }
  0x5b   : > { %1341 = vmatpush.bf16.msrb.mxu3 %v2140_v47  ;;  %v974_v11 = vsel %vm2582_vm15, %v1865_v62, %v1866_v63  ;;  %v1210_v47 = vor.u32 %v1209_v33, %v1206_v32  ;;  %v1239_v52 = vshll.u32 %v1197_v39, 16  ;;  %v2020_v62 = vld [vmem:[%s2420_s21 + $0xc] sm:$0x6]  ;;  %v1254_v0 = vrot.slane %v1252_v54, 7  ;;  %s185_s21 = sand.u32 1, %s2278_s13  }
  0x5c   : > { %v1224_v57 = vrot.slane %v1223_v49, 2  ;;  %s1613_s29 = sshll.u32 %s185_s21, 4  ;;  %s1509_s15 = scalar_lea.sflag [#allocation3], %s185_s21 }
  0x5d   : > { %1486 = vmatpush.bf16.msra.mxu0 %v2153_v14  ;;  %v1194_v14 = vsel %vm229_vm0, %v1969_v61, %v1178_v7  ;;  %v1211_v55 = vrot.slane %v1210_v47, 2  ;;  %v1241_v61 = vrot.slane %v1239_v52, 7  ;;  %s187_s10 = scalar_lea.vmem [#allocation2], %s1613_s29 }
  0x5e   : > { %v1230_v23 = vshrl.u32 %v1194_v14, 16  ;;  %v1233_v24 = vshll.u32 %v1194_v14, 16  ;;  %s1523_s11 = sshll.u32 %s187_s10, 4  ;;  %s1524_s11 = int_to_ptr.vmem [resolvable:$true] %s1523_s11 }
  0x60   : > { %v853_v8 = vld.sshfl [vmem:[#allocation1] sm:$0xff pattern:$0x73625140]  ;;  %v1232_v40 = vrot.slane %v1230_v23, 6  ;;  %v1235_v41 = vrot.slane %v1233_v24, 7 }
  0x61   : > { %1487 = vmatpush.bf16.msra.mxu0 %v2152_v27  ;;  %993 = vst [vmem:[#allocation1] ss:$4 sm:$0xff] %v962_v2  ;;  %v1243_v27 = vshrl.u32 %v1200_v15, 16  ;;  %v1216_v2 = vsel %vm2483_vm8, %v1211_v55, %v1215_v56 }
  0x62   : > { %911 = vmatmul.bf16.vlgmr.msrb.gmra.mxu0 %v853_v8  ;;  %996 = vst [vmem:[#allocation1 + $0x1] ss:$4 sm:$0xff] %v966_v6  ;;  %v1236_v51 = vor.u32 %v1235_v41, %v1232_v40  ;;  %v1358_v6 = vrot.slane %v2019_v59, 2  ;;  %v1359_v8 = vrot.slane %v2020_v62, 2 }
  0x63   : > { %999 = vst [vmem:[#allocation1 + $0x2] ss:$4 sm:$0xff] %v970_v9  ;;  %v1245_v44 = vrot.slane %v1243_v27, 6  ;;  %v2029_v27 = vrot.slane %v1385_v3, 9 }
  0x64   : > { %1002 = vst [vmem:[#allocation1 + $0x3] ss:$4 sm:$0xff] %v974_v11  ;;  %v1237_v60 = vrot.slane %v1236_v51, 2  ;;  %v1360_v11 = vrot.slane %v2021_v1, 2  ;;  %v1364_v14 = vsel %vm229_vm0, %v2019_v59, %v1358_v6  ;;  %v1366_v15 = vsel %vm233_vm1, %v2019_v59, %v1358_v6  ;;  %v2215_v59 = vld [vmem:[%s2795_s2] ss:$0 sm:$0xff] }
  0x65   : > { %1488 = vmatpush.bf16.msra.mxu0 %v2151_v42  ;;  %v1249_v53 = vor.u32 %v1248_v45, %v1245_v44  ;;  %v1371_v16 = vsel %vm229_vm0, %v2020_v62, %v1359_v8  ;;  %v1373_v17 = vsel %vm233_vm1, %v2020_v62, %v1359_v8  ;;  %v2023_v21 = vrot.slane %v1364_v14, 9 }
  0x66   : > { %v1242_v10 = vsel %vm2483_vm8, %v1237_v60, %v1241_v61  ;;  %v1380_v19 = vsel %vm233_vm1, %v2021_v1, %v1360_v11  ;;  %v2024_v22 = vrot.slane %v1366_v15, 9  ;;  %v2025_v23 = vrot.slane %v1371_v16, 9 }
  0x67   : > { %v1250_v63 = vrot.slane %v1249_v53, 2  ;;  %v2026_v24 = vrot.slane %v1373_v17, 9  ;;  %v2028_v26 = vrot.slane %v1380_v19, 9  ;;  %v1405_v33 = vsel %vm2582_vm15, %v2029_v27, %v2030_v28 }
  0x69   : > { %1489 = vmatpush.bf16.msra.mxu0 %v2150_v50  ;;  %v1226_v50 = vshll.u32 %v1191_v35, 16  ;;  %v1255_v12 = vsel %vm2483_vm8, %v1250_v63, %v1254_v0  ;;  %v1397_v30 = vsel %vm2582_vm15, %v2025_v23, %v2026_v24 }
  0x6b   : > { %v1003_v42 = vld.sshfl [vmem:[#allocation1] sm:$0xff pattern:$0x73625140]  ;;  %v1228_v58 = vrot.slane %v1226_v50, 7 }
  0x6c   : > { %1061 = vmatmul.bf16.vlgmr.msrb.gmra.mxu1 %v1003_v42  ;;  %1092 = vst [vmem:[#allocation1] ss:$4 sm:$0xff] %v1915_v29  ;;  %v1393_v29 = vsel %vm2582_vm15, %v2023_v21, %v2024_v22 }
  0x6d   : > { %1490 = vmatpush.bf16.msra.mxu0 %v2149_v18  ;;  %1095 = vst [vmem:[#allocation1 + $0x1] ss:$4 sm:$0xff] %v1916_v34  ;;  %v1229_v7 = vsel %vm2483_vm8, %v1224_v57, %v1228_v58  ;;  %v1378_v18 = vsel %vm229_vm0, %v2021_v1, %v1360_v11 }
  0x6e   : > { %1098 = vst [vmem:[#allocation1 + $0x2] ss:$4 sm:$0xff] %v1917_v38 }
  0x6f   : > { %1101 = vst [vmem:[#allocation1 + $0x3] ss:$4 sm:$0xff] %v1918_v46 }
  0x71   : > { %1491 = vmatpush.bf16.msra.mxu0 %v2148_v25  ;;  %v2027_v25 = vrot.slane %v1378_v18, 9 }
  0x73   : > { %v1401_v32 = vsel %vm2582_vm15, %v2027_v25, %v2028_v26 }
  0x76   : > { %v1102_v9 = vld.sshfl [vmem:[#allocation1] sm:$0xff pattern:$0x73625140] }
  0x77   : > { %1160 = vmatmul.bf16.vlgmr.msrb.gmra.mxu2 %v1102_v9  ;;  %1274 = vst [vmem:[#allocation1] ss:$4 sm:$0xff] %v1216_v2 }
  0x78   : > { %1277 = vst [vmem:[#allocation1 + $0x1] ss:$4 sm:$0xff] %v1229_v7 }
  0x79   : > { %1280 = vst [vmem:[#allocation1 + $0x2] ss:$4 sm:$0xff] %v1242_v10 }
  0x7a   : > { %1283 = vst [vmem:[#allocation1 + $0x3] ss:$4 sm:$0xff] %v1255_v12 }
  0x81   : > { %v1284_v31 = vld.sshfl [vmem:[#allocation1] sm:$0xff pattern:$0x73625140] }
  0x82   : > { %1342 = vmatmul.bf16.vlgmr.msrb.gmra.mxu3 %v1284_v31  ;;  %1424 = vst [vmem:[#allocation1] ss:$4 sm:$0xff] %v1393_v29 }
  0x83   : > { %1427 = vst [vmem:[#allocation1 + $0x1] ss:$4 sm:$0xff] %v1397_v30 }
  0x84   : > { %1430 = vst [vmem:[#allocation1 + $0x2] ss:$4 sm:$0xff] %v1401_v32 }
  0x85   : > { %1433 = vst [vmem:[#allocation1 + $0x3] ss:$4 sm:$0xff] %v1405_v33 }
  0x8c   : > { %v1434_v34 = vld.sshfl [vmem:[#allocation1] sm:$0xff pattern:$0x73625140] }
  0x8d   : > { %1492 = vmatmul.bf16.vlgmr.msra.gmra.mxu0 %v1434_v34 }
  0xb3   : > { %v401_v35 = vpop.f32.mrf.mxu0 }
  0xbb   : > { %v403_v38 = vpop.f32.mrf.mxu0 }
  0xbd   : > { %v476_v36 = vpop.f32.mrf.mxu1 }
  0xbe   : > { %v477_v39 = vadd.f32 %v476_v36, %v401_v35 }
  0xc5   : > { %v478_v41 = vpop.f32.mrf.mxu1 }
  0xc6   : > { %v479_v49 = vadd.f32 %v478_v41, %v403_v38 }
  0xcf   : > { %v631_v37 = vpop.f32.mrf.mxu2 }
  0xd0   : > { %v636_v42 = vadd.f32 %v631_v37, %v477_v39 }
  0xd7   : > { %v633_v43 = vpop.f32.mrf.mxu2 }
  0xd8   : > { %v637_v52 = vadd.f32 %v633_v43, %v479_v49 }
  0xd9   : > { %v730_v40 = vpop.f32.mrf.mxu3 }
  0xda   : > { %v735_v45 = vadd.f32 %v730_v40, %v636_v42 }
  0xdf   : > { %v912_v44 = vpop.f32.mrf.mxu0 }
  0xe0   : > { %v917_v47 = vadd.f32 %v912_v44, %v735_v45 }
  0xe1   : > { %v732_v4 = vpop.f32.mrf.mxu3 }
  0xe2   : > { %v736_v55 = vadd.f32 %v732_v4, %v637_v52 }
  0xe7   : > { %v914_v50 = vpop.f32.mrf.mxu0 }
  0xe8   : > { %v918_v58 = vadd.f32 %v914_v50, %v736_v55 }
  0xe9   : > { %v1062_v46 = vpop.f32.mrf.mxu1 }
  0xea   : > { %v1067_v51 = vadd.f32 %v1062_v46, %v917_v47 }
  0xf1   : > { %v1064_v57 = vpop.f32.mrf.mxu1 }
  0xf2   : > { %v1068_v62 = vadd.f32 %v1064_v57, %v918_v58 }
  0xfa   : > { %v1161_v48 = vpop.f32.mrf.mxu2 }
  0xfb   : > { %v1166_v53 = vadd.f32 %v1161_v48, %v1067_v51 }
 0x102   : > { %v1163_v60 = vpop.f32.mrf.mxu2 }
 0x103   : > { %v1167_v0 = vadd.f32 %v1163_v60, %v1068_v62 }
 0x105   : > { %v1343_v54 = vpop.f32.mrf.mxu3 }
 0x106   : > { %v1348_v56 = vadd.f32 %v1343_v54, %v1166_v53 }
 0x10a   : > { %v1493_v61 = vpop.f32.mrf.mxu0 }
 0x10b   : > { %v1498_v63 = vadd.f32 %v1493_v61, %v1348_v56 }
 0x10d   : > { %v1504_v1 = vadd.f32 %v2215_v59, %v1498_v63  ;;  %v1345_v2 = vpop.f32.mrf.mxu3 }
 0x10e   : > { %v1349_v5 = vadd.f32 %v1345_v2, %v1167_v0 }
 0x10f   : > { %1506 = vst [vmem:[%s187_s10] sm:$0xff] %v1504_v1 }
 0x112   : > { %v1495_v6 = vpop.f32.mrf.mxu0 }
 0x113   : > { %v1499_v7 = vadd.f32 %v1495_v6, %v1349_v5 }
 0x115   : > { %v1505_v8 = vadd.f32 %v2215_v59, %v1499_v7 }
 0x117   : > { %1507 = vst [vmem:[%s187_s10 + $0x8] sm:$0xff] %v1505_v8 }
 0x118   : > { %2243 = shalt.err (!%p2240_p5)
}
 0x119   : > { %s2296_s21 = smov 128   ;;  %s2297_s4 = smov 8  }
 0x11a   : > { %2158 = dma.vmem_to_hbm [thread:$0]  (%p2358_p4), %s1524_s11, 256, %s1526_s18, %s1509_s15, %s2296_s21, %s2296_s21, %s2297_s4  }
 0x11b PF: > { %p2164_p6 = scmp.ge.s32.totalorder %s2294_s17, 2  ;;  %s1540_s30 = sand.u32 1, %s2274_s12  }
 0x11c   : > { %s1541_s5 = scalar_lea.sflag [#allocation3], %s1540_s30 }
 0x11d   : > { %p2161_p7 = pnand %p2164_p6, %p2365_p8 }
 0x11f   : > { %p2162_p9 = pneg %p2161_p7 }
 0x121   : > { %2269 = dma.done.wait (%p2162_p9), %s1541_s5, 256  }
 0x122   : > { %2271 = vsyncadd (%p2162_p9), %s1541_s5, 4294967040  ;;  %s16_s17 = sadd.s32 1, %s2294_s17   ;;  %s2807_s12 = smov %s2278_s13 }
 0x123   : > { %p13_p10 = scmp.ge.s32.totalorder %s16_s17, 4   ;;  %s2808_s13 = smov %s2282_s14 }
 0x124   : > { %s2809_s14 = smov %s2371_s25  ;;  %s2810_s15 = smov %s2290_s16 }
 0x125   : > { %s2811_s16 = smov %s2813_s20  ;;  %15 = sbr.rel (!%p13_p10) target bundleno = 4 (0x4), region = 104 }
 0x12a   :  { %1547 = vsyncpa [#allocation3], 1 }
 0x12b   :  { %1549 = vsyncpa [#allocation3 + $0x1], 1 }

// kernel: pyramid_features.14
= control target key start
LH: loop header
LB: loop body
LE: loop exit
PB: predicated region body
PF: predicated region fallthrough
CT: control target
= control target key end

     0   :  { %vm329_vm0 = vcmask 523264   ;;  %s739_s1 = inlined_call_operand.vmem [shape: bf16[576,128], index: 1, kind: input, shape index: {}]   ;;  %s740_s0 = inlined_call_operand.vmem [shape: bf16[8,576], index: 0, kind: input, shape index: {}]   ;;  %s741_s2 = inlined_call_operand.vmem [shape: f32[1,128], index: 2, kind: input, shape index: {}]   ;;  %s742_s3 = inlined_call_operand.vmem [shape: f32[8,128], index: 3, kind: output, shape index: {}]  }
   0x1   :  { %v566_v0 = vld [vmem:[%s739_s1 + $0x38] sm:$0xff]  ;;  %v565_v4 = vld [vmem:[%s739_s1 + $0x30] sm:$0xff]  ;;  %v564_v8 = vld [vmem:[%s739_s1 + $0x28] sm:$0xff] }
   0x2   :  { %v574_v1 = vld [vmem:[%s739_s1 + $0x78] sm:$0xff]  ;;  %333 = vmatpush.bf16.msra.mxu0 %v566_v0  ;;  %v573_v5 = vld [vmem:[%s739_s1 + $0x70] sm:$0xff]  ;;  %v572_v9 = vld [vmem:[%s739_s1 + $0x68] sm:$0xff] }
   0x3   :  { %v582_v2 = vld [vmem:[%s739_s1 + $0xb8] sm:$0xff]  ;;  %346 = vmatpush.bf16.msra.mxu1 %v574_v1  ;;  %v581_v6 = vld [vmem:[%s739_s1 + $0xb0] sm:$0xff]  ;;  %v580_v10 = vld [vmem:[%s739_s1 + $0xa8] sm:$0xff] }
   0x4   :  { %v590_v3 = vld [vmem:[%s739_s1 + $0xf8] sm:$0xff]  ;;  %359 = vmatpush.bf16.msra.mxu2 %v582_v2  ;;  %v589_v7 = vld [vmem:[%s739_s1 + $0xf0] sm:$0xff]  ;;  %v588_v11 = vld [vmem:[%s739_s1 + $0xe8] sm:$0xff] }
   0x5   :  { %372 = vmatpush.bf16.msra.mxu3 %v590_v3  ;;  %v563_v12 = vld [vmem:[%s739_s1 + $0x20] sm:$0xff]  ;;  %v562_v16 = vld [vmem:[%s739_s1 + $0x18] sm:$0xff]  ;;  %v561_v20 = vld [vmem:[%s739_s1 + $0x10] sm:$0xff] }
   0x6   :  { %334 = vmatpush.bf16.msra.mxu0 %v565_v4  ;;  %v571_v13 = vld [vmem:[%s739_s1 + $0x60] sm:$0xff]  ;;  %v570_v17 = vld [vmem:[%s739_s1 + $0x58] sm:$0xff]  ;;  %v569_v21 = vld [vmem:[%s739_s1 + $0x50] sm:$0xff] }
   0x7   :  { %347 = vmatpush.bf16.msra.mxu1 %v573_v5  ;;  %v579_v14 = vld [vmem:[%s739_s1 + $0xa0] sm:$0xff]  ;;  %v578_v18 = vld [vmem:[%s739_s1 + $0x98] sm:$0xff]  ;;  %v577_v22 = vld [vmem:[%s739_s1 + $0x90] sm:$0xff] }
   0x8   :  { %360 = vmatpush.bf16.msra.mxu2 %v581_v6  ;;  %v587_v15 = vld [vmem:[%s739_s1 + $0xe0] sm:$0xff]  ;;  %v586_v19 = vld [vmem:[%s739_s1 + $0xd8] sm:$0xff]  ;;  %v585_v23 = vld [vmem:[%s739_s1 + $0xd0] sm:$0xff] }
   0x9   :  { %373 = vmatpush.bf16.msra.mxu3 %v589_v7  ;;  %v560_v24 = vld [vmem:[%s739_s1 + $0x8] sm:$0xff]  ;;  %v20_v26 = vld [vmem:[%s740_s0] sm:$0xff]  ;;  %v594_v38 = vld [vmem:[%s739_s1 + $0x118] sm:$0xff] }
   0xa   :  { %335 = vmatpush.bf16.msra.mxu0 %v564_v8  ;;  %v568_v25 = vld [vmem:[%s739_s1 + $0x48] sm:$0xff]  ;;  %v99_v30 = vunpack.c.l.b16 %v20_v26  ;;  %v100_v31 = vunpack.c.h.b16 %v20_v26  ;;  %v559_v32 = vld [vmem:[%s739_s1] sm:$0xff]  ;;  %v593_v43 = vld [vmem:[%s739_s1 + $0x110] sm:$0xff] }
   0xb   :  { %348 = vmatpush.bf16.msra.mxu1 %v572_v9  ;;  %v576_v27 = vld [vmem:[%s739_s1 + $0x88] sm:$0xff]  ;;  %v567_v33 = vld [vmem:[%s739_s1 + $0x40] sm:$0xff]  ;;  %v22_v45 = vld [vmem:[%s740_s0 + $0x10] sm:$0xf] }
   0xc   :  { %361 = vmatpush.bf16.msra.mxu2 %v580_v10  ;;  %v584_v28 = vld [vmem:[%s739_s1 + $0xc8] sm:$0xff]  ;;  %v575_v36 = vld [vmem:[%s739_s1 + $0x80] sm:$0xff]  ;;  %v104_v39 = vpack.c.b16 %v99_v30, %v99_v30  ;;  %v105_v40 = vpack.c.b16 %v100_v31, %v100_v31  ;;  %v103_v47 = vunpack.c.l.b16 %v22_v45 }
   0xd   :  { %374 = vmatpush.bf16.msra.mxu3 %v588_v11  ;;  %v21_v29 = vld [vmem:[%s740_s0 + $0x8] sm:$0xff]  ;;  %v583_v37 = vld [vmem:[%s739_s1 + $0xc0] sm:$0xff] }
   0xe   :  { %336 = vmatpush.bf16.msra.mxu0 %v563_v12  ;;  %v101_v34 = vunpack.c.l.b16 %v21_v29  ;;  %v102_v35 = vunpack.c.h.b16 %v21_v29  ;;  %v592_v44 = vld [vmem:[%s739_s1 + $0x108] sm:$0xff]  ;;  %v591_v46 = vld [vmem:[%s739_s1 + $0x100] sm:$0xff]  ;;  %v108_v48 = vpack.c.b16 %v103_v47, %v103_v47 }
   0xf   :  { %349 = vmatpush.bf16.msra.mxu1 %v571_v13  ;;  %v595_v60 = vld [vmem:[%s741_s2] ss:$0 sm:$0xff] }
  0x10   :  { %362 = vmatpush.bf16.msra.mxu2 %v579_v14  ;;  %v106_v41 = vpack.c.b16 %v101_v34, %v101_v34  ;;  %v107_v42 = vpack.c.b16 %v102_v35, %v102_v35 }
  0x11   :  { %375 = vmatpush.bf16.msra.mxu3 %v587_v15 }
  0x12   :  { %337 = vmatpush.bf16.msra.mxu0 %v562_v16 }
  0x13   :  { %350 = vmatpush.bf16.msra.mxu1 %v570_v17 }
  0x14   :  { %363 = vmatpush.bf16.msra.mxu2 %v578_v18 }
  0x15   :  { %376 = vmatpush.bf16.msra.mxu3 %v586_v19 }
  0x16   :  { %338 = vmatpush.bf16.msra.mxu0 %v561_v20 }
  0x17   :  { %351 = vmatpush.bf16.msra.mxu1 %v569_v21 }
  0x18   :  { %364 = vmatpush.bf16.msra.mxu2 %v577_v22 }
  0x19   :  { %377 = vmatpush.bf16.msra.mxu3 %v585_v23 }
  0x1a   :  { %339 = vmatpush.bf16.msra.mxu0 %v560_v24 }
  0x1b   :  { %352 = vmatpush.bf16.msra.mxu1 %v568_v25 }
  0x1c   :  { %365 = vmatpush.bf16.msra.mxu2 %v576_v27 }
  0x1d   :  { %378 = vmatpush.bf16.msra.mxu3 %v584_v28 }
  0x1e   :  { %340 = vmatpush.bf16.msra.mxu0 %v559_v32 }
  0x1f   :  { %353 = vmatpush.bf16.msra.mxu1 %v567_v33 }
  0x20   :  { %366 = vmatpush.bf16.msra.mxu2 %v575_v36 }
  0x21   :  { %379 = vmatpush.bf16.msra.mxu3 %v583_v37  ;;  %341 = vmatmul.bf16.vlgmr.msra.gmra.mxu0 %v104_v39 }
  0x22   :  { %389 = vmatpush.bf16.msrb.mxu0 %v594_v38  ;;  %354 = vmatmul.bf16.vlgmr.msra.gmra.mxu1 %v105_v40 }
  0x23   :  { %367 = vmatmul.bf16.vlgmr.msra.gmra.mxu2 %v106_v41 }
  0x24   :  { %380 = vmatmul.bf16.vlgmr.msra.gmra.mxu3 %v107_v42 }
  0x26   :  { %390 = vmatpush.bf16.msrb.mxu0 %v593_v43 }
  0x2a   :  { %391 = vmatpush.bf16.msrb.mxu0 %v592_v44 }
  0x2e   :  { %392 = vmatpush.bf16.msrb.mxu0 %v591_v46 }
  0x31   :  { %558 = vmatmul.msk.bf16.vlgmr.msrb.gmra.mxu0 %vm329_vm0, %v108_v48 }
  0x9e   :  { %v342_v49 = vpop.f32.mrf.mxu0 }
  0x9f   :  { %v355_v50 = vpop.f32.mrf.mxu1 }
  0xa0   :  { %v356_v55 = vadd.f32 %v355_v50, %v342_v49 }
  0xa6   :  { %v368_v51 = vpop.f32.mrf.mxu2  ;;  %v344_v53 = vpop.f32.mrf.mxu0 }
  0xa7   :  { %v381_v52 = vpop.f32.mrf.mxu3  ;;  %v357_v54 = vpop.f32.mrf.mxu1  ;;  %v369_v56 = vadd.f32 %v368_v51, %v356_v55 }
  0xa9   :  { %v382_v57 = vadd.f32 %v381_v52, %v369_v56 }
  0xae   :  { %v370_v58 = vpop.f32.mrf.mxu2  ;;  %v394_v61 = vpop.f32.mrf.mxu0 }
  0xaf   :  { %v383_v59 = vpop.f32.mrf.mxu3  ;;  %v395_v62 = vadd.f32 %v394_v61, %v382_v57 }
  0xb1   :  { %v408_v63 = vadd.f32 %v595_v60, %v395_v62 }
  0xb3   :  { %409 = vst [vmem:[%s742_s3] sm:$0xff] %v408_v63 }
  0xb6   :  { %v396_v0 = vpop.f32.mrf.mxu0 }

// kernel: pyramid_features.15
= control target key start
LH: loop header
LB: loop body
LE: loop exit
PB: predicated region body
PF: predicated region fallthrough
CT: control target
= control target key end

     0   :  { %s1423_s0 = inlined_call_operand.vmem [shape: bf16[2,1152], index: 0, kind: input, shape index: {}]   ;;  %s1424_s1 = inlined_call_operand.vmem [shape: bf16[1152,128], index: 1, kind: input, shape index: {}]   ;;  %s1425_s2 = inlined_call_operand.vmem [shape: f32[1,128], index: 2, kind: input, shape index: {}]   ;;  %s1426_s3 = inlined_call_operand.hbm [shape: f32[2,128], index: 3, kind: output, shape index: {}]  }
   0x1   :  { %v1079_v0 = vld [vmem:[%s1424_s1 + $0x38] sm:$0xff]  ;;  %v1078_v4 = vld [vmem:[%s1424_s1 + $0x30] sm:$0xff]  ;;  %v1077_v8 = vld [vmem:[%s1424_s1 + $0x28] sm:$0xff] }
   0x2   :  { %v1095_v1 = vld [vmem:[%s1424_s1 + $0xb8] sm:$0xff]  ;;  %639 = vmatpush.bf16.msra.mxu0 %v1079_v0  ;;  %v1094_v5 = vld [vmem:[%s1424_s1 + $0xb0] sm:$0xff]  ;;  %v1093_v9 = vld [vmem:[%s1424_s1 + $0xa8] sm:$0xff] }
   0x3   :  { %v1103_v2 = vld [vmem:[%s1424_s1 + $0xf8] sm:$0xff]  ;;  %665 = vmatpush.bf16.msra.mxu2 %v1095_v1  ;;  %v1102_v6 = vld [vmem:[%s1424_s1 + $0xf0] sm:$0xff]  ;;  %v1101_v10 = vld [vmem:[%s1424_s1 + $0xe8] sm:$0xff] }
   0x4   :  { %v1087_v3 = vld [vmem:[%s1424_s1 + $0x78] sm:$0xff]  ;;  %678 = vmatpush.bf16.msra.mxu3 %v1103_v2  ;;  %v1086_v7 = vld [vmem:[%s1424_s1 + $0x70] sm:$0xff]  ;;  %v1085_v11 = vld [vmem:[%s1424_s1 + $0x68] sm:$0xff] }
   0x5   :  { %652 = vmatpush.bf16.msra.mxu1 %v1087_v3  ;;  %v1076_v12 = vld [vmem:[%s1424_s1 + $0x20] sm:$0xff]  ;;  %v1075_v16 = vld [vmem:[%s1424_s1 + $0x18] sm:$0xff]  ;;  %v1074_v22 = vld [vmem:[%s1424_s1 + $0x10] sm:$0xff] }
   0x6   :  { %640 = vmatpush.bf16.msra.mxu0 %v1078_v4  ;;  %v1092_v13 = vld [vmem:[%s1424_s1 + $0xa0] sm:$0xff]  ;;  %v1091_v17 = vld [vmem:[%s1424_s1 + $0x98] sm:$0xff]  ;;  %v1090_v24 = vld [vmem:[%s1424_s1 + $0x90] sm:$0xff] }
   0x7   :  { %666 = vmatpush.bf16.msra.mxu2 %v1094_v5  ;;  %v1100_v14 = vld [vmem:[%s1424_s1 + $0xe0] sm:$0xff]  ;;  %v1099_v18 = vld [vmem:[%s1424_s1 + $0xd8] sm:$0xff]  ;;  %v21_v26 = vld [vmem:[%s1423_s0 + $0x8] sm:$0x1] }
   0x8   :  { %679 = vmatpush.bf16.msra.mxu3 %v1102_v6  ;;  %v1084_v15 = vld [vmem:[%s1424_s1 + $0x60] sm:$0xff]  ;;  %v1083_v19 = vld [vmem:[%s1424_s1 + $0x58] sm:$0xff] }
   0x9   :  { %653 = vmatpush.bf16.msra.mxu1 %v1086_v7  ;;  %v20_v20 = vld [vmem:[%s1423_s0] sm:$0xff] }
   0xa   :  { %641 = vmatpush.bf16.msra.mxu0 %v1077_v8  ;;  %v22_v21 = vunpack.c.l.bf16 %v20_v20  ;;  %v23_v23 = vunpack.c.h.bf16 %v20_v20 }
   0xb   :  { %667 = vmatpush.bf16.msra.mxu2 %v1093_v9 }
   0xc   :  { %680 = vmatpush.bf16.msra.mxu3 %v1101_v10  ;;  %v25_v25 = vmax.f32 %v22_v21, 0.0 }
   0xd   :  { %654 = vmatpush.bf16.msra.mxu1 %v1085_v11 }
   0xe   :  { %642 = vmatpush.bf16.msra.mxu0 %v1076_v12 }
   0xf   :  { %668 = vmatpush.bf16.msra.mxu2 %v1092_v13 }
  0x10   :  { %681 = vmatpush.bf16.msra.mxu3 %v1100_v14 }
  0x11   :  { %655 = vmatpush.bf16.msra.mxu1 %v1084_v15 }
  0x12   :  { %643 = vmatpush.bf16.msra.mxu0 %v1075_v16 }
  0x13   :  { %669 = vmatpush.bf16.msra.mxu2 %v1091_v17 }
  0x14   :  { %8 = vsyncpa [#allocation4], 0  ;;  %682 = vmatpush.bf16.msra.mxu3 %v1099_v18  ;;  %v1098_v27 = vld [vmem:[%s1424_s1 + $0xd0] sm:$0xff]  ;;  %v26_v29 = vmax.f32 %v23_v23, 0.0  ;;  %31 = vst [vmem:[#allocation1] ss:$4 sm:$0xff] %v25_v25  ;;  %v24_v30 = vunpack.c.l.bf16 %v21_v26 }
  0x15   :  { %656 = vmatpush.bf16.msra.mxu1 %v1083_v19  ;;  %v1082_v28 = vld [vmem:[%s1424_s1 + $0x50] sm:$0xff]  ;;  %v1073_v31 = vld [vmem:[%s1424_s1 + $0x8] sm:$0xff]  ;;  %v1072_v35 = vld [vmem:[%s1424_s1] sm:$0xff]  ;;  %s1174_s22 = smov [#allocation3]   ;;  %s775_s26 = sshll.u32 %s1426_s3, 4  ;;  %s776_s26 = int_to_ptr.hbm [resolvable:$true] %s775_s26 }
  0x16   :  { %33 = vst [vmem:[#allocation1 + $0x20] ss:$4 sm:$0xff] %v26_v29  ;;  %644 = vmatpush.bf16.msra.mxu0 %v1074_v22  ;;  %v1089_v32 = vld [vmem:[%s1424_s1 + $0x88] sm:$0xff]  ;;  %v1088_v36 = vld [vmem:[%s1424_s1 + $0x80] sm:$0xff]  ;;  %v1111_v37 = vld [vmem:[%s1424_s1 + $0x138] sm:$0xff]  ;;  %v27_v38 = vmax.f32 %v24_v30, 0.0 }
  0x17   :  { %670 = vmatpush.bf16.msra.mxu2 %v1090_v24  ;;  %v1097_v33 = vld [vmem:[%s1424_s1 + $0xc8] sm:$0xff]  ;;  %v1127_v39 = vld [vmem:[%s1424_s1 + $0x1b8] sm:$0xff]  ;;  %v1096_v40 = vld [vmem:[%s1424_s1 + $0xc0] sm:$0xff]  ;;  %s773_s23 = sshll.u32 %s1174_s22, 4  ;;  %s774_s23 = int_to_ptr.vmem [resolvable:$true] %s773_s23 }
  0x18   :  { %683 = vmatpush.bf16.msra.mxu3 %v1098_v27  ;;  %v1081_v34 = vld [vmem:[%s1424_s1 + $0x48] sm:$0xff]  ;;  %v1080_v41 = vld [vmem:[%s1424_s1 + $0x40] sm:$0xff]  ;;  %v1135_v46 = vld [vmem:[%s1424_s1 + $0x1f8] sm:$0xff] }
  0x19   :  { %657 = vmatpush.bf16.msra.mxu1 %v1082_v28  ;;  %v1119_v47 = vld [vmem:[%s1424_s1 + $0x178] sm:$0xff]  ;;  %v1110_v50 = vld [vmem:[%s1424_s1 + $0x130] sm:$0xff]  ;;  %v1109_v56 = vld [vmem:[%s1424_s1 + $0x128] sm:$0xff] }
  0x1a   :  { %645 = vmatpush.bf16.msra.mxu0 %v1073_v31  ;;  %v1126_v51 = vld [vmem:[%s1424_s1 + $0x1b0] sm:$0xff]  ;;  %v1125_v57 = vld [vmem:[%s1424_s1 + $0x1a8] sm:$0xff]  ;;  %v1108_v60 = vld [vmem:[%s1424_s1 + $0x120] sm:$0xff] }
  0x1b   :  { %671 = vmatpush.bf16.msra.mxu2 %v1089_v32  ;;  %v36_v42 = vld.sshfl [vmem:[#allocation1 + $0x10] sm:$0xff pattern:$0x73625140]  ;;  %v34_v43 = vld.sshfl [vmem:[#allocation1] sm:$0xff pattern:$0x73625140] }
  0x1c   :  { %684 = vmatpush.bf16.msra.mxu3 %v1097_v33  ;;  %v37_v44 = vld.sshfl [vmem:[#allocation1 + $0x18] sm:$0xff pattern:$0x73625140]  ;;  %v35_v45 = vld.sshfl [vmem:[#allocation1 + $0x8] sm:$0xff pattern:$0x73625140]  ;;  %v55_v48 = vpack.c.bf16 %v36_v42, %v36_v42  ;;  %v53_v49 = vpack.c.bf16 %v34_v43, %v34_v43 }
  0x1d   :  { %658 = vmatpush.bf16.msra.mxu1 %v1081_v34  ;;  %42 = vst [vmem:[#allocation1] ss:$4 sm:$0xff] %v27_v38  ;;  %v56_v52 = vpack.c.bf16 %v37_v44, %v37_v44  ;;  %v54_v53 = vpack.c.bf16 %v35_v45, %v35_v45  ;;  %v1134_v54 = vld [vmem:[%s1424_s1 + $0x1f0] sm:$0xff]  ;;  %v1133_v58 = vld [vmem:[%s1424_s1 + $0x1e8] sm:$0xff]  ;;  %v1124_v61 = vld [vmem:[%s1424_s1 + $0x1a0] sm:$0xff] }
  0x1e   :  { %646 = vmatpush.bf16.msra.mxu0 %v1072_v35  ;;  %v1118_v55 = vld [vmem:[%s1424_s1 + $0x170] sm:$0xff]  ;;  %v1117_v59 = vld [vmem:[%s1424_s1 + $0x168] sm:$0xff]  ;;  %v1132_v62 = vld [vmem:[%s1424_s1 + $0x1e0] sm:$0xff] }
  0x1f   :  { %672 = vmatpush.bf16.msra.mxu2 %v1088_v36  ;;  %v1116_v63 = vld [vmem:[%s1424_s1 + $0x160] sm:$0xff]  ;;  %v1107_v0 = vld [vmem:[%s1424_s1 + $0x118] sm:$0xff]  ;;  %v1106_v4 = vld [vmem:[%s1424_s1 + $0x110] sm:$0xff] }
  0x20   :  { %685 = vmatpush.bf16.msra.mxu3 %v1096_v40  ;;  %v1123_v1 = vld [vmem:[%s1424_s1 + $0x198] sm:$0xff]  ;;  %v1122_v5 = vld [vmem:[%s1424_s1 + $0x190] sm:$0xff]  ;;  %v1105_v8 = vld [vmem:[%s1424_s1 + $0x108] sm:$0xff]  ;;  %v1173_v40 = vmov 0.0  }
  0x21   :  { %659 = vmatpush.bf16.msra.mxu1 %v1080_v41  ;;  %647 = vmatmul.bf16.vlgmr.msra.gmra.mxu0 %v53_v49  ;;  %v1131_v2 = vld [vmem:[%s1424_s1 + $0x1d8] sm:$0xff]  ;;  %v1130_v6 = vld [vmem:[%s1424_s1 + $0x1d0] sm:$0xff]  ;;  %v1121_v9 = vld [vmem:[%s1424_s1 + $0x188] sm:$0xff]  ;;  %19 = vst [vmem:[#allocation2] sm:$0x3] %v1173_v40 }
  0x22   :  { %691 = vmatpush.bf16.msrb.mxu0 %v1111_v37  ;;  %673 = vmatmul.bf16.vlgmr.msra.gmra.mxu2 %v55_v48  ;;  %v1115_v3 = vld [vmem:[%s1424_s1 + $0x158] sm:$0xff]  ;;  %v1114_v7 = vld [vmem:[%s1424_s1 + $0x150] sm:$0xff]  ;;  %v1129_v10 = vld [vmem:[%s1424_s1 + $0x1c8] sm:$0xff] }
  0x23   :  { %717 = vmatpush.bf16.msrb.mxu2 %v1127_v39  ;;  %686 = vmatmul.bf16.vlgmr.msra.gmra.mxu3 %v56_v52  ;;  %v1113_v11 = vld [vmem:[%s1424_s1 + $0x148] sm:$0xff]  ;;  %v1104_v12 = vld [vmem:[%s1424_s1 + $0x100] sm:$0xff]  ;;  %v40_v14 = vld.sshfl [vmem:[#allocation1 + $0x30] sm:$0xff pattern:$0x73625140] }
  0x24   :  { %730 = vmatpush.bf16.msrb.mxu3 %v1135_v46  ;;  %660 = vmatmul.bf16.vlgmr.msra.gmra.mxu1 %v54_v53  ;;  %v1120_v13 = vld [vmem:[%s1424_s1 + $0x180] sm:$0xff]  ;;  %v1143_v16 = vld [vmem:[%s1424_s1 + $0x238] sm:$0xff]  ;;  %v59_v20 = vpack.c.bf16 %v40_v14, %v40_v14  ;;  %v39_v22 = vld.sshfl [vmem:[#allocation1 + $0x28] sm:$0xff pattern:$0x73625140] }
  0x25   :  { %704 = vmatpush.bf16.msrb.mxu1 %v1119_v47  ;;  %v38_v15 = vld.sshfl [vmem:[#allocation1 + $0x20] sm:$0xff pattern:$0x73625140]  ;;  %v41_v19 = vld.sshfl [vmem:[#allocation1 + $0x38] sm:$0xff pattern:$0x73625140]  ;;  %v58_v25 = vpack.c.bf16 %v39_v22, %v39_v22 }
  0x26   :  { %692 = vmatpush.bf16.msrb.mxu0 %v1110_v50  ;;  %v1128_v17 = vld [vmem:[%s1424_s1 + $0x1c0] sm:$0xff]  ;;  %v57_v21 = vpack.c.bf16 %v38_v15, %v38_v15  ;;  %v1142_v23 = vld [vmem:[%s1424_s1 + $0x230] sm:$0xff]  ;;  %v60_v24 = vpack.c.bf16 %v41_v19, %v41_v19  ;;  %v1141_v26 = vld [vmem:[%s1424_s1 + $0x228] sm:$0xff] }
  0x27   :  { %718 = vmatpush.bf16.msrb.mxu2 %v1126_v51  ;;  %v1112_v18 = vld [vmem:[%s1424_s1 + $0x140] sm:$0xff]  ;;  %v1139_v28 = vld [vmem:[%s1424_s1 + $0x218] sm:$0xff]  ;;  %v1138_v29 = vld [vmem:[%s1424_s1 + $0x210] sm:$0xff] }
  0x28   :  { %731 = vmatpush.bf16.msrb.mxu3 %v1134_v54  ;;  %v1140_v27 = vld [vmem:[%s1424_s1 + $0x220] sm:$0xff]  ;;  %v1137_v30 = vld [vmem:[%s1424_s1 + $0x208] sm:$0xff] }
  0x29   :  { %705 = vmatpush.bf16.msrb.mxu1 %v1118_v55  ;;  %v1136_v31 = vld [vmem:[%s1424_s1 + $0x200] sm:$0xff] }
  0x2a   :  { %693 = vmatpush.bf16.msrb.mxu0 %v1109_v56  ;;  %v43_v32 = vld.sshfl [vmem:[#allocation1] sm:$0xff pattern:$0x73625140] }
  0x2b   :  { %719 = vmatpush.bf16.msrb.mxu2 %v1125_v57  ;;  %v61_v33 = vpack.c.bf16 %v43_v32, %v43_v32 }
  0x2c   :  { %732 = vmatpush.bf16.msrb.mxu3 %v1133_v58  ;;  %v62_v58 = vld [vmem:[#allocation2] sm:$0x3] }
  0x2d   :  { %706 = vmatpush.bf16.msrb.mxu1 %v1117_v59 }
  0x2e   :  { %694 = vmatpush.bf16.msrb.mxu0 %v1108_v60 }
  0x2f   :  { %720 = vmatpush.bf16.msrb.mxu2 %v1124_v61 }
  0x30   :  { %733 = vmatpush.bf16.msrb.mxu3 %v1132_v62 }
  0x31   :  { %707 = vmatpush.bf16.msrb.mxu1 %v1116_v63  ;;  %v1146_v63 = vld [vmem:[%s1425_s2] ss:$0 sm:$0xff] }
  0x32   :  { %695 = vmatpush.bf16.msrb.mxu0 %v1107_v0 }
  0x33   :  { %721 = vmatpush.bf16.msrb.mxu2 %v1123_v1 }
  0x34   :  { %734 = vmatpush.bf16.msrb.mxu3 %v1131_v2 }
  0x35   :  { %708 = vmatpush.bf16.msrb.mxu1 %v1115_v3 }
  0x36   :  { %696 = vmatpush.bf16.msrb.mxu0 %v1106_v4 }
  0x37   :  { %722 = vmatpush.bf16.msrb.mxu2 %v1122_v5 }
  0x38   :  { %735 = vmatpush.bf16.msrb.mxu3 %v1130_v6 }
  0x39   :  { %709 = vmatpush.bf16.msrb.mxu1 %v1114_v7 }
  0x3a   :  { %697 = vmatpush.bf16.msrb.mxu0 %v1105_v8 }
  0x3b   :  { %723 = vmatpush.bf16.msrb.mxu2 %v1121_v9 }
  0x3c   :  { %736 = vmatpush.bf16.msrb.mxu3 %v1129_v10 }
  0x3d   :  { %710 = vmatpush.bf16.msrb.mxu1 %v1113_v11 }
  0x3e   :  { %698 = vmatpush.bf16.msrb.mxu0 %v1104_v12 }
  0x3f   :  { %724 = vmatpush.bf16.msrb.mxu2 %v1120_v13 }
  0x40   :  { %737 = vmatpush.bf16.msrb.mxu3 %v1128_v17 }
  0x41   :  { %711 = vmatpush.bf16.msrb.mxu1 %v1112_v18  ;;  %699 = vmatmul.bf16.vlgmr.msrb.gmra.mxu0 %v57_v21 }
  0x42   :  { %743 = vmatpush.bf16.msra.mxu0 %v1143_v16  ;;  %725 = vmatmul.bf16.vlgmr.msrb.gmra.mxu2 %v59_v20 }
  0x43   :  { %738 = vmatmul.bf16.vlgmr.msrb.gmra.mxu3 %v60_v24 }
  0x44   :  { %712 = vmatmul.bf16.vlgmr.msrb.gmra.mxu1 %v58_v25 }
  0x46   :  { %744 = vmatpush.bf16.msra.mxu0 %v1142_v23 }
  0x4a   :  { %745 = vmatpush.bf16.msra.mxu0 %v1141_v26 }
  0x4e   :  { %746 = vmatpush.bf16.msra.mxu0 %v1140_v27 }
  0x52   :  { %747 = vmatpush.bf16.msra.mxu0 %v1139_v28 }
  0x56   :  { %748 = vmatpush.bf16.msra.mxu0 %v1138_v29 }
  0x5a   :  { %749 = vmatpush.bf16.msra.mxu0 %v1137_v30 }
  0x5e   :  { %750 = vmatpush.bf16.msra.mxu0 %v1136_v31 }
  0x61   :  { %751 = vmatmul.bf16.vlgmr.msra.gmra.mxu0 %v61_v33 }
  0x9e   :  { %v648_v34 = vpop.f32.mrf.mxu0 }
  0xa1   :  { %v661_v35 = vpop.f32.mrf.mxu1 }
  0xa2   :  { %v662_v45 = vadd.f32 %v661_v35, %v648_v34 }
  0xa5   :  { %v674_v36 = vpop.f32.mrf.mxu2 }
  0xa6   :  { %v687_v37 = vpop.f32.mrf.mxu3  ;;  %v650_v38 = vpop.f32.mrf.mxu0  ;;  %v675_v47 = vadd.f32 %v674_v36, %v662_v45 }
  0xa8   :  { %v688_v51 = vadd.f32 %v687_v37, %v675_v47 }
  0xa9   :  { %v663_v39 = vpop.f32.mrf.mxu1 }
  0xad   :  { %v676_v41 = vpop.f32.mrf.mxu2 }
  0xae   :  { %v689_v42 = vpop.f32.mrf.mxu3 }
  0xbe   :  { %v700_v43 = vpop.f32.mrf.mxu0 }
  0xbf   :  { %v701_v53 = vadd.f32 %v700_v43, %v688_v51 }
  0xc1   :  { %v713_v44 = vpop.f32.mrf.mxu1 }
  0xc2   :  { %v714_v55 = vadd.f32 %v713_v44, %v701_v53 }
  0xc5   :  { %v726_v46 = vpop.f32.mrf.mxu2 }
  0xc6   :  { %v739_v48 = vpop.f32.mrf.mxu3  ;;  %v702_v49 = vpop.f32.mrf.mxu0  ;;  %v727_v56 = vadd.f32 %v726_v46, %v714_v55 }
  0xc8   :  { %v740_v57 = vadd.f32 %v739_v48, %v727_v56 }
  0xc9   :  { %v715_v50 = vpop.f32.mrf.mxu1 }
  0xcd   :  { %v728_v52 = vpop.f32.mrf.mxu2 }
  0xce   :  { %v741_v54 = vpop.f32.mrf.mxu3 }
  0xde   :  { %v752_v59 = vpop.f32.mrf.mxu0 }
  0xdf   :  { %v753_v60 = vadd.f32 %v752_v59, %v740_v57 }
  0xe1   :  { %v756_v61 = vadd.f32 %v753_v60, %v62_v58 }
  0xe3   :  { %757 = vst [vmem:[#allocation2] sm:$0x3] %v756_v61 }
  0xe6   :  { %v754_v62 = vpop.f32.mrf.mxu0 }
  0xea   :  { %v761_v0 = vld [vmem:[#allocation2] sm:$0x3] }
  0xeb   :  { %v766_v1 = vadd.f32 %v1146_v63, %v761_v0 }
  0xed   :  { %767 = vst [vmem:[#allocation3] sm:$0x3] %v766_v1 }
  0xee   :  { %778 = dma.vmem_to_hbm [thread:$0]  %s774_s23, 32, %s776_s26, [#allocation4]  }
  0xef   :  { %1171 = dma.done.wait [#allocation4], 32  }
  0xf0   :  { %1172 = vsyncadd [#allocation4], 4294967264 }
  0xf1   :  { %783 = vsyncpa [#allocation4], 1 }

</bundles_post_ra>
